<compile_context>
chip_gen: v5e
topology: v5e:2x2
jax: 0.10.0
libtpu: 0.0.40
codegen_flags: <defaults>
</compile_context>

<pallas_src>
import functools

import jax
import jax.numpy as jnp
from jax.experimental import pallas as pl
from jax.experimental.pallas import tpu as pltpu

# flipped to False (once) if this jax build rejects pl.Buffered(1) single-buffering
_CAPS = {"single_buffer_weights": True}


# ---------------------------------------------------------------------------
# sizing helpers
# ---------------------------------------------------------------------------
def _round_up(x, m):
    return (x + m - 1) // m * m


def _vmem_limit_bytes():
    """Generation-aware VMEM budget (v7x: 64 MiB physical; v5e/v6e: 128 MiB)."""
    phys = 128 * 1024 * 1024
    try:
        info = pltpu.get_tpu_info()
        phys = int(getattr(info, "vmem_capacity_bytes", phys) or phys)
    except Exception:
        pass
    # leave ~25% headroom for compiler temporaries / internal scratch, cap at 96 MiB
    return max(32 * 1024 * 1024, min(phys * 3 // 4, 96 * 1024 * 1024))


def _choose_batch_tile(batch, per_row_bytes, block_budget_bytes, max_rows=1024):
    """Largest multiple-of-8 batch tile whose blocks fit the VMEM byte budget."""
    tb = max(8, min(max_rows, block_budget_bytes // max(per_row_bytes, 1)) // 8 * 8)
    full = batch // 8 * 8 if batch >= 8 else 8
    tb = min(tb, max(8, full))           # at most the final tile is partial
    # v7x shards the "parallel" grid axis over 2 TensorCores: prefer >=4 grid steps
    # (2 per core => each core keeps double-buffered overlap), but only while every
    # tile still carries a reasonable amount of work (>=64 batch rows).
    quarter = max(8, (batch // 4) // 8 * 8)
    if pl.cdiv(batch, tb) < 4 and quarter >= 64:
        tb = min(tb, quarter)
    return tb


def _const_index_map(ndim):
    return lambda b: (0,) * ndim


def _fuse_direct_hidden(wd, w1, dc, compute_dtype):
    """[wd.T padded to `dc` lane columns | w1.T]: the hidden block starts on a 128-lane
    boundary so slicing it out for the next MXU push needs no lane relayout."""
    din = wd.shape[1]
    wf = jnp.zeros((din, dc + w1.shape[0]), jnp.float32)
    wf = wf.at[:, :wd.shape[0]].set(wd.T)
    wf = wf.at[:, dc:].set(w1.T)
    return wf.astype(compute_dtype)


# ---------------------------------------------------------------------------
# fused kernel: scalar MLP + VectorMLP + rank-2 TensLinear, one batch tile per step
# ---------------------------------------------------------------------------
def _local_mlp_kernel(xa_ref, xv_ref, xd_ref,
                      wfa_ref, b1a_ref, w2a_ref, b2a_ref, w3a_ref, b3a_ref,
                      wfv_ref, w2v_ref, w3v_ref, wdd_ref,
                      oa_ref, ov_ref, od_ref,
                      *, dca, dcv, compute_dtype):
    f32 = jnp.float32

    # ---------------- scalar branch: x + lin_direct(x) + layers(x) ----------------
    A = xa_ref.shape[-1]
    xa = xa_ref[...].astype(f32)
    # one fused MXU push: cols [0:A) = direct path, cols [dca:) = layer-0 hidden
    hda = jnp.dot(xa.astype(compute_dtype), wfa_ref[...], preferred_element_type=f32)
    direct_a = hda[:, :A]
    h = hda[:, dca:] + b1a_ref[...]                     # bias + gating kept in f32
    h = jnp.maximum(h, 0.1 * h)                         # LeakyReLU(0.1)
    h = jnp.dot(h.astype(compute_dtype), w2a_ref[...],
                preferred_element_type=f32) + b2a_ref[...]
    h = jnp.maximum(h, 0.1 * h)
    h = jnp.dot(h.astype(compute_dtype), w3a_ref[...],
                preferred_element_type=f32) + b3a_ref[...]
    oa_ref[...] = (xa + direct_a + h).astype(oa_ref.dtype)

    # ---------------- vector branch: x + lin_direct(x) + layers(x) ----------------
    _, TB, D = xv_ref.shape                             # block (3, TB, D), component-major
    xv = xv_ref[...].astype(f32)
    xv2 = xv.reshape(3 * TB, D)                         # free merge (TB % 8 == 0)

    def tens_sigmoid(h_flat, width):
        # gate each (batch, channel) 3-vector by sigmoid(|v|); component-major layout
        # keeps the norm a pure VPU FMA chain (no sublane reduce / relayout).
        hv = h_flat.reshape(3, TB, width)
        nsq = hv[0] * hv[0] + hv[1] * hv[1] + hv[2] * hv[2]
        gate = jax.nn.sigmoid(jnp.sqrt(nsq + 1e-12))    # EUP
        return (hv * gate[None]).reshape(3 * TB, width)

    hdv = jnp.dot(xv2.astype(compute_dtype), wfv_ref[...], preferred_element_type=f32)
    direct_v = hdv[:, :D]
    hv = tens_sigmoid(hdv[:, dcv:], 2 * D)
    hv = jnp.dot(hv.astype(compute_dtype), w2v_ref[...], preferred_element_type=f32)
    hv = tens_sigmoid(hv, 2 * D)
    hv = jnp.dot(hv.astype(compute_dtype), w3v_ref[...], preferred_element_type=f32)
    ov = xv2 + direct_v + hv                            # residual fused, f32
    ov_ref[...] = ov.reshape(3, TB, D).astype(ov_ref.dtype)

    # ------------- rank-2 branch: x + transpose(lin_d(x), -1, -2) ------------------
    _, _, TBd, Dd = xd_ref.shape                        # block (3, 3, TBd, Dd)
    xd = xd_ref[...].astype(f32)
    yd = jnp.dot(xd.reshape(9 * TBd, Dd).astype(compute_dtype), wdd_ref[...],
                 preferred_element_type=f32).reshape(3, 3, TBd, Dd)
    # PyTorch transpose(-1,-2) == swap of the two leading component axes in this layout;
    # nine static (TBd, Dd) tile stores, no in-kernel minor-dim transpose.
    # TODO(synk): if real dim_d stays < 128 these stores are lane-masked on v5e; a
    # lane-packed HBM layout (B, 9*dim_d) for x_d would make them dense.
    for i in range(3):
        for j in range(3):
            od_ref[i, j] = (xd[i, j] + yd[j, i]).astype(od_ref.dtype)


# ---------------------------------------------------------------------------
# wrapper
# ---------------------------------------------------------------------------
def local_mlp_forward(x_a, x_v, x_d, p, compute_dtype=jnp.bfloat16):
    """Fused LocalMLP forward.
    x_a: (B, dim_a); x_v: (3, B, dim_v) (PyTorch (B, dim_v, 3) component-major);
    x_d: (3, 3, B, dim_d) (PyTorch (B, dim_d, 3, 3) component-major)."""
    B, A = x_a.shape
    V, Bv, D = x_v.shape
    V0, V1, Bd, Dd = x_d.shape
    assert V == 3 and V0 == 3 and V1 == 3 and Bv == B and Bd == B

    cd = jnp.dtype(compute_dtype)
    dca = _round_up(A, 128)          # lane-aligned start of the scalar hidden block
    dcv = _round_up(D, 128)          # lane-aligned start of the vector hidden block

    # one-time host-side weight prep (constant-folded under jit)
    wfa = _fuse_direct_hidden(p["wd_a"], p["w1_a"], dca, compute_dtype)   # (A, dca+2A)
    w2a = p["w2_a"].T.astype(compute_dtype)                               # (2A, 2A)
    w3a = p["w3_a"].T.astype(compute_dtype)                               # (2A, A)
    b1a = p["b1_a"].reshape(1, -1).astype(jnp.float32)
    b2a = p["b2_a"].reshape(1, -1).astype(jnp.float32)
    b3a = p["b3_a"].reshape(1, -1).astype(jnp.float32)
    wfv = _fuse_direct_hidden(p["wd_v"], p["w1_v"], dcv, compute_dtype)   # (D, dcv+2D)
    w2v = p["w2_v"].T.astype(compute_dtype)                               # (2D, 2D)
    w3v = p["w3_v"].T.astype(compute_dtype)                               # (2D, D)
    wdd = p["w_d"].T.astype(compute_dtype)                                # (Dd, Dd)

    weights = (wfa, b1a, w2a, b2a, w3a, b3a, wfv, w2v, w3v, wdd)
    weight_bytes = sum(int(w.size) * w.dtype.itemsize for w in weights)

    # ----- VMEM-budgeted batch tile --------------------------------------------------
    vmem_limit = _vmem_limit_bytes()
    io_b = jnp.dtype(x_a.dtype).itemsize
    # per-batch-row VMEM bytes: double-buffered in+out blocks + f32/compute-dtype temps
    per_row = 2 * 2 * (A + 3 * D + 9 * Dd) * io_b
    per_row += (dca + 5 * A) * 4 + 3 * A * cd.itemsize            # scalar branch temps
    per_row += 3 * (dcv + 5 * D) * 4 + 9 * D * cd.itemsize        # vector branch temps
    per_row += 9 * Dd * (2 * 4 + cd.itemsize)                     # rank-2 branch temps
    # weights may end up double-buffered if pl.Buffered(1) is unavailable: budget for it
    block_budget = max(int(vmem_limit * 0.7) - 2 * weight_bytes, 1 << 20)
    tb = _choose_batch_tile(B, per_row, block_budget)
    grid = (pl.cdiv(B, tb),)         # ragged last tile masked in-kernel, no host pad

    # ----- cost estimate (helps XLA overlap this call with neighbouring ops) ----------
    flops = 2 * B * (A * (dca + 2 * A) + 4 * A * A + 2 * A * A)
    flops += 2 * 3 * B * (D * (dcv + 2 * D) + 4 * D * D + 2 * D * D)
    flops += 2 * 9 * B * Dd * Dd
    transcendentals = 2 * 2 * B * 2 * D                   # sqrt+sigmoid x two TensSigmoids
    bytes_accessed = 2 * B * (A + 3 * D + 9 * Dd) * io_b + weight_bytes
    cost = pl.CostEstimate(flops=int(flops), transcendentals=int(transcendentals),
                           bytes_accessed=int(bytes_accessed))

    out_shape = (jax.ShapeDtypeStruct((B, A), x_a.dtype),
                 jax.ShapeDtypeStruct((3, B, D), x_v.dtype),
                 jax.ShapeDtypeStruct((3, 3, B, Dd), x_d.dtype))
    out_specs = (pl.BlockSpec((tb, A), lambda b: (b, 0)),
                 pl.BlockSpec((3, tb, D), lambda b: (0, b, 0)),
                 pl.BlockSpec((3, 3, tb, Dd), lambda b: (0, 0, b, 0)))
    kernel = functools.partial(_local_mlp_kernel, dca=dca, dcv=dcv,
                               compute_dtype=compute_dtype)

    def _run(single_buffer_weights):
        def wspec(w):
            idx = _const_index_map(w.ndim)
            if single_buffer_weights:
                # constant operands: one resident VMEM buffer, no double-buffer waste
                return pl.BlockSpec(w.shape, idx, pipeline_mode=pl.Buffered(1))
            return pl.BlockSpec(w.shape, idx)

        in_specs = [pl.BlockSpec((tb, A), lambda b: (b, 0)),
                    pl.BlockSpec((3, tb, D), lambda b: (0, b, 0)),
                    pl.BlockSpec((3, 3, tb, Dd), lambda b: (0, 0, b, 0))]
        in_specs += [wspec(w) for w in weights]

        return pl.pallas_call(
            kernel,
            out_shape=out_shape,
            grid=grid,
            in_specs=in_specs,
            out_specs=out_specs,
            compiler_params=pltpu.CompilerParams(
                dimension_semantics=("parallel",),
                vmem_limit_bytes=vmem_limit),
            cost_estimate=cost,
        )(x_a, x_v, x_d, *weights)

    if _CAPS["single_buffer_weights"]:
        try:
            return _run(True)
        except Exception:
            _CAPS["single_buffer_weights"] = False   # this build rejects pl.Buffered(1)
    return _run(False)


# ---------------------------------------------------------------------------
# pure-JAX references (f32)
# ---------------------------------------------------------------------------
def _leaky(h):
    return jnp.where(h >= 0, h, 0.1 * h)


def ref_mlp_a(x, wd, w1, b1, w2, b2, w3, b3):
    direct = x @ wd.T
    h = _leaky(x @ w1.T + b1)
    h = _leaky(h @ w2.T + b2)
    h = h @ w3.T + b3
    return x + direct + h


def ref_vector_mlp(x, wd, w1, w2, w3):
    lin = lambda h, w: jnp.einsum("ibc,oc->ibo", h, w)

    def tsig(h):
        gate = jax.nn.sigmoid(jnp.sqrt(jnp.sum(h * h, axis=0, keepdims=True) + 1e-12))
        return h * gate

    return x + lin(x, wd) + lin(tsig(lin(tsig(lin(x, w1)), w2)), w3)


def ref_lin_d(x, w):
    y = jnp.einsum("ijbc,oc->ijbo", x, w)
    return x + jnp.transpose(y, (1, 0, 2, 3))


# ---------------------------------------------------------------------------
if __name__ == "__main__":
    B = 100                                   # deliberately NOT a multiple of the tile
    dim_a, dim_v, dim_d = 32, 32, 16
    key = jax.random.PRNGKey(0)
    ks = jax.random.split(key, 12)

    def lin_w(k, dout, din):
        bound = 1.0 / (din ** 0.5)
        return jax.random.uniform(k, (dout, din), jnp.float32, -bound, bound)

    def lin_b(k, dout, din):
        bound = 1.0 / (din ** 0.5)
        return jax.random.uniform(k, (dout,), jnp.float32, -bound, bound)

    x_a = jax.random.normal(ks[0], (B, dim_a), jnp.float32)
    x_v = jax.random.normal(ks[1], (3, B, dim_v), jnp.float32)      # torch (B, dim_v, 3)
    x_d = jax.random.normal(ks[2], (3, 3, B, dim_d), jnp.float32)   # torch (B, dim_d, 3, 3)

    params = dict(
        wd_a=lin_w(ks[3], dim_a, dim_a),
        w1_a=lin_w(ks[4], 2 * dim_a, dim_a), b1_a=lin_b(ks[4], 2 * dim_a, dim_a),
        w2_a=lin_w(ks[5], 2 * dim_a, 2 * dim_a), b2_a=lin_b(ks[5], 2 * dim_a, 2 * dim_a),
        w3_a=lin_w(ks[6], dim_a, 2 * dim_a), b3_a=lin_b(ks[6], dim_a, 2 * dim_a),
        wd_v=lin_w(ks[7], dim_v, dim_v),
        w1_v=lin_w(ks[8], 2 * dim_v, dim_v),
        w2_v=lin_w(ks[9], 2 * dim_v, 2 * dim_v),
        w3_v=lin_w(ks[10], dim_v, 2 * dim_v),
        w_d=lin_w(ks[11], dim_d, dim_d),
    )

    ref_a = ref_mlp_a(x_a, params["wd_a"], params["w1_a"], params["b1_a"],
                      params["w2_a"], params["b2_a"], params["w3_a"], params["b3_a"])
    ref_v = ref_vector_mlp(x_v, params["wd_v"], params["w1_v"], params["w2_v"], params["w3_v"])
    ref_d = ref_lin_d(x_d, params["w_d"])
    refs = (ref_a, ref_v, ref_d)

    # f32 MXU operands: tight correctness check
    out_f32 = jax.block_until_ready(
        local_mlp_forward(x_a, x_v, x_d, params, compute_dtype=jnp.float32))
    for o, r in zip(out_f32, refs):
        assert o.shape == r.shape
        assert jnp.allclose(o, r, atol=1e-4, rtol=1e-4), "f32 kernel mismatch vs reference"

    # bf16 MXU operands (f32 accumulation + f32 bias/gating/residual): loose check
    out_bf16 = jax.block_until_ready(
        local_mlp_forward(x_a, x_v, x_d, params, compute_dtype=jnp.bfloat16))
    for o, r in zip(out_bf16, refs):
        assert o.shape == r.shape
        assert jnp.allclose(o, r, atol=1e-1, rtol=5e-2), "bf16 kernel mismatch vs reference"

    print("KERNEL_OK")
</pallas_src>

<mosaic_0001>
module attributes {stable_mosaic.version = 11 : i64} {
  func.func @_local_mlp_kernel(%arg0: i32, %arg1: memref<96x32xf32, #tpu.memory_space<vmem>>, %arg2: memref<3x96x32xf32, #tpu.memory_space<vmem>>, %arg3: memref<3x3x96x16xf32, #tpu.memory_space<vmem>>, %arg4: memref<32x192xf32, #tpu.memory_space<vmem>>, %arg5: memref<1x64xf32, #tpu.memory_space<vmem>>, %arg6: memref<64x64xf32, #tpu.memory_space<vmem>>, %arg7: memref<1x64xf32, #tpu.memory_space<vmem>>, %arg8: memref<64x32xf32, #tpu.memory_space<vmem>>, %arg9: memref<1x32xf32, #tpu.memory_space<vmem>>, %arg10: memref<32x192xf32, #tpu.memory_space<vmem>>, %arg11: memref<64x64xf32, #tpu.memory_space<vmem>>, %arg12: memref<64x32xf32, #tpu.memory_space<vmem>>, %arg13: memref<16x16xf32, #tpu.memory_space<vmem>>, %arg14: memref<96x32xf32, #tpu.memory_space<vmem>>, %arg15: memref<3x96x32xf32, #tpu.memory_space<vmem>>, %arg16: memref<3x3x96x16xf32, #tpu.memory_space<vmem>>) attributes {dimension_semantics = [#tpu.dimension_semantics<parallel>], iteration_bounds = array<i64: 2>, scalar_prefetch = 0 : i64, scratch_operands = 0 : i64, tpu.core_type = #tpu.core_type<tc>, window_params = [{transform_indices = @transform_0, window_bounds = array<i64: 96, 32>}, {transform_indices = @transform_1, window_bounds = array<i64: 3, 96, 32>}, {transform_indices = @transform_2, window_bounds = array<i64: 3, 3, 96, 16>}, {pipeline_mode = #tpu.pipeline_mode<synchronous>, transform_indices = @transform_3, window_bounds = array<i64: 32, 192>}, {pipeline_mode = #tpu.pipeline_mode<synchronous>, transform_indices = @transform_4, window_bounds = array<i64: 1, 64>}, {pipeline_mode = #tpu.pipeline_mode<synchronous>, transform_indices = @transform_5, window_bounds = array<i64: 64, 64>}, {pipeline_mode = #tpu.pipeline_mode<synchronous>, transform_indices = @transform_6, window_bounds = array<i64: 1, 64>}, {pipeline_mode = #tpu.pipeline_mode<synchronous>, transform_indices = @transform_7, window_bounds = array<i64: 64, 32>}, {pipeline_mode = #tpu.pipeline_mode<synchronous>, transform_indices = @transform_8, window_bounds = array<i64: 1, 32>}, {pipeline_mode = #tpu.pipeline_mode<synchronous>, transform_indices = @transform_9, window_bounds = array<i64: 32, 192>}, {pipeline_mode = #tpu.pipeline_mode<synchronous>, transform_indices = @transform_10, window_bounds = array<i64: 64, 64>}, {pipeline_mode = #tpu.pipeline_mode<synchronous>, transform_indices = @transform_11, window_bounds = array<i64: 64, 32>}, {pipeline_mode = #tpu.pipeline_mode<synchronous>, transform_indices = @transform_12, window_bounds = array<i64: 16, 16>}, {transform_indices = @transform_13, window_bounds = array<i64: 96, 32>}, {transform_indices = @transform_14, window_bounds = array<i64: 3, 96, 32>}, {transform_indices = @transform_15, window_bounds = array<i64: 3, 3, 96, 16>}]} {
    %c0 = arith.constant 0 : index
    %c0_0 = arith.constant 0 : index
    %0 = vector.load %arg1[%c0, %c0_0] : memref<96x32xf32, #tpu.memory_space<vmem>>, vector<96x32xf32>
    %c0_1 = arith.constant 0 : index
    %c0_2 = arith.constant 0 : index
    %1 = vector.load %arg4[%c0_1, %c0_2] : memref<32x192xf32, #tpu.memory_space<vmem>>, vector<32x192xf32>
    %cst = arith.constant dense<0.000000e+00> : vector<96x192xf32>
    %2 = tpu.matmul %0, %1, %cst {dimension_numbers = #tpu.dot_dimension_numbers<[1], [0], [0], [1], [0, 0, 1, 1], [], []>} : vector<96x32xf32>, vector<32x192xf32>, vector<96x192xf32> -> vector<96x192xf32>
    %3 = vector.extract_strided_slice %2 {offsets = [0, 0], sizes = [96, 32], strides = [1, 1]} : vector<96x192xf32> to vector<96x32xf32>
    %4 = vector.extract_strided_slice %2 {offsets = [0, 128], sizes = [96, 64], strides = [1, 1]} : vector<96x192xf32> to vector<96x64xf32>
    %c0_3 = arith.constant 0 : index
    %c0_4 = arith.constant 0 : index
    %5 = vector.load %arg5[%c0_3, %c0_4] : memref<1x64xf32, #tpu.memory_space<vmem>>, vector<1x64xf32>
    %6 = vector.broadcast %5 : vector<1x64xf32> to vector<96x64xf32>
    %7 = arith.addf %4, %6 : vector<96x64xf32>
    %cst_5 = arith.constant 1.000000e-01 : f32
    %8 = vector.broadcast %cst_5 : f32 to vector<96x64xf32>
    %9 = arith.mulf %8, %7 : vector<96x64xf32>
    %10 = arith.maximumf %7, %9 : vector<96x64xf32>
    %c0_6 = arith.constant 0 : index
    %c0_7 = arith.constant 0 : index
    %11 = vector.load %arg6[%c0_6, %c0_7] : memref<64x64xf32, #tpu.memory_space<vmem>>, vector<64x64xf32>
    %cst_8 = arith.constant dense<0.000000e+00> : vector<96x64xf32>
    %12 = tpu.matmul %10, %11, %cst_8 {dimension_numbers = #tpu.dot_dimension_numbers<[1], [0], [0], [1], [0, 0, 1, 1], [], []>} : vector<96x64xf32>, vector<64x64xf32>, vector<96x64xf32> -> vector<96x64xf32>
    %c0_9 = arith.constant 0 : index
    %c0_10 = arith.constant 0 : index
    %13 = vector.load %arg7[%c0_9, %c0_10] : memref<1x64xf32, #tpu.memory_space<vmem>>, vector<1x64xf32>
    %14 = vector.broadcast %13 : vector<1x64xf32> to vector<96x64xf32>
    %15 = arith.addf %12, %14 : vector<96x64xf32>
    %cst_11 = arith.constant 1.000000e-01 : f32
    %16 = vector.broadcast %cst_11 : f32 to vector<96x64xf32>
    %17 = arith.mulf %16, %15 : vector<96x64xf32>
    %18 = arith.maximumf %15, %17 : vector<96x64xf32>
    %c0_12 = arith.constant 0 : index
    %c0_13 = arith.constant 0 : index
    %19 = vector.load %arg8[%c0_12, %c0_13] : memref<64x32xf32, #tpu.memory_space<vmem>>, vector<64x32xf32>
    %cst_14 = arith.constant dense<0.000000e+00> : vector<96x32xf32>
    %20 = tpu.matmul %18, %19, %cst_14 {dimension_numbers = #tpu.dot_dimension_numbers<[1], [0], [0], [1], [0, 0, 1, 1], [], []>} : vector<96x64xf32>, vector<64x32xf32>, vector<96x32xf32> -> vector<96x32xf32>
    %c0_15 = arith.constant 0 : index
    %c0_16 = arith.constant 0 : index
    %21 = vector.load %arg9[%c0_15, %c0_16] : memref<1x32xf32, #tpu.memory_space<vmem>>, vector<1x32xf32>
    %22 = vector.broadcast %21 : vector<1x32xf32> to vector<96x32xf32>
    %23 = arith.addf %20, %22 : vector<96x32xf32>
    %24 = arith.addf %0, %3 : vector<96x32xf32>
    %25 = arith.addf %24, %23 : vector<96x32xf32>
    %c0_17 = arith.constant 0 : index
    %c0_18 = arith.constant 0 : index
    %26 = vector.load %arg14[%c0_17, %c0_18] : memref<96x32xf32, #tpu.memory_space<vmem>>, vector<96x32xf32>
    tpu.vector_store %arg14[%c0_17, %c0_18], %25 {strides = array<i32>} : memref<96x32xf32, #tpu.memory_space<vmem>>, vector<96x32xf32>,
    %c0_19 = arith.constant 0 : index
    %c0_20 = arith.constant 0 : index
    %c0_21 = arith.constant 0 : index
    %27 = vector.load %arg2[%c0_19, %c0_20, %c0_21] : memref<3x96x32xf32, #tpu.memory_space<vmem>>, vector<3x96x32xf32>
    %28 = vector.shape_cast %27 : vector<3x96x32xf32> to vector<288x32xf32>
    %c0_22 = arith.constant 0 : index
    %c0_23 = arith.constant 0 : index
    %29 = vector.load %arg10[%c0_22, %c0_23] : memref<32x192xf32, #tpu.memory_space<vmem>>, vector<32x192xf32>
    %cst_24 = arith.constant dense<0.000000e+00> : vector<288x192xf32>
    %30 = tpu.matmul %28, %29, %cst_24 {dimension_numbers = #tpu.dot_dimension_numbers<[1], [0], [0], [1], [0, 0, 1, 1], [], []>} : vector<288x32xf32>, vector<32x192xf32>, vector<288x192xf32> -> vector<288x192xf32>
    %31 = vector.extract_strided_slice %30 {offsets = [0, 0], sizes = [288, 32], strides = [1, 1]} : vector<288x192xf32> to vector<288x32xf32>
    %32 = vector.extract_strided_slice %30 {offsets = [0, 128], sizes = [288, 64], strides = [1, 1]} : vector<288x192xf32> to vector<288x64xf32>
    %33 = vector.shape_cast %32 : vector<288x64xf32> to vector<3x96x64xf32>
    %34 = vector.extract_strided_slice %33 {offsets = [0, 0, 0], sizes = [1, 96, 64], strides = [1, 1, 1]} : vector<3x96x64xf32> to vector<1x96x64xf32>
    %35 = vector.shape_cast %34 : vector<1x96x64xf32> to vector<96x64xf32>
    %36 = vector.extract_strided_slice %33 {offsets = [0, 0, 0], sizes = [1, 96, 64], strides = [1, 1, 1]} : vector<3x96x64xf32> to vector<1x96x64xf32>
    %37 = vector.shape_cast %36 : vector<1x96x64xf32> to vector<96x64xf32>
    %38 = arith.mulf %35, %37 : vector<96x64xf32>
    %39 = vector.extract_strided_slice %33 {offsets = [1, 0, 0], sizes = [1, 96, 64], strides = [1, 1, 1]} : vector<3x96x64xf32> to vector<1x96x64xf32>
    %40 = vector.shape_cast %39 : vector<1x96x64xf32> to vector<96x64xf32>
    %41 = vector.extract_strided_slice %33 {offsets = [1, 0, 0], sizes = [1, 96, 64], strides = [1, 1, 1]} : vector<3x96x64xf32> to vector<1x96x64xf32>
    %42 = vector.shape_cast %41 : vector<1x96x64xf32> to vector<96x64xf32>
    %43 = arith.mulf %40, %42 : vector<96x64xf32>
    %44 = arith.addf %38, %43 : vector<96x64xf32>
    %45 = vector.extract_strided_slice %33 {offsets = [2, 0, 0], sizes = [1, 96, 64], strides = [1, 1, 1]} : vector<3x96x64xf32> to vector<1x96x64xf32>
    %46 = vector.shape_cast %45 : vector<1x96x64xf32> to vector<96x64xf32>
    %47 = vector.extract_strided_slice %33 {offsets = [2, 0, 0], sizes = [1, 96, 64], strides = [1, 1, 1]} : vector<3x96x64xf32> to vector<1x96x64xf32>
    %48 = vector.shape_cast %47 : vector<1x96x64xf32> to vector<96x64xf32>
    %49 = arith.mulf %46, %48 : vector<96x64xf32>
    %50 = arith.addf %44, %49 : vector<96x64xf32>
    %cst_25 = arith.constant 9.99999996E-13 : f32
    %51 = vector.broadcast %cst_25 : f32 to vector<96x64xf32>
    %52 = arith.addf %50, %51 : vector<96x64xf32>
    %53 = math.sqrt %52 : vector<96x64xf32>
    %54 = arith.negf %53 : vector<96x64xf32>
    %55 = math.exp %54 : vector<96x64xf32>
    %cst_26 = arith.constant 1.000000e+00 : f32
    %56 = vector.broadcast %cst_26 : f32 to vector<96x64xf32>
    %57 = arith.addf %56, %55 : vector<96x64xf32>
    %58 = arith.divf %56, %57 : vector<96x64xf32>
    %59 = vector.shape_cast %58 : vector<96x64xf32> to vector<1x96x64xf32>
    %60 = vector.broadcast %59 : vector<1x96x64xf32> to vector<3x96x64xf32>
    %61 = arith.mulf %33, %60 : vector<3x96x64xf32>
    %62 = vector.shape_cast %61 : vector<3x96x64xf32> to vector<288x64xf32>
    %c0_27 = arith.constant 0 : index
    %c0_28 = arith.constant 0 : index
    %63 = vector.load %arg11[%c0_27, %c0_28] : memref<64x64xf32, #tpu.memory_space<vmem>>, vector<64x64xf32>
    %cst_29 = arith.constant dense<0.000000e+00> : vector<288x64xf32>
    %64 = tpu.matmul %62, %63, %cst_29 {dimension_numbers = #tpu.dot_dimension_numbers<[1], [0], [0], [1], [0, 0, 1, 1], [], []>} : vector<288x64xf32>, vector<64x64xf32>, vector<288x64xf32> -> vector<288x64xf32>
    %65 = vector.shape_cast %64 : vector<288x64xf32> to vector<3x96x64xf32>
    %66 = vector.extract_strided_slice %65 {offsets = [0, 0, 0], sizes = [1, 96, 64], strides = [1, 1, 1]} : vector<3x96x64xf32> to vector<1x96x64xf32>
    %67 = vector.shape_cast %66 : vector<1x96x64xf32> to vector<96x64xf32>
    %68 = vector.extract_strided_slice %65 {offsets = [0, 0, 0], sizes = [1, 96, 64], strides = [1, 1, 1]} : vector<3x96x64xf32> to vector<1x96x64xf32>
    %69 = vector.shape_cast %68 : vector<1x96x64xf32> to vector<96x64xf32>
    %70 = arith.mulf %67, %69 : vector<96x64xf32>
    %71 = vector.extract_strided_slice %65 {offsets = [1, 0, 0], sizes = [1, 96, 64], strides = [1, 1, 1]} : vector<3x96x64xf32> to vector<1x96x64xf32>
    %72 = vector.shape_cast %71 : vector<1x96x64xf32> to vector<96x64xf32>
    %73 = vector.extract_strided_slice %65 {offsets = [1, 0, 0], sizes = [1, 96, 64], strides = [1, 1, 1]} : vector<3x96x64xf32> to vector<1x96x64xf32>
    %74 = vector.shape_cast %73 : vector<1x96x64xf32> to vector<96x64xf32>
    %75 = arith.mulf %72, %74 : vector<96x64xf32>
    %76 = arith.addf %70, %75 : vector<96x64xf32>
    %77 = vector.extract_strided_slice %65 {offsets = [2, 0, 0], sizes = [1, 96, 64], strides = [1, 1, 1]} : vector<3x96x64xf32> to vector<1x96x64xf32>
    %78 = vector.shape_cast %77 : vector<1x96x64xf32> to vector<96x64xf32>
    %79 = vector.extract_strided_slice %65 {offsets = [2, 0, 0], sizes = [1, 96, 64], strides = [1, 1, 1]} : vector<3x96x64xf32> to vector<1x96x64xf32>
    %80 = vector.shape_cast %79 : vector<1x96x64xf32> to vector<96x64xf32>
    %81 = arith.mulf %78, %80 : vector<96x64xf32>
    %82 = arith.addf %76, %81 : vector<96x64xf32>
    %cst_30 = arith.constant 9.99999996E-13 : f32
    %83 = vector.broadcast %cst_30 : f32 to vector<96x64xf32>
    %84 = arith.addf %82, %83 : vector<96x64xf32>
    %85 = math.sqrt %84 : vector<96x64xf32>
    %86 = arith.negf %85 : vector<96x64xf32>
    %87 = math.exp %86 : vector<96x64xf32>
    %cst_31 = arith.constant 1.000000e+00 : f32
    %88 = vector.broadcast %cst_31 : f32 to vector<96x64xf32>
    %89 = arith.addf %88, %87 : vector<96x64xf32>
    %90 = arith.divf %88, %89 : vector<96x64xf32>
    %91 = vector.shape_cast %90 : vector<96x64xf32> to vector<1x96x64xf32>
    %92 = vector.broadcast %91 : vector<1x96x64xf32> to vector<3x96x64xf32>
    %93 = arith.mulf %65, %92 : vector<3x96x64xf32>
    %94 = vector.shape_cast %93 : vector<3x96x64xf32> to vector<288x64xf32>
    %c0_32 = arith.constant 0 : index
    %c0_33 = arith.constant 0 : index
    %95 = vector.load %arg12[%c0_32, %c0_33] : memref<64x32xf32, #tpu.memory_space<vmem>>, vector<64x32xf32>
    %cst_34 = arith.constant dense<0.000000e+00> : vector<288x32xf32>
    %96 = tpu.matmul %94, %95, %cst_34 {dimension_numbers = #tpu.dot_dimension_numbers<[1], [0], [0], [1], [0, 0, 1, 1], [], []>} : vector<288x64xf32>, vector<64x32xf32>, vector<288x32xf32> -> vector<288x32xf32>
    %97 = arith.addf %28, %31 : vector<288x32xf32>
    %98 = arith.addf %97, %96 : vector<288x32xf32>
    %99 = vector.shape_cast %98 : vector<288x32xf32> to vector<3x96x32xf32>
    %c0_35 = arith.constant 0 : index
    %c0_36 = arith.constant 0 : index
    %c0_37 = arith.constant 0 : index
    %100 = vector.load %arg15[%c0_35, %c0_36, %c0_37] : memref<3x96x32xf32, #tpu.memory_space<vmem>>, vector<3x96x32xf32>
    tpu.vector_store %arg15[%c0_35, %c0_36, %c0_37], %99 {strides = array<i32>} : memref<3x96x32xf32, #tpu.memory_space<vmem>>, vector<3x96x32xf32>,
    %c0_38 = arith.constant 0 : index
    %c0_39 = arith.constant 0 : index
    %c0_40 = arith.constant 0 : index
    %c0_41 = arith.constant 0 : index
    %101 = vector.load %arg3[%c0_38, %c0_39, %c0_40, %c0_41] : memref<3x3x96x16xf32, #tpu.memory_space<vmem>>, vector<3x3x96x16xf32>
    %102 = vector.shape_cast %101 : vector<3x3x96x16xf32> to vector<864x16xf32>
    %c0_42 = arith.constant 0 : index
    %c0_43 = arith.constant 0 : index
    %103 = vector.load %arg13[%c0_42, %c0_43] : memref<16x16xf32, #tpu.memory_space<vmem>>, vector<16x16xf32>
    %cst_44 = arith.constant dense<0.000000e+00> : vector<864x16xf32>
    %104 = tpu.matmul %102, %103, %cst_44 {dimension_numbers = #tpu.dot_dimension_numbers<[1], [0], [0], [1], [0, 0, 1, 1], [], []>} : vector<864x16xf32>, vector<16x16xf32>, vector<864x16xf32> -> vector<864x16xf32>
    %105 = vector.shape_cast %104 : vector<864x16xf32> to vector<3x3x96x16xf32>
    %106 = vector.extract_strided_slice %101 {offsets = [0, 0, 0, 0], sizes = [1, 1, 96, 16], strides = [1, 1, 1, 1]} : vector<3x3x96x16xf32> to vector<1x1x96x16xf32>
    %107 = vector.shape_cast %106 : vector<1x1x96x16xf32> to vector<96x16xf32>
    %108 = vector.extract_strided_slice %105 {offsets = [0, 0, 0, 0], sizes = [1, 1, 96, 16], strides = [1, 1, 1, 1]} : vector<3x3x96x16xf32> to vector<1x1x96x16xf32>
    %109 = vector.shape_cast %108 : vector<1x1x96x16xf32> to vector<96x16xf32>
    %110 = arith.addf %107, %109 : vector<96x16xf32>
    %c0_45 = arith.constant 0 : index
    %c0_46 = arith.constant 0 : index
    %c0_47 = arith.constant 0 : index
    %c0_48 = arith.constant 0 : index
    %111 = vector.load %arg16[%c0_45, %c0_46, %c0_47, %c0_48] : memref<3x3x96x16xf32, #tpu.memory_space<vmem>>, vector<1x1x96x16xf32>
    %112 = vector.shape_cast %111 : vector<1x1x96x16xf32> to vector<96x16xf32>
    %113 = vector.shape_cast %110 : vector<96x16xf32> to vector<1x1x96x16xf32>
    tpu.vector_store %arg16[%c0_45, %c0_46, %c0_47, %c0_48], %113 {strides = array<i32>} : memref<3x3x96x16xf32, #tpu.memory_space<vmem>>, vector<1x1x96x16xf32>,
    %114 = vector.extract_strided_slice %101 {offsets = [0, 1, 0, 0], sizes = [1, 1, 96, 16], strides = [1, 1, 1, 1]} : vector<3x3x96x16xf32> to vector<1x1x96x16xf32>
    %115 = vector.shape_cast %114 : vector<1x1x96x16xf32> to vector<96x16xf32>
    %116 = vector.extract_strided_slice %105 {offsets = [1, 0, 0, 0], sizes = [1, 1, 96, 16], strides = [1, 1, 1, 1]} : vector<3x3x96x16xf32> to vector<1x1x96x16xf32>
    %117 = vector.shape_cast %116 : vector<1x1x96x16xf32> to vector<96x16xf32>
    %118 = arith.addf %115, %117 : vector<96x16xf32>
    %c0_49 = arith.constant 0 : index
    %c1 = arith.constant 1 : index
    %c0_50 = arith.constant 0 : index
    %c0_51 = arith.constant 0 : index
    %119 = vector.load %arg16[%c0_49, %c1, %c0_50, %c0_51] : memref<3x3x96x16xf32, #tpu.memory_space<vmem>>, vector<1x1x96x16xf32>
    %120 = vector.shape_cast %119 : vector<1x1x96x16xf32> to vector<96x16xf32>
    %121 = vector.shape_cast %118 : vector<96x16xf32> to vector<1x1x96x16xf32>
    tpu.vector_store %arg16[%c0_49, %c1, %c0_50, %c0_51], %121 {strides = array<i32>} : memref<3x3x96x16xf32, #tpu.memory_space<vmem>>, vector<1x1x96x16xf32>,
    %122 = vector.extract_strided_slice %101 {offsets = [0, 2, 0, 0], sizes = [1, 1, 96, 16], strides = [1, 1, 1, 1]} : vector<3x3x96x16xf32> to vector<1x1x96x16xf32>
    %123 = vector.shape_cast %122 : vector<1x1x96x16xf32> to vector<96x16xf32>
    %124 = vector.extract_strided_slice %105 {offsets = [2, 0, 0, 0], sizes = [1, 1, 96, 16], strides = [1, 1, 1, 1]} : vector<3x3x96x16xf32> to vector<1x1x96x16xf32>
    %125 = vector.shape_cast %124 : vector<1x1x96x16xf32> to vector<96x16xf32>
    %126 = arith.addf %123, %125 : vector<96x16xf32>
    %c0_52 = arith.constant 0 : index
    %c2 = arith.constant 2 : index
    %c0_53 = arith.constant 0 : index
    %c0_54 = arith.constant 0 : index
    %127 = vector.load %arg16[%c0_52, %c2, %c0_53, %c0_54] : memref<3x3x96x16xf32, #tpu.memory_space<vmem>>, vector<1x1x96x16xf32>
    %128 = vector.shape_cast %127 : vector<1x1x96x16xf32> to vector<96x16xf32>
    %129 = vector.shape_cast %126 : vector<96x16xf32> to vector<1x1x96x16xf32>
    tpu.vector_store %arg16[%c0_52, %c2, %c0_53, %c0_54], %129 {strides = array<i32>} : memref<3x3x96x16xf32, #tpu.memory_space<vmem>>, vector<1x1x96x16xf32>,
    %130 = vector.extract_strided_slice %101 {offsets = [1, 0, 0, 0], sizes = [1, 1, 96, 16], strides = [1, 1, 1, 1]} : vector<3x3x96x16xf32> to vector<1x1x96x16xf32>
    %131 = vector.shape_cast %130 : vector<1x1x96x16xf32> to vector<96x16xf32>
    %132 = vector.extract_strided_slice %105 {offsets = [0, 1, 0, 0], sizes = [1, 1, 96, 16], strides = [1, 1, 1, 1]} : vector<3x3x96x16xf32> to vector<1x1x96x16xf32>
    %133 = vector.shape_cast %132 : vector<1x1x96x16xf32> to vector<96x16xf32>
    %134 = arith.addf %131, %133 : vector<96x16xf32>
    %c1_55 = arith.constant 1 : index
    %c0_56 = arith.constant 0 : index
    %c0_57 = arith.constant 0 : index
    %c0_58 = arith.constant 0 : index
    %135 = vector.load %arg16[%c1_55, %c0_56, %c0_57, %c0_58] : memref<3x3x96x16xf32, #tpu.memory_space<vmem>>, vector<1x1x96x16xf32>
    %136 = vector.shape_cast %135 : vector<1x1x96x16xf32> to vector<96x16xf32>
    %137 = vector.shape_cast %134 : vector<96x16xf32> to vector<1x1x96x16xf32>
    tpu.vector_store %arg16[%c1_55, %c0_56, %c0_57, %c0_58], %137 {strides = array<i32>} : memref<3x3x96x16xf32, #tpu.memory_space<vmem>>, vector<1x1x96x16xf32>,
    %138 = vector.extract_strided_slice %101 {offsets = [1, 1, 0, 0], sizes = [1, 1, 96, 16], strides = [1, 1, 1, 1]} : vector<3x3x96x16xf32> to vector<1x1x96x16xf32>
    %139 = vector.shape_cast %138 : vector<1x1x96x16xf32> to vector<96x16xf32>
    %140 = vector.extract_strided_slice %105 {offsets = [1, 1, 0, 0], sizes = [1, 1, 96, 16], strides = [1, 1, 1, 1]} : vector<3x3x96x16xf32> to vector<1x1x96x16xf32>
    %141 = vector.shape_cast %140 : vector<1x1x96x16xf32> to vector<96x16xf32>
    %142 = arith.addf %139, %141 : vector<96x16xf32>
    %c1_59 = arith.constant 1 : index
    %c1_60 = arith.constant 1 : index
    %c0_61 = arith.constant 0 : index
    %c0_62 = arith.constant 0 : index
    %143 = vector.load %arg16[%c1_59, %c1_60, %c0_61, %c0_62] : memref<3x3x96x16xf32, #tpu.memory_space<vmem>>, vector<1x1x96x16xf32>
    %144 = vector.shape_cast %143 : vector<1x1x96x16xf32> to vector<96x16xf32>
    %145 = vector.shape_cast %142 : vector<96x16xf32> to vector<1x1x96x16xf32>
    tpu.vector_store %arg16[%c1_59, %c1_60, %c0_61, %c0_62], %145 {strides = array<i32>} : memref<3x3x96x16xf32, #tpu.memory_space<vmem>>, vector<1x1x96x16xf32>,
    %146 = vector.extract_strided_slice %101 {offsets = [1, 2, 0, 0], sizes = [1, 1, 96, 16], strides = [1, 1, 1, 1]} : vector<3x3x96x16xf32> to vector<1x1x96x16xf32>
    %147 = vector.shape_cast %146 : vector<1x1x96x16xf32> to vector<96x16xf32>
    %148 = vector.extract_strided_slice %105 {offsets = [2, 1, 0, 0], sizes = [1, 1, 96, 16], strides = [1, 1, 1, 1]} : vector<3x3x96x16xf32> to vector<1x1x96x16xf32>
    %149 = vector.shape_cast %148 : vector<1x1x96x16xf32> to vector<96x16xf32>
    %150 = arith.addf %147, %149 : vector<96x16xf32>
    %c1_63 = arith.constant 1 : index
    %c2_64 = arith.constant 2 : index
    %c0_65 = arith.constant 0 : index
    %c0_66 = arith.constant 0 : index
    %151 = vector.load %arg16[%c1_63, %c2_64, %c0_65, %c0_66] : memref<3x3x96x16xf32, #tpu.memory_space<vmem>>, vector<1x1x96x16xf32>
    %152 = vector.shape_cast %151 : vector<1x1x96x16xf32> to vector<96x16xf32>
    %153 = vector.shape_cast %150 : vector<96x16xf32> to vector<1x1x96x16xf32>
    tpu.vector_store %arg16[%c1_63, %c2_64, %c0_65, %c0_66], %153 {strides = array<i32>} : memref<3x3x96x16xf32, #tpu.memory_space<vmem>>, vector<1x1x96x16xf32>,
    %154 = vector.extract_strided_slice %101 {offsets = [2, 0, 0, 0], sizes = [1, 1, 96, 16], strides = [1, 1, 1, 1]} : vector<3x3x96x16xf32> to vector<1x1x96x16xf32>
    %155 = vector.shape_cast %154 : vector<1x1x96x16xf32> to vector<96x16xf32>
    %156 = vector.extract_strided_slice %105 {offsets = [0, 2, 0, 0], sizes = [1, 1, 96, 16], strides = [1, 1, 1, 1]} : vector<3x3x96x16xf32> to vector<1x1x96x16xf32>
    %157 = vector.shape_cast %156 : vector<1x1x96x16xf32> to vector<96x16xf32>
    %158 = arith.addf %155, %157 : vector<96x16xf32>
    %c2_67 = arith.constant 2 : index
    %c0_68 = arith.constant 0 : index
    %c0_69 = arith.constant 0 : index
    %c0_70 = arith.constant 0 : index
    %159 = vector.load %arg16[%c2_67, %c0_68, %c0_69, %c0_70] : memref<3x3x96x16xf32, #tpu.memory_space<vmem>>, vector<1x1x96x16xf32>
    %160 = vector.shape_cast %159 : vector<1x1x96x16xf32> to vector<96x16xf32>
    %161 = vector.shape_cast %158 : vector<96x16xf32> to vector<1x1x96x16xf32>
    tpu.vector_store %arg16[%c2_67, %c0_68, %c0_69, %c0_70], %161 {strides = array<i32>} : memref<3x3x96x16xf32, #tpu.memory_space<vmem>>, vector<1x1x96x16xf32>,
    %162 = vector.extract_strided_slice %101 {offsets = [2, 1, 0, 0], sizes = [1, 1, 96, 16], strides = [1, 1, 1, 1]} : vector<3x3x96x16xf32> to vector<1x1x96x16xf32>
    %163 = vector.shape_cast %162 : vector<1x1x96x16xf32> to vector<96x16xf32>
    %164 = vector.extract_strided_slice %105 {offsets = [1, 2, 0, 0], sizes = [1, 1, 96, 16], strides = [1, 1, 1, 1]} : vector<3x3x96x16xf32> to vector<1x1x96x16xf32>
    %165 = vector.shape_cast %164 : vector<1x1x96x16xf32> to vector<96x16xf32>
    %166 = arith.addf %163, %165 : vector<96x16xf32>
    %c2_71 = arith.constant 2 : index
    %c1_72 = arith.constant 1 : index
    %c0_73 = arith.constant 0 : index
    %c0_74 = arith.constant 0 : index
    %167 = vector.load %arg16[%c2_71, %c1_72, %c0_73, %c0_74] : memref<3x3x96x16xf32, #tpu.memory_space<vmem>>, vector<1x1x96x16xf32>
    %168 = vector.shape_cast %167 : vector<1x1x96x16xf32> to vector<96x16xf32>
    %169 = vector.shape_cast %166 : vector<96x16xf32> to vector<1x1x96x16xf32>
    tpu.vector_store %arg16[%c2_71, %c1_72, %c0_73, %c0_74], %169 {strides = array<i32>} : memref<3x3x96x16xf32, #tpu.memory_space<vmem>>, vector<1x1x96x16xf32>,
    %170 = vector.extract_strided_slice %101 {offsets = [2, 2, 0, 0], sizes = [1, 1, 96, 16], strides = [1, 1, 1, 1]} : vector<3x3x96x16xf32> to vector<1x1x96x16xf32>
    %171 = vector.shape_cast %170 : vector<1x1x96x16xf32> to vector<96x16xf32>
    %172 = vector.extract_strided_slice %105 {offsets = [2, 2, 0, 0], sizes = [1, 1, 96, 16], strides = [1, 1, 1, 1]} : vector<3x3x96x16xf32> to vector<1x1x96x16xf32>
    %173 = vector.shape_cast %172 : vector<1x1x96x16xf32> to vector<96x16xf32>
    %174 = arith.addf %171, %173 : vector<96x16xf32>
    %c2_75 = arith.constant 2 : index
    %c2_76 = arith.constant 2 : index
    %c0_77 = arith.constant 0 : index
    %c0_78 = arith.constant 0 : index
    %175 = vector.load %arg16[%c2_75, %c2_76, %c0_77, %c0_78] : memref<3x3x96x16xf32, #tpu.memory_space<vmem>>, vector<1x1x96x16xf32>
    %176 = vector.shape_cast %175 : vector<1x1x96x16xf32> to vector<96x16xf32>
    %177 = vector.shape_cast %174 : vector<96x16xf32> to vector<1x1x96x16xf32>
    tpu.vector_store %arg16[%c2_75, %c2_76, %c0_77, %c0_78], %177 {strides = array<i32>} : memref<3x3x96x16xf32, #tpu.memory_space<vmem>>, vector<1x1x96x16xf32>,
    return
  }
  func.func @transform_0(%arg0: i32) -> (i32, i32) {
    %c0_i32 = arith.constant 0 : i32
    %c0_i32_0 = arith.constant 0 : i32
    return %arg0, %c0_i32 : i32, i32
  }
  func.func @transform_1(%arg0: i32) -> (i32, i32, i32) {
    %c0_i32 = arith.constant 0 : i32
    %c0_i32_0 = arith.constant 0 : i32
    %c0_i32_1 = arith.constant 0 : i32
    return %c0_i32, %arg0, %c0_i32_0 : i32, i32, i32
  }
  func.func @transform_2(%arg0: i32) -> (i32, i32, i32, i32) {
    %c0_i32 = arith.constant 0 : i32
    %c0_i32_0 = arith.constant 0 : i32
    %c0_i32_1 = arith.constant 0 : i32
    %c0_i32_2 = arith.constant 0 : i32
    return %c0_i32, %c0_i32_0, %arg0, %c0_i32_1 : i32, i32, i32, i32
  }
  func.func @transform_3(%arg0: i32) -> (i32, i32) {
    %c0_i32 = arith.constant 0 : i32
    %c0_i32_0 = arith.constant 0 : i32
    %c0_i32_1 = arith.constant 0 : i32
    return %c0_i32, %c0_i32_0 : i32, i32
  }
  func.func @transform_4(%arg0: i32) -> (i32, i32) {
    %c0_i32 = arith.constant 0 : i32
    %c0_i32_0 = arith.constant 0 : i32
    %c0_i32_1 = arith.constant 0 : i32
    return %c0_i32, %c0_i32_0 : i32, i32
  }
  func.func @transform_5(%arg0: i32) -> (i32, i32) {
    %c0_i32 = arith.constant 0 : i32
    %c0_i32_0 = arith.constant 0 : i32
    %c0_i32_1 = arith.constant 0 : i32
    return %c0_i32, %c0_i32_0 : i32, i32
  }
  func.func @transform_6(%arg0: i32) -> (i32, i32) {
    %c0_i32 = arith.constant 0 : i32
    %c0_i32_0 = arith.constant 0 : i32
    %c0_i32_1 = arith.constant 0 : i32
    return %c0_i32, %c0_i32_0 : i32, i32
  }
  func.func @transform_7(%arg0: i32) -> (i32, i32) {
    %c0_i32 = arith.constant 0 : i32
    %c0_i32_0 = arith.constant 0 : i32
    %c0_i32_1 = arith.constant 0 : i32
    return %c0_i32, %c0_i32_0 : i32, i32
  }
  func.func @transform_8(%arg0: i32) -> (i32, i32) {
    %c0_i32 = arith.constant 0 : i32
    %c0_i32_0 = arith.constant 0 : i32
    %c0_i32_1 = arith.constant 0 : i32
    return %c0_i32, %c0_i32_0 : i32, i32
  }
  func.func @transform_9(%arg0: i32) -> (i32, i32) {
    %c0_i32 = arith.constant 0 : i32
    %c0_i32_0 = arith.constant 0 : i32
    %c0_i32_1 = arith.constant 0 : i32
    return %c0_i32, %c0_i32_0 : i32, i32
  }
  func.func @transform_10(%arg0: i32) -> (i32, i32) {
    %c0_i32 = arith.constant 0 : i32
    %c0_i32_0 = arith.constant 0 : i32
    %c0_i32_1 = arith.constant 0 : i32
    return %c0_i32, %c0_i32_0 : i32, i32
  }
  func.func @transform_11(%arg0: i32) -> (i32, i32) {
    %c0_i32 = arith.constant 0 : i32
    %c0_i32_0 = arith.constant 0 : i32
    %c0_i32_1 = arith.constant 0 : i32
    return %c0_i32, %c0_i32_0 : i32, i32
  }
  func.func @transform_12(%arg0: i32) -> (i32, i32) {
    %c0_i32 = arith.constant 0 : i32
    %c0_i32_0 = arith.constant 0 : i32
    %c0_i32_1 = arith.constant 0 : i32
    return %c0_i32, %c0_i32_0 : i32, i32
  }
  func.func @transform_13(%arg0: i32) -> (i32, i32) {
    %c0_i32 = arith.constant 0 : i32
    %c0_i32_0 = arith.constant 0 : i32
    return %arg0, %c0_i32 : i32, i32
  }
  func.func @transform_14(%arg0: i32) -> (i32, i32, i32) {
    %c0_i32 = arith.constant 0 : i32
    %c0_i32_0 = arith.constant 0 : i32
    %c0_i32_1 = arith.constant 0 : i32
    return %c0_i32, %arg0, %c0_i32_0 : i32, i32, i32
  }
  func.func @transform_15(%arg0: i32) -> (i32, i32, i32, i32) {
    %c0_i32 = arith.constant 0 : i32
    %c0_i32_0 = arith.constant 0 : i32
    %c0_i32_1 = arith.constant 0 : i32
    %c0_i32_2 = arith.constant 0 : i32
    return %c0_i32, %c0_i32_0, %arg0, %c0_i32_1 : i32, i32, i32, i32
  }
}

module attributes {stable_mosaic.version = 11 : i64} {
  func.func @_local_mlp_kernel(%arg0: i32, %arg1: memref<96x32xf32, #tpu.memory_space<vmem>>, %arg2: memref<3x96x32xf32, #tpu.memory_space<vmem>>, %arg3: memref<3x3x96x16xf32, #tpu.memory_space<vmem>>, %arg4: memref<32x192xf32, #tpu.memory_space<vmem>>, %arg5: memref<1x64xf32, #tpu.memory_space<vmem>>, %arg6: memref<64x64xf32, #tpu.memory_space<vmem>>, %arg7: memref<1x64xf32, #tpu.memory_space<vmem>>, %arg8: memref<64x32xf32, #tpu.memory_space<vmem>>, %arg9: memref<1x32xf32, #tpu.memory_space<vmem>>, %arg10: memref<32x192xf32, #tpu.memory_space<vmem>>, %arg11: memref<64x64xf32, #tpu.memory_space<vmem>>, %arg12: memref<64x32xf32, #tpu.memory_space<vmem>>, %arg13: memref<16x16xf32, #tpu.memory_space<vmem>>, %arg14: memref<96x32xf32, #tpu.memory_space<vmem>>, %arg15: memref<3x96x32xf32, #tpu.memory_space<vmem>>, %arg16: memref<3x3x96x16xf32, #tpu.memory_space<vmem>>) attributes {dimension_semantics = [#tpu.dimension_semantics<parallel>], iteration_bounds = array<i64: 2>, scalar_prefetch = 0 : i64, scratch_operands = 0 : i64, tpu.core_type = #tpu.core_type<tc>, window_params = [{transform_indices = @transform_0, window_bounds = array<i64: 96, 32>}, {transform_indices = @transform_1, window_bounds = array<i64: 3, 96, 32>}, {transform_indices = @transform_2, window_bounds = array<i64: 3, 3, 96, 16>}, {pipeline_mode = #tpu.pipeline_mode<synchronous>, transform_indices = @transform_3, window_bounds = array<i64: 32, 192>}, {pipeline_mode = #tpu.pipeline_mode<synchronous>, transform_indices = @transform_4, window_bounds = array<i64: 1, 64>}, {pipeline_mode = #tpu.pipeline_mode<synchronous>, transform_indices = @transform_5, window_bounds = array<i64: 64, 64>}, {pipeline_mode = #tpu.pipeline_mode<synchronous>, transform_indices = @transform_6, window_bounds = array<i64: 1, 64>}, {pipeline_mode = #tpu.pipeline_mode<synchronous>, transform_indices = @transform_7, window_bounds = array<i64: 64, 32>}, {pipeline_mode = #tpu.pipeline_mode<synchronous>, transform_indices = @transform_8, window_bounds = array<i64: 1, 32>}, {pipeline_mode = #tpu.pipeline_mode<synchronous>, transform_indices = @transform_9, window_bounds = array<i64: 32, 192>}, {pipeline_mode = #tpu.pipeline_mode<synchronous>, transform_indices = @transform_10, window_bounds = array<i64: 64, 64>}, {pipeline_mode = #tpu.pipeline_mode<synchronous>, transform_indices = @transform_11, window_bounds = array<i64: 64, 32>}, {pipeline_mode = #tpu.pipeline_mode<synchronous>, transform_indices = @transform_12, window_bounds = array<i64: 16, 16>}, {transform_indices = @transform_13, window_bounds = array<i64: 96, 32>}, {transform_indices = @transform_14, window_bounds = array<i64: 3, 96, 32>}, {transform_indices = @transform_15, window_bounds = array<i64: 3, 3, 96, 16>}]} {
    %c0 = arith.constant 0 : index
    %c0_0 = arith.constant 0 : index
    %0 = vector.load %arg1[%c0, %c0_0] : memref<96x32xf32, #tpu.memory_space<vmem>>, vector<96x32xf32>
    %c0_1 = arith.constant 0 : index
    %c0_2 = arith.constant 0 : index
    %1 = vector.load %arg4[%c0_1, %c0_2] : memref<32x192xf32, #tpu.memory_space<vmem>>, vector<32x192xf32>
    %cst = arith.constant dense<0.000000e+00> : vector<96x192xf32>
    %2 = tpu.matmul %0, %1, %cst {dimension_numbers = #tpu.dot_dimension_numbers<[1], [0], [0], [1], [0, 0, 1, 1], [], []>} : vector<96x32xf32>, vector<32x192xf32>, vector<96x192xf32> -> vector<96x192xf32>
    %3 = vector.extract_strided_slice %2 {offsets = [0, 0], sizes = [96, 32], strides = [1, 1]} : vector<96x192xf32> to vector<96x32xf32>
    %4 = vector.extract_strided_slice %2 {offsets = [0, 128], sizes = [96, 64], strides = [1, 1]} : vector<96x192xf32> to vector<96x64xf32>
    %c0_3 = arith.constant 0 : index
    %c0_4 = arith.constant 0 : index
    %5 = vector.load %arg5[%c0_3, %c0_4] : memref<1x64xf32, #tpu.memory_space<vmem>>, vector<1x64xf32>
    %6 = vector.broadcast %5 : vector<1x64xf32> to vector<96x64xf32>
    %7 = arith.addf %4, %6 : vector<96x64xf32>
    %cst_5 = arith.constant 1.000000e-01 : f32
    %8 = vector.broadcast %cst_5 : f32 to vector<96x64xf32>
    %9 = arith.mulf %8, %7 : vector<96x64xf32>
    %10 = arith.maximumf %7, %9 : vector<96x64xf32>
    %c0_6 = arith.constant 0 : index
    %c0_7 = arith.constant 0 : index
    %11 = vector.load %arg6[%c0_6, %c0_7] : memref<64x64xf32, #tpu.memory_space<vmem>>, vector<64x64xf32>
    %cst_8 = arith.constant dense<0.000000e+00> : vector<96x64xf32>
    %12 = tpu.matmul %10, %11, %cst_8 {dimension_numbers = #tpu.dot_dimension_numbers<[1], [0], [0], [1], [0, 0, 1, 1], [], []>} : vector<96x64xf32>, vector<64x64xf32>, vector<96x64xf32> -> vector<96x64xf32>
    %c0_9 = arith.constant 0 : index
    %c0_10 = arith.constant 0 : index
    %13 = vector.load %arg7[%c0_9, %c0_10] : memref<1x64xf32, #tpu.memory_space<vmem>>, vector<1x64xf32>
    %14 = vector.broadcast %13 : vector<1x64xf32> to vector<96x64xf32>
    %15 = arith.addf %12, %14 : vector<96x64xf32>
    %cst_11 = arith.constant 1.000000e-01 : f32
    %16 = vector.broadcast %cst_11 : f32 to vector<96x64xf32>
    %17 = arith.mulf %16, %15 : vector<96x64xf32>
    %18 = arith.maximumf %15, %17 : vector<96x64xf32>
    %c0_12 = arith.constant 0 : index
    %c0_13 = arith.constant 0 : index
    %19 = vector.load %arg8[%c0_12, %c0_13] : memref<64x32xf32, #tpu.memory_space<vmem>>, vector<64x32xf32>
    %cst_14 = arith.constant dense<0.000000e+00> : vector<96x32xf32>
    %20 = tpu.matmul %18, %19, %cst_14 {dimension_numbers = #tpu.dot_dimension_numbers<[1], [0], [0], [1], [0, 0, 1, 1], [], []>} : vector<96x64xf32>, vector<64x32xf32>, vector<96x32xf32> -> vector<96x32xf32>
    %c0_15 = arith.constant 0 : index
    %c0_16 = arith.constant 0 : index
    %21 = vector.load %arg9[%c0_15, %c0_16] : memref<1x32xf32, #tpu.memory_space<vmem>>, vector<1x32xf32>
    %22 = vector.broadcast %21 : vector<1x32xf32> to vector<96x32xf32>
    %23 = arith.addf %20, %22 : vector<96x32xf32>
    %24 = arith.addf %0, %3 : vector<96x32xf32>
    %25 = arith.addf %24, %23 : vector<96x32xf32>
    %c0_17 = arith.constant 0 : index
    %c0_18 = arith.constant 0 : index
    %26 = vector.load %arg14[%c0_17, %c0_18] : memref<96x32xf32, #tpu.memory_space<vmem>>, vector<96x32xf32>
    tpu.vector_store %arg14[%c0_17, %c0_18], %25 {strides = array<i32>} : memref<96x32xf32, #tpu.memory_space<vmem>>, vector<96x32xf32>,
    %c0_19 = arith.constant 0 : index
    %c0_20 = arith.constant 0 : index
    %c0_21 = arith.constant 0 : index
    %27 = vector.load %arg2[%c0_19, %c0_20, %c0_21] : memref<3x96x32xf32, #tpu.memory_space<vmem>>, vector<3x96x32xf32>
    %28 = vector.shape_cast %27 : vector<3x96x32xf32> to vector<288x32xf32>
    %c0_22 = arith.constant 0 : index
    %c0_23 = arith.constant 0 : index
    %29 = vector.load %arg10[%c0_22, %c0_23] : memref<32x192xf32, #tpu.memory_space<vmem>>, vector<32x192xf32>
    %cst_24 = arith.constant dense<0.000000e+00> : vector<288x192xf32>
    %30 = tpu.matmul %28, %29, %cst_24 {dimension_numbers = #tpu.dot_dimension_numbers<[1], [0], [0], [1], [0, 0, 1, 1], [], []>} : vector<288x32xf32>, vector<32x192xf32>, vector<288x192xf32> -> vector<288x192xf32>
    %31 = vector.extract_strided_slice %30 {offsets = [0, 0], sizes = [288, 32], strides = [1, 1]} : vector<288x192xf32> to vector<288x32xf32>
    %32 = vector.extract_strided_slice %30 {offsets = [0, 128], sizes = [288, 64], strides = [1, 1]} : vector<288x192xf32> to vector<288x64xf32>
    %33 = vector.shape_cast %32 : vector<288x64xf32> to vector<3x96x64xf32>
    %34 = vector.extract_strided_slice %33 {offsets = [0, 0, 0], sizes = [1, 96, 64], strides = [1, 1, 1]} : vector<3x96x64xf32> to vector<1x96x64xf32>
    %35 = vector.shape_cast %34 : vector<1x96x64xf32> to vector<96x64xf32>
    %36 = vector.extract_strided_slice %33 {offsets = [0, 0, 0], sizes = [1, 96, 64], strides = [1, 1, 1]} : vector<3x96x64xf32> to vector<1x96x64xf32>
    %37 = vector.shape_cast %36 : vector<1x96x64xf32> to vector<96x64xf32>
    %38 = arith.mulf %35, %37 : vector<96x64xf32>
    %39 = vector.extract_strided_slice %33 {offsets = [1, 0, 0], sizes = [1, 96, 64], strides = [1, 1, 1]} : vector<3x96x64xf32> to vector<1x96x64xf32>
    %40 = vector.shape_cast %39 : vector<1x96x64xf32> to vector<96x64xf32>
    %41 = vector.extract_strided_slice %33 {offsets = [1, 0, 0], sizes = [1, 96, 64], strides = [1, 1, 1]} : vector<3x96x64xf32> to vector<1x96x64xf32>
    %42 = vector.shape_cast %41 : vector<1x96x64xf32> to vector<96x64xf32>
    %43 = arith.mulf %40, %42 : vector<96x64xf32>
    %44 = arith.addf %38, %43 : vector<96x64xf32>
    %45 = vector.extract_strided_slice %33 {offsets = [2, 0, 0], sizes = [1, 96, 64], strides = [1, 1, 1]} : vector<3x96x64xf32> to vector<1x96x64xf32>
    %46 = vector.shape_cast %45 : vector<1x96x64xf32> to vector<96x64xf32>
    %47 = vector.extract_strided_slice %33 {offsets = [2, 0, 0], sizes = [1, 96, 64], strides = [1, 1, 1]} : vector<3x96x64xf32> to vector<1x96x64xf32>
    %48 = vector.shape_cast %47 : vector<1x96x64xf32> to vector<96x64xf32>
    %49 = arith.mulf %46, %48 : vector<96x64xf32>
    %50 = arith.addf %44, %49 : vector<96x64xf32>
    %cst_25 = arith.constant 9.99999996E-13 : f32
    %51 = vector.broadcast %cst_25 : f32 to vector<96x64xf32>
    %52 = arith.addf %50, %51 : vector<96x64xf32>
    %53 = math.sqrt %52 : vector<96x64xf32>
    %54 = arith.negf %53 : vector<96x64xf32>
    %55 = math.exp %54 : vector<96x64xf32>
    %cst_26 = arith.constant 1.000000e+00 : f32
    %56 = vector.broadcast %cst_26 : f32 to vector<96x64xf32>
    %57 = arith.addf %56, %55 : vector<96x64xf32>
    %58 = arith.divf %56, %57 : vector<96x64xf32>
    %59 = vector.shape_cast %58 : vector<96x64xf32> to vector<1x96x64xf32>
    %60 = vector.broadcast %59 : vector<1x96x64xf32> to vector<3x96x64xf32>
    %61 = arith.mulf %33, %60 : vector<3x96x64xf32>
    %62 = vector.shape_cast %61 : vector<3x96x64xf32> to vector<288x64xf32>
    %c0_27 = arith.constant 0 : index
    %c0_28 = arith.constant 0 : index
    %63 = vector.load %arg11[%c0_27, %c0_28] : memref<64x64xf32, #tpu.memory_space<vmem>>, vector<64x64xf32>
    %cst_29 = arith.constant dense<0.000000e+00> : vector<288x64xf32>
    %64 = tpu.matmul %62, %63, %cst_29 {dimension_numbers = #tpu.dot_dimension_numbers<[1], [0], [0], [1], [0, 0, 1, 1], [], []>} : vector<288x64xf32>, vector<64x64xf32>, vector<288x64xf32> -> vector<288x64xf32>
    %65 = vector.shape_cast %64 : vector<288x64xf32> to vector<3x96x64xf32>
    %66 = vector.extract_strided_slice %65 {offsets = [0, 0, 0], sizes = [1, 96, 64], strides = [1, 1, 1]} : vector<3x96x64xf32> to vector<1x96x64xf32>
    %67 = vector.shape_cast %66 : vector<1x96x64xf32> to vector<96x64xf32>
    %68 = vector.extract_strided_slice %65 {offsets = [0, 0, 0], sizes = [1, 96, 64], strides = [1, 1, 1]} : vector<3x96x64xf32> to vector<1x96x64xf32>
    %69 = vector.shape_cast %68 : vector<1x96x64xf32> to vector<96x64xf32>
    %70 = arith.mulf %67, %69 : vector<96x64xf32>
    %71 = vector.extract_strided_slice %65 {offsets = [1, 0, 0], sizes = [1, 96, 64], strides = [1, 1, 1]} : vector<3x96x64xf32> to vector<1x96x64xf32>
    %72 = vector.shape_cast %71 : vector<1x96x64xf32> to vector<96x64xf32>
    %73 = vector.extract_strided_slice %65 {offsets = [1, 0, 0], sizes = [1, 96, 64], strides = [1, 1, 1]} : vector<3x96x64xf32> to vector<1x96x64xf32>
    %74 = vector.shape_cast %73 : vector<1x96x64xf32> to vector<96x64xf32>
    %75 = arith.mulf %72, %74 : vector<96x64xf32>
    %76 = arith.addf %70, %75 : vector<96x64xf32>
    %77 = vector.extract_strided_slice %65 {offsets = [2, 0, 0], sizes = [1, 96, 64], strides = [1, 1, 1]} : vector<3x96x64xf32> to vector<1x96x64xf32>
    %78 = vector.shape_cast %77 : vector<1x96x64xf32> to vector<96x64xf32>
    %79 = vector.extract_strided_slice %65 {offsets = [2, 0, 0], sizes = [1, 96, 64], strides = [1, 1, 1]} : vector<3x96x64xf32> to vector<1x96x64xf32>
    %80 = vector.shape_cast %79 : vector<1x96x64xf32> to vector<96x64xf32>
    %81 = arith.mulf %78, %80 : vector<96x64xf32>
    %82 = arith.addf %76, %81 : vector<96x64xf32>
    %cst_30 = arith.constant 9.99999996E-13 : f32
    %83 = vector.broadcast %cst_30 : f32 to vector<96x64xf32>
    %84 = arith.addf %82, %83 : vector<96x64xf32>
    %85 = math.sqrt %84 : vector<96x64xf32>
    %86 = arith.negf %85 : vector<96x64xf32>
    %87 = math.exp %86 : vector<96x64xf32>
    %cst_31 = arith.constant 1.000000e+00 : f32
    %88 = vector.broadcast %cst_31 : f32 to vector<96x64xf32>
    %89 = arith.addf %88, %87 : vector<96x64xf32>
    %90 = arith.divf %88, %89 : vector<96x64xf32>
    %91 = vector.shape_cast %90 : vector<96x64xf32> to vector<1x96x64xf32>
    %92 = vector.broadcast %91 : vector<1x96x64xf32> to vector<3x96x64xf32>
    %93 = arith.mulf %65, %92 : vector<3x96x64xf32>
    %94 = vector.shape_cast %93 : vector<3x96x64xf32> to vector<288x64xf32>
    %c0_32 = arith.constant 0 : index
    %c0_33 = arith.constant 0 : index
    %95 = vector.load %arg12[%c0_32, %c0_33] : memref<64x32xf32, #tpu.memory_space<vmem>>, vector<64x32xf32>
    %cst_34 = arith.constant dense<0.000000e+00> : vector<288x32xf32>
    %96 = tpu.matmul %94, %95, %cst_34 {dimension_numbers = #tpu.dot_dimension_numbers<[1], [0], [0], [1], [0, 0, 1, 1], [], []>} : vector<288x64xf32>, vector<64x32xf32>, vector<288x32xf32> -> vector<288x32xf32>
    %97 = arith.addf %28, %31 : vector<288x32xf32>
    %98 = arith.addf %97, %96 : vector<288x32xf32>
    %99 = vector.shape_cast %98 : vector<288x32xf32> to vector<3x96x32xf32>
    %c0_35 = arith.constant 0 : index
    %c0_36 = arith.constant 0 : index
    %c0_37 = arith.constant 0 : index
    %100 = vector.load %arg15[%c0_35, %c0_36, %c0_37] : memref<3x96x32xf32, #tpu.memory_space<vmem>>, vector<3x96x32xf32>
    tpu.vector_store %arg15[%c0_35, %c0_36, %c0_37], %99 {strides = array<i32>} : memref<3x96x32xf32, #tpu.memory_space<vmem>>, vector<3x96x32xf32>,
    %c0_38 = arith.constant 0 : index
    %c0_39 = arith.constant 0 : index
    %c0_40 = arith.constant 0 : index
    %c0_41 = arith.constant 0 : index
    %101 = vector.load %arg3[%c0_38, %c0_39, %c0_40, %c0_41] : memref<3x3x96x16xf32, #tpu.memory_space<vmem>>, vector<3x3x96x16xf32>
    %102 = vector.shape_cast %101 : vector<3x3x96x16xf32> to vector<864x16xf32>
    %c0_42 = arith.constant 0 : index
    %c0_43 = arith.constant 0 : index
    %103 = vector.load %arg13[%c0_42, %c0_43] : memref<16x16xf32, #tpu.memory_space<vmem>>, vector<16x16xf32>
    %cst_44 = arith.constant dense<0.000000e+00> : vector<864x16xf32>
    %104 = tpu.matmul %102, %103, %cst_44 {dimension_numbers = #tpu.dot_dimension_numbers<[1], [0], [0], [1], [0, 0, 1, 1], [], []>} : vector<864x16xf32>, vector<16x16xf32>, vector<864x16xf32> -> vector<864x16xf32>
    %105 = vector.shape_cast %104 : vector<864x16xf32> to vector<3x3x96x16xf32>
    %106 = vector.extract_strided_slice %101 {offsets = [0, 0, 0, 0], sizes = [1, 1, 96, 16], strides = [1, 1, 1, 1]} : vector<3x3x96x16xf32> to vector<1x1x96x16xf32>
    %107 = vector.shape_cast %106 : vector<1x1x96x16xf32> to vector<96x16xf32>
    %108 = vector.extract_strided_slice %105 {offsets = [0, 0, 0, 0], sizes = [1, 1, 96, 16], strides = [1, 1, 1, 1]} : vector<3x3x96x16xf32> to vector<1x1x96x16xf32>
    %109 = vector.shape_cast %108 : vector<1x1x96x16xf32> to vector<96x16xf32>
    %110 = arith.addf %107, %109 : vector<96x16xf32>
    %c0_45 = arith.constant 0 : index
    %c0_46 = arith.constant 0 : index
    %c0_47 = arith.constant 0 : index
    %c0_48 = arith.constant 0 : index
    %111 = vector.load %arg16[%c0_45, %c0_46, %c0_47, %c0_48] : memref<3x3x96x16xf32, #tpu.memory_space<vmem>>, vector<1x1x96x16xf32>
    %112 = vector.shape_cast %111 : vector<1x1x96x16xf32> to vector<96x16xf32>
    %113 = vector.shape_cast %110 : vector<96x16xf32> to vector<1x1x96x16xf32>
    tpu.vector_store %arg16[%c0_45, %c0_46, %c0_47, %c0_48], %113 {strides = array<i32>} : memref<3x3x96x16xf32, #tpu.memory_space<vmem>>, vector<1x1x96x16xf32>,
    %114 = vector.extract_strided_slice %101 {offsets = [0, 1, 0, 0], sizes = [1, 1, 96, 16], strides = [1, 1, 1, 1]} : vector<3x3x96x16xf32> to vector<1x1x96x16xf32>
    %115 = vector.shape_cast %114 : vector<1x1x96x16xf32> to vector<96x16xf32>
    %116 = vector.extract_strided_slice %105 {offsets = [1, 0, 0, 0], sizes = [1, 1, 96, 16], strides = [1, 1, 1, 1]} : vector<3x3x96x16xf32> to vector<1x1x96x16xf32>
    %117 = vector.shape_cast %116 : vector<1x1x96x16xf32> to vector<96x16xf32>
    %118 = arith.addf %115, %117 : vector<96x16xf32>
    %c0_49 = arith.constant 0 : index
    %c1 = arith.constant 1 : index
    %c0_50 = arith.constant 0 : index
    %c0_51 = arith.constant 0 : index
    %119 = vector.load %arg16[%c0_49, %c1, %c0_50, %c0_51] : memref<3x3x96x16xf32, #tpu.memory_space<vmem>>, vector<1x1x96x16xf32>
    %120 = vector.shape_cast %119 : vector<1x1x96x16xf32> to vector<96x16xf32>
    %121 = vector.shape_cast %118 : vector<96x16xf32> to vector<1x1x96x16xf32>
    tpu.vector_store %arg16[%c0_49, %c1, %c0_50, %c0_51], %121 {strides = array<i32>} : memref<3x3x96x16xf32, #tpu.memory_space<vmem>>, vector<1x1x96x16xf32>,
    %122 = vector.extract_strided_slice %101 {offsets = [0, 2, 0, 0], sizes = [1, 1, 96, 16], strides = [1, 1, 1, 1]} : vector<3x3x96x16xf32> to vector<1x1x96x16xf32>
    %123 = vector.shape_cast %122 : vector<1x1x96x16xf32> to vector<96x16xf32>
    %124 = vector.extract_strided_slice %105 {offsets = [2, 0, 0, 0], sizes = [1, 1, 96, 16], strides = [1, 1, 1, 1]} : vector<3x3x96x16xf32> to vector<1x1x96x16xf32>
    %125 = vector.shape_cast %124 : vector<1x1x96x16xf32> to vector<96x16xf32>
    %126 = arith.addf %123, %125 : vector<96x16xf32>
    %c0_52 = arith.constant 0 : index
    %c2 = arith.constant 2 : index
    %c0_53 = arith.constant 0 : index
    %c0_54 = arith.constant 0 : index
    %127 = vector.load %arg16[%c0_52, %c2, %c0_53, %c0_54] : memref<3x3x96x16xf32, #tpu.memory_space<vmem>>, vector<1x1x96x16xf32>
    %128 = vector.shape_cast %127 : vector<1x1x96x16xf32> to vector<96x16xf32>
    %129 = vector.shape_cast %126 : vector<96x16xf32> to vector<1x1x96x16xf32>
    tpu.vector_store %arg16[%c0_52, %c2, %c0_53, %c0_54], %129 {strides = array<i32>} : memref<3x3x96x16xf32, #tpu.memory_space<vmem>>, vector<1x1x96x16xf32>,
    %130 = vector.extract_strided_slice %101 {offsets = [1, 0, 0, 0], sizes = [1, 1, 96, 16], strides = [1, 1, 1, 1]} : vector<3x3x96x16xf32> to vector<1x1x96x16xf32>
    %131 = vector.shape_cast %130 : vector<1x1x96x16xf32> to vector<96x16xf32>
    %132 = vector.extract_strided_slice %105 {offsets = [0, 1, 0, 0], sizes = [1, 1, 96, 16], strides = [1, 1, 1, 1]} : vector<3x3x96x16xf32> to vector<1x1x96x16xf32>
    %133 = vector.shape_cast %132 : vector<1x1x96x16xf32> to vector<96x16xf32>
    %134 = arith.addf %131, %133 : vector<96x16xf32>
    %c1_55 = arith.constant 1 : index
    %c0_56 = arith.constant 0 : index
    %c0_57 = arith.constant 0 : index
    %c0_58 = arith.constant 0 : index
    %135 = vector.load %arg16[%c1_55, %c0_56, %c0_57, %c0_58] : memref<3x3x96x16xf32, #tpu.memory_space<vmem>>, vector<1x1x96x16xf32>
    %136 = vector.shape_cast %135 : vector<1x1x96x16xf32> to vector<96x16xf32>
    %137 = vector.shape_cast %134 : vector<96x16xf32> to vector<1x1x96x16xf32>
    tpu.vector_store %arg16[%c1_55, %c0_56, %c0_57, %c0_58], %137 {strides = array<i32>} : memref<3x3x96x16xf32, #tpu.memory_space<vmem>>, vector<1x1x96x16xf32>,
    %138 = vector.extract_strided_slice %101 {offsets = [1, 1, 0, 0], sizes = [1, 1, 96, 16], strides = [1, 1, 1, 1]} : vector<3x3x96x16xf32> to vector<1x1x96x16xf32>
    %139 = vector.shape_cast %138 : vector<1x1x96x16xf32> to vector<96x16xf32>
    %140 = vector.extract_strided_slice %105 {offsets = [1, 1, 0, 0], sizes = [1, 1, 96, 16], strides = [1, 1, 1, 1]} : vector<3x3x96x16xf32> to vector<1x1x96x16xf32>
    %141 = vector.shape_cast %140 : vector<1x1x96x16xf32> to vector<96x16xf32>
    %142 = arith.addf %139, %141 : vector<96x16xf32>
    %c1_59 = arith.constant 1 : index
    %c1_60 = arith.constant 1 : index
    %c0_61 = arith.constant 0 : index
    %c0_62 = arith.constant 0 : index
    %143 = vector.load %arg16[%c1_59, %c1_60, %c0_61, %c0_62] : memref<3x3x96x16xf32, #tpu.memory_space<vmem>>, vector<1x1x96x16xf32>
    %144 = vector.shape_cast %143 : vector<1x1x96x16xf32> to vector<96x16xf32>
    %145 = vector.shape_cast %142 : vector<96x16xf32> to vector<1x1x96x16xf32>
    tpu.vector_store %arg16[%c1_59, %c1_60, %c0_61, %c0_62], %145 {strides = array<i32>} : memref<3x3x96x16xf32, #tpu.memory_space<vmem>>, vector<1x1x96x16xf32>,
    %146 = vector.extract_strided_slice %101 {offsets = [1, 2, 0, 0], sizes = [1, 1, 96, 16], strides = [1, 1, 1, 1]} : vector<3x3x96x16xf32> to vector<1x1x96x16xf32>
    %147 = vector.shape_cast %146 : vector<1x1x96x16xf32> to vector<96x16xf32>
    %148 = vector.extract_strided_slice %105 {offsets = [2, 1, 0, 0], sizes = [1, 1, 96, 16], strides = [1, 1, 1, 1]} : vector<3x3x96x16xf32> to vector<1x1x96x16xf32>
    %149 = vector.shape_cast %148 : vector<1x1x96x16xf32> to vector<96x16xf32>
    %150 = arith.addf %147, %149 : vector<96x16xf32>
    %c1_63 = arith.constant 1 : index
    %c2_64 = arith.constant 2 : index
    %c0_65 = arith.constant 0 : index
    %c0_66 = arith.constant 0 : index
    %151 = vector.load %arg16[%c1_63, %c2_64, %c0_65, %c0_66] : memref<3x3x96x16xf32, #tpu.memory_space<vmem>>, vector<1x1x96x16xf32>
    %152 = vector.shape_cast %151 : vector<1x1x96x16xf32> to vector<96x16xf32>
    %153 = vector.shape_cast %150 : vector<96x16xf32> to vector<1x1x96x16xf32>
    tpu.vector_store %arg16[%c1_63, %c2_64, %c0_65, %c0_66], %153 {strides = array<i32>} : memref<3x3x96x16xf32, #tpu.memory_space<vmem>>, vector<1x1x96x16xf32>,
    %154 = vector.extract_strided_slice %101 {offsets = [2, 0, 0, 0], sizes = [1, 1, 96, 16], strides = [1, 1, 1, 1]} : vector<3x3x96x16xf32> to vector<1x1x96x16xf32>
    %155 = vector.shape_cast %154 : vector<1x1x96x16xf32> to vector<96x16xf32>
    %156 = vector.extract_strided_slice %105 {offsets = [0, 2, 0, 0], sizes = [1, 1, 96, 16], strides = [1, 1, 1, 1]} : vector<3x3x96x16xf32> to vector<1x1x96x16xf32>
    %157 = vector.shape_cast %156 : vector<1x1x96x16xf32> to vector<96x16xf32>
    %158 = arith.addf %155, %157 : vector<96x16xf32>
    %c2_67 = arith.constant 2 : index
    %c0_68 = arith.constant 0 : index
    %c0_69 = arith.constant 0 : index
    %c0_70 = arith.constant 0 : index
    %159 = vector.load %arg16[%c2_67, %c0_68, %c0_69, %c0_70] : memref<3x3x96x16xf32, #tpu.memory_space<vmem>>, vector<1x1x96x16xf32>
    %160 = vector.shape_cast %159 : vector<1x1x96x16xf32> to vector<96x16xf32>
    %161 = vector.shape_cast %158 : vector<96x16xf32> to vector<1x1x96x16xf32>
    tpu.vector_store %arg16[%c2_67, %c0_68, %c0_69, %c0_70], %161 {strides = array<i32>} : memref<3x3x96x16xf32, #tpu.memory_space<vmem>>, vector<1x1x96x16xf32>,
    %162 = vector.extract_strided_slice %101 {offsets = [2, 1, 0, 0], sizes = [1, 1, 96, 16], strides = [1, 1, 1, 1]} : vector<3x3x96x16xf32> to vector<1x1x96x16xf32>
    %163 = vector.shape_cast %162 : vector<1x1x96x16xf32> to vector<96x16xf32>
    %164 = vector.extract_strided_slice %105 {offsets = [1, 2, 0, 0], sizes = [1, 1, 96, 16], strides = [1, 1, 1, 1]} : vector<3x3x96x16xf32> to vector<1x1x96x16xf32>
    %165 = vector.shape_cast %164 : vector<1x1x96x16xf32> to vector<96x16xf32>
    %166 = arith.addf %163, %165 : vector<96x16xf32>
    %c2_71 = arith.constant 2 : index
    %c1_72 = arith.constant 1 : index
    %c0_73 = arith.constant 0 : index
    %c0_74 = arith.constant 0 : index
    %167 = vector.load %arg16[%c2_71, %c1_72, %c0_73, %c0_74] : memref<3x3x96x16xf32, #tpu.memory_space<vmem>>, vector<1x1x96x16xf32>
    %168 = vector.shape_cast %167 : vector<1x1x96x16xf32> to vector<96x16xf32>
    %169 = vector.shape_cast %166 : vector<96x16xf32> to vector<1x1x96x16xf32>
    tpu.vector_store %arg16[%c2_71, %c1_72, %c0_73, %c0_74], %169 {strides = array<i32>} : memref<3x3x96x16xf32, #tpu.memory_space<vmem>>, vector<1x1x96x16xf32>,
    %170 = vector.extract_strided_slice %101 {offsets = [2, 2, 0, 0], sizes = [1, 1, 96, 16], strides = [1, 1, 1, 1]} : vector<3x3x96x16xf32> to vector<1x1x96x16xf32>
    %171 = vector.shape_cast %170 : vector<1x1x96x16xf32> to vector<96x16xf32>
    %172 = vector.extract_strided_slice %105 {offsets = [2, 2, 0, 0], sizes = [1, 1, 96, 16], strides = [1, 1, 1, 1]} : vector<3x3x96x16xf32> to vector<1x1x96x16xf32>
    %173 = vector.shape_cast %172 : vector<1x1x96x16xf32> to vector<96x16xf32>
    %174 = arith.addf %171, %173 : vector<96x16xf32>
    %c2_75 = arith.constant 2 : index
    %c2_76 = arith.constant 2 : index
    %c0_77 = arith.constant 0 : index
    %c0_78 = arith.constant 0 : index
    %175 = vector.load %arg16[%c2_75, %c2_76, %c0_77, %c0_78] : memref<3x3x96x16xf32, #tpu.memory_space<vmem>>, vector<1x1x96x16xf32>
    %176 = vector.shape_cast %175 : vector<1x1x96x16xf32> to vector<96x16xf32>
    %177 = vector.shape_cast %174 : vector<96x16xf32> to vector<1x1x96x16xf32>
    tpu.vector_store %arg16[%c2_75, %c2_76, %c0_77, %c0_78], %177 {strides = array<i32>} : memref<3x3x96x16xf32, #tpu.memory_space<vmem>>, vector<1x1x96x16xf32>,
    return
  }
  func.func @transform_0(%arg0: i32) -> (i32, i32) {
    %c0_i32 = arith.constant 0 : i32
    %c0_i32_0 = arith.constant 0 : i32
    return %arg0, %c0_i32 : i32, i32
  }
  func.func @transform_1(%arg0: i32) -> (i32, i32, i32) {
    %c0_i32 = arith.constant 0 : i32
    %c0_i32_0 = arith.constant 0 : i32
    %c0_i32_1 = arith.constant 0 : i32
    return %c0_i32, %arg0, %c0_i32_0 : i32, i32, i32
  }
  func.func @transform_2(%arg0: i32) -> (i32, i32, i32, i32) {
    %c0_i32 = arith.constant 0 : i32
    %c0_i32_0 = arith.constant 0 : i32
    %c0_i32_1 = arith.constant 0 : i32
    %c0_i32_2 = arith.constant 0 : i32
    return %c0_i32, %c0_i32_0, %arg0, %c0_i32_1 : i32, i32, i32, i32
  }
  func.func @transform_3(%arg0: i32) -> (i32, i32) {
    %c0_i32 = arith.constant 0 : i32
    %c0_i32_0 = arith.constant 0 : i32
    %c0_i32_1 = arith.constant 0 : i32
    return %c0_i32, %c0_i32_0 : i32, i32
  }
  func.func @transform_4(%arg0: i32) -> (i32, i32) {
    %c0_i32 = arith.constant 0 : i32
    %c0_i32_0 = arith.constant 0 : i32
    %c0_i32_1 = arith.constant 0 : i32
    return %c0_i32, %c0_i32_0 : i32, i32
  }
  func.func @transform_5(%arg0: i32) -> (i32, i32) {
    %c0_i32 = arith.constant 0 : i32
    %c0_i32_0 = arith.constant 0 : i32
    %c0_i32_1 = arith.constant 0 : i32
    return %c0_i32, %c0_i32_0 : i32, i32
  }
  func.func @transform_6(%arg0: i32) -> (i32, i32) {
    %c0_i32 = arith.constant 0 : i32
    %c0_i32_0 = arith.constant 0 : i32
    %c0_i32_1 = arith.constant 0 : i32
    return %c0_i32, %c0_i32_0 : i32, i32
  }
  func.func @transform_7(%arg0: i32) -> (i32, i32) {
    %c0_i32 = arith.constant 0 : i32
    %c0_i32_0 = arith.constant 0 : i32
    %c0_i32_1 = arith.constant 0 : i32
    return %c0_i32, %c0_i32_0 : i32, i32
  }
  func.func @transform_8(%arg0: i32) -> (i32, i32) {
    %c0_i32 = arith.constant 0 : i32
    %c0_i32_0 = arith.constant 0 : i32
    %c0_i32_1 = arith.constant 0 : i32
    return %c0_i32, %c0_i32_0 : i32, i32
  }
  func.func @transform_9(%arg0: i32) -> (i32, i32) {
    %c0_i32 = arith.constant 0 : i32
    %c0_i32_0 = arith.constant 0 : i32
    %c0_i32_1 = arith.constant 0 : i32
    return %c0_i32, %c0_i32_0 : i32, i32
  }
  func.func @transform_10(%arg0: i32) -> (i32, i32) {
    %c0_i32 = arith.constant 0 : i32
    %c0_i32_0 = arith.constant 0 : i32
    %c0_i32_1 = arith.constant 0 : i32
    return %c0_i32, %c0_i32_0 : i32, i32
  }
  func.func @transform_11(%arg0: i32) -> (i32, i32) {
    %c0_i32 = arith.constant 0 : i32
    %c0_i32_0 = arith.constant 0 : i32
    %c0_i32_1 = arith.constant 0 : i32
    return %c0_i32, %c0_i32_0 : i32, i32
  }
  func.func @transform_12(%arg0: i32) -> (i32, i32) {
    %c0_i32 = arith.constant 0 : i32
    %c0_i32_0 = arith.constant 0 : i32
    %c0_i32_1 = arith.constant 0 : i32
    return %c0_i32, %c0_i32_0 : i32, i32
  }
  func.func @transform_13(%arg0: i32) -> (i32, i32) {
    %c0_i32 = arith.constant 0 : i32
    %c0_i32_0 = arith.constant 0 : i32
    return %arg0, %c0_i32 : i32, i32
  }
  func.func @transform_14(%arg0: i32) -> (i32, i32, i32) {
    %c0_i32 = arith.constant 0 : i32
    %c0_i32_0 = arith.constant 0 : i32
    %c0_i32_1 = arith.constant 0 : i32
    return %c0_i32, %arg0, %c0_i32_0 : i32, i32, i32
  }
  func.func @transform_15(%arg0: i32) -> (i32, i32, i32, i32) {
    %c0_i32 = arith.constant 0 : i32
    %c0_i32_0 = arith.constant 0 : i32
    %c0_i32_1 = arith.constant 0 : i32
    %c0_i32_2 = arith.constant 0 : i32
    return %c0_i32, %c0_i32_0, %arg0, %c0_i32_1 : i32, i32, i32, i32
  }
}

</mosaic_0001>

<bundles_post_ra>
// kernel: tpu_custom_call.1
= control target key start
LH: loop header
LB: loop body
LE: loop exit
PB: predicated region body
PF: predicated region fallthrough
CT: control target
= control target key end

     0   :  { %s10639_s0 = inlined_call_operand.vmem [shape: f32[100,32], index: 0, kind: input, shape index: {}]   ;;  %s10640_s1 = inlined_call_operand.vmem [shape: f32[3,100,32], index: 1, kind: input, shape index: {}]   ;;  %s10641_s2 = inlined_call_operand.vmem [shape: f32[3,3,100,16], index: 2, kind: input, shape index: {}]   ;;  %s10642_s3 = inlined_call_operand.vmem [shape: f32[32,192], index: 3, kind: input, shape index: {}]   ;;  %s10643_s4 = inlined_call_operand.vmem [shape: f32[1,64], index: 4, kind: input, shape index: {}]   ;;  %s10644_s5 = inlined_call_operand.vmem [shape: f32[64,64], index: 5, kind: input, shape index: {}]   ;;  %s10645_s6 = inlined_call_operand.vmem [shape: f32[1,64], index: 6, kind: input, shape index: {}]   ;;  %s10646_s7 = inlined_call_operand.vmem [shape: f32[64,32], index: 7, kind: input, shape index: {}]   ;;  %s10647_s8 = inlined_call_operand.vmem [shape: f32[1,32], index: 8, kind: input, shape index: {}]   ;;  %s10648_s9 = inlined_call_operand.vmem [shape: f32[32,192], index: 9, kind: input, shape index: {}]   ;;  %s10649_s10 = inlined_call_operand.vmem [shape: f32[64,64], index: 10, kind: input, shape index: {}]   ;;  %s10650_s11 = inlined_call_operand.vmem [shape: f32[64,32], index: 11, kind: input, shape index: {}]   ;;  %s10651_s12 = inlined_call_operand.vmem [shape: f32[16,16], index: 12, kind: input, shape index: {}]   ;;  %s10652_s13 = inlined_call_operand.vmem [shape: f32[100,32], index: 13, kind: output, shape index: {0}]   ;;  %s10653_s14 = inlined_call_operand.vmem [shape: f32[3,100,32], index: 14, kind: output, shape index: {1}]   ;;  %s10654_s15 = inlined_call_operand.vmem [shape: f32[3,3,100,16], index: 15, kind: output, shape index: {2}]  }
   0x1   :  { %10683 = sst [smem:[#allocation68_spill]] %s10639_s0 }
   0x2   :  { %10684 = sst [smem:[#allocation69_spill]] %s10640_s1 }
   0x3   :  { %10685 = sst [smem:[#allocation70_spill]] %s10641_s2 }
   0x4   :  { %10686 = sst [smem:[#allocation71_spill]] %s10650_s11 }
   0x5   :  { %10687 = sst [smem:[#allocation72_spill]] %s10652_s13 }
   0x6   :  { %10688 = sst [smem:[#allocation73_spill]] %s10653_s14 }
   0x7   :  { %10689 = sst [smem:[#allocation74_spill]] %s10654_s15 }
   0x8   :  { %s7147_s18 = smov 0   ;;  %s7149_s19 = smov 0  }
   0x9   :  { %s7151_s20 = smov 0  }
   0xa LB: > { %s7163_s21 = sadd.s32 4294967295, %s6905_s20   ;;  %s7166_s22 = sadd.s32 1, %s6905_s20   ;;  %s6905_s20 = sphi %s7151_s20, %s10876_s20   ;;  %s6901_s19 = sphi %s7149_s19, %s10879_s19   ;;  %s6897_s18 = sphi %s7147_s18, %s10878_s18  }
   0xb   : > { %10690 = sst [smem:[#allocation7_spill]] %s7166_s22  ;;  %s56_s23 = ssub.s32 %s6905_s20, %s7166_s22 }
   0xc   : > { %s59_s24 = sadd.s32 1, %s6901_s19  ;;  %p57_p0 = scmp.eq.s32.totalorder %s56_s23, 0 }
   0xd   : > { %p66_p1 = scmp.ne.s32.totalorder %s6901_s19, %s6897_s18  ;;  %p67_p2 = scmp.eq.s32.totalorder %s6905_s20, 0 }
   0xe   : > { %p332_p3 = scmp.eq.s32.totalorder %s7163_s21, 1  ;;  %p5629_p6 = scmp.ge.s32.totalorder %s6905_s20, 2 }
   0xf   : > { %s7176_s25 = scalar_select %p57_p0, %s6901_s19, %s59_s24  }
  0x10   : > { %p7178_p4 = por %p67_p2, %p66_p1  ;;  %p7182_p5 = por %p332_p3, %p66_p1 }
  0x11   : > { %10691 = sst [smem:[#allocation8_spill]] %s7176_s25  ;;  %436 = sbr.rel (%p5629_p6) target bundleno = 187 (0xbb), region = 56 }
  0x12   : > { %s10693_s27 = scalar_select %p7182_p5, 1, 0 }
  0x14   : > { %10694 = sst [smem:[#allocation9_spill]] %s10693_s27 }
  0x16   : > { %456 = sbr.rel (!%p7178_p4) target bundleno = 109 (0x6d), region = 64  ;;  %s458_s28 = sand.u32 (%p7178_p4), 1, %s6901_s19  }
  0x17   : > { %s461_s29 = smul.u32 (%p7178_p4), 12, %s6905_s20  ;;  %s10695_s1 = sld [smem:[#allocation69_spill]] (%p7178_p4) }
  0x18   : > { %s6129_s30 = smul.u32 (%p7178_p4), 288, %s458_s28 }
  0x19   : > { %s462_s16 = ssub.s32 (%p7178_p4), 13, %s461_s29  ;;  %s6106_s17 = smul.u32 (%p7178_p4), 96, %s6905_s20 }
  0x1a   : > { %p463_p7 = scmp.lt.s32.totalorder (%p7178_p4), %s462_s16, 12  ;;  %s7200_s15 = scalar_lea.vmem (%p7178_p4), [#allocation2], %s6129_s30  }
  0x1c   : > { %s10881_s16 = smov (!%p463_p7, %s462_s16), 12 }
  0x1d   : > { %s7195_s25 = scalar_lea.vmem %s10695_s1, %s6106_s17   ;;  %s465_s22 = smul.u32 24, %s10881_s16 }
  0x1f   : > { %p5632_p8 = scmp.eq.s32.totalorder %s465_s22, 0 }
  0x20   : > { %6481 = sdivrem.u32 (!%p5632_p8), %s10881_s16, 11 }
  0x21   : > { %471 = sbr.rel (%p5632_p8) target bundleno = 109 (0x6d), region = 68 }
  0x29   : > { %s7203_s14 = spop.drf %6481 }
  0x2a   : > { %s6483_s28 = spop.drf %6481  ;;  %p5633_p9 = scmp.le.s32.totalorder %s7203_s14, 0 }
  0x2b   : > { %s10696_s29 = smov (!%p5633_p9), %s7200_s15  ;;  %s10697_s17 = smov (!%p5633_p9), %s7195_s25 }
  0x2c   : > { %5441 = sbr.rel (%p5633_p9) target bundleno = 83 (0x53), region = 444  ;;  %s7212_s23 = smov (!%p5633_p9), 0  }
  0x2d   : > { %s7214_s30 = smov (!%p5633_p9), 0  }
  0x31 LB: >> { %v604_v0 = vld [vmem:[%s6913_s17] sm:$0xff]  ;;  %v606_v1 = vld [vmem:[%s6913_s17 + $0x8] sm:$0xff]  ;;  %v608_v2 = vld [vmem:[%s6913_s17 + $0x10] sm:$0xff]  ;;  %s670_s22 = sadd.s32 1, %s6917_s23  ;;  %s598_s30 = sadd.s32 1, %s6921_s30   ;;  %s6921_s30 = sphi %s7214_s30, %s598_s30   ;;  %s6917_s23 = sphi %s7212_s23, %s10700_s23   ;;  %s6913_s17 = sphi %s10697_s17, %s10699_s17   ;;  %s6909_s29 = sphi %s10696_s29, %s10698_s29  }
  0x32   : >> { %605 = vst [vmem:[%s6909_s29] sm:$0xff] %v604_v0  ;;  %v610_v3 = vld [vmem:[%s6913_s17 + $0x18] sm:$0xff]  ;;  %p671_p10 = scmp.ge.s32.totalorder %s670_s22, %s7203_s14  ;;  %v612_v4 = vld [vmem:[%s6913_s17 + $0x20] sm:$0xff]  ;;  %v614_v5 = vld [vmem:[%s6913_s17 + $0x28] sm:$0xff]  ;;  %p597_p11 = scmp.ge.s32.totalorder %s598_s30, %s7203_s14 }
  0x33   : >> { %607 = vst [vmem:[%s6909_s29 + $0x8] sm:$0xff] %v606_v1  ;;  %v616_v6 = vld [vmem:[%s6913_s17 + $0x30] sm:$0xff]  ;;  %v618_v7 = vld [vmem:[%s6913_s17 + $0x38] sm:$0xff]  ;;  %v620_v8 = vld [vmem:[%s6913_s17 + $0x40] sm:$0xff] }
  0x34   : >> { %609 = vst [vmem:[%s6909_s29 + $0x10] sm:$0xff] %v608_v2  ;;  %s10883_s22 = smov (%p671_p10, %s670_s22), 0  ;;  %v622_v9 = vld [vmem:[%s6913_s17 + $0x48] sm:$0xff]  ;;  %v624_v10 = vld [vmem:[%s6913_s17 + $0x50] sm:$0xff]  ;;  %v630_v13 = vld [vmem:[%s6913_s17 + $0x78] sm:$0xff] }
  0x35   : >> { %611 = vst [vmem:[%s6909_s29 + $0x18] sm:$0xff] %v610_v3  ;;  %s673_s24 = smul.u32 88, %s10883_s22  ;;  %v626_v11 = vld [vmem:[%s6913_s17 + $0x68] sm:$0xff]  ;;  %v628_v12 = vld [vmem:[%s6913_s17 + $0x70] sm:$0xff]  ;;  %v632_v14 = vld [vmem:[%s6913_s17 + $0x80] sm:$0xff] }
  0x36   : >> { %613 = vst [vmem:[%s6909_s29 + $0x20] sm:$0xff] %v612_v4  ;;  %v634_v15 = vld [vmem:[%s6913_s17 + $0x88] sm:$0xff]  ;;  %v636_v16 = vld [vmem:[%s6913_s17 + $0x90] sm:$0xff]  ;;  %v638_v17 = vld [vmem:[%s6913_s17 + $0x98] sm:$0xff] }
  0x37   : >> { %615 = vst [vmem:[%s6909_s29 + $0x28] sm:$0xff] %v614_v5  ;;  %s7248_s28 = scalar_lea.vmem %s7195_s25, %s673_s24   ;;  %s7251_s23 = scalar_lea.vmem %s7200_s15, %s673_s24 [#allocation2]   ;;  %v640_v18 = vld [vmem:[%s6913_s17 + $0xa0] sm:$0xff]  ;;  %v642_v19 = vld [vmem:[%s6913_s17 + $0xa8] sm:$0xff]  ;;  %v644_v20 = vld [vmem:[%s6913_s17 + $0xb0] sm:$0xff] }
  0x38   : >> { %617 = vst [vmem:[%s6909_s29 + $0x30] sm:$0xff] %v616_v6  ;;  %v646_v21 = vld [vmem:[%s6913_s17 + $0xb8] sm:$0xff]  ;;  %v648_v22 = vld [vmem:[%s6913_s17 + $0xd0] sm:$0xff]  ;;  %v652_v24 = vld [vmem:[%s6913_s17 + $0xe0] sm:$0xff] }
  0x39   : >> { %619 = vst [vmem:[%s6909_s29 + $0x38] sm:$0xff] %v618_v7  ;;  %v650_v23 = vld [vmem:[%s6913_s17 + $0xd8] sm:$0xff]  ;;  %v654_v25 = vld [vmem:[%s6913_s17 + $0xe8] sm:$0xff]  ;;  %v656_v26 = vld [vmem:[%s6913_s17 + $0xf0] sm:$0xff] }
  0x3a   : >> { %621 = vst [vmem:[%s6909_s29 + $0x40] sm:$0xff] %v620_v8  ;;  %v658_v27 = vld [vmem:[%s6913_s17 + $0xf8] sm:$0xff]  ;;  %v660_v28 = vld [vmem:[%s6913_s17 + $0x100] sm:$0xff]  ;;  %v662_v29 = vld [vmem:[%s6913_s17 + $0x108] sm:$0xff] }
  0x3b   : >> { %623 = vst [vmem:[%s6909_s29 + $0x48] sm:$0xff] %v622_v9  ;;  %v664_v30 = vld [vmem:[%s6913_s17 + $0x110] sm:$0xff]  ;;  %v666_v31 = vld [vmem:[%s6913_s17 + $0x118] sm:$0xff]  ;;  %v668_v32 = vld [vmem:[%s6913_s17 + $0x120] sm:$0xff]  ;;  %s10699_s17 = smov %s7248_s28 }
  0x3c   : >> { %625 = vst [vmem:[%s6909_s29 + $0x50] sm:$0xff] %v624_v10 }
  0x3d   : >> { %627 = vst [vmem:[%s6909_s29 + $0x60] sm:$0xff] %v626_v11 }
  0x3e   : >> { %629 = vst [vmem:[%s6909_s29 + $0x68] sm:$0xff] %v628_v12 }
  0x3f   : >> { %631 = vst [vmem:[%s6909_s29 + $0x70] sm:$0xff] %v630_v13 }
  0x40   : >> { %633 = vst [vmem:[%s6909_s29 + $0x78] sm:$0xff] %v632_v14 }
  0x41   : >> { %635 = vst [vmem:[%s6909_s29 + $0x80] sm:$0xff] %v634_v15 }
  0x42   : >> { %637 = vst [vmem:[%s6909_s29 + $0x88] sm:$0xff] %v636_v16 }
  0x43   : >> { %639 = vst [vmem:[%s6909_s29 + $0x90] sm:$0xff] %v638_v17 }
  0x44   : >> { %641 = vst [vmem:[%s6909_s29 + $0x98] sm:$0xff] %v640_v18 }
  0x45   : >> { %643 = vst [vmem:[%s6909_s29 + $0xa0] sm:$0xff] %v642_v19 }
  0x46   : >> { %645 = vst [vmem:[%s6909_s29 + $0xa8] sm:$0xff] %v644_v20 }
  0x47   : >> { %647 = vst [vmem:[%s6909_s29 + $0xb0] sm:$0xff] %v646_v21 }
  0x48   : >> { %649 = vst [vmem:[%s6909_s29 + $0xc0] sm:$0xff] %v648_v22 }
  0x49   : >> { %651 = vst [vmem:[%s6909_s29 + $0xc8] sm:$0xff] %v650_v23 }
  0x4a   : >> { %653 = vst [vmem:[%s6909_s29 + $0xd0] sm:$0xff] %v652_v24 }
  0x4b   : >> { %655 = vst [vmem:[%s6909_s29 + $0xd8] sm:$0xff] %v654_v25 }
  0x4c   : >> { %657 = vst [vmem:[%s6909_s29 + $0xe0] sm:$0xff] %v656_v26 }
  0x4d   : >> { %659 = vst [vmem:[%s6909_s29 + $0xe8] sm:$0xff] %v658_v27 }
  0x4e   : >> { %661 = vst [vmem:[%s6909_s29 + $0xf0] sm:$0xff] %v660_v28  ;;  %600 = sbr.rel (!%p597_p11) target bundleno = 49 (0x31), region = 450 }
  0x4f   : >> { %663 = vst [vmem:[%s6909_s29 + $0xf8] sm:$0xff] %v662_v29 }
  0x50   : >> { %665 = vst [vmem:[%s6909_s29 + $0x100] sm:$0xff] %v664_v30 }
  0x51   : >> { %667 = vst [vmem:[%s6909_s29 + $0x108] sm:$0xff] %v666_v31 }
  0x52   : >> { %669 = vst [vmem:[%s6909_s29 + $0x110] sm:$0xff] %v668_v32  ;;  %s10698_s29 = smov %s7251_s23  ;;  %s10700_s23 = smov %s10883_s22 }
  0x53 PF: > { %6484 = sdivrem.u32 %s10881_s16, 11 }
  0x54   : > { %s5634_s24 = smul.u32 88, %s7203_s14 }
  0x56   : > { %s7318_s1 = scalar_lea.vmem %s7195_s25, %s5634_s24   ;;  %s7321_s13 = scalar_lea.vmem %s7200_s15, %s5634_s24 [#allocation2]  }
  0x5c   : > { %s6485_s27 = spop.drf %6484 }
  0x5d   : > { %s7323_s11 = spop.drf %6484 }
  0x5e   : > { %p5636_p12 = scmp.le.s32.totalorder %s7323_s11, 0 }
  0x5f   : > { %s10701_s29 = smov (!%p5636_p12), %s7321_s13  ;;  %s6927_s17 = smov (!%p5636_p12), %s7318_s1  }
  0x60   : > { %5455 = sbr.rel (%p5636_p12) target bundleno = 109 (0x6d), region = 455  ;;  %s6931_s30 = smov (!%p5636_p12), 0  }
  0x61   : > { %s6935_s22 = smov (!%p5636_p12), 0  }
  0x65 LB: >> { %v693_v33 = vld [vmem:[%s6929_s17] sm:$0xff]  ;;  %v695_v34 = vld [vmem:[%s6929_s17 + $0x68] sm:$0xff]  ;;  %v697_v35 = vld [vmem:[%s6929_s17 + $0xd0] sm:$0xff]  ;;  %s699_s14 = sadd.s32 1, %s6933_s30  ;;  %s687_s22 = sadd.s32 1, %s6937_s22   ;;  %s6937_s22 = sphi %s6935_s22, %s687_s22   ;;  %s6933_s30 = sphi %s6931_s30, %s6932_s30   ;;  %s6929_s17 = sphi %s6927_s17, %s704_s17   ;;  %s6925_s29 = sphi %s10701_s29, %s705_s29  }
  0x66   : >> { %694 = vst [vmem:[%s6925_s29] sm:$0xff] %v693_v33  ;;  %p700_p13 = scmp.ge.s32.totalorder %s699_s14, %s7323_s11  ;;  %p686_p0 = scmp.ge.s32.totalorder %s687_s22, %s7323_s11 }
  0x67   : >> { %696 = vst [vmem:[%s6925_s29 + $0x60] sm:$0xff] %v695_v34 }
  0x68   : >> { %698 = vst [vmem:[%s6925_s29 + $0xc0] sm:$0xff] %v697_v35  ;;  %s10885_s14 = smov (%p700_p13, %s699_s14), 0  ;;  %689 = sbr.rel (!%p686_p0) target bundleno = 101 (0x65), region = 461 }
  0x69   : >> { %s5637_s15 = sshll.u32 %s10885_s14, 3  ;;  %s6932_s30 = smov %s10885_s14  }
  0x6a   : >> { %s704_s17 = scalar_lea.vmem %s7318_s1, %s5637_s15   ;;  %s705_s29 = scalar_lea.vmem %s7321_s13, %s5637_s15 [#allocation2]  }
  0x6d PF: > { %711 = sbr.rel (!%p7178_p4) target bundleno = 187 (0xbb), region = 116  ;;  %s713_s25 = sand.u32 (%p7178_p4), 1, %s6901_s19  }
  0x6e   : > { %s716_s27 = smul.u32 (%p7178_p4), 12, %s6905_s20  ;;  %s10702_s2 = sld [smem:[#allocation70_spill]] (%p7178_p4) }
  0x6f   : > { %s6130_s16 = smul.u32 (%p7178_p4), 864, %s713_s25 }
  0x70   : > { %s717_s28 = ssub.s32 (%p7178_p4), 13, %s716_s27  ;;  %s6107_s23 = smul.u32 (%p7178_p4), 96, %s6905_s20 }
  0x71   : > { %p718_p1 = scmp.lt.s32.totalorder (%p7178_p4), %s717_s28, 12  ;;  %s7350_s11 = scalar_lea.vmem (%p7178_p4), [#allocation3], %s6130_s16  }
  0x73   : > { %s10887_s28 = smov (!%p718_p1, %s717_s28), 12 }
  0x74   : > { %s7345_s17 = scalar_lea.vmem %s10702_s2, %s6107_s23   ;;  %s720_s1 = smul.u32 72, %s10887_s28 }
  0x76   : > { %p5641_p2 = scmp.eq.s32.totalorder %s720_s1, 0 }
  0x77   : > { %s7353_s13 = sshrl.u32 (!%p5641_p2), %s10887_s28, 2 }
  0x78   : > { %726 = sbr.rel (%p5641_p2) target bundleno = 187 (0xbb), region = 120  ;;  %p5642_p3 = scmp.le.s32.totalorder (!%p5641_p2), %s7353_s13, 0 }
  0x7d   : > { %5469 = sbr.rel (%p5642_p3) target bundleno = 167 (0xa7), region = 466  ;;  %s10703_s26 = smov (!%p5642_p3), %s7350_s11 }
  0x7e   : > { %s10704_s30 = smov (!%p5642_p3), %s7345_s17  ;;  %s7362_s22 = smov (!%p5642_p3), 0  }
  0x7f   : > { %s7364_s14 = smov (!%p5642_p3), 0  }
  0x82 LB: >> { %v875_v36 = vld [vmem:[%s6945_s30] sm:$0xff]  ;;  %v877_v37 = vld [vmem:[%s6945_s30 + $0x8] sm:$0xff]  ;;  %v879_v38 = vld [vmem:[%s6945_s30 + $0x10] sm:$0xff]  ;;  %s947_s15 = sadd.s32 1, %s6949_s22  ;;  %s869_s14 = sadd.s32 1, %s6953_s14   ;;  %s6953_s14 = sphi %s7364_s14, %s869_s14   ;;  %s6949_s22 = sphi %s7362_s22, %s10707_s22   ;;  %s6945_s30 = sphi %s10704_s30, %s10706_s30   ;;  %s6941_s26 = sphi %s10703_s26, %s10705_s26  }
  0x83   : >> { %876 = vst [vmem:[%s6941_s26] sm:$0xff] %v875_v36  ;;  %v881_v39 = vld [vmem:[%s6945_s30 + $0x18] sm:$0xff]  ;;  %p948_p4 = scmp.ge.s32.totalorder %s947_s15, %s7353_s13  ;;  %v883_v40 = vld [vmem:[%s6945_s30 + $0x68] sm:$0xff]  ;;  %v885_v41 = vld [vmem:[%s6945_s30 + $0x70] sm:$0xff]  ;;  %p868_p6 = scmp.ge.s32.totalorder %s869_s14, %s7353_s13 }
  0x84   : >> { %878 = vst [vmem:[%s6941_s26 + $0x8] sm:$0xff] %v877_v37  ;;  %v887_v42 = vld [vmem:[%s6945_s30 + $0x78] sm:$0xff]  ;;  %v889_v43 = vld [vmem:[%s6945_s30 + $0x80] sm:$0xff]  ;;  %v891_v44 = vld [vmem:[%s6945_s30 + $0xd0] sm:$0xff] }
  0x85   : >> { %880 = vst [vmem:[%s6941_s26 + $0x10] sm:$0xff] %v879_v38  ;;  %s10889_s15 = smov (%p948_p4, %s947_s15), 0  ;;  %v893_v45 = vld [vmem:[%s6945_s30 + $0xd8] sm:$0xff]  ;;  %v895_v46 = vld [vmem:[%s6945_s30 + $0xe0] sm:$0xff]  ;;  %v897_v47 = vld [vmem:[%s6945_s30 + $0xe8] sm:$0xff] }
  0x86   : >> { %882 = vst [vmem:[%s6941_s26 + $0x18] sm:$0xff] %v881_v39  ;;  %s5643_s25 = sshll.u32 %s10889_s15, 5  ;;  %v899_v48 = vld [vmem:[%s6945_s30 + $0x138] sm:$0xff]  ;;  %v901_v49 = vld [vmem:[%s6945_s30 + $0x140] sm:$0xff]  ;;  %v903_v50 = vld [vmem:[%s6945_s30 + $0x148] sm:$0xff]  ;;  %s10707_s22 = smov %s10889_s15 }
  0x87   : >> { %884 = vst [vmem:[%s6941_s26 + $0x60] sm:$0xff] %v883_v40  ;;  %s7396_s27 = scalar_lea.vmem %s7345_s17, %s5643_s25   ;;  %s7399_s16 = scalar_lea.vmem %s7350_s11, %s5643_s25 [#allocation3]   ;;  %v905_v51 = vld [vmem:[%s6945_s30 + $0x150] sm:$0xff]  ;;  %v907_v52 = vld [vmem:[%s6945_s30 + $0x1a0] sm:$0xff]  ;;  %v909_v53 = vld [vmem:[%s6945_s30 + $0x1a8] sm:$0xff] }
  0x88   : >> { %886 = vst [vmem:[%s6941_s26 + $0x68] sm:$0xff] %v885_v41  ;;  %v911_v54 = vld [vmem:[%s6945_s30 + $0x1b0] sm:$0xff]  ;;  %v913_v55 = vld [vmem:[%s6945_s30 + $0x1b8] sm:$0xff]  ;;  %v915_v56 = vld [vmem:[%s6945_s30 + $0x208] sm:$0xff] }
  0x89   : >> { %888 = vst [vmem:[%s6941_s26 + $0x70] sm:$0xff] %v887_v42  ;;  %v917_v57 = vld [vmem:[%s6945_s30 + $0x210] sm:$0xff]  ;;  %v919_v58 = vld [vmem:[%s6945_s30 + $0x218] sm:$0xff]  ;;  %v921_v59 = vld [vmem:[%s6945_s30 + $0x220] sm:$0xff] }
  0x8a   : >> { %890 = vst [vmem:[%s6941_s26 + $0x78] sm:$0xff] %v889_v43  ;;  %v923_v60 = vld [vmem:[%s6945_s30 + $0x270] sm:$0xff]  ;;  %v925_v61 = vld [vmem:[%s6945_s30 + $0x278] sm:$0xff]  ;;  %v927_v62 = vld [vmem:[%s6945_s30 + $0x280] sm:$0xff] }
  0x8b   : >> { %892 = vst [vmem:[%s6941_s26 + $0xc0] sm:$0xff] %v891_v44  ;;  %v929_v63 = vld [vmem:[%s6945_s30 + $0x288] sm:$0xff]  ;;  %v931_v0 = vld [vmem:[%s6945_s30 + $0x2d8] sm:$0xff]  ;;  %v933_v1 = vld [vmem:[%s6945_s30 + $0x2e0] sm:$0xff] }
  0x8c   : >> { %894 = vst [vmem:[%s6941_s26 + $0xc8] sm:$0xff] %v893_v45  ;;  %v935_v2 = vld [vmem:[%s6945_s30 + $0x2e8] sm:$0xff]  ;;  %v937_v3 = vld [vmem:[%s6945_s30 + $0x2f0] sm:$0xff]  ;;  %v939_v4 = vld [vmem:[%s6945_s30 + $0x340] sm:$0xff] }
  0x8d   : >> { %896 = vst [vmem:[%s6941_s26 + $0xd0] sm:$0xff] %v895_v46  ;;  %v941_v5 = vld [vmem:[%s6945_s30 + $0x348] sm:$0xff]  ;;  %v943_v6 = vld [vmem:[%s6945_s30 + $0x350] sm:$0xff]  ;;  %v945_v7 = vld [vmem:[%s6945_s30 + $0x358] sm:$0xff]  ;;  %s10706_s30 = smov %s7396_s27 }
  0x8e   : >> { %898 = vst [vmem:[%s6941_s26 + $0xd8] sm:$0xff] %v897_v47 }
  0x8f   : >> { %900 = vst [vmem:[%s6941_s26 + $0x120] sm:$0xff] %v899_v48 }
  0x90   : >> { %902 = vst [vmem:[%s6941_s26 + $0x128] sm:$0xff] %v901_v49 }
  0x91   : >> { %904 = vst [vmem:[%s6941_s26 + $0x130] sm:$0xff] %v903_v50 }
  0x92   : >> { %906 = vst [vmem:[%s6941_s26 + $0x138] sm:$0xff] %v905_v51 }
  0x93   : >> { %908 = vst [vmem:[%s6941_s26 + $0x180] sm:$0xff] %v907_v52 }
  0x94   : >> { %910 = vst [vmem:[%s6941_s26 + $0x188] sm:$0xff] %v909_v53 }
  0x95   : >> { %912 = vst [vmem:[%s6941_s26 + $0x190] sm:$0xff] %v911_v54 }
  0x96   : >> { %914 = vst [vmem:[%s6941_s26 + $0x198] sm:$0xff] %v913_v55 }
  0x97   : >> { %916 = vst [vmem:[%s6941_s26 + $0x1e0] sm:$0xff] %v915_v56 }
  0x98   : >> { %918 = vst [vmem:[%s6941_s26 + $0x1e8] sm:$0xff] %v917_v57 }
  0x99   : >> { %920 = vst [vmem:[%s6941_s26 + $0x1f0] sm:$0xff] %v919_v58 }
  0x9a   : >> { %922 = vst [vmem:[%s6941_s26 + $0x1f8] sm:$0xff] %v921_v59 }
  0x9b   : >> { %924 = vst [vmem:[%s6941_s26 + $0x240] sm:$0xff] %v923_v60 }
  0x9c   : >> { %926 = vst [vmem:[%s6941_s26 + $0x248] sm:$0xff] %v925_v61 }
  0x9d   : >> { %928 = vst [vmem:[%s6941_s26 + $0x250] sm:$0xff] %v927_v62 }
  0x9e   : >> { %930 = vst [vmem:[%s6941_s26 + $0x258] sm:$0xff] %v929_v63 }
  0x9f   : >> { %932 = vst [vmem:[%s6941_s26 + $0x2a0] sm:$0xff] %v931_v0 }
  0xa0   : >> { %934 = vst [vmem:[%s6941_s26 + $0x2a8] sm:$0xff] %v933_v1 }
  0xa1   : >> { %936 = vst [vmem:[%s6941_s26 + $0x2b0] sm:$0xff] %v935_v2 }
  0xa2   : >> { %938 = vst [vmem:[%s6941_s26 + $0x2b8] sm:$0xff] %v937_v3  ;;  %871 = sbr.rel (!%p868_p6) target bundleno = 130 (0x82), region = 472 }
  0xa3   : >> { %940 = vst [vmem:[%s6941_s26 + $0x300] sm:$0xff] %v939_v4 }
  0xa4   : >> { %942 = vst [vmem:[%s6941_s26 + $0x308] sm:$0xff] %v941_v5 }
  0xa5   : >> { %944 = vst [vmem:[%s6941_s26 + $0x310] sm:$0xff] %v943_v6 }
  0xa6   : >> { %946 = vst [vmem:[%s6941_s26 + $0x318] sm:$0xff] %v945_v7  ;;  %s10705_s26 = smov %s7399_s16 }
  0xa7 PF: > { %s7472_s23 = sand.u32 3, %s10887_s28   ;;  %s6108_s24 = sshll.u32 %s7353_s13, 5 }
  0xa8   : > { %s7476_s29 = scalar_lea.vmem %s7345_s17, %s6108_s24   ;;  %s7479_s1 = scalar_lea.vmem %s7350_s11, %s6108_s24 [#allocation3]  }
  0xa9   : > { %p5648_p7 = scmp.le.s32.totalorder %s7472_s23, 0 }
  0xaa   : > { %s10708_s14 = smov (!%p5648_p7), %s7479_s1  ;;  %s10709_s26 = smov (!%p5648_p7), %s7476_s29 }
  0xab   : > { %5483 = sbr.rel (%p5648_p7) target bundleno = 187 (0xbb), region = 477  ;;  %s7488_s30 = smov (!%p5648_p7), 0  }
  0xac   : > { %s7490_s22 = smov (!%p5648_p7), 0  }
  0xb0 LB: >> { %v970_v8 = vld [vmem:[%s6961_s26] sm:$0xff]  ;;  %v972_v9 = vld [vmem:[%s6961_s26 + $0x68] sm:$0xff]  ;;  %v974_v10 = vld [vmem:[%s6961_s26 + $0xd0] sm:$0xff]  ;;  %s988_s28 = sadd.s32 1, %s6965_s30  ;;  %s964_s22 = sadd.s32 1, %s6969_s22   ;;  %s6969_s22 = sphi %s7490_s22, %s964_s22   ;;  %s6965_s30 = sphi %s7488_s30, %s10711_s30   ;;  %s6961_s26 = sphi %s10709_s26, %s993_s26   ;;  %s6957_s14 = sphi %s10708_s14, %s10710_s14  }
  0xb1   : >> { %971 = vst [vmem:[%s6957_s14] sm:$0xff] %v970_v8  ;;  %v976_v11 = vld [vmem:[%s6961_s26 + $0x138] sm:$0xff]  ;;  %p989_p8 = scmp.ge.s32.totalorder %s988_s28, %s7472_s23  ;;  %v978_v12 = vld [vmem:[%s6961_s26 + $0x1a0] sm:$0xff]  ;;  %v980_v13 = vld [vmem:[%s6961_s26 + $0x208] sm:$0xff]  ;;  %p963_p9 = scmp.ge.s32.totalorder %s964_s22, %s7472_s23 }
  0xb2   : >> { %973 = vst [vmem:[%s6957_s14 + $0x60] sm:$0xff] %v972_v9  ;;  %v982_v14 = vld [vmem:[%s6961_s26 + $0x270] sm:$0xff]  ;;  %v984_v15 = vld [vmem:[%s6961_s26 + $0x2d8] sm:$0xff]  ;;  %v986_v16 = vld [vmem:[%s6961_s26 + $0x340] sm:$0xff] }
  0xb3   : >> { %975 = vst [vmem:[%s6957_s14 + $0xc0] sm:$0xff] %v974_v10  ;;  %s10891_s28 = smov (%p989_p8, %s988_s28), 0 }
  0xb4   : >> { %977 = vst [vmem:[%s6957_s14 + $0x120] sm:$0xff] %v976_v11  ;;  %s5649_s17 = sshll.u32 %s10891_s28, 3  ;;  %s10711_s30 = smov %s10891_s28 }
  0xb5   : >> { %979 = vst [vmem:[%s6957_s14 + $0x180] sm:$0xff] %v978_v12  ;;  %s993_s26 = scalar_lea.vmem %s7476_s29, %s5649_s17   ;;  %s994_s11 = scalar_lea.vmem %s7479_s1, %s5649_s17 [#allocation3]  }
  0xb6   : >> { %981 = vst [vmem:[%s6957_s14 + $0x1e0] sm:$0xff] %v980_v13  ;;  %966 = sbr.rel (!%p963_p9) target bundleno = 176 (0xb0), region = 483 }
  0xb7   : >> { %983 = vst [vmem:[%s6957_s14 + $0x240] sm:$0xff] %v982_v14 }
  0xb8   : >> { %985 = vst [vmem:[%s6957_s14 + $0x2a0] sm:$0xff] %v984_v15 }
  0xb9   : >> { %987 = vst [vmem:[%s6957_s14 + $0x300] sm:$0xff] %v986_v16  ;;  %s10710_s14 = smov %s994_s11 }
  0xbb PF: > { %p5651_p10 = scmp.ge.s32.totalorder %s6905_s20, 1  ;;  %p999_p11 = scmp.lt.s32.totalorder %s6905_s20, 3 }
  0xbd   : > { %p1000_p12 = pnand %p5651_p10, %p999_p11 }
  0xbf   : > { %1003 = sbr.rel (%p1000_p12) target bundleno = 1815 (0x717), region = 168 }
  0xc4   : > { %v1138_v17 = vld [vmem:[%s10642_s3 + $0x38] sm:$0xff]  ;;  %v1136_v18 = vld [vmem:[%s10642_s3 + $0x28] sm:$0xff]  ;;  %s7520_s16 = smul.u32 12, %s7163_s21  ;;  %s7527_s24 = sand.u32 1, %s6897_s18   ;;  %v1627_v21 = vld [vmem:[%s10648_s9 + $0x30] sm:$0xff]  ;;  %vm1139_vm0 = vcmask 261120  }
  0xc5   : > { %1241 = vmatpush.msra.mxu1 %v1138_v17  ;;  %6115 = vmatpush.msra.mxu3 %v1138_v17  ;;  %v1134_v19 = vld [vmem:[%s10642_s3 + $0x18] sm:$0xff]  ;;  %v1132_v20 = vld [vmem:[%s10642_s3 + $0x8] sm:$0xff]  ;;  %s10712_s0 = sld [smem:[#allocation68_spill]]  ;;  %v1625_v22 = vld [vmem:[%s10648_s9 + $0x20] sm:$0xff]  ;;  %s6131_s15 = smul.u32 288, %s7527_s24  ;;  %vm1334_vm1 = vcmask 523264  }
  0xc6   : > { %p1085_p13 = scmp.lt.s32.totalorder %s7520_s16, 12  ;;  %v1623_v24 = vld [vmem:[%s10648_s9 + $0x10] sm:$0xff]  ;;  %v1621_v25 = vld [vmem:[%s10648_s9] sm:$0xff]  ;;  %v1628_v26 = vld [vmem:[%s10648_s9 + $0x38] sm:$0xff]  ;;  %s6133_s26 = smul.u32 96, %s7527_s24 }
  0xc7   : > { %1242 = vmatpush.msra.mxu1 %v1136_v18  ;;  %6116 = vmatpush.msra.mxu3 %v1136_v18  ;;  %v1626_v33 = vld [vmem:[%s10648_s9 + $0x28] sm:$0xff]  ;;  %v1329_v38 = vld [vmem:[%s10644_s5 + $0x38] sm:$0xff]  ;;  %v1328_v39 = vld [vmem:[%s10644_s5 + $0x30] sm:$0xff]  ;;  %s6132_s20 = smul.u32 864, %s7527_s24  ;;  %s10753_s13 = sld [smem:[#allocation71_spill]] }
  0xc8   : > { %s1086_s14 = scalar_select %p1085_p13, %s7520_s16, 12  ;;  %1379 = vmatpush.msra.mxu2 %v1329_v38  ;;  %v1327_v41 = vld [vmem:[%s10644_s5 + $0x28] sm:$0xff]  ;;  %v1326_v42 = vld [vmem:[%s10644_s5 + $0x20] sm:$0xff]  ;;  %v1325_v43 = vld [vmem:[%s10644_s5 + $0x18] sm:$0xff] }
  0xc9   : > { %1243 = vmatpush.msra.mxu1 %v1134_v19  ;;  %6117 = vmatpush.msra.mxu3 %v1134_v19  ;;  %v1324_v45 = vld [vmem:[%s10644_s5 + $0x10] sm:$0xff]  ;;  %v1323_v46 = vld [vmem:[%s10644_s5 + $0x8] sm:$0xff]  ;;  %v1322_v47 = vld [vmem:[%s10644_s5] sm:$0xff]  ;;  %s8030_s30 = scalar_lea.vmem [#allocation4], %s6133_s26   ;;  %s8521_s26 = scalar_lea.vmem [#allocation3], %s6132_s20 }
  0xca   : > { %s5652_s22 = sshll.u32 %s1086_s14, 3  ;;  %s7561_s14 = scalar_lea.vmem [#allocation2], %s6131_s15  ;;  %1380 = vmatpush.msra.mxu2 %v1328_v39  ;;  %v1624_v51 = vld [vmem:[%s10648_s9 + $0x18] sm:$0xff]  ;;  %v7671_v52 = vld [vmem:[%s10643_s4] ss:$0 sm:$0xff]  ;;  %v1622_v16 = vld [vmem:[%s10648_s9 + $0x8] sm:$0xff] }
  0xcb   : > { %1244 = vmatpush.msra.mxu1 %v1132_v20  ;;  %s7539_s17 = scalar_lea.vmem %s10712_s0, %s5652_s22  ;;  %6118 = vmatpush.msra.mxu3 %v1132_v20  ;;  %v7564_v27 = vld [vmem:[%s7561_s14] sm:$0xff]  ;;  %v7569_v28 = vld [vmem:[%s7561_s14 + $0x8] sm:$0xff]  ;;  %v7574_v29 = vld [vmem:[%s7561_s14 + $0x10] sm:$0xff]  ;;  %s8778_s28 = scalar_lea.vmem [#allocation6], %s6132_s20  }
  0xcc   : > { %v7546_v23 = vld [vmem:[%s7539_s17] sm:$0xff]  ;;  %v7579_v30 = vld [vmem:[%s7561_s14 + $0x18] sm:$0xff]  ;;  %v7589_v32 = vld [vmem:[%s7561_s14 + $0x28] sm:$0xff]  ;;  %1381 = vmatpush.msra.mxu2 %v1327_v41  ;;  %s9692_s1 = scalar_lea.vmem [#allocation5], %s6131_s15   ;;  %s4553_s15 = ssub.s32 (%p7182_p5), 13, %s7520_s16 }
  0xcd   : > { %1749 = vmatpush.msrb.mxu1 %v1627_v21  ;;  %v7584_v31 = vld [vmem:[%s7561_s14 + $0x20] sm:$0xff]  ;;  %v7597_v34 = vld [vmem:[%s7561_s14 + $0x30] sm:$0xff]  ;;  %v7602_v35 = vld [vmem:[%s7561_s14 + $0x38] sm:$0xff]  ;;  %p4554_p0 = scmp.lt.s32.totalorder (%p7182_p5), %s4553_s15, 12  ;;  %s10851_s20 = sld [smem:[#allocation72_spill]] (%p7182_p5) }
  0xce   : > { %5665 = vmatmul.msk.f32.vlgmr.msra.gmra.mxu1 %vm1139_vm0, %v7546_v23  ;;  %v7607_v36 = vld [vmem:[%s7561_s14 + $0x40] sm:$0xff]  ;;  %v7612_v37 = vld [vmem:[%s7561_s14 + $0x48] sm:$0xff]  ;;  %v7623_v40 = vld [vmem:[%s7561_s14 + $0x50] sm:$0xff]  ;;  %1382 = vmatpush.msra.mxu2 %v1326_v42 }
  0xcf   : > { %1750 = vmatpush.msrb.mxu1 %v1625_v22  ;;  %v7637_v44 = vld [vmem:[%s7561_s14 + $0x58] sm:$0xff]  ;;  %v7651_v48 = vld [vmem:[%s7561_s14 + $0x60] sm:$0xff]  ;;  %v7656_v49 = vld [vmem:[%s7561_s14 + $0x68] sm:$0xff] }
  0xd0   : > { %1383 = vmatpush.msra.mxu2 %v1325_v43  ;;  %v7661_v50 = vld [vmem:[%s7561_s14 + $0x70] sm:$0xff]  ;;  %v7674_v54 = vld [vmem:[%s7561_s14 + $0x78] sm:$0xff]  ;;  %v7683_v59 = vld [vmem:[%s7561_s14 + $0x80] sm:$0xff] }
  0xd1   : > { %1751 = vmatpush.msrb.mxu1 %v1623_v24  ;;  %v7690_v61 = vld [vmem:[%s7561_s14 + $0x88] sm:$0xff]  ;;  %v7697_v63 = vld [vmem:[%s7561_s14 + $0x90] sm:$0xff]  ;;  %v7709_v2 = vld [vmem:[%s7561_s14 + $0x98] sm:$0xff] }
  0xd2   : > { %1384 = vmatpush.msra.mxu2 %v1324_v45  ;;  %v7700_v0 = vld [vmem:[%s7539_s17 + $0x8] sm:$0xff]  ;;  %v7712_v3 = vld [vmem:[%s7539_s17 + $0x10] sm:$0xff]  ;;  %v7721_v5 = vld [vmem:[%s7561_s14 + $0xa0] sm:$0xff] }
  0xd3   : > { %1752 = vmatpush.msrb.mxu1 %v1621_v25  ;;  %5666 = vmatmul.msk.f32.vlgmr.msra.gmra.mxu3 %vm1139_vm0, %v7700_v0  ;;  %v7724_v6 = vld [vmem:[%s7539_s17 + $0x18] sm:$0xff]  ;;  %v7733_v8 = vld [vmem:[%s7561_s14 + $0xa8] sm:$0xff]  ;;  %v7736_v9 = vld [vmem:[%s7539_s17 + $0x20] sm:$0xff] }
  0xd4   : > { %1385 = vmatpush.msra.mxu2 %v1323_v46  ;;  %v7745_v11 = vld [vmem:[%s7561_s14 + $0xb0] sm:$0xff]  ;;  %v7748_v12 = vld [vmem:[%s7539_s17 + $0x28] sm:$0xff]  ;;  %v7757_v14 = vld [vmem:[%s7561_s14 + $0xb8] sm:$0xff] }
  0xd5   : > { %1874 = vmatpush.msra.mxu1 %v1628_v26  ;;  %v7760_v15 = vld [vmem:[%s7539_s17 + $0x30] sm:$0xff]  ;;  %v7772_v18 = vld [vmem:[%s7561_s14 + $0xc0] sm:$0xff]  ;;  %v7775_v19 = vld [vmem:[%s7539_s17 + $0x38] sm:$0xff] }
  0xd6   : > { %5701 = vmatmul.msk.f32.vlgmr.msrb.gmra.mxu1 %vm1139_vm0, %v7564_v27  ;;  %1386 = vmatpush.msra.mxu2 %v1322_v47  ;;  %v7784_v21 = vld [vmem:[%s7561_s14 + $0xc8] sm:$0xff]  ;;  %v7787_v22 = vld [vmem:[%s7539_s17 + $0x40] sm:$0xff]  ;;  %v7796_v25 = vld [vmem:[%s7561_s14 + $0xd0] sm:$0xff] }
  0xd7   : > { %1875 = vmatpush.msra.mxu1 %v1626_v33  ;;  %v7799_v26 = vld [vmem:[%s7539_s17 + $0x48] sm:$0xff]  ;;  %v7808_v38 = vld [vmem:[%s7561_s14 + $0xd8] sm:$0xff]  ;;  %v7811_v39 = vld [vmem:[%s7539_s17 + $0x50] sm:$0xff] }
  0xd8   : > { %v1455_v41 = vld [vmem:[%s10646_s7 + $0x38] sm:$0xff]  ;;  %v1454_v42 = vld [vmem:[%s10646_s7 + $0x30] sm:$0xff]  ;;  %v1453_v43 = vld [vmem:[%s10646_s7 + $0x28] sm:$0xff] }
  0xd9   : > { %1876 = vmatpush.msra.mxu1 %v1624_v51  ;;  %1504 = vmatpush.msrb.mxu3 %v1455_v41  ;;  %v1452_v45 = vld [vmem:[%s10646_s7 + $0x20] sm:$0xff]  ;;  %v7835_v51 = vld [vmem:[%s7539_s17 + $0x58] sm:$0xff] }
  0xda   : > { %v7832_v47 = vld [vmem:[%s7561_s14 + $0xe0] sm:$0xff] }
  0xdb   : > { %5667 = vmatmul.msk.f32.gmra.mxu3 %vm1139_vm0, %v7712_v3  ;;  %1877 = vmatpush.msra.mxu1 %v1622_v16  ;;  %v1448_v16 = vld [vmem:[%s10646_s7] sm:$0xff] }
  0xdc   : > { %1505 = vmatpush.msrb.mxu3 %v1454_v42  ;;  %v7859_v42 = vld [vmem:[%s7561_s14 + $0xe8] sm:$0xff] }
  0xde   : > { %5702 = vmatmul.msk.f32.gmra.mxu1 %vm1139_vm0, %v7569_v28  ;;  %1506 = vmatpush.msrb.mxu3 %v1453_v43  ;;  %v1135_v43 = vld [vmem:[%s10642_s3 + $0x20] sm:$0xff] }
  0xe0   : > { %1507 = vmatpush.msrb.mxu3 %v1452_v45  ;;  %v1133_v45 = vld [vmem:[%s10642_s3 + $0x10] sm:$0xff] }
  0xe3   : > { %5668 = vmatmul.msk.f32.gmra.mxu3 %vm1139_vm0, %v7724_v6 }
  0xe6   : > { %5703 = vmatmul.msk.f32.gmra.mxu1 %vm1139_vm0, %v7574_v29 }
  0xeb   : > { %5669 = vmatmul.msk.f32.gmra.mxu3 %vm1139_vm0, %v7736_v9 }
  0xee   : > { %5704 = vmatmul.msk.f32.gmra.mxu1 %vm1139_vm0, %v7579_v30 }
  0xf3   : > { %5670 = vmatmul.msk.f32.gmra.mxu3 %vm1139_vm0, %v7748_v12 }
  0xf6   : > { %5705 = vmatmul.msk.f32.gmra.mxu1 %vm1139_vm0, %v7584_v31 }
  0xfb   : > { %5671 = vmatmul.msk.f32.gmra.mxu3 %vm1139_vm0, %v7760_v15 }
  0xfe   : > { %5706 = vmatmul.msk.f32.gmra.mxu1 %vm1139_vm0, %v7589_v32 }
 0x103   : > { %5672 = vmatmul.msk.f32.gmra.mxu3 %vm1139_vm0, %v7775_v19 }
 0x106   : > { %5707 = vmatmul.msk.f32.gmra.mxu1 %vm1139_vm0, %v7597_v34 }
 0x10b   : > { %5673 = vmatmul.msk.f32.gmra.mxu3 %vm1139_vm0, %v7787_v22 }
 0x10e   : > { %5708 = vmatmul.msk.f32.gmra.mxu1 %vm1139_vm0, %v7602_v35 }
 0x113   : > { %5674 = vmatmul.msk.f32.gmra.mxu3 %vm1139_vm0, %v7799_v26 }
 0x116   : > { %5709 = vmatmul.msk.f32.gmra.mxu1 %vm1139_vm0, %v7607_v36 }
 0x11b   : > { %5675 = vmatmul.msk.f32.gmra.mxu3 %vm1139_vm0, %v7811_v39 }
 0x11e   : > { %5710 = vmatmul.msk.f32.gmra.mxu1 %vm1139_vm0, %v7612_v37 }
 0x123   : > { %5676 = vmatmul.msk.f32.gmra.mxu3 %vm1139_vm0, %v7835_v51 }
 0x126   : > { %5711 = vmatmul.msk.f32.gmra.mxu1 %vm1139_vm0, %v7623_v40 }
 0x12e   : > { %5712 = vmatmul.msk.f32.gmra.mxu1 %vm1139_vm0, %v7637_v44 }
 0x136   : > { %5713 = vmatmul.msk.f32.gmra.mxu1 %vm1139_vm0, %v7651_v48 }
 0x13e   : > { %5714 = vmatmul.msk.f32.gmra.mxu1 %vm1139_vm0, %v7656_v49 }
 0x146   : > { %5715 = vmatmul.msk.f32.gmra.mxu1 %vm1139_vm0, %v7661_v50 }
 0x14b   : > { %v1246_v53 = vpop.f32.mrf.mxu1 }
 0x14c   : > { %v1286_v55 = vadd.f32 %v7671_v52, %v1246_v53  ;;  %v1451_v53 = vld [vmem:[%s10646_s7 + $0x18] sm:$0xff] }
 0x14d   : > { %1508 = vmatpush.msrb.mxu3 %v1451_v53  ;;  %v1131_v53 = vld [vmem:[%s10642_s3] sm:$0xff] }
 0x14e   : > { %v1298_v56 = vmul.f32 0.1, %v1286_v55  ;;  %5716 = vmatmul.msk.f32.gmra.mxu1 %vm1139_vm0, %v7674_v54 }
 0x150   : > { %v1310_v57 = vmax.f32 %v1286_v55, %v1298_v56  ;;  %v1450_v55 = vld [vmem:[%s10646_s7 + $0x10] sm:$0xff]  ;;  %v1449_v56 = vld [vmem:[%s10646_s7 + $0x8] sm:$0xff] }
 0x151   : > { %1509 = vmatpush.msrb.mxu3 %v1450_v55 }
 0x152   : > { %5677 = vmatmul.msk.f32.vlgmr.msra.gmra.mxu2 %vm1334_vm1, %v1310_v57  ;;  %v1137_v57 = vld [vmem:[%s10642_s3 + $0x30] sm:$0xff] }
 0x153   : > { %v7680_v58 = vpop.f32.mrf.mxu1  ;;  %1510 = vmatpush.msrb.mxu3 %v1449_v56  ;;  %1188 = vmatpush.msra.mxu0 %v1137_v57  ;;  %v7877_v56 = vld [vmem:[%s7561_s14 + $0xf0] sm:$0xff] }
 0x154   : > { %10713 = vst [vmem:[#allocation10_spill] sm:$0xff] %v7680_v58 }
 0x155   : > { %1511 = vmatpush.msrb.mxu3 %v1448_v16  ;;  %1189 = vmatpush.msra.mxu0 %v1135_v43  ;;  %v7886_v16 = vld [vmem:[%s7561_s14 + $0xf8] sm:$0xff]  ;;  %v7893_v43 = vld [vmem:[%s10645_s6] ss:$0 sm:$0xff] }
 0x156   : > { %5717 = vmatmul.msk.f32.gmra.mxu1 %vm1139_vm0, %v7683_v59 }
 0x157   : > { %1190 = vmatpush.msra.mxu0 %v1133_v45 }
 0x159   : > { %1191 = vmatpush.msra.mxu0 %v1131_v53  ;;  %v7900_v53 = vld [vmem:[%s7561_s14 + $0x100] sm:$0xff] }
 0x15a   : > { %5653 = vmatmul.msk.f32.vlgmr.msra.gmra.mxu0 %vm1139_vm0, %v7546_v23 }
 0x15b   : > { %v7687_v60 = vpop.f32.mrf.mxu1 }
 0x15c   : > { %10714 = vst [vmem:[#allocation11_spill] sm:$0xff] %v7687_v60 }
 0x15e   : > { %5718 = vmatmul.msk.f32.gmra.mxu1 %vm1139_vm0, %v7690_v61 }
 0x162   : > { %5654 = vmatmul.msk.f32.gmra.mxu0 %vm1139_vm0, %v7700_v0 }
 0x163   : > { %v7694_v62 = vpop.f32.mrf.mxu1 }
 0x164   : > { %10715 = vst [vmem:[#allocation12_spill] sm:$0xff] %v7694_v62 }
 0x166   : > { %5719 = vmatmul.msk.f32.gmra.mxu1 %vm1139_vm0, %v7697_v63 }
 0x16a   : > { %5655 = vmatmul.msk.f32.gmra.mxu0 %vm1139_vm0, %v7712_v3 }
 0x16b   : > { %v7706_v1 = vpop.f32.mrf.mxu1 }
 0x16c   : > { %10716 = vst [vmem:[#allocation13_spill] sm:$0xff] %v7706_v1 }
 0x16e   : > { %5720 = vmatmul.msk.f32.gmra.mxu1 %vm1139_vm0, %v7709_v2 }
 0x172   : > { %5656 = vmatmul.msk.f32.gmra.mxu0 %vm1139_vm0, %v7724_v6  ;;  %v1249_v6 = vpop.f32.mrf.mxu3 }
 0x173   : > { %v7718_v4 = vpop.f32.mrf.mxu1 }
 0x174   : > { %10717 = vst [vmem:[#allocation14_spill] sm:$0xff] %v7718_v4 }
 0x176   : > { %5721 = vmatmul.msk.f32.gmra.mxu1 %vm1139_vm0, %v7721_v5 }
 0x17a   : > { %5657 = vmatmul.msk.f32.gmra.mxu0 %vm1139_vm0, %v7736_v9  ;;  %v1252_v9 = vpop.f32.mrf.mxu3 }
 0x17b   : > { %v7730_v7 = vpop.f32.mrf.mxu1 }
 0x17c   : > { %10718 = vst [vmem:[#allocation15_spill] sm:$0xff] %v7730_v7 }
 0x17e   : > { %5722 = vmatmul.msk.f32.gmra.mxu1 %vm1139_vm0, %v7733_v8 }
 0x182   : > { %5658 = vmatmul.msk.f32.gmra.mxu0 %vm1139_vm0, %v7748_v12 }
 0x183   : > { %v7742_v10 = vpop.f32.mrf.mxu1 }
 0x184   : > { %10719 = vst [vmem:[#allocation16_spill] sm:$0xff] %v7742_v10 }
 0x186   : > { %5723 = vmatmul.msk.f32.gmra.mxu1 %vm1139_vm0, %v7745_v11 }
 0x18a   : > { %5659 = vmatmul.msk.f32.gmra.mxu0 %vm1139_vm0, %v7760_v15 }
 0x18b   : > { %v7754_v13 = vpop.f32.mrf.mxu1 }
 0x18c   : > { %10720 = vst [vmem:[#allocation17_spill] sm:$0xff] %v7754_v13 }
 0x18e   : > { %5724 = vmatmul.msk.f32.gmra.mxu1 %vm1139_vm0, %v7757_v14 }
 0x192   : > { %5660 = vmatmul.msk.f32.gmra.mxu0 %vm1139_vm0, %v7775_v19 }
 0x193   : > { %v7769_v17 = vpop.f32.mrf.mxu1 }
 0x194   : > { %10721 = vst [vmem:[#allocation18_spill] sm:$0xff] %v7769_v17 }
 0x196   : > { %5725 = vmatmul.msk.f32.gmra.mxu1 %vm1139_vm0, %v7772_v18 }
 0x19a   : > { %5661 = vmatmul.msk.f32.gmra.mxu0 %vm1139_vm0, %v7787_v22 }
 0x19b   : > { %v7781_v20 = vpop.f32.mrf.mxu1 }
 0x19c   : > { %10722 = vst [vmem:[#allocation19_spill] sm:$0xff] %v7781_v20 }
 0x19e   : > { %5726 = vmatmul.msk.f32.gmra.mxu1 %vm1139_vm0, %v7784_v21 }
 0x1a2   : > { %5662 = vmatmul.msk.f32.gmra.mxu0 %vm1139_vm0, %v7799_v26 }
 0x1a3   : > { %v7793_v24 = vpop.f32.mrf.mxu1 }
 0x1a4   : > { %10723 = vst [vmem:[#allocation20_spill] sm:$0xff] %v7793_v24 }
 0x1a6   : > { %5727 = vmatmul.msk.f32.gmra.mxu1 %vm1139_vm0, %v7796_v25 }
 0x1aa   : > { %5663 = vmatmul.msk.f32.gmra.mxu0 %vm1139_vm0, %v7811_v39 }
 0x1ab   : > { %v7805_v33 = vpop.f32.mrf.mxu1 }
 0x1ac   : > { %10724 = vst [vmem:[#allocation21_spill] sm:$0xff] %v7805_v33  ;;  %v7910_v33 = vld [vmem:[%s7561_s14 + $0x108] sm:$0xff] }
 0x1ae   : > { %5728 = vmatmul.msk.f32.gmra.mxu1 %vm1139_vm0, %v7808_v38 }
 0x1b2   : > { %5664 = vmatmul.msk.f32.gmra.mxu0 %vm1139_vm0, %v7835_v51 }
 0x1b3   : > { %v7829_v46 = vpop.f32.mrf.mxu1 }
 0x1b4   : > { %10725 = vst [vmem:[#allocation22_spill] sm:$0xff] %v7829_v46 }
 0x1b6   : > { %5729 = vmatmul.msk.f32.gmra.mxu1 %vm1139_vm0, %v7832_v47 }
 0x1bb   : > { %v7856_v41 = vpop.f32.mrf.mxu1 }
 0x1bc   : > { %10726 = vst [vmem:[#allocation23_spill] sm:$0xff] %v7856_v41 }
 0x1be   : > { %5730 = vmatmul.msk.f32.gmra.mxu1 %vm1139_vm0, %v7859_v42 }
 0x1c3   : > { %v7874_v55 = vpop.f32.mrf.mxu1 }
 0x1c4   : > { %10727 = vst [vmem:[#allocation24_spill] sm:$0xff] %v7874_v55 }
 0x1c6   : > { %5731 = vmatmul.msk.f32.gmra.mxu1 %vm1139_vm0, %v7877_v56 }
 0x1cb   : > { %v7883_v57 = vpop.f32.mrf.mxu1 }
 0x1cc   : > { %10728 = vst [vmem:[#allocation25_spill] sm:$0xff] %v7883_v57 }
 0x1ce   : > { %5732 = vmatmul.msk.f32.gmra.mxu1 %vm1139_vm0, %v7886_v16 }
 0x1d3   : > { %v7897_v45 = vpop.f32.mrf.mxu1 }
 0x1d4   : > { %10729 = vst [vmem:[#allocation26_spill] sm:$0xff] %v7897_v45 }
 0x1d5   : > { %v1388_v0 = vpop.f32.mrf.mxu2 }
 0x1d6   : > { %v1389_v57 = vadd.f32 %v7893_v43, %v1388_v0  ;;  %5733 = vmatmul.msk.f32.gmra.mxu1 %vm1139_vm0, %v7900_v53  ;;  %v7920_v0 = vld [vmem:[%s7561_s14 + $0x110] sm:$0xff] }
 0x1d8   : > { %v1424_v55 = vmul.f32 0.1, %v1389_v57 }
 0x1da   : > { %v1436_v41 = vmax.f32 %v1389_v57, %v1424_v55  ;;  %v1287_v55 = vadd.f32 %v7671_v52, %v1249_v6 }
 0x1db   : > { %v7907_v46 = vpop.f32.mrf.mxu1 }
 0x1dc   : > { %10730 = vst [vmem:[#allocation27_spill] sm:$0xff] %v7907_v46  ;;  %5689 = vmatmul.msk.f32.vlgmr.msrb.gmra.mxu3 %vm1334_vm1, %v1436_v41  ;;  %v1299_v57 = vmul.f32 0.1, %v1287_v55  ;;  %v7930_v46 = vld [vmem:[%s7561_s14 + $0x118] sm:$0xff] }
 0x1de   : > { %5734 = vmatmul.msk.f32.gmra.mxu1 %vm1139_vm0, %v7910_v33  ;;  %v1311_v45 = vmax.f32 %v1287_v55, %v1299_v57  ;;  %v1255_v55 = vpop.f32.mrf.mxu3 }
 0x1df   : > { %v1289_v57 = vadd.f32 %v7671_v52, %v1255_v55 }
 0x1e0   : > { %5678 = vmatmul.msk.f32.gmra.mxu2 %vm1334_vm1, %v1311_v45 }
 0x1e3   : > { %v7917_v3 = vpop.f32.mrf.mxu1 }
 0x1e4   : > { %10731 = vst [vmem:[#allocation28_spill] sm:$0xff] %v7917_v3  ;;  %v1288_v3 = vadd.f32 %v7671_v52, %v1252_v9 }
 0x1e6   : > { %5735 = vmatmul.msk.f32.gmra.mxu1 %vm1139_vm0, %v7920_v0  ;;  %v1300_v24 = vmul.f32 0.1, %v1288_v3  ;;  %v1258_v15 = vpop.f32.mrf.mxu3 }
 0x1e8   : > { %v1312_v12 = vmax.f32 %v1288_v3, %v1300_v24 }
 0x1ea   : > { %5679 = vmatmul.msk.f32.gmra.mxu2 %vm1334_vm1, %v1312_v12 }
 0x1eb   : > { %v7927_v41 = vpop.f32.mrf.mxu1 }
 0x1ec   : > { %10732 = vst [vmem:[#allocation29_spill] sm:$0xff] %v7927_v41  ;;  %v1301_v41 = vmul.f32 0.1, %v1289_v57 }
 0x1ee   : > { %5736 = vmatmul.msk.f32.gmra.mxu1 %vm1139_vm0, %v7930_v46  ;;  %v1313_v9 = vmax.f32 %v1289_v57, %v1301_v41  ;;  %v1261_v19 = vpop.f32.mrf.mxu3 }
 0x1f2   : > { %5680 = vmatmul.msk.f32.gmra.mxu2 %vm1334_vm1, %v1313_v9 }
 0x1f3   : > { %v7938_v6 = vpop.f32.mrf.mxu1 }
 0x1f4   : > { %10733 = vst [vmem:[#allocation30_spill] sm:$0xff] %v7938_v6 }
 0x1f6   : > { %5737 = vmatmul.msk.f32.vlgmr.msra.gmra.mxu1 %vm1139_vm0, %v7564_v27  ;;  %v1290_v27 = vadd.f32 %v7671_v52, %v1258_v15  ;;  %v1264_v22 = vpop.f32.mrf.mxu3 }
 0x1f8   : > { %v1302_v24 = vmul.f32 0.1, %v1290_v27 }
 0x1fa   : > { %v1314_v12 = vmax.f32 %v1290_v27, %v1302_v24 }
 0x1fb   : > { %v7946_v45 = vpop.f32.mrf.mxu1 }
 0x1fc   : > { %10734 = vst [vmem:[#allocation31_spill] sm:$0xff] %v7946_v45  ;;  %5681 = vmatmul.msk.f32.gmra.mxu2 %vm1334_vm1, %v1314_v12 }
 0x1fe   : > { %5738 = vmatmul.msk.f32.gmra.mxu1 %vm1139_vm0, %v7569_v28  ;;  %v1291_v28 = vadd.f32 %v7671_v52, %v1261_v19  ;;  %v1267_v26 = vpop.f32.mrf.mxu3 }
 0x200   : > { %v1303_v41 = vmul.f32 0.1, %v1291_v28 }
 0x202   : > { %v1315_v57 = vmax.f32 %v1291_v28, %v1303_v41 }
 0x203   : > { %v7954_v3 = vpop.f32.mrf.mxu1 }
 0x204   : > { %10735 = vst [vmem:[#allocation32_spill] sm:$0xff] %v7954_v3  ;;  %5682 = vmatmul.msk.f32.gmra.mxu2 %vm1334_vm1, %v1315_v57 }
 0x206   : > { %5739 = vmatmul.msk.f32.gmra.mxu1 %vm1139_vm0, %v7574_v29  ;;  %v1292_v29 = vadd.f32 %v7671_v52, %v1264_v22  ;;  %v1270_v39 = vpop.f32.mrf.mxu3 }
 0x208   : > { %v1304_v9 = vmul.f32 0.1, %v1292_v29 }
 0x20a   : > { %v1316_v27 = vmax.f32 %v1292_v29, %v1304_v9 }
 0x20b   : > { %v7962_v55 = vpop.f32.mrf.mxu1 }
 0x20c   : > { %10736 = vst [vmem:[#allocation33_spill] sm:$0xff] %v7962_v55  ;;  %5683 = vmatmul.msk.f32.gmra.mxu2 %vm1334_vm1, %v1316_v27 }
 0x20e   : > { %5740 = vmatmul.msk.f32.gmra.mxu1 %vm1139_vm0, %v7579_v30  ;;  %v1293_v30 = vadd.f32 %v7671_v52, %v1267_v26  ;;  %v1273_v51 = vpop.f32.mrf.mxu3 }
 0x20f   : > { %v1295_v22 = vadd.f32 %v7671_v52, %v1273_v51 }
 0x210   : > { %v1305_v24 = vmul.f32 0.1, %v1293_v30 }
 0x211   : > { %v1307_v29 = vmul.f32 0.1, %v1295_v22 }
 0x212   : > { %v1317_v19 = vmax.f32 %v1293_v30, %v1305_v24 }
 0x213   : > { %v7970_v15 = vpop.f32.mrf.mxu1 }
 0x214   : > { %10737 = vst [vmem:[#allocation34_spill] sm:$0xff] %v7970_v15  ;;  %5684 = vmatmul.msk.f32.gmra.mxu2 %vm1334_vm1, %v1317_v19 }
 0x216   : > { %5741 = vmatmul.msk.f32.gmra.mxu1 %vm1139_vm0, %v7584_v31  ;;  %v1294_v31 = vadd.f32 %v7671_v52, %v1270_v39  ;;  %v1276_v27 = vpop.f32.mrf.mxu3 }
 0x217   : > { %v1296_v26 = vadd.f32 %v7671_v52, %v1276_v27 }
 0x218   : > { %v1306_v28 = vmul.f32 0.1, %v1294_v31 }
 0x219   : > { %v1308_v30 = vmul.f32 0.1, %v1296_v26 }
 0x21a   : > { %v1318_v57 = vmax.f32 %v1294_v31, %v1306_v28 }
 0x21b   : > { %v7978_v12 = vpop.f32.mrf.mxu1 }
 0x21c   : > { %10738 = vst [vmem:[#allocation35_spill] sm:$0xff] %v7978_v12  ;;  %5685 = vmatmul.msk.f32.gmra.mxu2 %vm1334_vm1, %v1318_v57 }
 0x21e   : > { %5742 = vmatmul.msk.f32.gmra.mxu1 %vm1139_vm0, %v7589_v32  ;;  %v1319_v32 = vmax.f32 %v1295_v22, %v1307_v29  ;;  %v1279_v19 = vpop.f32.mrf.mxu3  ;;  %v6489_v22 = vld [vmem:[%s10647_s8] ss:$0 sm:$0xff] }
 0x21f   : > { %v1297_v39 = vadd.f32 %v7671_v52, %v1279_v19 }
 0x221   : > { %v1309_v31 = vmul.f32 0.1, %v1297_v39 }
 0x223   : > { %v7984_v41 = vpop.f32.mrf.mxu1  ;;  %v1321_v28 = vmax.f32 %v1297_v39, %v1309_v31 }
 0x224   : > { %10739 = vst [vmem:[#allocation36_spill] sm:$0xff] %v7984_v41  ;;  %5686 = vmatmul.msk.f32.gmra.mxu2 %vm1334_vm1, %v1319_v32 }
 0x226   : > { %5743 = vmatmul.msk.f32.gmra.mxu1 %vm1139_vm0, %v7597_v34  ;;  %v1320_v34 = vmax.f32 %v1296_v26, %v1308_v30 }
 0x22b   : > { %v7990_v9 = vpop.f32.mrf.mxu1 }
 0x22c   : > { %10740 = vst [vmem:[#allocation37_spill] sm:$0xff] %v7990_v9  ;;  %5687 = vmatmul.msk.f32.gmra.mxu2 %vm1334_vm1, %v1320_v34 }
 0x22e   : > { %5744 = vmatmul.msk.f32.gmra.mxu1 %vm1139_vm0, %v7602_v35 }
 0x233   : > { %v7996_v24 = vpop.f32.mrf.mxu1 }
 0x234   : > { %10741 = vst [vmem:[#allocation38_spill] sm:$0xff] %v7996_v24  ;;  %5688 = vmatmul.msk.f32.gmra.mxu2 %vm1334_vm1, %v1321_v28  ;;  %v2469_v24 = vld [vmem:[%s10649_s10 + $0x10] sm:$0xff] }
 0x236   : > { %5745 = vmatmul.msk.f32.gmra.mxu1 %vm1139_vm0, %v7607_v36 }
 0x23b   : > { %v8002_v35 = vpop.f32.mrf.mxu1 }
 0x23c   : > { %10742 = vst [vmem:[#allocation39_spill] sm:$0xff] %v8002_v35 }
 0x23e   : > { %5746 = vmatmul.msk.f32.gmra.mxu1 %vm1139_vm0, %v7612_v37  ;;  %v1193_v37 = vpop.f32.mrf.mxu0 }
 0x243   : > { %v8007_v57 = vpop.f32.mrf.mxu1 }
 0x244   : > { %10743 = vst [vmem:[#allocation40_spill] sm:$0xff] %v8007_v57 }
 0x246   : > { %5747 = vmatmul.msk.f32.gmra.mxu1 %vm1139_vm0, %v7623_v40  ;;  %v1549_v40 = vadd.f32 %v1193_v37, %v7546_v23 }
 0x24b   : > { %v8011_v36 = vpop.f32.mrf.mxu1 }
 0x24c   : > { %10744 = vst [vmem:[#allocation41_spill] sm:$0xff] %v8011_v36 }
 0x24e   : > { %5748 = vmatmul.msk.f32.gmra.mxu1 %vm1139_vm0, %v7637_v44 }
 0x253   : > { %v8015_v52 = vpop.f32.mrf.mxu1 }
 0x254   : > { %10745 = vst [vmem:[#allocation42_spill] sm:$0xff] %v8015_v52 }
 0x256   : > { %5749 = vmatmul.msk.f32.gmra.mxu1 %vm1139_vm0, %v7651_v48 }
 0x25b   : > { %v8019_v51 = vpop.f32.mrf.mxu1 }
 0x25c   : > { %10746 = vst [vmem:[#allocation43_spill] sm:$0xff] %v8019_v51 }
 0x25e   : > { %5750 = vmatmul.msk.f32.gmra.mxu1 %vm1139_vm0, %v7656_v49 }
 0x25f   : > { %v1513_v29 = vpop.f32.mrf.mxu3 }
 0x260   : > { %v1514_v44 = vadd.f32 %v6489_v22, %v1513_v29 }
 0x262   : > { %v1561_v32 = vadd.f32 %v1549_v40, %v1514_v44 }
 0x263   : > { %v8028_v27 = vpop.f32.mrf.mxu1  ;;  %v1391_v39 = vpop.f32.mrf.mxu2 }
 0x264   : > { %10747 = vst [vmem:[#allocation44_spill] sm:$0xff] %v8028_v27  ;;  %v1392_v31 = vadd.f32 %v7893_v43, %v1391_v39 }
 0x265   : > { %1573 = vst.msk [vmem:[%s8030_s30] sm:$0xff] %vm1139_vm0, %v1561_v32 }
 0x266   : > { %5751 = vmatmul.msk.f32.gmra.mxu1 %vm1139_vm0, %v7661_v50  ;;  %v1425_v28 = vmul.f32 0.1, %v1392_v31 }
 0x268   : > { %v1437_v22 = vmax.f32 %v1392_v31, %v1425_v28 }
 0x26a   : > { %5690 = vmatmul.msk.f32.gmra.mxu3 %vm1334_vm1, %v1437_v22 }
 0x26b   : > { %v8036_v48 = vpop.f32.mrf.mxu1 }
 0x26c   : > { %10748 = vst [vmem:[#allocation45_spill] sm:$0xff] %v8036_v48 }
 0x26e   : > { %5752 = vmatmul.msk.f32.gmra.mxu1 %vm1139_vm0, %v7674_v54 }
 0x273   : > { %v8040_v49 = vpop.f32.mrf.mxu1 }
 0x274   : > { %v1987_v32 = vmul.f32 %v8040_v49, %v8040_v49 }
 0x276   : > { %5753 = vmatmul.msk.f32.gmra.mxu1 %vm1139_vm0, %v7683_v59 }
 0x27b   : > { %v8044_v23 = vpop.f32.mrf.mxu1 }
 0x27c   : > { %v1988_v22 = vmul.f32 %v8044_v23, %v8044_v23 }
 0x27e   : > { %5754 = vmatmul.msk.f32.gmra.mxu1 %vm1139_vm0, %v7690_v61 }
 0x283   : > { %v8048_v26 = vpop.f32.mrf.mxu1 }
 0x284   : > { %v1989_v52 = vmul.f32 %v8048_v26, %v8048_v26 }
 0x286   : > { %5755 = vmatmul.msk.f32.gmra.mxu1 %vm1139_vm0, %v7697_v63 }
 0x28b   : > { %v8052_v50 = vpop.f32.mrf.mxu1 }
 0x28e   : > { %5756 = vmatmul.msk.f32.gmra.mxu1 %vm1139_vm0, %v7709_v2 }
 0x293   : > { %v8056_v54 = vpop.f32.mrf.mxu1 }
 0x296   : > { %5757 = vmatmul.msk.f32.gmra.mxu1 %vm1139_vm0, %v7721_v5 }
 0x29b   : > { %v8060_v59 = vpop.f32.mrf.mxu1 }
 0x29e   : > { %5758 = vmatmul.msk.f32.gmra.mxu1 %vm1139_vm0, %v7733_v8 }
 0x2a3   : > { %v8064_v61 = vpop.f32.mrf.mxu1 }
 0x2a6   : > { %5759 = vmatmul.msk.f32.gmra.mxu1 %vm1139_vm0, %v7745_v11 }
 0x2ab   : > { %v8068_v63 = vpop.f32.mrf.mxu1 }
 0x2ae   : > { %5760 = vmatmul.msk.f32.gmra.mxu1 %vm1139_vm0, %v7757_v14 }
 0x2b3   : > { %v8072_v2 = vpop.f32.mrf.mxu1 }
 0x2b6   : > { %5761 = vmatmul.msk.f32.gmra.mxu1 %vm1139_vm0, %v7772_v18 }
 0x2bb   : > { %v8076_v5 = vpop.f32.mrf.mxu1 }
 0x2be   : > { %5762 = vmatmul.msk.f32.gmra.mxu1 %vm1139_vm0, %v7784_v21 }
 0x2c3   : > { %v8080_v8 = vpop.f32.mrf.mxu1 }
 0x2c6   : > { %5763 = vmatmul.msk.f32.gmra.mxu1 %vm1139_vm0, %v7796_v25 }
 0x2cb   : > { %v8084_v11 = vpop.f32.mrf.mxu1 }
 0x2ce   : > { %5764 = vmatmul.msk.f32.gmra.mxu1 %vm1139_vm0, %v7808_v38  ;;  %v2474_v38 = vld [vmem:[%s10649_s10 + $0x38] sm:$0xff] }
 0x2cf   : > { %2591 = vmatpush.msrb.mxu2 %v2474_v38  ;;  %6119 = vmatpush.msra.mxu3 %v2474_v38 }
 0x2d3   : > { %v8088_v14 = vpop.f32.mrf.mxu1 }
 0x2d4   : > { %v1999_v29 = vmul.f32 %v8088_v14, %v8088_v14 }
 0x2d6   : > { %5765 = vmatmul.msk.f32.gmra.mxu1 %vm1139_vm0, %v7832_v47 }
 0x2db   : > { %v8092_v18 = vpop.f32.mrf.mxu1 }
 0x2dc   : > { %v2000_v31 = vmul.f32 %v8092_v18, %v8092_v18 }
 0x2de   : > { %5766 = vmatmul.msk.f32.gmra.mxu1 %vm1139_vm0, %v7859_v42  ;;  %v2473_v42 = vld [vmem:[%s10649_s10 + $0x30] sm:$0xff]  ;;  %v2012_v48 = vadd.f32 %v2000_v31, %v1988_v22 }
 0x2df   : > { %2592 = vmatpush.msrb.mxu2 %v2473_v42  ;;  %6120 = vmatpush.msra.mxu3 %v2473_v42 }
 0x2e3   : > { %v8096_v21 = vpop.f32.mrf.mxu1 }
 0x2e6   : > { %5767 = vmatmul.msk.f32.gmra.mxu1 %vm1139_vm0, %v7877_v56 }
 0x2eb   : > { %v8100_v25 = vpop.f32.mrf.mxu1 }
 0x2ee   : > { %5768 = vmatmul.msk.f32.gmra.mxu1 %vm1139_vm0, %v7886_v16 }
 0x2f3   : > { %v8107_v47 = vpop.f32.mrf.mxu1 }
 0x2f6   : > { %5769 = vmatmul.msk.f32.gmra.mxu1 %vm1139_vm0, %v7900_v53  ;;  %v2472_v53 = vld [vmem:[%s10649_s10 + $0x28] sm:$0xff] }
 0x2f7   : > { %2593 = vmatpush.msrb.mxu2 %v2472_v53  ;;  %6121 = vmatpush.msra.mxu3 %v2472_v53  ;;  %v2011_v53 = vadd.f32 %v1999_v29, %v1987_v32 }
 0x2fb   : > { %v8114_v56 = vpop.f32.mrf.mxu1 }
 0x2fe   : > { %5770 = vmatmul.msk.f32.gmra.mxu1 %vm1139_vm0, %v7910_v33  ;;  %v2471_v33 = vld [vmem:[%s10649_s10 + $0x20] sm:$0xff] }
 0x2ff   : > { %2594 = vmatpush.msrb.mxu2 %v2471_v33  ;;  %6122 = vmatpush.msra.mxu3 %v2471_v33 }
 0x303   : > { %v8118_v16 = vpop.f32.mrf.mxu1 }
 0x304   : > { %10749 = vst [vmem:[#allocation46_spill] sm:$0xff] %v8118_v16 }
 0x306   : > { %5771 = vmatmul.msk.f32.gmra.mxu1 %vm1139_vm0, %v7920_v0 }
 0x30b   : > { %v8125_v30 = vpop.f32.mrf.mxu1 }
 0x30e   : > { %5772 = vmatmul.msk.f32.gmra.mxu1 %vm1139_vm0, %v7930_v46  ;;  %v1394_v46 = vpop.f32.mrf.mxu2 }
 0x30f   : > { %v1395_v40 = vadd.f32 %v7893_v43, %v1394_v46 }
 0x311   : > { %v1426_v44 = vmul.f32 0.1, %v1395_v40 }
 0x313   : > { %v8132_v34 = vpop.f32.mrf.mxu1  ;;  %v1438_v42 = vmax.f32 %v1395_v40, %v1426_v44 }
 0x314   : > { %v2007_v6 = vmul.f32 %v8132_v34, %v8132_v34 }
 0x315   : > { %5691 = vmatmul.msk.f32.gmra.mxu3 %vm1334_vm1, %v1438_v42 }
 0x316   : > { %v1397_v29 = vpop.f32.mrf.mxu2 }
 0x317   : > { %v1398_v44 = vadd.f32 %v7893_v43, %v1397_v29 }
 0x319   : > { %v1427_v42 = vmul.f32 0.1, %v1398_v44 }
 0x31b   : > { %v8134_v0 = vpop.f32.mrf.mxu1  ;;  %v1439_v51 = vmax.f32 %v1398_v44, %v1427_v42  ;;  %v2470_v44 = vld [vmem:[%s10649_s10 + $0x18] sm:$0xff] }
 0x31c   : > { %2595 = vmatpush.msrb.mxu2 %v2470_v44  ;;  %6123 = vmatpush.msra.mxu3 %v2470_v44  ;;  %v2008_v60 = vmul.f32 %v8134_v0, %v8134_v0 }
 0x31d   : > { %5692 = vmatmul.msk.f32.gmra.mxu3 %vm1334_vm1, %v1439_v51 }
 0x31e   : > { %v1400_v29 = vpop.f32.mrf.mxu2  ;;  %2596 = vmatpush.msrb.mxu2 %v2469_v24  ;;  %6124 = vmatpush.msra.mxu3 %v2469_v24 }
 0x323   : > { %v8136_v19 = vpop.f32.mrf.mxu1 }
 0x32b   : > { %v8139_v37 = vpop.f32.mrf.mxu1 }
 0x333   : > { %v8147_v38 = vpop.f32.mrf.mxu1 }
 0x334   : > { %v2023_v33 = vmul.f32 %v8147_v38, %v8147_v38 }
 0x336   : > { %v2035_v39 = vadd.f32 %v2023_v33, %v2011_v53  ;;  %v2001_v33 = vmul.f32 %v8096_v21, %v8096_v21 }
 0x338   : > { %v2047_v28 = vadd.f32 1e-12, %v2035_v39 }
 0x33a   : > { %6490 = vrsqrt.f32 %v2047_v28  ;;  %vm2066_vm2 = vcmp.eq.f32.partialorder %v2047_v28, inf  ;;  %v2069_v44 = vand.u32 2147483648, %v2047_v28  ;;  %vm2068_vm3 = vcmp.eq.f32.partialorder %v2047_v28, 0.0 }
 0x33b   : > { %v8156_v46 = vpop.f32.mrf.mxu1 }
 0x33c   : > { %v2024_v40 = vmul.f32 %v8156_v46, %v8156_v46 }
 0x33e   : > { %v2036_v32 = vadd.f32 %v2024_v40, %v2012_v48  ;;  %v2013_v48 = vadd.f32 %v2001_v33, %v1989_v52  ;;  %v2002_v52 = vmul.f32 %v8100_v25, %v8100_v25 }
 0x340   : > { %v6491_v53 = vpop.eup %6490  ;;  %v8163_v39 = vadd.f32 1e-12, %v2036_v32  ;;  %v1401_v32 = vadd.f32 %v7893_v43, %v1400_v29 }
 0x341   : > { %v2060_v27 = vmul.f32 %v6491_v53, %v2047_v28 }
 0x342   : > { %6492 = vrsqrt.f32 %v8163_v39  ;;  %v1428_v57 = vmul.f32 0.1, %v1401_v32  ;;  %vm2078_vm4 = vcmp.eq.f32.partialorder %v8163_v39, inf  ;;  %vm2080_vm5 = vcmp.eq.f32.partialorder %v8163_v39, 0.0 }
 0x343   : > { %v2061_v31 = vmul.f32 %v6491_v53, %v2060_v27  ;;  %v8168_v22 = vpop.f32.mrf.mxu1 }
 0x344   : > { %v2025_v40 = vmul.f32 %v8168_v22, %v8168_v22  ;;  %v1440_v9 = vmax.f32 %v1401_v32, %v1428_v57  ;;  %v1403_v57 = vpop.f32.mrf.mxu2 }
 0x345   : > { %v2062_v36 = vmul.f32 0.5, %v2061_v31  ;;  %v1404_v41 = vadd.f32 %v7893_v43, %v1403_v57 }
 0x346   : > { %v2037_v42 = vadd.f32 %v2025_v40, %v2013_v48  ;;  %v1990_v48 = vmul.f32 %v8052_v50, %v8052_v50  ;;  %5693 = vmatmul.msk.f32.gmra.mxu3 %vm1334_vm1, %v1440_v9  ;;  %v2003_v9 = vmul.f32 %v8107_v47, %v8107_v47 }
 0x347   : > { %v2063_v27 = vsub.f32 1.5, %v2062_v36  ;;  %v1429_v15 = vmul.f32 0.1, %v1404_v41 }
 0x348   : > { %v6493_v35 = vpop.eup %6492  ;;  %v8179_v51 = vadd.f32 1e-12, %v2037_v42 }
 0x349   : > { %v2064_v33 = vmul.f32 %v6491_v53, %v2063_v27  ;;  %v2072_v31 = vmul.f32 %v6493_v35, %v8163_v39  ;;  %v2014_v53 = vadd.f32 %v2002_v52, %v1990_v48 }
 0x34a   : > { %6494 = vrsqrt.f32 %v8179_v51  ;;  %vm2090_vm6 = vcmp.eq.f32.partialorder %v8179_v51, inf  ;;  %vm2092_vm7 = vcmp.eq.f32.partialorder %v8179_v51, 0.0 }
 0x34b   : > { %v2065_v36 = vmul.f32 %v2064_v33, %v2047_v28  ;;  %v2073_v40 = vmul.f32 %v6493_v35, %v2072_v31  ;;  %v8188_v29 = vpop.f32.mrf.mxu1 }
 0x34c   : > { %v2026_v42 = vmul.f32 %v8188_v29, %v8188_v29  ;;  %v1406_v57 = vpop.f32.mrf.mxu2 }
 0x34d   : > { %v2067_v32 = vsel %vm2066_vm2, %v2047_v28, %v2065_v36  ;;  %v2074_v27 = vmul.f32 0.5, %v2073_v40  ;;  %v2468_v28 = vld [vmem:[%s10649_s10 + $0x8] sm:$0xff]  ;;  %v1441_v36 = vmax.f32 %v1404_v41, %v1429_v15  ;;  %v2081_v15 = vand.u32 2147483648, %v8163_v39 }
 0x34e   : > { %v2070_v12 = vsel %vm2068_vm3, %v2069_v44, %v2067_v32  ;;  %v2038_v24 = vadd.f32 %v2026_v42, %v2014_v53  ;;  %2597 = vmatpush.msrb.mxu2 %v2468_v28  ;;  %6125 = vmatpush.msra.mxu3 %v2468_v28 }
 0x34f   : > { %v5773_v33 = vmul.f32 -1.442695, %v2070_v12  ;;  %v2075_v31 = vsub.f32 1.5, %v2074_v27  ;;  %v1991_v12 = vmul.f32 %v8056_v54, %v8056_v54  ;;  %5694 = vmatmul.msk.f32.gmra.mxu3 %vm1334_vm1, %v1441_v36  ;;  %v1407_v27 = vadd.f32 %v7893_v43, %v1406_v57 }
 0x350   : > { %v6495_v55 = vpop.eup %6494  ;;  %v8196_v52 = vadd.f32 1e-12, %v2038_v24 }
 0x351   : > { %6496 = vpow2.f32 %v5773_v33  ;;  %v2076_v48 = vmul.f32 %v6493_v35, %v2075_v31  ;;  %v2084_v3 = vmul.f32 %v6495_v55, %v8179_v51  ;;  %v2467_v35 = vld [vmem:[%s10649_s10] sm:$0xff]  ;;  %v2015_v42 = vadd.f32 %v2003_v9, %v1991_v12 }
 0x352   : > { %6498 = vrsqrt.f32 %v8196_v52  ;;  %2598 = vmatpush.msrb.mxu2 %v2467_v35  ;;  %6126 = vmatpush.msra.mxu3 %v2467_v35  ;;  %v1430_v28 = vmul.f32 0.1, %v1407_v27  ;;  %v2004_v12 = vmul.f32 %v8114_v56, %v8114_v56  ;;  %vm2102_vm8 = vcmp.eq.f32.partialorder %v8196_v52, inf }
 0x353   : > { %v2077_v40 = vmul.f32 %v2076_v48, %v8163_v39  ;;  %v2085_v53 = vmul.f32 %v6495_v55, %v2084_v3  ;;  %v8206_v44 = vpop.f32.mrf.mxu1  ;;  %vm2104_vm9 = vcmp.eq.f32.partialorder %v8196_v52, 0.0 }
 0x354   : > { %v2027_v41 = vmul.f32 %v8206_v44, %v8206_v44 }
 0x355   : > { %v2079_v3 = vsel %vm2078_vm4, %v8163_v39, %v2077_v40  ;;  %v2086_v32 = vmul.f32 0.5, %v2085_v53  ;;  %v1442_v53 = vmax.f32 %v1407_v27, %v1430_v28  ;;  %v1409_v27 = vpop.f32.mrf.mxu2  ;;  %v1995_v28 = vmul.f32 %v8072_v2, %v8072_v2 }
 0x356   : > { %v2082_v24 = vsel %vm2080_vm5, %v2081_v15, %v2079_v3  ;;  %v2039_v33 = vadd.f32 %v2027_v41, %v2015_v42  ;;  %v1992_v42 = vmul.f32 %v8060_v59, %v8060_v59  ;;  %v1993_v15 = vmul.f32 %v8064_v61, %v8064_v61 }
 0x357   : > { %v6497_v31 = vpop.eup %6496  ;;  %v5774_v9 = vmul.f32 -1.442695, %v2082_v24  ;;  %v2087_v48 = vsub.f32 1.5, %v2086_v32  ;;  %5695 = vmatmul.msk.f32.gmra.mxu3 %vm1334_vm1, %v1442_v53  ;;  %v2093_v32 = vand.u32 2147483648, %v8179_v51 }
 0x358   : > { %v6499_v36 = vpop.eup %6498  ;;  %v8221_v45 = vadd.f32 1.0, %v6497_v31  ;;  %v8223_v35 = vadd.f32 1e-12, %v2039_v33 }
 0x359   : > { %6500 = vpow2.f32 %v5774_v9  ;;  %v2088_v40 = vmul.f32 %v6495_v55, %v2087_v48  ;;  %v2096_v39 = vmul.f32 %v6499_v36, %v8196_v52  ;;  %v2016_v55 = vadd.f32 %v2004_v12, %v1992_v42 }
 0x35a   : > { %6502 = vrcp.f32 %v8221_v45  ;;  %v1410_v9 = vadd.f32 %v7893_v43, %v1409_v27  ;;  %v1994_v48 = vmul.f32 %v8068_v63, %v8068_v63  ;;  %v1996_v12 = vmul.f32 %v8076_v5, %v8076_v5 }
 0x35b   : > { %v2089_v41 = vmul.f32 %v2088_v40, %v8179_v51  ;;  %v2097_v57 = vmul.f32 %v6499_v36, %v2096_v39  ;;  %6504 = vrsqrt.f32 %v8223_v35  ;;  %v8233_v3 = vpop.f32.mrf.mxu1  ;;  %v2006_v27 = vmul.f32 %v8125_v30, %v8125_v30 }
 0x35c   : > { %v2028_v31 = vmul.f32 %v8233_v3, %v8233_v3  ;;  %v1431_v17 = vmul.f32 0.1, %v1410_v9  ;;  %v2262_v10 = vand.u32 2147483648, %v8221_v45  ;;  %vm2256_vm11 = vweird.f32 %v8221_v45 }
 0x35d   : > { %v2091_v24 = vsel %vm2090_vm6, %v8179_v51, %v2089_v41  ;;  %v2098_v33 = vmul.f32 0.5, %v2097_v57  ;;  %v2005_v51 = vmul.f32 %v8118_v16, %v8118_v16  ;;  %v2018_v62 = vadd.f32 %v2006_v27, %v1994_v48 }
 0x35e   : > { %v2094_v40 = vsel %vm2092_vm7, %v2093_v32, %v2091_v24  ;;  %v2040_v41 = vadd.f32 %v2028_v31, %v2016_v55  ;;  %v2260_v55 = vand.u32 2147483647, %v8221_v45  ;;  %v1443_v7 = vmax.f32 %v1410_v9, %v1431_v17 }
 0x35f   : > { %v6501_v39 = vpop.eup %6500  ;;  %v5775_v53 = vmul.f32 -1.442695, %v2094_v40  ;;  %v2099_v42 = vsub.f32 1.5, %v2098_v33  ;;  %v2105_v33 = vand.u32 2147483648, %v8196_v52  ;;  %v8288_v9 = vadd.f32 %v2007_v6, %v1995_v28 }
 0x360   : > { %v6503_v57 = vpop.eup %6502  ;;  %v8255_v20 = vadd.f32 1.0, %v6501_v39  ;;  %v3646_v39 = vld [vmem:[%s10651_s12 + $0x8] sm:$0xff]  ;;  %5696 = vmatmul.msk.f32.gmra.mxu3 %vm1334_vm1, %v1443_v7  ;;  %vm2261_vm13 = vcmp.eq.f32.partialorder %v2260_v55, 8.507059e+37  ;;  %v8299_v6 = vmul.f32 %v8136_v19, %v8136_v19  ;;  %vm2114_vm14 = vcmp.eq.f32.partialorder %v8223_v35, inf }
 0x361   : > { %v8257_v13 = vpop.eup %6504  ;;  %v2252_v32 = vmul.f32 %v6503_v57, %v8221_v45  ;;  %6506 = vpow2.f32 %v5775_v53  ;;  %v2100_v24 = vmul.f32 %v6499_v36, %v2099_v42  ;;  %v8271_v53 = vadd.f32 1e-12, %v2040_v41  ;;  %3986 = vmatpush.msrb.mxu0 %v3646_v39  ;;  %6127 = vmatpush.msra.mxu2 %v3646_v39 }
 0x362   : > { %6508 = vrcp.f32 %v8255_v20  ;;  %v2108_v36 = vmul.f32 %v8257_v13, %v8223_v35  ;;  %vm2257_vm10 = vweird.f32 %v6503_v57  ;;  %v2017_v41 = vadd.f32 %v2005_v51, %v1993_v15 }
 0x363   : > { %v2253_v31 = vsub.f32 1.0, %v2252_v32  ;;  %v2101_v40 = vmul.f32 %v2100_v24, %v8196_v52  ;;  %v8273_v42 = vpop.f32.mrf.mxu1  ;;  %6510 = vrsqrt.f32 %v8271_v53  ;;  %vm2258_vm12 = vmor %vm2256_vm11, %vm2257_vm10  ;;  %v2263_v15 = vor.u32 1.1754944e-38, %v2262_v10 }
 0x364   : > { %v2029_v32 = vmul.f32 %v8273_v42, %v8273_v42  ;;  %v2109_v1 = vmul.f32 %v8257_v13, %v2108_v36  ;;  %vm2116_vm2 = vcmp.eq.f32.partialorder %v8223_v35, 0.0  ;;  %vm2271_vm3 = vweird.f32 %v8255_v20 }
 0x365   : > { %v2254_v24 = vmul.f32 %v6503_v57, %v2253_v31  ;;  %v2103_v4 = vsel %vm2102_vm8, %v8196_v52, %v2101_v40  ;;  %v8295_v52 = vadd.f32 %v2008_v60, %v1996_v12  ;;  %v2275_v60 = vand.u32 2147483647, %v8255_v20 }
 0x366   : > { %v2106_v58 = vsel %vm2104_vm9, %v2105_v33, %v2103_v4  ;;  %v2110_v51 = vmul.f32 0.5, %v2109_v1  ;;  %v2041_v7 = vadd.f32 %v2029_v32, %v2017_v41  ;;  %vm2126_vm6 = vcmp.eq.f32.partialorder %v8271_v53, inf }
 0x367   : > { %v6507_v17 = vpop.eup %6506  ;;  %v2255_v31 = vadd.f32 %v6503_v57, %v2254_v24  ;;  %v5776_v40 = vmul.f32 -1.442695, %v2106_v58  ;;  %v2117_v24 = vand.u32 2147483648, %v8223_v35  ;;  %vm2276_vm4 = vcmp.eq.f32.partialorder %v2275_v60, 8.507059e+37 }
 0x368   : > { %v6509_v39 = vpop.eup %6508  ;;  %v8292_v48 = vadd.f32 1.0, %v6507_v17  ;;  %v2111_v55 = vsub.f32 1.5, %v2110_v51  ;;  %v8316_v32 = vadd.f32 1e-12, %v2041_v7  ;;  %vm2128_vm7 = vcmp.eq.f32.partialorder %v8271_v53, 0.0 }
 0x369   : > { %v2259_v27 = vsel %vm2258_vm12, %v6503_v57, %v2255_v31  ;;  %v2267_v4 = vmul.f32 %v6509_v39, %v8255_v20  ;;  %6512 = vpow2.f32 %v5776_v40  ;;  %v6511_v45 = vpop.eup %6510  ;;  %v2277_v57 = vand.u32 2147483648, %v8255_v20 }
 0x36a   : > { %v8301_v58 = vsel %vm2261_vm13, %v2263_v15, %v2259_v27  ;;  %6514 = vrcp.f32 %v8292_v48  ;;  %v2120_v33 = vmul.f32 %v6511_v45, %v8271_v53  ;;  %vm2272_vm15 = vweird.f32 %v6509_v39 }
 0x36b   : > { %v2431_v10 = vmul.f32 %v8301_v58, %v8040_v49  ;;  %v8308_v1 = vmul.f32 %v8301_v58, %v8147_v38  ;;  %v2268_v28 = vsub.f32 1.0, %v2267_v4  ;;  %v8311_v12 = vpop.f32.mrf.mxu1  ;;  %v2112_v38 = vmul.f32 %v8257_v13, %v2111_v55  ;;  %vm2273_vm5 = vmor %vm2271_vm3, %vm2272_vm15 }
 0x36c   : > { %v2030_v49 = vmul.f32 %v8311_v12, %v8311_v12  ;;  %v2121_v41 = vmul.f32 %v6511_v45, %v2120_v33  ;;  %6516 = vrsqrt.f32 %v8316_v32  ;;  %v2278_v15 = vor.u32 1.1754944e-38, %v2277_v57 }
 0x36d   : > { %v2269_v36 = vmul.f32 %v6509_v39, %v2268_v28  ;;  %5785 = vmatmul.msk.f32.vlgmr.msrb.gmra.mxu2 %vm1334_vm1, %v2431_v10  ;;  %v2113_v27 = vmul.f32 %v2112_v38, %v8223_v35  ;;  %v2129_v20 = vand.u32 2147483648, %v8271_v53  ;;  %v2292_v55 = vand.u32 2147483648, %v8292_v48  ;;  %v1412_v38 = vpop.f32.mrf.mxu2 }
 0x36e   : > { %v2122_v13 = vmul.f32 0.5, %v2121_v41  ;;  %v2042_v10 = vadd.f32 %v2030_v49, %v2018_v62  ;;  %vm2286_vm8 = vweird.f32 %v8292_v48  ;;  %vm2138_vm12 = vcmp.eq.f32.partialorder %v8316_v32, inf }
 0x36f   : > { %v6513_v17 = vpop.eup %6512  ;;  %v2270_v31 = vadd.f32 %v6509_v39, %v2269_v36  ;;  %v2115_v62 = vsel %vm2114_vm14, %v8223_v35, %v2113_v27  ;;  %vm2140_vm3 = vcmp.eq.f32.partialorder %v8316_v32, 0.0 }
 0x370   : > { %v6515_v40 = vpop.eup %6514  ;;  %v8326_v51 = vadd.f32 1.0, %v6513_v17  ;;  %v2123_v36 = vsub.f32 1.5, %v2122_v13  ;;  %v8348_v49 = vadd.f32 1e-12, %v2042_v10  ;;  %v2118_v17 = vsel %vm2116_vm2, %v2117_v24, %v2115_v62 }
 0x371   : > { %v2274_v4 = vsel %vm2273_vm5, %v6509_v39, %v2270_v31  ;;  %v2282_v7 = vmul.f32 %v6515_v40, %v8292_v48  ;;  %v2290_v39 = vand.u32 2147483647, %v8292_v48  ;;  %vm2287_vm9 = vweird.f32 %v6515_v40 }
 0x372   : > { %v8331_v28 = vsel %vm2276_vm4, %v2278_v15, %v2274_v4  ;;  %6518 = vrcp.f32 %v8326_v51  ;;  %v6517_v41 = vpop.eup %6516  ;;  %v5777_v15 = vmul.f32 -1.442695, %v2118_v17  ;;  %v2124_v4 = vmul.f32 %v6511_v45, %v2123_v36  ;;  %vm2288_vm11 = vmor %vm2286_vm8, %vm2287_vm9 }
 0x373   : > { %v8338_v60 = vmul.f32 %v8331_v28, %v8156_v46  ;;  %v2283_v57 = vsub.f32 1.0, %v2282_v7  ;;  %v8342_v33 = vpop.f32.mrf.mxu1  ;;  %v2132_v7 = vmul.f32 %v6517_v41, %v8316_v32  ;;  %6520 = vrsqrt.f32 %v8348_v49 }
 0x374   : > { %v2031_v31 = vmul.f32 %v8342_v33, %v8342_v33  ;;  %vm2291_vm10 = vcmp.eq.f32.partialorder %v2290_v39, 8.507059e+37  ;;  %v2293_v13 = vor.u32 1.1754944e-38, %v2292_v55  ;;  %v1413_v10 = vadd.f32 %v7893_v43, %v1412_v38 }
 0x375   : > { %v2284_v46 = vmul.f32 %v6515_v40, %v2283_v57  ;;  %6522 = vpow2.f32 %v5777_v15  ;;  %v2125_v35 = vmul.f32 %v2124_v4, %v8271_v53  ;;  %v2133_v24 = vmul.f32 %v6517_v41, %v2132_v7 }
 0x376   : > { %v2043_v57 = vadd.f32 %v2031_v31, %v8288_v9  ;;  %v2432_v39 = vmul.f32 %v8331_v28, %v8044_v23  ;;  %vm2301_vm13 = vweird.f32 %v8326_v51  ;;  %v2307_v31 = vand.u32 2147483648, %v8326_v51 }
 0x377   : > { %v2285_v27 = vadd.f32 %v6515_v40, %v2284_v46  ;;  %v2127_v48 = vsel %vm2126_vm6, %v8271_v53, %v2125_v35  ;;  %v2134_v36 = vmul.f32 0.5, %v2133_v24  ;;  %v1432_v35 = vmul.f32 0.1, %v1413_v10 }
 0x378   : > { %v6519_v16 = vpop.eup %6518  ;;  %v8370_v38 = vadd.f32 1e-12, %v2043_v57  ;;  %v2130_v46 = vsel %vm2128_vm7, %v2129_v20, %v2127_v48  ;;  %5786 = vmatmul.msk.f32.gmra.mxu2 %vm1334_vm1, %v2432_v39  ;;  %v2308_v39 = vor.u32 1.1754944e-38, %v2307_v31  ;;  %vm2150_vm4 = vcmp.eq.f32.partialorder %v8348_v49, inf }
 0x379   : > { %v2289_v45 = vsel %vm2288_vm11, %v6515_v40, %v2285_v27  ;;  %v2297_v62 = vmul.f32 %v6519_v16, %v8326_v51  ;;  %v6521_v17 = vpop.eup %6520  ;;  %v5778_v15 = vmul.f32 -1.442695, %v2130_v46  ;;  %v2135_v4 = vsub.f32 1.5, %v2134_v36 }
 0x37a   : > { %v8365_v55 = vsel %vm2291_vm10, %v2293_v13, %v2289_v45  ;;  %6524 = vrsqrt.f32 %v8370_v38  ;;  %vm2302_vm14 = vweird.f32 %v6519_v16  ;;  %v2144_v27 = vmul.f32 %v6521_v17, %v8348_v49 }
 0x37b   : > { %v8374_v9 = vmul.f32 %v8365_v55, %v8168_v22  ;;  %v2298_v40 = vsub.f32 1.0, %v2297_v62  ;;  %v8380_v23 = vpop.f32.mrf.mxu1  ;;  %v2305_v22 = vand.u32 2147483647, %v8326_v51  ;;  %v6523_v13 = vpop.eup %6522  ;;  %6526 = vpow2.f32 %v5778_v15  ;;  %vm2303_vm15 = vmor %vm2301_vm13, %vm2302_vm14 }
 0x37c   : > { %10750 = vst [vmem:[#allocation47_spill] sm:$0xff] %v8380_v23  ;;  %v2136_v53 = vmul.f32 %v6517_v41, %v2135_v4  ;;  %v2032_v20 = vmul.f32 %v8380_v23, %v8380_v23  ;;  %v8388_v57 = vadd.f32 1.0, %v6523_v13  ;;  %v2145_v45 = vmul.f32 %v6521_v17, %v2144_v27 }
 0x37d   : > { %v2299_v7 = vmul.f32 %v6519_v16, %v2298_v40  ;;  %v2433_v62 = vmul.f32 %v8365_v55, %v8048_v26  ;;  %v2141_v36 = vand.u32 2147483648, %v8316_v32  ;;  %v1444_v41 = vmax.f32 %v1413_v10, %v1432_v35  ;;  %v1415_v40 = vpop.f32.mrf.mxu2 }
 0x37e   : > { %v2137_v48 = vmul.f32 %v2136_v53, %v8316_v32  ;;  %vm2306_vm2 = vcmp.eq.f32.partialorder %v2305_v22, 8.507059e+37  ;;  %6528 = vrcp.f32 %v8388_v57  ;;  %v2044_v15 = vadd.f32 %v2032_v20, %v8295_v52 }
 0x37f   : > { %v2300_v24 = vadd.f32 %v6519_v16, %v2299_v7  ;;  %v2146_v51 = vmul.f32 0.5, %v2145_v45  ;;  %5697 = vmatmul.msk.f32.gmra.mxu3 %vm1334_vm1, %v1444_v41  ;;  %v1416_v31 = vadd.f32 %v7893_v43, %v1415_v40  ;;  %v8418_v20 = vmul.f32 %v8084_v11, %v8084_v11 }
 0x380   : > { %v6525_v4 = vpop.eup %6524  ;;  %v2139_v26 = vsel %vm2138_vm12, %v8316_v32, %v2137_v48  ;;  %5787 = vmatmul.msk.f32.gmra.mxu2 %vm1334_vm1, %v2433_v62  ;;  %v8427_v43 = vmul.f32 %v8139_v37, %v8139_v37  ;;  %vm2152_vm5 = vcmp.eq.f32.partialorder %v8348_v49, 0.0  ;;  %vm2162_vm6 = vcmp.eq.f32.partialorder %v8370_v38, inf }
 0x381   : > { %v2304_v46 = vsel %vm2303_vm15, %v6519_v16, %v2300_v24  ;;  %v1997_v16 = vmul.f32 %v8080_v8, %v8080_v8  ;;  %v2142_v52 = vsel %vm2140_vm3, %v2141_v36, %v2139_v26  ;;  %v6527_v22 = vpop.eup %6526  ;;  %v2147_v13 = vsub.f32 1.5, %v2146_v51 }
 0x382   : > { %v8398_v7 = vsel %vm2306_vm2, %v2308_v39, %v2304_v46  ;;  %v5779_v27 = vmul.f32 -1.442695, %v2142_v52  ;;  %v2156_v32 = vmul.f32 %v6525_v4, %v8370_v38  ;;  %v8423_v24 = vadd.f32 1e-12, %v2044_v15 }
 0x383   : > { %v8409_v10 = vmul.f32 %v8398_v7, %v8188_v29  ;;  %v8414_v53 = vpop.f32.mrf.mxu1  ;;  %v2021_v35 = vadd.f32 %v8299_v6, %v1997_v16  ;;  %v8421_v29 = vadd.f32 1.0, %v6527_v22  ;;  %v2148_v45 = vmul.f32 %v6521_v17, %v2147_v13 }
 0x384   : > { %6530 = vpow2.f32 %v5779_v27  ;;  %v2157_v62 = vmul.f32 %v6525_v4, %v2156_v32  ;;  %v6529_v39 = vpop.eup %6528  ;;  %v2033_v48 = vmul.f32 %v8414_v53, %v8414_v53  ;;  %v1433_v36 = vmul.f32 0.1, %v1416_v31 }
 0x385   : > { %6532 = vrcp.f32 %v8421_v29  ;;  %v2434_v6 = vmul.f32 %v8398_v7, %v8052_v50  ;;  %v2312_v41 = vmul.f32 %v6529_v39, %v8388_v57  ;;  %v2149_v40 = vmul.f32 %v2148_v45, %v8348_v49  ;;  %v1418_v13 = vpop.f32.mrf.mxu2 }
 0x386   : > { %v2158_v46 = vmul.f32 0.5, %v2157_v62  ;;  %v2153_v17 = vand.u32 2147483648, %v8348_v49  ;;  %6534 = vrsqrt.f32 %v8423_v24  ;;  %v2320_v26 = vand.u32 2147483647, %v8388_v57 }
 0x387   : > { %v2313_v15 = vsub.f32 1.0, %v2312_v41  ;;  %v2151_v50 = vsel %vm2150_vm4, %v8348_v49, %v2149_v40  ;;  %vm2164_vm7 = vcmp.eq.f32.partialorder %v8370_v38, 0.0  ;;  %v2322_v16 = vand.u32 2147483648, %v8388_v57 }
 0x388   : > { %v2159_v51 = vsub.f32 1.5, %v2158_v46  ;;  %v2154_v52 = vsel %vm2152_vm5, %v2153_v17, %v2151_v50  ;;  %v2045_v22 = vadd.f32 %v2033_v48, %v2021_v35  ;;  %v1445_v27 = vmax.f32 %v1416_v31, %v1433_v36  ;;  %5788 = vmatmul.msk.f32.gmra.mxu2 %vm1334_vm1, %v2434_v6 }
 0x389   : > { %v2314_v45 = vmul.f32 %v6529_v39, %v2313_v15  ;;  %vm2317_vm8 = vweird.f32 %v6529_v39  ;;  %v5780_v62 = vmul.f32 -1.442695, %v2154_v52  ;;  %vm2316_vm9 = vweird.f32 %v8388_v57 }
 0x38a   : > { %v6531_v32 = vpop.eup %6530  ;;  %v2160_v41 = vmul.f32 %v6525_v4, %v2159_v51  ;;  %v2165_v40 = vand.u32 2147483648, %v8370_v38  ;;  %v8450_v46 = vadd.f32 1e-12, %v2045_v22  ;;  %5698 = vmatmul.msk.f32.gmra.mxu3 %vm1334_vm1, %v1445_v27  ;;  %vm2321_vm10 = vcmp.eq.f32.partialorder %v2320_v26, 8.507059e+37  ;;  %vm2318_vm11 = vmor %vm2316_vm9, %vm2317_vm8 }
 0x38b   : > { %v6533_v23 = vpop.eup %6532  ;;  %v8447_v49 = vadd.f32 1.0, %v6531_v32  ;;  %v2315_v31 = vadd.f32 %v6529_v39, %v2314_v45  ;;  %6536 = vpow2.f32 %v5780_v62  ;;  %v8454_v48 = vpop.f32.mrf.mxu1  ;;  %v2323_v4 = vor.u32 1.1754944e-38, %v2322_v16  ;;  %v6634_v16 = vld [vmem:[%s10645_s6] ss:$0 sm:$0xff] }
 0x38c   : > { %v2327_v35 = vmul.f32 %v6533_v23, %v8421_v29  ;;  %v6535_v36 = vpop.eup %6534  ;;  %v2335_v57 = vand.u32 2147483647, %v8421_v29  ;;  %v2337_v6 = vand.u32 2147483648, %v8421_v29  ;;  %v2161_v50 = vmul.f32 %v2160_v41, %v8370_v38 }
 0x38d   : > { %6538 = vrcp.f32 %v8447_v49  ;;  %v2319_v17 = vsel %vm2318_vm11, %v6529_v39, %v2315_v31  ;;  %v2168_v26 = vmul.f32 %v6535_v36, %v8423_v24  ;;  %v2034_v52 = vmul.f32 %v8454_v48, %v8454_v48 }
 0x38e   : > { %v2328_v15 = vsub.f32 1.0, %v2327_v35  ;;  %v8462_v51 = vsel %vm2321_vm10, %v2323_v4, %v2319_v17  ;;  %6540 = vrsqrt.f32 %v8450_v46  ;;  %v1419_v22 = vadd.f32 %v6634_v16, %v1418_v13 }
 0x38f   : > { %v8472_v39 = vmul.f32 %v8462_v51, %v8206_v44  ;;  %vm2332_vm12 = vweird.f32 %v6533_v23  ;;  %v2163_v32 = vsel %vm2162_vm6, %v8370_v38, %v2161_v50  ;;  %v2022_v45 = vadd.f32 %v8427_v43, %v8418_v20 }
 0x390   : > { %v2329_v27 = vmul.f32 %v6533_v23, %v2328_v15  ;;  %vm2331_vm13 = vweird.f32 %v8421_v29  ;;  %v2166_v62 = vsel %vm2164_vm7, %v2165_v40, %v2163_v32  ;;  %v2169_v41 = vmul.f32 %v6535_v36, %v2168_v26  ;;  %v1421_v29 = vpop.f32.mrf.mxu2 }
 0x391   : > { %v6537_v13 = vpop.eup %6536  ;;  %vm8482_vm14 = vcmp.eq.f32.partialorder %v2335_v57, 8.507059e+37  ;;  %v2338_v35 = vor.u32 1.1754944e-38, %v2337_v6  ;;  %v5781_v4 = vmul.f32 -1.442695, %v2166_v62  ;;  %vm2333_vm15 = vmor %vm2331_vm13, %vm2332_vm12  ;;  %v2046_v43 = vadd.f32 %v2034_v52, %v2022_v45 }
 0x392   : > { %v2330_v31 = vadd.f32 %v6533_v23, %v2329_v27  ;;  %v8486_v15 = vadd.f32 1.0, %v6537_v13  ;;  %v2170_v20 = vmul.f32 0.5, %v2169_v41  ;;  %v2435_v38 = vmul.f32 %v8462_v51, %v8056_v54 }
 0x393   : > { %v6539_v17 = vpop.eup %6538  ;;  %6542 = vpow2.f32 %v5781_v4  ;;  %v1434_v57 = vmul.f32 0.1, %v1419_v22  ;;  %v1422_v27 = vadd.f32 %v6634_v16, %v1421_v29  ;;  %v8504_v62 = vadd.f32 1e-12, %v2046_v43 }
 0x394   : > { %v2334_v40 = vsel %vm2333_vm15, %v6533_v23, %v2330_v31  ;;  %v2342_v50 = vmul.f32 %v6539_v17, %v8447_v49  ;;  %v6541_v26 = vpop.eup %6540  ;;  %6544 = vrcp.f32 %v8486_v15  ;;  %5789 = vmatmul.msk.f32.gmra.mxu2 %vm1334_vm1, %v2435_v38  ;;  %v2352_v23 = vand.u32 2147483648, %v8447_v49 }
 0x395   : > { %v8494_v6 = vsel %vm8482_vm14, %v2338_v35, %v2334_v40  ;;  %v2171_v32 = vsub.f32 1.5, %v2170_v20  ;;  %v2180_v45 = vmul.f32 %v6541_v26, %v8450_v46  ;;  %vm2347_vm2 = vweird.f32 %v6539_v17 }
 0x396   : > { %v8500_v52 = vmul.f32 %v8494_v6, %v8233_v3  ;;  %v2343_v54 = vsub.f32 1.0, %v2342_v50  ;;  %v2350_v13 = vand.u32 2147483647, %v8447_v49  ;;  %v1446_v31 = vmax.f32 %v1419_v22, %v1434_v57  ;;  %v8524_v57 = vld [vmem:[%s8521_s26] sm:$0xff] }
 0x397   : > { %v2172_v44 = vmul.f32 %v6535_v36, %v2171_v32  ;;  %v2181_v35 = vmul.f32 %v6541_v26, %v2180_v45  ;;  %6546 = vrsqrt.f32 %v8504_v62  ;;  %vm2346_vm3 = vweird.f32 %v8447_v49  ;;  %v3645_v36 = vld [vmem:[%s10651_s12] sm:$0xff] }
 0x398   : > { %v2344_v41 = vmul.f32 %v6539_v17, %v2343_v54  ;;  %v2353_v16 = vor.u32 1.1754944e-38, %v2352_v23  ;;  %5699 = vmatmul.msk.f32.gmra.mxu3 %vm1334_vm1, %v1446_v31  ;;  %v1435_v20 = vmul.f32 0.1, %v1422_v27  ;;  %vm2348_vm4 = vmor %vm2346_vm3, %vm2347_vm2  ;;  %v2436_v40 = vmul.f32 %v8494_v6, %v8060_v59  ;;  %3987 = vmatpush.msrb.mxu0 %v3645_v36 }
 0x399   : > { %v6543_v3 = vpop.eup %6542  ;;  %v2173_v29 = vmul.f32 %v2172_v44, %v8423_v24  ;;  %v2182_v22 = vmul.f32 0.5, %v2181_v35  ;;  %vm2351_vm5 = vcmp.eq.f32.partialorder %v2350_v13, 8.507059e+37  ;;  %vm3647_vm6 = vcmask 130048   ;;  %6128 = vmatpush.msra.mxu2 %v3645_v36 }
 0x39a   : > { %v2345_v4 = vadd.f32 %v6539_v17, %v2344_v41  ;;  %v6545_v43 = vpop.eup %6544  ;;  %v8510_v38 = vadd.f32 1.0, %v6543_v3  ;;  %vm2174_vm7 = vcmp.eq.f32.partialorder %v8423_v24, inf  ;;  %vm2176_vm8 = vcmp.eq.f32.partialorder %v8423_v24, 0.0  ;;  %5869 = vmatmul.msk.f32.vlgmr.msrb.gmra.mxu0 %vm3647_vm6, %v8524_v57 }
 0x39b   : > { %v2357_v49 = vmul.f32 %v6545_v43, %v8486_v15  ;;  %v2177_v23 = vand.u32 2147483648, %v8423_v24  ;;  %v1447_v32 = vmax.f32 %v1422_v27, %v1435_v20  ;;  %v2365_v41 = vand.u32 2147483647, %v8486_v15 }
 0x39c   : > { %v2349_v50 = vsel %vm2348_vm4, %v6539_v17, %v2345_v4  ;;  %6548 = vrcp.f32 %v8510_v38  ;;  %5790 = vmatmul.msk.f32.gmra.mxu2 %vm1334_vm1, %v2436_v40  ;;  %v2367_v13 = vand.u32 2147483648, %v8486_v15  ;;  %v2175_v31 = vsel %vm2174_vm7, %v8423_v24, %v2173_v29 }
 0x39d   : > { %v8526_v54 = vsel %vm2351_vm5, %v2353_v16, %v2349_v50  ;;  %v2358_v17 = vsub.f32 1.0, %v2357_v49  ;;  %v6547_v45 = vpop.eup %6546  ;;  %v2183_v44 = vsub.f32 1.5, %v2182_v22  ;;  %vm2362_vm9 = vweird.f32 %v6545_v43  ;;  %v8552_v49 = vld [vmem:[%s8521_s26 + $0x8] sm:$0xff] }
 0x39e   : > { %v8536_v59 = vmul.f32 %v8526_v54, %v8273_v42  ;;  %v2178_v3 = vsel %vm2176_vm8, %v2177_v23, %v2175_v31  ;;  %v2192_v4 = vmul.f32 %v6547_v45, %v8504_v62  ;;  %v2437_v36 = vmul.f32 %v8526_v54, %v8064_v61 }
 0x39f   : > { %v2359_v35 = vmul.f32 %v6545_v43, %v2358_v17  ;;  %v5782_v16 = vmul.f32 -1.442695, %v2178_v3  ;;  %v2184_v42 = vmul.f32 %v6541_v26, %v2183_v44  ;;  %vm2361_vm10 = vweird.f32 %v8486_v15 }
 0x3a0   : > { %vm2186_vm11 = vcmp.eq.f32.partialorder %v8450_v46, inf  ;;  %v2193_v20 = vmul.f32 %v6547_v45, %v2192_v4  ;;  %5700 = vmatmul.msk.f32.gmra.mxu3 %vm1334_vm1, %v1447_v32  ;;  %vm2363_vm12 = vmor %vm2361_vm10, %vm2362_vm9  ;;  %v2368_v29 = vor.u32 1.1754944e-38, %v2367_v13  ;;  %v2189_v26 = vand.u32 2147483648, %v8450_v46 }
 0x3a1   : > { %v2360_v27 = vadd.f32 %v6545_v43, %v2359_v35  ;;  %6550 = vpow2.f32 %v5782_v16  ;;  %v2185_v22 = vmul.f32 %v2184_v42, %v8450_v46  ;;  %vm2366_vm13 = vcmp.eq.f32.partialorder %v2365_v41, 8.507059e+37 }
 0x3a2   : > { %v6549_v24 = vpop.eup %6548  ;;  %v2194_v50 = vmul.f32 0.5, %v2193_v20  ;;  %vm2188_vm14 = vcmp.eq.f32.partialorder %v8450_v46, 0.0  ;;  %5870 = vmatmul.msk.f32.gmra.mxu0 %vm3647_vm6, %v8552_v49  ;;  %v2382_v13 = vand.u32 2147483648, %v8510_v38  ;;  %vm2376_vm2 = vweird.f32 %v8510_v38 }
 0x3a3   : > { %v2364_v40 = vsel %vm2363_vm12, %v6545_v43, %v2360_v27  ;;  %v2372_v61 = vmul.f32 %v6549_v24, %v8510_v38  ;;  %v2187_v17 = vsel %vm2186_vm11, %v8450_v46, %v2185_v22  ;;  %vm2377_vm15 = vweird.f32 %v6549_v24  ;;  %v8571_v27 = vld [vmem:[%s8521_s26 + $0x10] sm:$0xff] }
 0x3a4   : > { %v2369_v15 = vsel %vm2366_vm13, %v2368_v29, %v2364_v40  ;;  %5791 = vmatmul.msk.f32.gmra.mxu2 %vm1334_vm1, %v2437_v36  ;;  %v2190_v41 = vsel %vm2188_vm14, %v2189_v26, %v2187_v17  ;;  %v2195_v44 = vsub.f32 1.5, %v2194_v50  ;;  %v2380_v46 = vand.u32 2147483647, %v8510_v38  ;;  %vm2378_vm3 = vmor %vm2376_vm2, %vm2377_vm15 }
 0x3a5   : > { %v2450_v23 = vmul.f32 %v2369_v15, %v8125_v30  ;;  %v8561_v43 = vmul.f32 %v2369_v15, %v8311_v12  ;;  %v2373_v32 = vsub.f32 1.0, %v2372_v61  ;;  %v5783_v31 = vmul.f32 -1.442695, %v2190_v41 }
 0x3a6   : > { %v2196_v4 = vmul.f32 %v6547_v45, %v2195_v44  ;;  %v2438_v16 = vmul.f32 %v2369_v15, %v8068_v63  ;;  %v2383_v42 = vor.u32 1.1754944e-38, %v2382_v13  ;;  %vm2198_vm4 = vcmp.eq.f32.partialorder %v8504_v62, inf  ;;  %v1516_v13 = vpop.f32.mrf.mxu3 }
 0x3a7   : > { %v2374_v35 = vmul.f32 %v6549_v24, %v2373_v32  ;;  %v6551_v3 = vpop.eup %6550  ;;  %6552 = vpow2.f32 %v5783_v31  ;;  %vm2381_vm5 = vcmp.eq.f32.partialorder %v2380_v46, 8.507059e+37  ;;  %v2201_v45 = vand.u32 2147483648, %v8504_v62 }
 0x3a8   : > { %v2248_v12 = vadd.f32 1.0, %v6551_v3  ;;  %5804 = vmatmul.msk.f32.vlgmr.msra.gmra.mxu3 %vm1334_vm1, %v2450_v23  ;;  %v2197_v36 = vmul.f32 %v2196_v4, %v8504_v62  ;;  %vm2200_vm7 = vcmp.eq.f32.partialorder %v8504_v62, 0.0  ;;  %v8597_v3 = vld [vmem:[%s10647_s8] ss:$0 sm:$0xff] }
 0x3a9   : > { %v2375_v30 = vadd.f32 %v6549_v24, %v2374_v35  ;;  %v6635_v35 = vld [vmem:[%s7539_s17 + $0x8] sm:$0xff]  ;;  %v1517_v4 = vadd.f32 %v8597_v3, %v1516_v13 }
 0x3aa   : > { %6554 = vrcp.f32 %v2248_v12  ;;  %v2199_v38 = vsel %vm2198_vm4, %v8504_v62, %v2197_v36  ;;  %5871 = vmatmul.msk.f32.gmra.mxu0 %vm3647_vm6, %v8571_v27  ;;  %v8586_v62 = vld [vmem:[%s8521_s26 + $0x18] sm:$0xff]  ;;  %v2395_v41 = vand.u32 2147483647, %v2248_v12  ;;  %vm2391_vm9 = vweird.f32 %v2248_v12 }
 0x3ab   : > { %v2379_v20 = vsel %vm2378_vm3, %v6549_v24, %v2375_v30  ;;  %v2202_v24 = vsel %vm2200_vm7, %v2201_v45, %v2199_v38 }
 0x3ac   : > { %v2384_v63 = vsel %vm2381_vm5, %v2383_v42, %v2379_v20  ;;  %5792 = vmatmul.msk.f32.gmra.mxu2 %vm1334_vm1, %v2438_v16  ;;  %v5784_v40 = vmul.f32 -1.442695, %v2202_v24  ;;  %vm2396_vm11 = vcmp.eq.f32.partialorder %v2395_v41, 8.507059e+37 }
 0x3ad   : > { %v2451_v29 = vmul.f32 %v2384_v63, %v8132_v34  ;;  %v8581_v22 = vmul.f32 %v2384_v63, %v8342_v33  ;;  %v6553_v26 = vpop.eup %6552  ;;  %v2439_v50 = vmul.f32 %v2384_v63, %v8072_v2  ;;  %v2397_v34 = vand.u32 2147483648, %v2248_v12  ;;  %v1196_v2 = vpop.f32.mrf.mxu0  ;;  %v8602_v63 = vld [vmem:[%s8521_s26 + $0x20] sm:$0xff] }
 0x3ae   : > { %v2249_v61 = vadd.f32 1.0, %v6553_v26  ;;  %6556 = vpow2.f32 %v5784_v40  ;;  %v1550_v46 = vadd.f32 %v6635_v35, %v1196_v2 }
 0x3af   : > { %v2398_v42 = vor.u32 1.1754944e-38, %v2397_v34  ;;  %v6637_v34 = vld [vmem:[%s7539_s17 + $0x10] sm:$0xff] }
 0x3b0   : > { %v6555_v15 = vpop.eup %6554  ;;  %6558 = vrcp.f32 %v2249_v61  ;;  %5805 = vmatmul.msk.f32.gmra.mxu3 %vm1334_vm1, %v2451_v29  ;;  %v1562_v45 = vadd.f32 %v1550_v46, %v1517_v4  ;;  %v2410_v29 = vand.u32 2147483647, %v2249_v61  ;;  %v2412_v24 = vand.u32 2147483648, %v2249_v61 }
 0x3b1   : > { %v2387_v17 = vmul.f32 %v6555_v15, %v2248_v12  ;;  %vm2392_vm8 = vweird.f32 %v6555_v15  ;;  %vm2406_vm13 = vweird.f32 %v2249_v61 }
 0x3b2   : > { %5872 = vmatmul.msk.f32.gmra.mxu0 %vm3647_vm6, %v8586_v62  ;;  %vm2393_vm10 = vmor %vm2391_vm9, %vm2392_vm8  ;;  %1574 = vst.msk [vmem:[%s8030_s30 + $0x8] sm:$0xff] %vm1139_vm0, %v1562_v45  ;;  %vm2411_vm15 = vcmp.eq.f32.partialorder %v2410_v29, 8.507059e+37 }
 0x3b3   : > { %v2388_v23 = vsub.f32 1.0, %v2387_v17  ;;  %v1519_v17 = vpop.f32.mrf.mxu3 }
 0x3b4   : > { %5793 = vmatmul.msk.f32.gmra.mxu2 %vm1334_vm1, %v2439_v50  ;;  %v6557_v33 = vpop.eup %6556 }
 0x3b5   : > { %v2389_v32 = vmul.f32 %v6555_v15, %v2388_v23  ;;  %v8591_v44 = vadd.f32 1.0, %v6557_v33  ;;  %v2413_v23 = vor.u32 1.1754944e-38, %v2412_v24  ;;  %v1520_v33 = vadd.f32 %v8597_v3, %v1519_v17 }
 0x3b6   : > { %v6559_v31 = vpop.eup %6558 }
 0x3b7   : > { %v2390_v16 = vadd.f32 %v6555_v15, %v2389_v32  ;;  %v2402_v30 = vmul.f32 %v6559_v31, %v2249_v61  ;;  %6560 = vrcp.f32 %v8591_v44  ;;  %vm2407_vm12 = vweird.f32 %v6559_v31 }
 0x3b8   : > { %vm2408_vm14 = vmor %vm2406_vm13, %vm2407_vm12  ;;  %vm2421_vm3 = vweird.f32 %v8591_v44 }
 0x3b9   : > { %v2394_v36 = vsel %vm2393_vm10, %v6555_v15, %v2390_v16  ;;  %v2403_v20 = vsub.f32 1.0, %v2402_v30  ;;  %v1199_v15 = vpop.f32.mrf.mxu0  ;;  %v8625_v16 = vld [vmem:[%s8521_s26 + $0x28] sm:$0xff]  ;;  %v2427_v30 = vand.u32 2147483648, %v8591_v44 }
 0x3ba   : > { %v8604_v38 = vsel %vm2396_vm11, %v2398_v42, %v2394_v36  ;;  %5873 = vmatmul.msk.f32.gmra.mxu0 %vm3647_vm6, %v8602_v63  ;;  %v2425_v42 = vand.u32 2147483647, %v8591_v44 }
 0x3bb   : > { %v2452_v12 = vmul.f32 %v8604_v38, %v8134_v0  ;;  %v2404_v26 = vmul.f32 %v6559_v31, %v2403_v20  ;;  %v2440_v40 = vmul.f32 %v8604_v38, %v8076_v5  ;;  %v1551_v5 = vadd.f32 %v6637_v34, %v1199_v15  ;;  %v6638_v20 = vld [vmem:[%s7539_s17 + $0x18] sm:$0xff] }
 0x3bc   : > { %v2428_v36 = vor.u32 1.1754944e-38, %v2427_v30  ;;  %vm2426_vm5 = vcmp.eq.f32.partialorder %v2425_v42, 8.507059e+37  ;;  %v8656_v34 = vld [vmem:[%s8521_s26 + $0x38] sm:$0xff] }
 0x3bd   : > { %v2405_v50 = vadd.f32 %v6559_v31, %v2404_v26  ;;  %5794 = vmatmul.msk.f32.gmra.mxu2 %vm1334_vm1, %v2440_v40  ;;  %5806 = vmatmul.msk.f32.gmra.mxu3 %vm1334_vm1, %v2452_v12  ;;  %v6561_v0 = vpop.eup %6560  ;;  %v1563_v2 = vadd.f32 %v1551_v5, %v1520_v33  ;;  %v2443_v5 = vmul.f32 %v8301_v58, %v8088_v14 }
 0x3be   : > { %v2417_v41 = vmul.f32 %v6561_v0, %v8591_v44  ;;  %vm2422_vm2 = vweird.f32 %v6561_v0  ;;  %v2444_v14 = vmul.f32 %v8331_v28, %v8092_v18  ;;  %v2445_v18 = vmul.f32 %v8365_v55, %v8096_v21  ;;  %v8701_v55 = vld [vmem:[%s8521_s26 + $0x50] sm:$0xff] }
 0x3bf   : > { %v2409_v32 = vsel %vm2408_vm14, %v6559_v31, %v2405_v50  ;;  %1575 = vst.msk [vmem:[%s8030_s30 + $0x10] sm:$0xff] %vm1139_vm0, %v1563_v2  ;;  %vm2423_vm4 = vmor %vm2421_vm3, %vm2422_vm2  ;;  %v8645_v50 = vld [vmem:[%s8521_s26 + $0x30] sm:$0xff] }
 0x3c0   : > { %v2414_v61 = vsel %vm2411_vm15, %v2413_v23, %v2409_v32  ;;  %v2418_v46 = vsub.f32 1.0, %v2417_v41  ;;  %v6640_v41 = vld [vmem:[%s7539_s17 + $0x28] sm:$0xff] }
 0x3c1   : > { %v2453_v13 = vmul.f32 %v2414_v61, %v8136_v19  ;;  %v8621_v35 = vmul.f32 %v2414_v61, %v8414_v53  ;;  %v2441_v4 = vmul.f32 %v2414_v61, %v8080_v8  ;;  %v1202_v8 = vpop.f32.mrf.mxu0  ;;  %v1522_v53 = vpop.f32.mrf.mxu3 }
 0x3c2   : > { %v2419_v31 = vmul.f32 %v6561_v0, %v2418_v46  ;;  %5874 = vmatmul.msk.f32.gmra.mxu0 %vm3647_vm6, %v8625_v16  ;;  %v1552_v45 = vadd.f32 %v6638_v20, %v1202_v8  ;;  %v1523_v29 = vadd.f32 %v8597_v3, %v1522_v53  ;;  %v8670_v46 = vld [vmem:[%s8521_s26 + $0x40] sm:$0xff]  ;;  %v3195_v8 = vld [vmem:[%s10753_s13 + $0x38] sm:$0xff] }
 0x3c3   : > { %v6642_v53 = vld [vmem:[%s7539_s17 + $0x38] sm:$0xff]  ;;  %3312 = vmatpush.msrb.mxu3 %v3195_v8 }
 0x3c4   : > { %v2420_v19 = vadd.f32 %v6561_v0, %v2419_v31  ;;  %v1564_v44 = vadd.f32 %v1552_v45, %v1523_v29  ;;  %v8715_v29 = vld [vmem:[%s8521_s26 + $0x58] sm:$0xff] }
 0x3c5   : > { %5795 = vmatmul.msk.f32.gmra.mxu2 %vm1334_vm1, %v2441_v4  ;;  %5807 = vmatmul.msk.f32.gmra.mxu3 %vm1334_vm1, %v2453_v13  ;;  %v6641_v4 = vld [vmem:[%s7539_s17 + $0x30] sm:$0xff]  ;;  %v6646_v8 = vld [vmem:[%s7539_s17 + $0x58] sm:$0xff] }
 0x3c6   : > { %v2424_v24 = vsel %vm2423_vm4, %v6561_v0, %v2420_v19  ;;  %1576 = vst.msk [vmem:[%s8030_s30 + $0x18] sm:$0xff] %vm1139_vm0, %v1564_v44  ;;  %v6639_v0 = vld [vmem:[%s7539_s17 + $0x20] sm:$0xff]  ;;  %v8684_v19 = vld [vmem:[%s8521_s26 + $0x48] sm:$0xff]  ;;  %v2447_v44 = vmul.f32 %v8462_v51, %v8107_v47  ;;  %v3194_v47 = vld [vmem:[%s10753_s13 + $0x30] sm:$0xff] }
 0x3c7   : > { %v8638_v12 = vsel %vm2426_vm5, %v2428_v36, %v2424_v24  ;;  %3313 = vmatpush.msrb.mxu3 %v3194_v47  ;;  %v6643_v51 = vld [vmem:[%s7539_s17 + $0x40] sm:$0xff]  ;;  %v3556_v47 = vld [vmem:[%s8521_s26 + $0x98] sm:$0xff] }
 0x3c8   : > { %v2454_v26 = vmul.f32 %v8638_v12, %v8139_v37  ;;  %v2442_v40 = vmul.f32 %v8638_v12, %v8084_v11 }
 0x3c9   : > { %v1205_v15 = vpop.f32.mrf.mxu0  ;;  %v1525_v17 = vpop.f32.mrf.mxu3 }
 0x3ca   : > { %5875 = vmatmul.msk.f32.gmra.mxu0 %vm3647_vm6, %v8645_v50  ;;  %v1553_v37 = vadd.f32 %v6639_v0, %v1205_v15  ;;  %v1526_v11 = vadd.f32 %v8597_v3, %v1525_v17  ;;  %v10754_v17 = vld [vmem:[#allocation46_spill] sm:$0xff] }
 0x3cb   : > { %v2449_v0 = vmul.f32 %v8526_v54, %v10754_v17 }
 0x3cc   : > { %v1565_v23 = vadd.f32 %v1553_v37, %v1526_v11  ;;  %v3551_v11 = vld [vmem:[%s8521_s26 + $0x70] sm:$0xff] }
 0x3cd   : > { %5796 = vmatmul.msk.f32.gmra.mxu2 %vm1334_vm1, %v2442_v40  ;;  %5808 = vmatmul.msk.f32.gmra.mxu3 %vm1334_vm1, %v2454_v26 }
 0x3ce   : > { %1577 = vst.msk [vmem:[%s8030_s30 + $0x20] sm:$0xff] %vm1139_vm0, %v1565_v23  ;;  %v6644_v23 = vld [vmem:[%s7539_s17 + $0x48] sm:$0xff] }
 0x3d1   : > { %v1208_v33 = vpop.f32.mrf.mxu0 }
 0x3d2   : > { %5876 = vmatmul.msk.f32.gmra.mxu0 %vm3647_vm6, %v8656_v34  ;;  %v1528_v32 = vpop.f32.mrf.mxu3  ;;  %v1554_v61 = vadd.f32 %v6640_v41, %v1208_v33 }
 0x3d3   : > { %v1529_v2 = vadd.f32 %v8597_v3, %v1528_v32 }
 0x3d5   : > { %5797 = vmatmul.msk.f32.gmra.mxu2 %vm1334_vm1, %v2443_v5  ;;  %5809 = vmatmul.msk.f32.gmra.mxu3 %vm1334_vm1, %v8308_v1  ;;  %v1566_v13 = vadd.f32 %v1554_v61, %v1529_v2  ;;  %v3552_v2 = vld [vmem:[%s8521_s26 + $0x78] sm:$0xff] }
 0x3d7   : > { %1578 = vst.msk [vmem:[%s8030_s30 + $0x28] sm:$0xff] %vm1139_vm0, %v1566_v13 }
 0x3d9   : > { %v1211_v58 = vpop.f32.mrf.mxu0 }
 0x3da   : > { %5877 = vmatmul.msk.f32.gmra.mxu0 %vm3647_vm6, %v8670_v46  ;;  %v1531_v1 = vpop.f32.mrf.mxu3  ;;  %v1555_v30 = vadd.f32 %v6641_v4, %v1211_v58  ;;  %v3553_v58 = vld [vmem:[%s8521_s26 + $0x80] sm:$0xff]  ;;  %v6645_v4 = vld [vmem:[%s7539_s17 + $0x50] sm:$0xff] }
 0x3db   : > { %v1532_v31 = vadd.f32 %v8597_v3, %v1531_v1  ;;  %v3192_v1 = vld [vmem:[%s10753_s13 + $0x20] sm:$0xff] }
 0x3dd   : > { %5798 = vmatmul.msk.f32.gmra.mxu2 %vm1334_vm1, %v2444_v14  ;;  %5810 = vmatmul.msk.f32.gmra.mxu3 %vm1334_vm1, %v8338_v60  ;;  %v1567_v42 = vadd.f32 %v1555_v30, %v1532_v31  ;;  %v10755_v31 = vld [vmem:[#allocation47_spill] sm:$0xff] }
 0x3df   : > { %1579 = vst.msk [vmem:[%s8030_s30 + $0x30] sm:$0xff] %vm1139_vm0, %v1567_v42  ;;  %v2464_v42 = vmul.f32 %v8604_v38, %v10755_v31 }
 0x3e1   : > { %v1214_v28 = vpop.f32.mrf.mxu0 }
 0x3e2   : > { %5878 = vmatmul.msk.f32.gmra.mxu0 %vm3647_vm6, %v8684_v19  ;;  %v1556_v36 = vadd.f32 %v6642_v53, %v1214_v28 }
 0x3e3   : > { %v1534_v60 = vpop.f32.mrf.mxu3 }
 0x3e4   : > { %v1535_v20 = vadd.f32 %v8597_v3, %v1534_v60 }
 0x3e5   : > { %5799 = vmatmul.msk.f32.gmra.mxu2 %vm1334_vm1, %v2445_v18  ;;  %5811 = vmatmul.msk.f32.gmra.mxu3 %vm1334_vm1, %v8374_v9  ;;  %v2446_v9 = vmul.f32 %v8398_v7, %v8100_v25  ;;  %v3549_v25 = vld [vmem:[%s8521_s26 + $0x60] sm:$0xff] }
 0x3e6   : > { %v1568_v21 = vadd.f32 %v1556_v36, %v1535_v20  ;;  %v3554_v36 = vld [vmem:[%s8521_s26 + $0x88] sm:$0xff] }
 0x3e8   : > { %1580 = vst.msk [vmem:[%s8030_s30 + $0x38] sm:$0xff] %vm1139_vm0, %v1568_v21 }
 0x3e9   : > { %v1217_v24 = vpop.f32.mrf.mxu0 }
 0x3ea   : > { %5879 = vmatmul.msk.f32.gmra.mxu0 %vm3647_vm6, %v8701_v55 }
 0x3ed   : > { %5800 = vmatmul.msk.f32.gmra.mxu2 %vm1334_vm1, %v2446_v9  ;;  %5812 = vmatmul.msk.f32.gmra.mxu3 %vm1334_vm1, %v8409_v10  ;;  %v2448_v10 = vmul.f32 %v8494_v6, %v8114_v56  ;;  %v3550_v56 = vld [vmem:[%s8521_s26 + $0x68] sm:$0xff] }
 0x3f0   : > { %v8712_v45 = vpop.f32.mrf.mxu2 }
 0x3f1   : > { %v1220_v26 = vpop.f32.mrf.mxu0 }
 0x3f2   : > { %5880 = vmatmul.msk.f32.gmra.mxu0 %vm3647_vm6, %v8715_v29  ;;  %v1558_v5 = vadd.f32 %v6644_v23, %v1220_v26 }
 0x3f5   : > { %5801 = vmatmul.msk.f32.gmra.mxu2 %vm1334_vm1, %v2447_v44  ;;  %5813 = vmatmul.msk.f32.gmra.mxu3 %vm1334_vm1, %v8472_v39  ;;  %v1557_v39 = vadd.f32 %v6643_v51, %v1217_v24 }
 0x3fa   : > { %5881 = vmatmul.msk.f32.gmra.mxu0 %vm3647_vm6, %v3549_v25  ;;  %v3555_v25 = vld [vmem:[%s8521_s26 + $0x90] sm:$0xff] }
 0x3fb   : > { %v8725_v7 = vpop.f32.mrf.mxu2 }
 0x3fd   : > { %5802 = vmatmul.msk.f32.gmra.mxu2 %vm1334_vm1, %v2448_v10  ;;  %5814 = vmatmul.msk.f32.gmra.mxu3 %vm1334_vm1, %v8500_v52  ;;  %v1223_v52 = vpop.f32.mrf.mxu0 }
 0x3fe   : > { %v1559_v30 = vadd.f32 %v6645_v4, %v1223_v52  ;;  %v2708_v4 = vmul.f32 %v8712_v45, %v8712_v45 }
 0x402   : > { %v1537_v40 = vpop.f32.mrf.mxu3  ;;  %5882 = vmatmul.msk.f32.gmra.mxu0 %vm3647_vm6, %v3550_v56  ;;  %v3557_v56 = vld [vmem:[%s8521_s26 + $0xa0] sm:$0xff] }
 0x403   : > { %v8738_v6 = vpop.f32.mrf.mxu2  ;;  %v1538_v15 = vadd.f32 %v8597_v3, %v1537_v40 }
 0x405   : > { %v1569_v37 = vadd.f32 %v1557_v39, %v1538_v15  ;;  %5803 = vmatmul.msk.f32.gmra.mxu2 %vm1334_vm1, %v2449_v0  ;;  %5815 = vmatmul.msk.f32.gmra.mxu3 %vm1334_vm1, %v8536_v59  ;;  %v3193_v59 = vld [vmem:[%s10753_s13 + $0x28] sm:$0xff]  ;;  %v1226_v61 = vpop.f32.mrf.mxu0 }
 0x406   : > { %3314 = vmatpush.msrb.mxu3 %v3193_v59  ;;  %v1560_v53 = vadd.f32 %v6646_v8, %v1226_v61  ;;  %v3602_v15 = vld [vmem:[%s8521_s26 + $0x208] sm:$0xff]  ;;  %v3559_v59 = vld [vmem:[%s8521_s26 + $0xb0] sm:$0xff] }
 0x407   : > { %1581 = vst.msk [vmem:[%s8030_s30 + $0x40] sm:$0xff] %vm1139_vm0, %v1569_v37 }
 0x408   : > { %3315 = vmatpush.msrb.mxu3 %v3192_v1 }
 0x40a   : > { %5883 = vmatmul.msk.f32.gmra.mxu0 %vm3647_vm6, %v3551_v11  ;;  %v3558_v11 = vld [vmem:[%s8521_s26 + $0xa8] sm:$0xff] }
 0x40b   : > { %v8751_v33 = vpop.f32.mrf.mxu2 }
 0x40d   : > { %v1540_v54 = vpop.f32.mrf.mxu3  ;;  %5816 = vmatmul.msk.f32.gmra.mxu3 %vm1334_vm1, %v8561_v43 }
 0x40e   : > { %v1541_v32 = vadd.f32 %v8597_v3, %v1540_v54 }
 0x410   : > { %v1570_v41 = vadd.f32 %v1558_v5, %v1541_v32 }
 0x412   : > { %1582 = vst.msk [vmem:[%s8030_s30 + $0x48] sm:$0xff] %vm1139_vm0, %v1570_v41  ;;  %5884 = vmatmul.msk.f32.gmra.mxu0 %vm3647_vm6, %v3552_v2 }
 0x415   : > { %5817 = vmatmul.msk.f32.gmra.mxu3 %vm1334_vm1, %v8581_v22 }
 0x417   : > { %v8766_v13 = vpop.f32.mrf.mxu2  ;;  %v3989_v43 = vpop.f32.mrf.mxu0 }
 0x418   : > { %v4313_v14 = vadd.f32 %v3989_v43, %v8524_v57 }
 0x41a   : > { %4325 = vst.msk [vmem:[%s8778_s28] sm:$0xff] %vm3647_vm6, %v4313_v14  ;;  %5885 = vmatmul.msk.f32.gmra.mxu0 %vm3647_vm6, %v3553_v58  ;;  %v3605_v14 = vld [vmem:[%s8521_s26 + $0x220] sm:$0xff] }
 0x41b   : > { %v1543_v22 = vpop.f32.mrf.mxu3 }
 0x41c   : > { %v1544_v57 = vadd.f32 %v8597_v3, %v1543_v22 }
 0x41d   : > { %5818 = vmatmul.msk.f32.gmra.mxu3 %vm1334_vm1, %v2464_v42 }
 0x41e   : > { %v1571_v18 = vadd.f32 %v1559_v30, %v1544_v57 }
 0x41f   : > { %v8785_v28 = vpop.f32.mrf.mxu2  ;;  %v3992_v38 = vpop.f32.mrf.mxu0 }
 0x420   : > { %1583 = vst.msk [vmem:[%s8030_s30 + $0x50] sm:$0xff] %vm1139_vm0, %v1571_v18  ;;  %v4314_v60 = vadd.f32 %v3992_v38, %v8552_v49  ;;  %v3561_v18 = vld [vmem:[%s8521_s26 + $0xc0] sm:$0xff] }
 0x422   : > { %4326 = vst.msk [vmem:[%s8778_s28 + $0x8] sm:$0xff] %vm3647_vm6, %v4314_v60  ;;  %5886 = vmatmul.msk.f32.gmra.mxu0 %vm3647_vm6, %v3554_v36  ;;  %v3606_v60 = vld [vmem:[%s8521_s26 + $0x228] sm:$0xff] }
 0x423   : > { %v1546_v20 = vpop.f32.mrf.mxu3 }
 0x424   : > { %v1547_v21 = vadd.f32 %v8597_v3, %v1546_v20  ;;  %v2466_v3 = vmul.f32 %v8638_v12, %v8454_v48  ;;  %v3191_v48 = vld [vmem:[%s10753_s13 + $0x18] sm:$0xff]  ;;  %v3601_v12 = vld [vmem:[%s8521_s26 + $0x200] sm:$0xff] }
 0x425   : > { %5819 = vmatmul.msk.f32.gmra.mxu3 %vm1334_vm1, %v8621_v35  ;;  %5933 = vmatmul.msk.f32.vlgmr.msra.gmra.mxu2 %vm3647_vm6, %v3601_v12  ;;  %v2710_v12 = vmul.f32 %v8738_v6, %v8738_v6 }
 0x426   : > { %v1572_v9 = vadd.f32 %v1560_v53, %v1547_v21  ;;  %3316 = vmatpush.msrb.mxu3 %v3191_v48  ;;  %v3562_v48 = vld [vmem:[%s8521_s26 + $0xc8] sm:$0xff] }
 0x427   : > { %v8798_v24 = vpop.f32.mrf.mxu2  ;;  %v3995_v49 = vpop.f32.mrf.mxu0 }
 0x428   : > { %1584 = vst.msk [vmem:[%s8030_s30 + $0x58] sm:$0xff] %vm1139_vm0, %v1572_v9  ;;  %v4315_v44 = vadd.f32 %v3995_v49, %v8571_v27 }
 0x42a   : > { %4327 = vst.msk [vmem:[%s8778_s28 + $0x10] sm:$0xff] %vm3647_vm6, %v4315_v44  ;;  %5887 = vmatmul.msk.f32.gmra.mxu0 %vm3647_vm6, %v3555_v25 }
 0x42b   : > { %v8808_v10 = vpop.f32.mrf.mxu3 }
 0x42c   : > { %10756 = vst [vmem:[#allocation46_spill] sm:$0xff] %v8808_v10 }
 0x42d   : > { %5820 = vmatmul.msk.f32.gmra.mxu3 %vm1334_vm1, %v2466_v3  ;;  %5934 = vmatmul.msk.f32.gmra.mxu2 %vm3647_vm6, %v3602_v15 }
 0x42f   : > { %v8812_v35 = vpop.f32.mrf.mxu2  ;;  %v3998_v26 = vpop.f32.mrf.mxu0 }
 0x430   : > { %v4316_v27 = vadd.f32 %v3998_v26, %v8586_v62 }
 0x432   : > { %4328 = vst.msk [vmem:[%s8778_s28 + $0x18] sm:$0xff] %vm3647_vm6, %v4316_v27  ;;  %5888 = vmatmul.msk.f32.gmra.mxu0 %vm3647_vm6, %v3556_v47 }
 0x433   : > { %v8826_v39 = vpop.f32.mrf.mxu3 }
 0x434   : > { %10757 = vst [vmem:[#allocation47_spill] sm:$0xff] %v8826_v39 }
 0x437   : > { %v8824_v51 = vpop.f32.mrf.mxu2  ;;  %v4001_v62 = vpop.f32.mrf.mxu0 }
 0x438   : > { %v4317_v40 = vadd.f32 %v4001_v62, %v8602_v63  ;;  %v3603_v63 = vld [vmem:[%s8521_s26 + $0x210] sm:$0xff] }
 0x439   : > { %5935 = vmatmul.msk.f32.gmra.mxu2 %vm3647_vm6, %v3603_v63 }
 0x43a   : > { %4329 = vst.msk [vmem:[%s8778_s28 + $0x20] sm:$0xff] %vm3647_vm6, %v4317_v40  ;;  %5889 = vmatmul.msk.f32.gmra.mxu0 %vm3647_vm6, %v3557_v56  ;;  %v3607_v40 = vld [vmem:[%s8521_s26 + $0x230] sm:$0xff] }
 0x43f   : > { %v4004_v37 = vpop.f32.mrf.mxu0 }
 0x440   : > { %v8835_v17 = vpop.f32.mrf.mxu2  ;;  %v8837_v0 = vpop.f32.mrf.mxu3  ;;  %v4318_v52 = vadd.f32 %v4004_v37, %v8625_v16  ;;  %v3604_v16 = vld [vmem:[%s8521_s26 + $0x218] sm:$0xff] }
 0x441   : > { %10758 = vst [vmem:[#allocation48_spill] sm:$0xff] %v8837_v0  ;;  %5936 = vmatmul.msk.f32.gmra.mxu2 %vm3647_vm6, %v3604_v16 }
 0x442   : > { %4330 = vst.msk [vmem:[%s8778_s28 + $0x28] sm:$0xff] %vm3647_vm6, %v4318_v52  ;;  %5890 = vmatmul.msk.f32.gmra.mxu0 %vm3647_vm6, %v3558_v11 }
 0x447   : > { %v4007_v54 = vpop.f32.mrf.mxu0 }
 0x448   : > { %v8846_v23 = vpop.f32.mrf.mxu2  ;;  %v8848_v5 = vpop.f32.mrf.mxu3  ;;  %v4319_v32 = vadd.f32 %v4007_v54, %v8645_v50  ;;  %v3560_v50 = vld [vmem:[%s8521_s26 + $0xb8] sm:$0xff] }
 0x449   : > { %10759 = vst [vmem:[#allocation49_spill] sm:$0xff] %v8848_v5  ;;  %5937 = vmatmul.msk.f32.gmra.mxu2 %vm3647_vm6, %v3605_v14 }
 0x44a   : > { %4331 = vst.msk [vmem:[%s8778_s28 + $0x30] sm:$0xff] %vm3647_vm6, %v4319_v32  ;;  %5891 = vmatmul.msk.f32.gmra.mxu0 %vm3647_vm6, %v3559_v59 }
 0x44f   : > { %v4010_v2 = vpop.f32.mrf.mxu0 }
 0x450   : > { %v8857_v41 = vpop.f32.mrf.mxu2  ;;  %v8859_v61 = vpop.f32.mrf.mxu3  ;;  %v4320_v43 = vadd.f32 %v4010_v2, %v8656_v34  ;;  %v3190_v2 = vld [vmem:[%s10753_s13 + $0x10] sm:$0xff] }
 0x451   : > { %10760 = vst [vmem:[#allocation50_spill] sm:$0xff] %v8859_v61  ;;  %5938 = vmatmul.msk.f32.gmra.mxu2 %vm3647_vm6, %v3606_v60  ;;  %3317 = vmatpush.msrb.mxu3 %v3190_v2  ;;  %v3563_v60 = vld [vmem:[%s8521_s26 + $0xd0] sm:$0xff] }
 0x452   : > { %4332 = vst.msk [vmem:[%s8778_s28 + $0x38] sm:$0xff] %vm3647_vm6, %v4320_v43  ;;  %5892 = vmatmul.msk.f32.gmra.mxu0 %vm3647_vm6, %v3560_v50 }
 0x457   : > { %v4013_v42 = vpop.f32.mrf.mxu0 }
 0x458   : > { %v8867_v58 = vpop.f32.mrf.mxu2  ;;  %v8869_v1 = vpop.f32.mrf.mxu3  ;;  %v4321_v22 = vadd.f32 %v4013_v42, %v8670_v46  ;;  %v2709_v46 = vmul.f32 %v8725_v7, %v8725_v7 }
 0x459   : > { %10761 = vst [vmem:[#allocation51_spill] sm:$0xff] %v8869_v1  ;;  %v2720_v34 = vmul.f32 %v8867_v58, %v8867_v58  ;;  %v2744_v31 = vmul.f32 %v8869_v1, %v8869_v1  ;;  %5939 = vmatmul.msk.f32.gmra.mxu2 %vm3647_vm6, %v3607_v40  ;;  %v3188_v40 = vld [vmem:[%s10753_s13] sm:$0xff] }
 0x45a   : > { %4333 = vst.msk [vmem:[%s8778_s28 + $0x40] sm:$0xff] %vm3647_vm6, %v4321_v22  ;;  %5893 = vmatmul.msk.f32.gmra.mxu0 %vm3647_vm6, %v3561_v18  ;;  %v3189_v18 = vld [vmem:[%s10753_s13 + $0x8] sm:$0xff] }
 0x45b   : > { %v2732_v30 = vadd.f32 %v2720_v34, %v2708_v4  ;;  %3318 = vmatpush.msrb.mxu3 %v3189_v18 }
 0x45d   : > { %v2756_v57 = vadd.f32 %v2744_v31, %v2732_v30  ;;  %3319 = vmatpush.msrb.mxu3 %v3188_v40 }
 0x45f   : > { %v2768_v38 = vadd.f32 1e-12, %v2756_v57  ;;  %v4016_v20 = vpop.f32.mrf.mxu0 }
 0x460   : > { %v8884_v8 = vpop.f32.mrf.mxu2  ;;  %v8886_v53 = vpop.f32.mrf.mxu3  ;;  %v4322_v49 = vadd.f32 %v4016_v20, %v8684_v19 }
 0x461   : > { %10762 = vst [vmem:[#allocation52_spill] sm:$0xff] %v8886_v53  ;;  %6562 = vrsqrt.f32 %v2768_v38  ;;  %v2721_v36 = vmul.f32 %v8884_v8, %v8884_v8  ;;  %v2745_v9 = vmul.f32 %v8886_v53, %v8886_v53  ;;  %vm2787_vm7 = vcmp.eq.f32.partialorder %v2768_v38, inf }
 0x462   : > { %4334 = vst.msk [vmem:[%s8778_s28 + $0x48] sm:$0xff] %vm3647_vm6, %v4322_v49  ;;  %5894 = vmatmul.msk.f32.gmra.mxu0 %vm3647_vm6, %v3562_v48  ;;  %v2790_v30 = vand.u32 2147483648, %v2768_v38  ;;  %vm2789_vm8 = vcmp.eq.f32.partialorder %v2768_v38, 0.0 }
 0x463   : > { %v2733_v21 = vadd.f32 %v2721_v36, %v2709_v46 }
 0x465   : > { %v2757_v44 = vadd.f32 %v2745_v9, %v2733_v21  ;;  %v3608_v9 = vld [vmem:[%s8521_s26 + $0x238] sm:$0xff] }
 0x466   : > { %5940 = vmatmul.msk.f32.gmra.mxu2 %vm3647_vm6, %v3608_v9 }
 0x467   : > { %v6563_v25 = vpop.eup %6562  ;;  %v8898_v26 = vadd.f32 1e-12, %v2757_v44  ;;  %v4019_v63 = vpop.f32.mrf.mxu0 }
 0x468   : > { %v2781_v3 = vmul.f32 %v6563_v25, %v2768_v38  ;;  %v8900_v27 = vpop.f32.mrf.mxu2  ;;  %v8902_v47 = vpop.f32.mrf.mxu3  ;;  %v4323_v32 = vadd.f32 %v4019_v63, %v8701_v55  ;;  %v2711_v55 = vmul.f32 %v8751_v33, %v8751_v33 }
 0x469   : > { %10763 = vst [vmem:[#allocation53_spill] sm:$0xff] %v8902_v47  ;;  %v2722_v62 = vmul.f32 %v8900_v27, %v8900_v27  ;;  %6564 = vrsqrt.f32 %v8898_v26  ;;  %v2746_v15 = vmul.f32 %v8902_v47, %v8902_v47  ;;  %vm2799_vm9 = vcmp.eq.f32.partialorder %v8898_v26, inf  ;;  %v9124_v47 = vld [vmem:[%s8521_s26 + $0x138] sm:$0xff] }
 0x46a   : > { %v2782_v19 = vmul.f32 %v6563_v25, %v2781_v3  ;;  %4335 = vst.msk [vmem:[%s8778_s28 + $0x50] sm:$0xff] %vm3647_vm6, %v4323_v32  ;;  %5895 = vmatmul.msk.f32.gmra.mxu0 %vm3647_vm6, %v3563_v60  ;;  %v2802_v32 = vand.u32 2147483648, %v8898_v26  ;;  %vm2801_vm10 = vcmp.eq.f32.partialorder %v8898_v26, 0.0 }
 0x46b   : > { %v2734_v56 = vadd.f32 %v2722_v62, %v2710_v12  ;;  %v2712_v12 = vmul.f32 %v8766_v13, %v8766_v13 }
 0x46c   : > { %v2783_v37 = vmul.f32 0.5, %v2782_v19 }
 0x46d   : > { %v2758_v52 = vadd.f32 %v2746_v15, %v2734_v56 }
 0x46e   : > { %v2784_v11 = vsub.f32 1.5, %v2783_v37 }
 0x46f   : > { %v8915_v54 = vadd.f32 1e-12, %v2758_v52  ;;  %v6565_v59 = vpop.eup %6564  ;;  %v4022_v15 = vpop.f32.mrf.mxu0 }
 0x470   : > { %v2785_v16 = vmul.f32 %v6563_v25, %v2784_v11  ;;  %v8921_v43 = vpop.f32.mrf.mxu2  ;;  %v8923_v50 = vpop.f32.mrf.mxu3  ;;  %v2793_v14 = vmul.f32 %v6565_v59, %v8898_v26  ;;  %v4324_v63 = vadd.f32 %v4022_v15, %v8715_v29  ;;  %v8970_v29 = vld [vmem:[%s8521_s26 + $0x240] sm:$0xff] }
 0x471   : > { %10764 = vst [vmem:[#allocation54_spill] sm:$0xff] %v8923_v50  ;;  %6566 = vrsqrt.f32 %v8915_v54  ;;  %v2723_v34 = vmul.f32 %v8921_v43, %v8921_v43  ;;  %v2747_v57 = vmul.f32 %v8923_v50, %v8923_v50  ;;  %5941 = vmatmul.msk.f32.gmra.mxu2 %vm3647_vm6, %v8970_v29  ;;  %vm2811_vm11 = vcmp.eq.f32.partialorder %v8915_v54, inf }
 0x472   : > { %v2786_v4 = vmul.f32 %v2785_v16, %v2768_v38  ;;  %v2794_v31 = vmul.f32 %v6565_v59, %v2793_v14  ;;  %v3564_v16 = vld [vmem:[%s8521_s26 + $0xd8] sm:$0xff]  ;;  %4336 = vst.msk [vmem:[%s8778_s28 + $0x58] sm:$0xff] %vm3647_vm6, %v4324_v63  ;;  %v2814_v9 = vand.u32 2147483648, %v8915_v54  ;;  %vm2813_vm12 = vcmp.eq.f32.partialorder %v8915_v54, 0.0 }
 0x473   : > { %v2735_v22 = vadd.f32 %v2723_v34, %v2711_v55  ;;  %5896 = vmatmul.msk.f32.gmra.mxu0 %vm3647_vm6, %v3564_v16 }
 0x474   : > { %v2788_v42 = vsel %vm2787_vm7, %v2768_v38, %v2786_v4  ;;  %v2795_v36 = vmul.f32 0.5, %v2794_v31 }
 0x475   : > { %v2791_v46 = vsel %vm2789_vm8, %v2790_v30, %v2788_v42  ;;  %v2759_v21 = vadd.f32 %v2747_v57, %v2735_v22 }
 0x476   : > { %v5821_v20 = vmul.f32 -1.442695, %v2791_v46  ;;  %v2796_v44 = vsub.f32 1.5, %v2795_v36  ;;  %v8986_v36 = vld [vmem:[%s8521_s26 + $0x120] sm:$0xff] }
 0x477   : > { %v6567_v49 = vpop.eup %6566  ;;  %v8943_v25 = vadd.f32 1e-12, %v2759_v21  ;;  %v2713_v21 = vmul.f32 %v8785_v28, %v8785_v28 }
 0x478   : > { %6568 = vpow2.f32 %v5821_v20  ;;  %v2805_v38 = vmul.f32 %v6567_v49, %v8915_v54  ;;  %v8945_v3 = vpop.f32.mrf.mxu2  ;;  %v8947_v48 = vpop.f32.mrf.mxu3  ;;  %v2797_v62 = vmul.f32 %v6565_v59, %v2796_v44 }
 0x479   : > { %10765 = vst [vmem:[#allocation55_spill] sm:$0xff] %v8947_v48  ;;  %v2724_v19 = vmul.f32 %v8945_v3, %v8945_v3  ;;  %6570 = vrsqrt.f32 %v8943_v25  ;;  %v2748_v11 = vmul.f32 %v8947_v48, %v8947_v48  ;;  %v4025_v20 = vpop.f32.mrf.mxu0  ;;  %vm2823_vm13 = vcmp.eq.f32.partialorder %v8943_v25, inf }
 0x47a   : > { %v2806_v56 = vmul.f32 %v6567_v49, %v2805_v38  ;;  %v2798_v37 = vmul.f32 %v2797_v62, %v8898_v26  ;;  %v2715_v62 = vmul.f32 %v8812_v35, %v8812_v35  ;;  %vm2825_vm2 = vcmp.eq.f32.partialorder %v8943_v25, 0.0 }
 0x47b   : > { %v2736_v52 = vadd.f32 %v2724_v19, %v2712_v12  ;;  %v3565_v12 = vld [vmem:[%s8521_s26 + $0xe0] sm:$0xff]  ;;  %v2727_v19 = vmul.f32 %v8808_v10, %v8808_v10 }
 0x47c   : > { %v2807_v59 = vmul.f32 0.5, %v2806_v56  ;;  %v2800_v2 = vsel %vm2799_vm9, %v8898_v26, %v2798_v37  ;;  %v4387_v56 = vadd.f32 %v4025_v20, %v8986_v36  ;;  %5897 = vmatmul.msk.f32.gmra.mxu0 %vm3647_vm6, %v3565_v12 }
 0x47d   : > { %v2760_v14 = vadd.f32 %v2748_v11, %v2736_v52  ;;  %v2803_v4 = vsel %vm2801_vm10, %v2802_v32, %v2800_v2 }
 0x47e   : > { %v6569_v55 = vpop.eup %6568  ;;  %v2808_v34 = vsub.f32 1.5, %v2807_v59  ;;  %v5822_v31 = vmul.f32 -1.442695, %v2803_v4  ;;  %6001 = vst.msk [vmem:[%s8778_s28 + $0x120] sm:$0xff] %vm3647_vm6, %v4387_v56  ;;  %v2714_v59 = vmul.f32 %v8798_v24, %v8798_v24  ;;  %v2826_v56 = vand.u32 2147483648, %v8943_v25 }
 0x47f   : > { %v8972_v30 = vadd.f32 1.0, %v6569_v55  ;;  %v8974_v42 = vadd.f32 1e-12, %v2760_v14  ;;  %v6571_v26 = vpop.eup %6570 }
 0x480   : > { %v2809_v22 = vmul.f32 %v6567_v49, %v2808_v34  ;;  %v8978_v57 = vpop.f32.mrf.mxu2  ;;  %v8980_v18 = vpop.f32.mrf.mxu3  ;;  %v2817_v46 = vmul.f32 %v6571_v26, %v8943_v25  ;;  %v9020_v34 = vadd.f32 %v2727_v19, %v2715_v62 }
 0x481   : > { %10766 = vst [vmem:[#allocation56_spill] sm:$0xff] %v8980_v18  ;;  %6572 = vrcp.f32 %v8972_v30  ;;  %v2725_v38 = vmul.f32 %v8978_v57, %v8978_v57  ;;  %v2749_v63 = vmul.f32 %v8980_v18, %v8980_v18  ;;  %vm2977_vm15 = vweird.f32 %v8972_v30 }
 0x482   : > { %6574 = vpow2.f32 %v5822_v31  ;;  %v2810_v60 = vmul.f32 %v2809_v22, %v8915_v54  ;;  %v2818_v44 = vmul.f32 %v6571_v26, %v2817_v46  ;;  %v2981_v46 = vand.u32 2147483647, %v8972_v30 }
 0x483   : > { %6576 = vrsqrt.f32 %v8974_v42  ;;  %v2737_v52 = vadd.f32 %v2725_v38, %v2713_v21  ;;  %vm2835_vm5 = vcmp.eq.f32.partialorder %v8974_v42, inf  ;;  %vm2837_vm9 = vcmp.eq.f32.partialorder %v8974_v42, 0.0 }
 0x484   : > { %v2812_v49 = vsel %vm2811_vm11, %v8915_v54, %v2810_v60  ;;  %v2819_v37 = vmul.f32 0.5, %v2818_v44  ;;  %v9005_v54 = vld [vmem:[%s8521_s26 + $0x248] sm:$0xff]  ;;  %v2983_v44 = vand.u32 2147483648, %v8972_v30  ;;  %vm2982_vm4 = vcmp.eq.f32.partialorder %v2981_v46, 8.507059e+37 }
 0x485   : > { %v2815_v40 = vsel %vm2813_vm12, %v2814_v9, %v2812_v49  ;;  %5942 = vmatmul.msk.f32.gmra.mxu2 %vm3647_vm6, %v9005_v54  ;;  %v2761_v22 = vadd.f32 %v2749_v63, %v2737_v52  ;;  %v9028_v9 = vld [vmem:[%s8521_s26 + $0x128] sm:$0xff]  ;;  %v4028_v49 = vpop.f32.mrf.mxu0  ;;  %v2716_v46 = vmul.f32 %v8824_v51, %v8824_v51 }
 0x486   : > { %v5823_v15 = vmul.f32 -1.442695, %v2815_v40  ;;  %v2820_v2 = vsub.f32 1.5, %v2819_v37 }
 0x487   : > { %v6573_v11 = vpop.eup %6572  ;;  %v9035_v40 = vadd.f32 1e-12, %v2761_v22 }
 0x488   : > { %v6575_v32 = vpop.eup %6574  ;;  %v2973_v16 = vmul.f32 %v6573_v11, %v8972_v30  ;;  %6578 = vpow2.f32 %v5823_v15  ;;  %v9016_v14 = vpop.f32.mrf.mxu2  ;;  %v2821_v20 = vmul.f32 %v6571_v26, %v2820_v2  ;;  %vm2978_vm14 = vweird.f32 %v6573_v11  ;;  %v3566_v26 = vld [vmem:[%s8521_s26 + $0xe8] sm:$0xff] }
 0x489   : > { %10767 = vst [vmem:[#allocation57_spill] sm:$0xff] %v9016_v14  ;;  %v9018_v55 = vpop.f32.mrf.mxu3  ;;  %v6577_v4 = vpop.eup %6576  ;;  %v9022_v31 = vadd.f32 1.0, %v6575_v32  ;;  %v2726_v38 = vmul.f32 %v9016_v14, %v9016_v14  ;;  %v4388_v15 = vadd.f32 %v4028_v49, %v9028_v9  ;;  %5898 = vmatmul.msk.f32.gmra.mxu0 %vm3647_vm6, %v3566_v26  ;;  %vm9051_vm3 = vmor %vm2977_vm15, %vm2978_vm14  ;;  %v2984_v2 = vor.u32 1.1754944e-38, %v2983_v44 }
 0x48a   : > { %10768 = vst [vmem:[#allocation58_spill] sm:$0xff] %v9018_v55  ;;  %v2974_v60 = vsub.f32 1.0, %v2973_v16  ;;  %v2829_v21 = vmul.f32 %v6577_v4, %v8974_v42  ;;  %v2822_v62 = vmul.f32 %v2821_v20, %v8943_v25  ;;  %v9048_v16 = vld [vmem:[%s8521_s26 + $0x250] sm:$0xff]  ;;  %v2728_v44 = vmul.f32 %v8826_v39, %v8826_v39 }
 0x48b   : > { %6580 = vrcp.f32 %v9022_v31  ;;  %6002 = vst.msk [vmem:[%s8778_s28 + $0x128] sm:$0xff] %vm3647_vm6, %v4388_v15  ;;  %v2738_v49 = vadd.f32 %v2726_v38, %v2714_v59  ;;  %v2717_v26 = vmul.f32 %v8835_v17, %v8835_v17  ;;  %v2750_v38 = vmul.f32 %v9018_v55, %v9018_v55 }
 0x48c   : > { %v2975_v12 = vmul.f32 %v6573_v11, %v2974_v60  ;;  %v2830_v19 = vmul.f32 %v6577_v4, %v2829_v21  ;;  %v2824_v63 = vsel %vm2823_vm13, %v8943_v25, %v2822_v62  ;;  %6582 = vrsqrt.f32 %v9035_v40 }
 0x48d   : > { %v2827_v60 = vsel %vm2825_vm2, %v2826_v56, %v2824_v63  ;;  %5943 = vmatmul.msk.f32.gmra.mxu2 %vm3647_vm6, %v9048_v16  ;;  %v9080_v56 = vld [vmem:[%s8521_s26 + $0x130] sm:$0xff]  ;;  %v4031_v15 = vpop.f32.mrf.mxu0  ;;  %v2762_v30 = vadd.f32 %v2750_v38, %v2738_v49  ;;  %v2838_v55 = vand.u32 2147483648, %v8974_v42  ;;  %v2996_v49 = vand.u32 2147483647, %v9022_v31 }
 0x48e   : > { %v6579_v37 = vpop.eup %6578  ;;  %v2976_v52 = vadd.f32 %v6573_v11, %v2975_v12  ;;  %v2831_v32 = vmul.f32 0.5, %v2830_v19  ;;  %v5824_v20 = vmul.f32 -1.442695, %v2827_v60  ;;  %v3567_v60 = vld [vmem:[%s8521_s26 + $0xf0] sm:$0xff]  ;;  %vm2992_vm8 = vweird.f32 %v9022_v31 }
 0x48f   : > { %v9055_v22 = vadd.f32 1.0, %v6579_v37  ;;  %v2729_v37 = vmul.f32 %v8837_v0, %v8837_v0  ;;  %vm2997_vm11 = vcmp.eq.f32.partialorder %v2996_v49, 8.507059e+37  ;;  %vm2847_vm13 = vcmp.eq.f32.partialorder %v9035_v40, inf }
 0x490   : > { %v2980_v25 = vsel %vm9051_vm3, %v6573_v11, %v2976_v52  ;;  %v2832_v21 = vsub.f32 1.5, %v2831_v32  ;;  %vm2849_vm2 = vcmp.eq.f32.partialorder %v9035_v40, 0.0 }
 0x491   : > { %v9063_v12 = vpop.f32.mrf.mxu3  ;;  %v6581_v62 = vpop.eup %6580  ;;  %v9069_v19 = vsel %vm2982_vm4, %v2984_v2, %v2980_v25  ;;  %6584 = vrcp.f32 %v9055_v22  ;;  %v4389_v2 = vadd.f32 %v4031_v15, %v9080_v56  ;;  %5899 = vmatmul.msk.f32.gmra.mxu0 %vm3647_vm6, %v3567_v60  ;;  %vm3007_vm14 = vweird.f32 %v9055_v22 }
 0x492   : > { %10771 = vst [vmem:[#allocation59_spill] sm:$0xff] %v9063_v12  ;;  %v3152_v11 = vmul.f32 %v9069_v19, %v8712_v45  ;;  %v2988_v59 = vmul.f32 %v6581_v62, %v9022_v31  ;;  %6586 = vpow2.f32 %v5824_v20  ;;  %v2833_v52 = vmul.f32 %v6577_v4, %v2832_v21  ;;  %v6583_v63 = vpop.eup %6582 }
 0x493   : > { %v2998_v45 = vand.u32 2147483648, %v9022_v31  ;;  %v2841_v4 = vmul.f32 %v6583_v63, %v9035_v40  ;;  %v2751_v20 = vmul.f32 %v9063_v12, %v9063_v12  ;;  %vm2993_vm7 = vweird.f32 %v6581_v62  ;;  %6003 = vst.msk [vmem:[%s8778_s28 + $0x130] sm:$0xff] %vm3647_vm6, %v4389_v2 }
 0x494   : > { %v2989_v32 = vsub.f32 1.0, %v2988_v59  ;;  %5833 = vmatmul.msk.f32.vlgmr.msrb.gmra.mxu3 %vm1334_vm1, %v3152_v11  ;;  %v2834_v25 = vmul.f32 %v2833_v52, %v8974_v42  ;;  %v9096_v59 = vadd.f32 1e-12, %v2762_v30  ;;  %v9101_v11 = vld [vmem:[%s8521_s26 + $0x258] sm:$0xff]  ;;  %vm2994_vm10 = vmor %vm2992_vm8, %vm2993_vm7 }
 0x495   : > { %v2842_v52 = vmul.f32 %v6583_v63, %v2841_v4  ;;  %5944 = vmatmul.msk.f32.gmra.mxu2 %vm3647_vm6, %v9101_v11  ;;  %v2999_v30 = vor.u32 1.1754944e-38, %v2998_v45  ;;  %v4034_v48 = vpop.f32.mrf.mxu0 }
 0x496   : > { %v2990_v21 = vmul.f32 %v6581_v62, %v2989_v32  ;;  %v2836_v15 = vsel %vm2835_vm5, %v8974_v42, %v2834_v25  ;;  %6588 = vrsqrt.f32 %v9096_v59  ;;  %v2763_v42 = vadd.f32 %v2751_v20, %v9020_v34 }
 0x497   : > { %v9103_v38 = vpop.eup %6584  ;;  %v2839_v60 = vsel %vm2837_vm9, %v2838_v55, %v2836_v15  ;;  %v2843_v25 = vmul.f32 0.5, %v2842_v52  ;;  %v2740_v55 = vadd.f32 %v2728_v44, %v2716_v46  ;;  %v9126_v52 = vadd.f32 %v2729_v37, %v2717_v26 }
 0x498   : > { %v2991_v32 = vadd.f32 %v6581_v62, %v2990_v21  ;;  %v3003_v2 = vmul.f32 %v9103_v38, %v9055_v22  ;;  %v6587_v31 = vpop.eup %6586  ;;  %v5825_v18 = vmul.f32 -1.442695, %v2839_v60  ;;  %v2718_v60 = vmul.f32 %v8846_v23, %v8846_v23 }
 0x499   : > { %v9114_v12 = vpop.f32.mrf.mxu3  ;;  %v9119_v21 = vadd.f32 1.0, %v6587_v31  ;;  %v2844_v50 = vsub.f32 1.5, %v2843_v25  ;;  %v2730_v46 = vmul.f32 %v8848_v5, %v8848_v5  ;;  %vm3008_vm12 = vweird.f32 %v9103_v38 }
 0x49a   : > { %10772 = vst [vmem:[#allocation60_spill] sm:$0xff] %v9114_v12  ;;  %v2995_v4 = vsel %vm2994_vm10, %v6581_v62, %v2991_v32  ;;  %v3004_v45 = vsub.f32 1.0, %v3003_v2  ;;  %6590 = vpow2.f32 %v5825_v18  ;;  %v3568_v62 = vld [vmem:[%s8521_s26 + $0xf8] sm:$0xff]  ;;  %v9136_v44 = vadd.f32 1e-12, %v2763_v42  ;;  %v9146_v32 = vld [vmem:[%s8521_s26 + $0x260] sm:$0xff]  ;;  %vm9167_vm15 = vmor %vm3007_vm14, %vm3008_vm12 }
 0x49b   : > { %v9121_v15 = vsel %vm2997_vm11, %v2999_v30, %v2995_v4  ;;  %6592 = vrcp.f32 %v9119_v21  ;;  %v2845_v18 = vmul.f32 %v6583_v63, %v2844_v50  ;;  %5900 = vmatmul.msk.f32.gmra.mxu0 %vm3647_vm6, %v3568_v62  ;;  %v2752_v37 = vmul.f32 %v9114_v12, %v9114_v12 }
 0x49c   : > { %v3005_v34 = vmul.f32 %v9103_v38, %v3004_v45  ;;  %v3153_v20 = vmul.f32 %v9121_v15, %v8725_v7  ;;  %v4390_v49 = vadd.f32 %v4034_v48, %v9124_v47  ;;  %v6589_v30 = vpop.eup %6588  ;;  %v3013_v50 = vand.u32 2147483648, %v9055_v22 }
 0x49d   : > { %v2846_v63 = vmul.f32 %v2845_v18, %v9035_v40  ;;  %6594 = vrsqrt.f32 %v9136_v44  ;;  %5945 = vmatmul.msk.f32.gmra.mxu2 %vm3647_vm6, %v9146_v32  ;;  %v3011_v7 = vand.u32 2147483647, %v9055_v22  ;;  %v2850_v48 = vand.u32 2147483648, %v9035_v40 }
 0x49e   : > { %v3006_v26 = vadd.f32 %v9103_v38, %v3005_v34  ;;  %v2853_v2 = vmul.f32 %v6589_v30, %v9096_v59  ;;  %5834 = vmatmul.msk.f32.gmra.mxu3 %vm1334_vm1, %v3153_v20  ;;  %6004 = vst.msk [vmem:[%s8778_s28 + $0x138] sm:$0xff] %vm3647_vm6, %v4390_v49  ;;  %v9163_v42 = vadd.f32 %v2730_v46, %v2718_v60  ;;  %v4037_v20 = vpop.f32.mrf.mxu0  ;;  %v3014_v49 = vor.u32 1.1754944e-38, %v3013_v50 }
 0x49f   : > { %v2848_v22 = vsel %vm2847_vm13, %v9035_v40, %v2846_v63  ;;  %v2764_v45 = vadd.f32 %v2752_v37, %v2740_v55  ;;  %v9186_v55 = vmul.f32 %v8857_v41, %v8857_v41  ;;  %vm3012_vm3 = vcmp.eq.f32.partialorder %v3011_v7, 8.507059e+37 }
 0x4a0   : > { %v6591_v25 = vpop.eup %6590  ;;  %v3010_v62 = vsel %vm9167_vm15, %v9103_v38, %v3006_v26  ;;  %v2851_v46 = vsel %vm2849_vm2, %v2850_v48, %v2848_v22  ;;  %v2854_v18 = vmul.f32 %v6589_v30, %v2853_v2  ;;  %v9190_v38 = vmul.f32 %v8859_v61, %v8859_v61  ;;  %v9194_v26 = vld [vmem:[%s8521_s26 + $0x100] sm:$0xff]  ;;  %v9208_v22 = vld [vmem:[%s8521_s26 + $0x268] sm:$0xff] }
 0x4a1   : > { %v9159_v31 = vpop.f32.mrf.mxu3  ;;  %v9173_v34 = vpop.eup %6592  ;;  %v9178_v60 = vadd.f32 1.0, %v6591_v25  ;;  %v5826_v12 = vmul.f32 -1.442695, %v2851_v46  ;;  %v9182_v40 = vadd.f32 1e-12, %v2764_v45  ;;  %10776 = vst [vmem:[#allocation62_spill] sm:$0xff] %v9194_v26  ;;  %v9196_v50 = vsel %vm3012_vm3, %v3014_v49, %v3010_v62 }
 0x4a2   : > { %10773 = vst [vmem:[#allocation61_spill] sm:$0xff] %v9159_v31  ;;  %v3018_v63 = vmul.f32 %v9173_v34, %v9119_v21  ;;  %v2855_v2 = vmul.f32 0.5, %v2854_v18  ;;  %v9199_v25 = vld [vmem:[%s8521_s26 + $0x140] sm:$0xff]  ;;  %v3026_v4 = vand.u32 2147483647, %v9119_v21  ;;  %vm2859_vm4 = vcmp.eq.f32.partialorder %v9096_v59, inf }
 0x4a3   : > { %6596 = vrcp.f32 %v9178_v60  ;;  %v6595_v37 = vpop.eup %6594  ;;  %5901 = vmatmul.msk.f32.gmra.mxu0 %vm3647_vm6, %v9194_v26  ;;  %vm2861_vm5 = vcmp.eq.f32.partialorder %v9096_v59, 0.0  ;;  %v2753_v18 = vmul.f32 %v9159_v31, %v9159_v31  ;;  %v3154_v49 = vmul.f32 %v9196_v50, %v8738_v6 }
 0x4a4   : > { %v3019_v48 = vsub.f32 1.0, %v3018_v63  ;;  %6598 = vpow2.f32 %v5826_v12  ;;  %v2865_v7 = vmul.f32 %v6595_v37, %v9136_v44  ;;  %v3028_v12 = vand.u32 2147483648, %v9119_v21 }
 0x4a5   : > { %6600 = vrsqrt.f32 %v9182_v40  ;;  %v2856_v62 = vsub.f32 1.5, %v2855_v2  ;;  %5946 = vmatmul.msk.f32.gmra.mxu2 %vm3647_vm6, %v9208_v22  ;;  %vm3023_vm7 = vweird.f32 %v9173_v34  ;;  %v2862_v1 = vand.u32 2147483648, %v9096_v59 }
 0x4a6   : > { %v3020_v45 = vmul.f32 %v9173_v34, %v3019_v48  ;;  %v2866_v46 = vmul.f32 %v6595_v37, %v2865_v7  ;;  %v4391_v48 = vadd.f32 %v4037_v20, %v9199_v25  ;;  %vm3022_vm8 = vweird.f32 %v9119_v21  ;;  %5835 = vmatmul.msk.f32.gmra.mxu3 %vm1334_vm1, %v3154_v49  ;;  %v9236_v20 = vpop.f32.mrf.mxu0  ;;  %v9254_v49 = vld [vmem:[%s8521_s26 + $0x108] sm:$0xff] }
 0x4a7   : > { %v2857_v2 = vmul.f32 %v6589_v30, %v2856_v62  ;;  %vm9228_vm9 = vcmp.eq.f32.partialorder %v3026_v4, 8.507059e+37  ;;  %v2765_v31 = vadd.f32 %v2753_v18, %v9126_v52  ;;  %vm2871_vm10 = vcmp.eq.f32.partialorder %v9136_v44, inf  ;;  %vm9244_vm11 = vmor %vm3022_vm8, %vm3023_vm7  ;;  %10782 = vst [vmem:[#allocation64_spill] sm:$0xff] %v9254_v49 }
 0x4a8   : > { %v3021_v53 = vadd.f32 %v9173_v34, %v3020_v45  ;;  %v2867_v6 = vmul.f32 0.5, %v2866_v46  ;;  %6005 = vst.msk [vmem:[%s8778_s28 + $0x140] sm:$0xff] %vm3647_vm6, %v4391_v48  ;;  %v3029_v45 = vor.u32 1.1754944e-38, %v3028_v12  ;;  %vm2873_vm12 = vcmp.eq.f32.partialorder %v9136_v44, 0.0 }
 0x4a9   : > { %v9219_v63 = vpop.f32.mrf.mxu3  ;;  %v9225_v61 = vpop.eup %6596  ;;  %v2858_v21 = vmul.f32 %v2857_v2, %v9096_v59  ;;  %v9251_v12 = vadd.f32 1e-12, %v2765_v31  ;;  %v3043_v31 = vand.u32 2147483648, %v9178_v60  ;;  %vm3037_vm14 = vweird.f32 %v9178_v60 }
 0x4aa   : > { %10777 = vst [vmem:[#allocation63_spill] sm:$0xff] %v9219_v63  ;;  %v6599_v30 = vpop.eup %6598  ;;  %v3033_v62 = vmul.f32 %v9225_v61, %v9178_v60  ;;  %v2868_v18 = vsub.f32 1.5, %v2867_v6  ;;  %v3025_v48 = vsel %vm9244_vm11, %v9173_v34, %v3021_v53  ;;  %vm3038_vm13 = vweird.f32 %v9225_v61  ;;  %v9271_v53 = vld [vmem:[%s8521_s26 + $0x270] sm:$0xff] }
 0x4ab   : > { %v6601_v4 = vpop.eup %6600  ;;  %v9248_v46 = vadd.f32 1.0, %v6599_v30  ;;  %v2860_v5 = vsel %vm2859_vm4, %v9096_v59, %v2858_v21  ;;  %5902 = vmatmul.msk.f32.gmra.mxu0 %vm3647_vm6, %v9254_v49  ;;  %v2754_v6 = vmul.f32 %v9219_v63, %v9219_v63  ;;  %v9280_v52 = vsel %vm9228_vm9, %v3029_v45, %v3025_v48  ;;  %vm9291_vm15 = vmor %vm3037_vm14, %vm3038_vm13 }
 0x4ac   : > { %v3034_v2 = vsub.f32 1.0, %v3033_v62  ;;  %v2877_v26 = vmul.f32 %v6601_v4, %v9182_v40  ;;  %v2863_v30 = vsel %vm2861_vm5, %v2862_v1, %v2860_v5  ;;  %v2869_v62 = vmul.f32 %v6595_v37, %v2868_v18 }
 0x4ad   : > { %6602 = vrcp.f32 %v9248_v46  ;;  %5947 = vmatmul.msk.f32.gmra.mxu2 %vm3647_vm6, %v9271_v53  ;;  %v3041_v49 = vand.u32 2147483647, %v9178_v60  ;;  %v5827_v0 = vmul.f32 -1.442695, %v2863_v30  ;;  %v3044_v37 = vor.u32 1.1754944e-38, %v3043_v31 }
 0x4ae   : > { %v3035_v34 = vmul.f32 %v9225_v61, %v3034_v2  ;;  %v2878_v21 = vmul.f32 %v6601_v4, %v2877_v26  ;;  %6604 = vrsqrt.f32 %v9251_v12  ;;  %v2870_v5 = vmul.f32 %v2869_v62, %v9136_v44  ;;  %v4043_v18 = vpop.f32.mrf.mxu0 }
 0x4af   : > { %6606 = vpow2.f32 %v5827_v0  ;;  %v2874_v7 = vand.u32 2147483648, %v9136_v44  ;;  %v2766_v45 = vadd.f32 %v2754_v6, %v9163_v42  ;;  %vm3042_vm2 = vcmp.eq.f32.partialorder %v3041_v49, 8.507059e+37 }
 0x4b0   : > { %v3036_v63 = vadd.f32 %v9225_v61, %v3035_v34  ;;  %v2879_v1 = vmul.f32 0.5, %v2878_v21  ;;  %v2872_v48 = vsel %vm2871_vm10, %v9136_v44, %v2870_v5  ;;  %v3155_v34 = vmul.f32 %v9280_v52, %v8751_v33  ;;  %v9324_v44 = vld [vmem:[%s8521_s26 + $0x148] sm:$0xff] }
 0x4b1   : > { %v9287_v59 = vpop.f32.mrf.mxu3  ;;  %v2875_v0 = vsel %vm2873_vm12, %v2874_v7, %v2872_v48  ;;  %v9309_v42 = vadd.f32 1e-12, %v2766_v45  ;;  %v2743_v6 = vadd.f32 %v9190_v38, %v9186_v55  ;;  %vm2883_vm3 = vcmp.eq.f32.partialorder %v9182_v40, inf  ;;  %v9332_v55 = vld [vmem:[%s8521_s26 + $0x150] sm:$0xff]  ;;  %v9335_v38 = vld [vmem:[%s8521_s26 + $0x278] sm:$0xff] }
 0x4b2   : > { %10783 = vst [vmem:[#allocation65_spill] sm:$0xff] %v9287_v59  ;;  %v3040_v60 = vsel %vm9291_vm15, %v9225_v61, %v3036_v63  ;;  %v2880_v2 = vsub.f32 1.5, %v2879_v1  ;;  %v2755_v61 = vmul.f32 %v9287_v59, %v9287_v59  ;;  %v9314_v63 = vld [vmem:[%s8521_s26 + $0x110] sm:$0xff]  ;;  %v5828_v49 = vmul.f32 -1.442695, %v2875_v0  ;;  %5836 = vmatmul.msk.f32.gmra.mxu3 %vm1334_vm1, %v3155_v34 }
 0x4b3   : > { %v9305_v31 = vpop.eup %6602  ;;  %10786 = vst [vmem:[#allocation66_spill] sm:$0xff] %v9314_v63  ;;  %v9318_v30 = vsel %vm3042_vm2, %v3044_v37, %v3040_v60  ;;  %5903 = vmatmul.msk.f32.gmra.mxu0 %vm3647_vm6, %v9314_v63  ;;  %vm2885_vm4 = vcmp.eq.f32.partialorder %v9182_v40, 0.0  ;;  %6608 = vrsqrt.f32 %v9309_v42  ;;  %v4392_v45 = vadd.f32 %v9236_v20, %v9324_v44 }
 0x4b4   : > { %v3048_v33 = vmul.f32 %v9305_v31, %v9248_v46  ;;  %v6605_v62 = vpop.eup %6604  ;;  %v2881_v21 = vmul.f32 %v6601_v4, %v2880_v2  ;;  %vm3053_vm5 = vweird.f32 %v9305_v31  ;;  %6610 = vpow2.f32 %v5828_v49 }
 0x4b5   : > { %v2889_v1 = vmul.f32 %v6605_v62, %v9251_v12  ;;  %5948 = vmatmul.msk.f32.gmra.mxu2 %vm3647_vm6, %v9335_v38  ;;  %v6607_v4 = vpop.eup %6606  ;;  %v2767_v37 = vadd.f32 %v2755_v61, %v2743_v6  ;;  %v3156_v7 = vmul.f32 %v9318_v30, %v8766_v13  ;;  %v4393_v34 = vadd.f32 %v4043_v18, %v9332_v55 }
 0x4b6   : > { %v3049_v5 = vsub.f32 1.0, %v3048_v33  ;;  %v2882_v26 = vmul.f32 %v2881_v21, %v9182_v40  ;;  %v9347_v48 = vadd.f32 1.0, %v6607_v4  ;;  %v3058_v0 = vand.u32 2147483648, %v9248_v46  ;;  %6006 = vst.msk [vmem:[%s8778_s28 + $0x148] sm:$0xff] %vm3647_vm6, %v4392_v45  ;;  %v4046_v20 = vpop.f32.mrf.mxu0  ;;  %v9375_v4 = vld [vmem:[%s8521_s26 + $0x118] sm:$0xff] }
 0x4b7   : > { %v2890_v2 = vmul.f32 %v6605_v62, %v2889_v1  ;;  %v2886_v13 = vand.u32 2147483648, %v9182_v40  ;;  %v9355_v6 = vadd.f32 1e-12, %v2767_v37  ;;  %vm3052_vm7 = vweird.f32 %v9248_v46  ;;  %6007 = vst.msk [vmem:[%s8778_s28 + $0x150] sm:$0xff] %vm3647_vm6, %v4393_v34  ;;  %v9387_v34 = vld [vmem:[%s8521_s26 + $0x280] sm:$0xff] }
 0x4b8   : > { %v3050_v60 = vmul.f32 %v9305_v31, %v3049_v5  ;;  %v2884_v61 = vsel %vm2883_vm3, %v9182_v40, %v2882_v26  ;;  %v3056_v18 = vand.u32 2147483647, %v9248_v46  ;;  %6612 = vrcp.f32 %v9347_v48  ;;  %vm9367_vm8 = vmor %vm3052_vm7, %vm3053_vm5  ;;  %10789 = vst [vmem:[#allocation67_spill] sm:$0xff] %v9375_v4 }
 0x4b9   : > { %v6609_v49 = vpop.eup %6608  ;;  %v2887_v5 = vsel %vm2885_vm4, %v2886_v13, %v2884_v61  ;;  %v2891_v1 = vmul.f32 0.5, %v2890_v2  ;;  %6614 = vrsqrt.f32 %v9355_v6  ;;  %v3059_v40 = vor.u32 1.1754944e-38, %v3058_v0 }
 0x4ba   : > { %v3051_v33 = vadd.f32 %v9305_v31, %v3050_v60  ;;  %v6611_v46 = vpop.eup %6610  ;;  %v5829_v37 = vmul.f32 -1.442695, %v2887_v5  ;;  %v2901_v45 = vmul.f32 %v6609_v49, %v9309_v42  ;;  %5837 = vmatmul.msk.f32.gmra.mxu3 %vm1334_vm1, %v3156_v7  ;;  %vm3057_vm9 = vcmp.eq.f32.partialorder %v3056_v18, 8.507059e+37  ;;  %v9400_v18 = vld [vmem:[%s8521_s26 + $0x158] sm:$0xff] }
 0x4bb   : > { %5904 = vmatmul.msk.f32.gmra.mxu0 %vm3647_vm6, %v9375_v4  ;;  %v9384_v60 = vadd.f32 1.0, %v6611_v46  ;;  %v2892_v2 = vsub.f32 1.5, %v2891_v1  ;;  %vm2895_vm10 = vcmp.eq.f32.partialorder %v9251_v12, inf  ;;  %vm2897_vm11 = vcmp.eq.f32.partialorder %v9251_v12, 0.0  ;;  %v9410_v46 = vld [vmem:[%s8521_s26 + $0x160] sm:$0xff] }
 0x4bc   : > { %v3055_v26 = vsel %vm9367_vm8, %v9305_v31, %v3051_v33  ;;  %6616 = vpow2.f32 %v5829_v37  ;;  %v2902_v61 = vmul.f32 %v6609_v49, %v2901_v45  ;;  %v2898_v13 = vand.u32 2147483648, %v9251_v12  ;;  %v4181_v37 = vpop.f32.mrf.mxu2 }
 0x4bd   : > { %5949 = vmatmul.msk.f32.gmra.mxu2 %vm3647_vm6, %v9387_v34  ;;  %v9391_v31 = vsel %vm3057_vm9, %v3059_v40, %v3055_v26  ;;  %6618 = vrcp.f32 %v9384_v60  ;;  %v2893_v0 = vmul.f32 %v6605_v62, %v2892_v2  ;;  %v3071_v1 = vand.u32 2147483647, %v9347_v48  ;;  %v9413_v26 = vld [vmem:[%s8521_s26 + $0x2c0] sm:$0xff] }
 0x4be   : > { %v9395_v7 = vpop.eup %6612  ;;  %v2903_v33 = vmul.f32 0.5, %v2902_v61  ;;  %vm2907_vm12 = vcmp.eq.f32.partialorder %v9309_v42, inf  ;;  %vm2909_vm13 = vcmp.eq.f32.partialorder %v9309_v42, 0.0  ;;  %v4049_v62 = vpop.f32.mrf.mxu0  ;;  %v3157_v61 = vmul.f32 %v9391_v31, %v8785_v28 }
 0x4bf   : > { %v9402_v21 = vpop.eup %6614  ;;  %v3063_v5 = vmul.f32 %v9395_v7, %v9347_v48  ;;  %v2894_v45 = vmul.f32 %v2893_v0, %v9251_v12  ;;  %v4394_v4 = vadd.f32 %v4046_v20, %v9400_v18  ;;  %v4395_v63 = vadd.f32 %v4049_v62, %v9410_v46 }
 0x4c0   : > { %v2904_v40 = vsub.f32 1.5, %v2903_v33  ;;  %v2913_v2 = vmul.f32 %v9402_v21, %v9355_v6  ;;  %v4491_v39 = vadd.f32 %v4181_v37, %v9413_v26  ;;  %vm3068_vm14 = vweird.f32 %v9395_v7 }
 0x4c1   : > { %v3064_v59 = vsub.f32 1.0, %v3063_v5  ;;  %v3073_v0 = vand.u32 2147483648, %v9347_v48  ;;  %v2896_v33 = vsel %vm2895_vm10, %v9251_v12, %v2894_v45  ;;  %6008 = vst.msk [vmem:[%s8778_s28 + $0x158] sm:$0xff] %vm3647_vm6, %v4394_v4  ;;  %v9440_v45 = vld [vmem:[%s8521_s26 + $0x288] sm:$0xff]  ;;  %vm3067_vm15 = vweird.f32 %v9347_v48 }
 0x4c2   : > { %v6617_v10 = vpop.eup %6616  ;;  %v2905_v28 = vmul.f32 %v6609_v49, %v2904_v40  ;;  %5838 = vmatmul.msk.f32.gmra.mxu3 %vm1334_vm1, %v3157_v61  ;;  %v2899_v37 = vsel %vm2897_vm11, %v2898_v13, %v2896_v33  ;;  %v2914_v14 = vmul.f32 %v9402_v21, %v2913_v2  ;;  %v2910_v61 = vand.u32 2147483648, %v9309_v42  ;;  %6009 = vst.msk [vmem:[%s8778_s28 + $0x160] sm:$0xff] %vm3647_vm6, %v4395_v63  ;;  %vm3069_vm3 = vmor %vm3067_vm15, %vm3068_vm14  ;;  %v9468_v33 = vld [vmem:[%s8521_s26 + $0x168] sm:$0xff] }
 0x4c3   : > { %5905 = vmatmul.msk.f32.gmra.mxu0 %vm3647_vm6, %v8986_v36  ;;  %v6619_v20 = vpop.eup %6618  ;;  %v3065_v5 = vmul.f32 %v9395_v7, %v3064_v59  ;;  %v9432_v62 = vadd.f32 1.0, %v6617_v10  ;;  %v5830_v40 = vmul.f32 -1.442695, %v2899_v37  ;;  %vm9451_vm2 = vcmp.eq.f32.partialorder %v3071_v1, 8.507059e+37  ;;  %6053 = vst.msk [vmem:[%s8778_s28 + $0x2c0] sm:$0xff] %vm3647_vm6, %v4491_v39 }
 0x4c4   : > { %v3078_v49 = vmul.f32 %v6619_v20, %v9384_v60  ;;  %v2906_v36 = vmul.f32 %v2905_v28, %v9309_v42  ;;  %v3074_v59 = vor.u32 1.1754944e-38, %v3073_v0  ;;  %v3088_v13 = vand.u32 2147483648, %v9384_v60  ;;  %v9471_v28 = vld [vmem:[%s8521_s26 + $0x2c8] sm:$0xff]  ;;  %v4184_v0 = vpop.f32.mrf.mxu2 }
 0x4c5   : > { %5950 = vmatmul.msk.f32.gmra.mxu2 %vm3647_vm6, %v9440_v45  ;;  %v3066_v10 = vadd.f32 %v9395_v7, %v3065_v5  ;;  %6620 = vrcp.f32 %v9432_v62  ;;  %v2915_v2 = vmul.f32 0.5, %v2914_v14  ;;  %vm3083_vm4 = vweird.f32 %v6619_v20 }
 0x4c6   : > { %v3079_v63 = vsub.f32 1.0, %v3078_v49  ;;  %6622 = vpow2.f32 %v5830_v40  ;;  %v2908_v4 = vsel %vm2907_vm12, %v9309_v42, %v2906_v36  ;;  %v4052_v39 = vpop.f32.mrf.mxu0  ;;  %v3086_v49 = vand.u32 2147483647, %v9384_v60 }
 0x4c7   : > { %v3070_v48 = vsel %vm3069_vm3, %v9395_v7, %v3066_v10  ;;  %v2911_v1 = vsel %vm2909_vm13, %v2910_v61, %v2908_v4  ;;  %v2916_v42 = vsub.f32 1.5, %v2915_v2  ;;  %v4396_v40 = vadd.f32 %v4052_v39, %v9468_v33 }
 0x4c8   : > { %v9475_v5 = vsel %vm9451_vm2, %v3074_v59, %v3070_v48  ;;  %v3080_v37 = vmul.f32 %v6619_v20, %v3079_v63  ;;  %v5831_v7 = vmul.f32 -1.442695, %v2911_v1  ;;  %vm3082_vm5 = vweird.f32 %v9384_v60 }
 0x4c9   : > { %v3158_v14 = vmul.f32 %v9475_v5, %v8798_v24  ;;  %v4492_v61 = vadd.f32 %v4184_v0, %v9471_v28  ;;  %vm3084_vm7 = vmor %vm3082_vm5, %vm3083_vm4  ;;  %v2917_v12 = vmul.f32 %v9402_v21, %v2916_v42  ;;  %6010 = vst.msk [vmem:[%s8778_s28 + $0x168] sm:$0xff] %vm3647_vm6, %v4396_v40  ;;  %v9490_v24 = vld [vmem:[%s8521_s26 + $0x290] sm:$0xff]  ;;  %v3089_v63 = vor.u32 1.1754944e-38, %v3088_v13 }
 0x4ca   : > { %v3081_v36 = vadd.f32 %v6619_v20, %v3080_v37  ;;  %6624 = vpow2.f32 %v5831_v7  ;;  %vm3087_vm8 = vcmp.eq.f32.partialorder %v3086_v49, 8.507059e+37  ;;  %vm2919_vm9 = vcmp.eq.f32.partialorder %v9355_v6, inf  ;;  %v9508_v13 = vld [vmem:[%s8521_s26 + $0x2d0] sm:$0xff] }
 0x4cb   : > { %5906 = vmatmul.msk.f32.gmra.mxu0 %vm3647_vm6, %v9028_v9  ;;  %v6621_v10 = vpop.eup %6620  ;;  %5839 = vmatmul.msk.f32.gmra.mxu3 %vm1334_vm1, %v3158_v14  ;;  %6054 = vst.msk [vmem:[%s8778_s28 + $0x2c8] sm:$0xff] %vm3647_vm6, %v4492_v61  ;;  %v2918_v21 = vmul.f32 %v2917_v12, %v9355_v6  ;;  %vm2921_vm10 = vcmp.eq.f32.partialorder %v9355_v6, 0.0  ;;  %v3103_v2 = vand.u32 2147483648, %v9432_v62  ;;  %v2922_v39 = vand.u32 2147483648, %v9355_v6 }
 0x4cc   : > { %v6623_v59 = vpop.eup %6622  ;;  %v3085_v60 = vsel %vm3084_vm7, %v6619_v20, %v3081_v36  ;;  %v3093_v4 = vmul.f32 %v6621_v10, %v9432_v62  ;;  %v9505_v20 = vld [vmem:[%s8521_s26 + $0x170] sm:$0xff]  ;;  %vm3098_vm11 = vweird.f32 %v6621_v10  ;;  %v4187_v37 = vpop.f32.mrf.mxu2  ;;  %v3101_v36 = vand.u32 2147483647, %v9432_v62 }
 0x4cd   : > { %5951 = vmatmul.msk.f32.gmra.mxu2 %vm3647_vm6, %v9490_v24  ;;  %v9497_v9 = vadd.f32 1.0, %v6623_v59  ;;  %v9500_v48 = vsel %vm3087_vm8, %v3089_v63, %v3085_v60  ;;  %v2920_v42 = vsel %vm2919_vm9, %v9355_v6, %v2918_v21  ;;  %v4493_v40 = vadd.f32 %v4187_v37, %v9508_v13  ;;  %v9539_v21 = vld [vmem:[%s8521_s26 + $0x178] sm:$0xff] }
 0x4ce   : > { %v3094_v1 = vsub.f32 1.0, %v3093_v4  ;;  %v4055_v0 = vpop.f32.mrf.mxu0  ;;  %v2923_v12 = vsel %vm2921_vm10, %v2922_v39, %v2920_v42  ;;  %v3159_v59 = vmul.f32 %v9500_v48, %v8812_v35  ;;  %vm3097_vm12 = vweird.f32 %v9432_v62  ;;  %v9534_v35 = vld [vmem:[%s8521_s26 + $0x298] sm:$0xff] }
 0x4cf   : > { %6626 = vrcp.f32 %v9497_v9  ;;  %v4397_v14 = vadd.f32 %v4055_v0, %v9505_v20  ;;  %v5832_v63 = vmul.f32 -1.442695, %v2923_v12  ;;  %vm3099_vm13 = vmor %vm3097_vm12, %vm3098_vm11  ;;  %6055 = vst.msk [vmem:[%s8778_s28 + $0x2d0] sm:$0xff] %vm3647_vm6, %v4493_v40  ;;  %v3104_v4 = vor.u32 1.1754944e-38, %v3103_v2 }
 0x4d0   : > { %v6625_v7 = vpop.eup %6624  ;;  %v3095_v49 = vmul.f32 %v6621_v10, %v3094_v1  ;;  %vm3102_vm14 = vcmp.eq.f32.partialorder %v3101_v36, 8.507059e+37  ;;  %v3118_v42 = vand.u32 2147483648, %v9497_v9  ;;  %v3116_v12 = vand.u32 2147483647, %v9497_v9 }
 0x4d1   : > { %v9517_v61 = vadd.f32 1.0, %v6625_v7  ;;  %6011 = vst.msk [vmem:[%s8778_s28 + $0x170] sm:$0xff] %vm3647_vm6, %v4397_v14  ;;  %vm3112_vm2 = vweird.f32 %v9497_v9 }
 0x4d2   : > { %v3096_v60 = vadd.f32 %v6621_v10, %v3095_v49  ;;  %vm3117_vm4 = vcmp.eq.f32.partialorder %v3116_v12, 8.507059e+37 }
 0x4d3   : > { %5907 = vmatmul.msk.f32.gmra.mxu0 %vm3647_vm6, %v9080_v56  ;;  %6628 = vrcp.f32 %v9517_v61  ;;  %5840 = vmatmul.msk.f32.gmra.mxu3 %vm1334_vm1, %v3159_v59  ;;  %v9542_v56 = vld [vmem:[%s8521_s26 + $0x2d8] sm:$0xff]  ;;  %vm3127_vm7 = vweird.f32 %v9517_v61 }
 0x4d4   : > { %v3100_v6 = vsel %vm3099_vm13, %v6621_v10, %v3096_v60  ;;  %6630 = vpow2.f32 %v5832_v63  ;;  %v4190_v37 = vpop.f32.mrf.mxu2  ;;  %v9562_v63 = vld [vmem:[%s8521_s26 + $0x2a0] sm:$0xff] }
 0x4d5   : > { %5952 = vmatmul.msk.f32.gmra.mxu2 %vm3647_vm6, %v9534_v35  ;;  %v6627_v62 = vpop.eup %6626  ;;  %v9544_v1 = vsel %vm3102_vm14, %v3104_v4, %v3100_v6  ;;  %v4494_v7 = vadd.f32 %v4190_v37, %v9542_v56  ;;  %v3119_v4 = vor.u32 1.1754944e-38, %v3118_v42 }
 0x4d6   : > { %v3108_v39 = vmul.f32 %v6627_v62, %v9497_v9  ;;  %v4058_v0 = vpop.f32.mrf.mxu0  ;;  %v3160_v14 = vmul.f32 %v9544_v1, %v8824_v51  ;;  %vm3113_vm15 = vweird.f32 %v6627_v62 }
 0x4d7   : > { %v4398_v2 = vadd.f32 %v4058_v0, %v9539_v21  ;;  %6056 = vst.msk [vmem:[%s8778_s28 + $0x2d8] sm:$0xff] %vm3647_vm6, %v4494_v7  ;;  %vm3114_vm3 = vmor %vm3112_vm2, %vm3113_vm15  ;;  %v9568_v0 = vld [vmem:[%s8521_s26 + $0x2e0] sm:$0xff]  ;;  %v3133_v7 = vand.u32 2147483648, %v9517_v61 }
 0x4d8   : > { %v3109_v10 = vsub.f32 1.0, %v3108_v39 }
 0x4d9   : > { %v6629_v49 = vpop.eup %6628  ;;  %6012 = vst.msk [vmem:[%s8778_s28 + $0x178] sm:$0xff] %vm3647_vm6, %v4398_v2 }
 0x4da   : > { %v6631_v40 = vpop.eup %6630  ;;  %v3110_v36 = vmul.f32 %v6627_v62, %v3109_v10  ;;  %v3123_v59 = vmul.f32 %v6629_v49, %v9517_v61  ;;  %vm3128_vm5 = vweird.f32 %v6629_v49 }
 0x4db   : > { %5908 = vmatmul.msk.f32.gmra.mxu0 %vm3647_vm6, %v9124_v47  ;;  %v2971_v60 = vadd.f32 1.0, %v6631_v40  ;;  %5841 = vmatmul.msk.f32.gmra.mxu3 %vm1334_vm1, %v3160_v14  ;;  %vm3129_vm8 = vmor %vm3127_vm7, %vm3128_vm5 }
 0x4dc   : > { %v3111_v51 = vadd.f32 %v6627_v62, %v3110_v36  ;;  %v3124_v6 = vsub.f32 1.0, %v3123_v59  ;;  %v4193_v9 = vpop.f32.mrf.mxu2 }
 0x4dd   : > { %5953 = vmatmul.msk.f32.gmra.mxu2 %vm3647_vm6, %v9562_v63  ;;  %6632 = vrcp.f32 %v2971_v60  ;;  %v4495_v40 = vadd.f32 %v4193_v9, %v9568_v0  ;;  %v3146_v9 = vand.u32 2147483647, %v2971_v60  ;;  %vm3142_vm11 = vweird.f32 %v2971_v60 }
 0x4de   : > { %v3115_v39 = vsel %vm3114_vm3, %v6627_v62, %v3111_v51  ;;  %v3125_v47 = vmul.f32 %v6629_v49, %v3124_v6  ;;  %v4061_v10 = vpop.f32.mrf.mxu0  ;;  %v3131_v62 = vand.u32 2147483647, %v9517_v61  ;;  %v3134_v61 = vor.u32 1.1754944e-38, %v3133_v7 }
 0x4df   : > { %v9570_v37 = vsel %vm3117_vm4, %v3119_v4, %v3115_v39  ;;  %v4462_v14 = vadd.f32 %v4061_v10, %v8970_v29  ;;  %6057 = vst.msk [vmem:[%s8778_s28 + $0x2e0] sm:$0xff] %vm3647_vm6, %v4495_v40  ;;  %v9587_v29 = vld [vmem:[%s8521_s26 + $0x2a8] sm:$0xff]  ;;  %vm3147_vm13 = vcmp.eq.f32.partialorder %v3146_v9, 8.507059e+37  ;;  %v3166_v9 = vmul.f32 %v9196_v50, %v8900_v27 }
 0x4e0   : > { %v3126_v2 = vadd.f32 %v6629_v49, %v3125_v47  ;;  %v3161_v42 = vmul.f32 %v9570_v37, %v8835_v17  ;;  %vm3132_vm9 = vcmp.eq.f32.partialorder %v3131_v62, 8.507059e+37  ;;  %v9592_v17 = vld [vmem:[%s8521_s26 + $0x2e8] sm:$0xff] }
 0x4e1   : > { %6037 = vst.msk [vmem:[%s8778_s28 + $0x240] sm:$0xff] %vm3647_vm6, %v4462_v14 }
 0x4e2   : > { %v3130_v12 = vsel %vm3129_vm8, %v6629_v49, %v3126_v2  ;;  %v3148_v49 = vand.u32 2147483648, %v2971_v60 }
 0x4e3   : > { %5909 = vmatmul.msk.f32.gmra.mxu0 %vm3647_vm6, %v9199_v25  ;;  %v6633_v36 = vpop.eup %6632  ;;  %5842 = vmatmul.msk.f32.gmra.mxu3 %vm1334_vm1, %v3161_v42  ;;  %v9594_v51 = vsel %vm3132_vm9, %v3134_v61, %v3130_v12  ;;  %v9629_v61 = vld [vmem:[%s8521_s26 + $0x2b8] sm:$0xff] }
 0x4e4   : > { %v3138_v59 = vmul.f32 %v6633_v36, %v2971_v60  ;;  %v4196_v4 = vpop.f32.mrf.mxu2  ;;  %vm3143_vm10 = vweird.f32 %v6633_v36  ;;  %v3162_v2 = vmul.f32 %v9594_v51, %v8846_v23  ;;  %v3149_v62 = vor.u32 1.1754944e-38, %v3148_v49  ;;  %v9613_v23 = vld [vmem:[%s8521_s26 + $0x2f0] sm:$0xff] }
 0x4e5   : > { %5954 = vmatmul.msk.f32.gmra.mxu2 %vm3647_vm6, %v9587_v29  ;;  %v4496_v10 = vadd.f32 %v4196_v4, %v9592_v17  ;;  %vm3144_vm12 = vmor %vm3142_vm11, %vm3143_vm10 }
 0x4e6   : > { %v3139_v25 = vsub.f32 1.0, %v3138_v59  ;;  %v4064_v6 = vpop.f32.mrf.mxu0 }
 0x4e7   : > { %v4463_v47 = vadd.f32 %v4064_v6, %v9005_v54  ;;  %6058 = vst.msk [vmem:[%s8778_s28 + $0x2e8] sm:$0xff] %vm3647_vm6, %v4496_v10  ;;  %v9608_v54 = vld [vmem:[%s8521_s26 + $0x2b0] sm:$0xff]  ;;  %v6648_v10 = vld [vmem:[%s8521_s26 + $0xc8] sm:$0xff] }
 0x4e8   : > { %v3140_v39 = vmul.f32 %v6633_v36, %v3139_v25 }
 0x4e9   : > { %6038 = vst.msk [vmem:[%s8778_s28 + $0x248] sm:$0xff] %vm3647_vm6, %v4463_v47  ;;  %v3165_v47 = vmul.f32 %v9121_v15, %v8884_v8 }
 0x4ea   : > { %v3141_v7 = vadd.f32 %v6633_v36, %v3140_v39  ;;  %v6647_v39 = vld [vmem:[%s8521_s26 + $0xc0] sm:$0xff] }
 0x4eb   : > { %5910 = vmatmul.msk.f32.gmra.mxu0 %vm3647_vm6, %v9324_v44  ;;  %5843 = vmatmul.msk.f32.gmra.mxu3 %vm1334_vm1, %v3162_v2  ;;  %v6649_v2 = vld [vmem:[%s8521_s26 + $0xd0] sm:$0xff] }
 0x4ec   : > { %v3145_v14 = vsel %vm3144_vm12, %v6633_v36, %v3141_v7  ;;  %v4199_v42 = vpop.f32.mrf.mxu2  ;;  %v3167_v7 = vmul.f32 %v9280_v52, %v8921_v43 }
 0x4ed   : > { %5955 = vmatmul.msk.f32.gmra.mxu2 %vm3647_vm6, %v9608_v54  ;;  %v9615_v44 = vsel %vm3147_vm13, %v3149_v62, %v3145_v14  ;;  %v4497_v12 = vadd.f32 %v4199_v42, %v9613_v23  ;;  %v10792_v14 = vld [vmem:[#allocation10_spill] sm:$0xff] }
 0x4ee   : > { %v4067_v60 = vpop.f32.mrf.mxu0  ;;  %v3163_v36 = vmul.f32 %v9615_v44, %v8857_v41 }
 0x4ef   : > { %v4464_v40 = vadd.f32 %v4067_v60, %v9048_v16  ;;  %6059 = vst.msk [vmem:[%s8778_s28 + $0x2f0] sm:$0xff] %vm3647_vm6, %v4497_v12  ;;  %v9634_v16 = vld [vmem:[%s8521_s26 + $0x2f8] sm:$0xff]  ;;  %v3168_v60 = vmul.f32 %v9318_v30, %v8945_v3  ;;  %v6652_v3 = vld [vmem:[%s7561_s14 + $0x8] sm:$0xff] }
 0x4f1   : > { %6039 = vst.msk [vmem:[%s8778_s28 + $0x250] sm:$0xff] %vm3647_vm6, %v4464_v40  ;;  %v6651_v40 = vld [vmem:[%s8521_s26 + $0xd8] sm:$0xff] }
 0x4f3   : > { %5911 = vmatmul.msk.f32.gmra.mxu0 %vm3647_vm6, %v9332_v55  ;;  %5844 = vmatmul.msk.f32.gmra.mxu3 %vm1334_vm1, %v3163_v36  ;;  %v3164_v55 = vmul.f32 %v9069_v19, %v8867_v58 }
 0x4f4   : > { %v4202_v41 = vpop.f32.mrf.mxu2 }
 0x4f5   : > { %5956 = vmatmul.msk.f32.gmra.mxu2 %vm3647_vm6, %v9629_v61  ;;  %v4498_v49 = vadd.f32 %v4202_v41, %v9634_v16  ;;  %v3169_v41 = vmul.f32 %v9391_v31, %v8978_v57 }
 0x4f6   : > { %v4070_v59 = vpop.f32.mrf.mxu0 }
 0x4f7   : > { %v4465_v25 = vadd.f32 %v4070_v59, %v9101_v11  ;;  %6060 = vst.msk [vmem:[%s8778_s28 + $0x2f8] sm:$0xff] %vm3647_vm6, %v4498_v49 }
 0x4f9   : > { %6040 = vst.msk [vmem:[%s8778_s28 + $0x258] sm:$0xff] %vm3647_vm6, %v4465_v25 }
 0x4fb   : > { %5912 = vmatmul.msk.f32.gmra.mxu0 %vm3647_vm6, %v9400_v18  ;;  %5845 = vmatmul.msk.f32.gmra.mxu3 %vm1334_vm1, %v3164_v55 }
 0x4fc   : > { %v4205_v6 = vpop.f32.mrf.mxu2 }
 0x4fd   : > { %5957 = vmatmul.msk.f32.gmra.mxu2 %vm3647_vm6, %v9413_v26  ;;  %v4362_v58 = vadd.f32 %v6647_v39, %v4205_v6  ;;  %v6654_v6 = vld [vmem:[%s7561_s14 + $0x10] sm:$0xff] }
 0x4fe   : > { %v4073_v11 = vpop.f32.mrf.mxu0 }
 0x4ff   : > { %v4466_v4 = vadd.f32 %v4073_v11, %v9146_v32  ;;  %5989 = vst.msk [vmem:[%s8778_s28 + $0xc0] sm:$0xff] %vm3647_vm6, %v4362_v58  ;;  %v6653_v11 = vld [vmem:[%s8521_s26 + $0xe0] sm:$0xff]  ;;  %v10795_v58 = vld [vmem:[#allocation57_spill] sm:$0xff] }
 0x501   : > { %6041 = vst.msk [vmem:[%s8778_s28 + $0x260] sm:$0xff] %vm3647_vm6, %v4466_v4  ;;  %v10794_v4 = vld [vmem:[#allocation12_spill] sm:$0xff] }
 0x502   : > { %v3431_v39 = vadd.f32 %v6654_v6, %v10794_v4  ;;  %v9803_v4 = vld [vmem:[%s8521_s26 + $0x308] sm:$0xff] }
 0x503   : > { %5913 = vmatmul.msk.f32.gmra.mxu0 %vm3647_vm6, %v9410_v46  ;;  %5846 = vmatmul.msk.f32.gmra.mxu3 %vm1334_vm1, %v3165_v47  ;;  %v3170_v47 = vmul.f32 %v9475_v5, %v10795_v58  ;;  %v10802_v58 = vld [vmem:[#allocation15_spill] sm:$0xff] }
 0x505   : > { %5958 = vmatmul.msk.f32.gmra.mxu2 %vm3647_vm6, %v9471_v28 }
 0x506   : > { %v4076_v32 = vpop.f32.mrf.mxu0 }
 0x507   : > { %v4467_v26 = vadd.f32 %v4076_v32, %v9208_v22 }
 0x508   : > { %v4208_v18 = vpop.f32.mrf.mxu2 }
 0x509   : > { %v4363_v8 = vadd.f32 %v6648_v10, %v4208_v18  ;;  %6042 = vst.msk [vmem:[%s8778_s28 + $0x268] sm:$0xff] %vm3647_vm6, %v4467_v26 }
 0x50b   : > { %5914 = vmatmul.msk.f32.gmra.mxu0 %vm3647_vm6, %v9468_v33  ;;  %5847 = vmatmul.msk.f32.gmra.mxu3 %vm1334_vm1, %v3166_v9  ;;  %5990 = vst.msk [vmem:[%s8778_s28 + $0xc8] sm:$0xff] %vm3647_vm6, %v4363_v8  ;;  %v6650_v33 = vld [vmem:[%s7561_s14] sm:$0xff] }
 0x50c   : > { %v3429_v62 = vadd.f32 %v6650_v33, %v10792_v14  ;;  %v10797_v33 = vld [vmem:[#allocation13_spill] sm:$0xff] }
 0x50d   : > { %5959 = vmatmul.msk.f32.gmra.mxu2 %vm3647_vm6, %v9508_v13 }
 0x50e   : > { %v4079_v22 = vpop.f32.mrf.mxu0 }
 0x50f   : > { %v4468_v28 = vadd.f32 %v4079_v22, %v9271_v53 }
 0x510   : > { %v4211_v46 = vpop.f32.mrf.mxu2 }
 0x511   : > { %v4364_v27 = vadd.f32 %v6649_v2, %v4211_v46  ;;  %6043 = vst.msk [vmem:[%s8778_s28 + $0x270] sm:$0xff] %vm3647_vm6, %v4468_v28  ;;  %v9752_v28 = vld [vmem:[%s8521_s26 + $0x190] sm:$0xff] }
 0x513   : > { %5915 = vmatmul.msk.f32.gmra.mxu0 %vm3647_vm6, %v9505_v20  ;;  %5848 = vmatmul.msk.f32.gmra.mxu3 %vm1334_vm1, %v3167_v7  ;;  %5991 = vst.msk [vmem:[%s8778_s28 + $0xd0] sm:$0xff] %vm3647_vm6, %v4364_v27  ;;  %v6656_v27 = vld [vmem:[%s8521_s26 + $0xf0] sm:$0xff] }
 0x515   : > { %5960 = vmatmul.msk.f32.gmra.mxu2 %vm3647_vm6, %v9542_v56  ;;  %v10793_v56 = vld [vmem:[#allocation11_spill] sm:$0xff] }
 0x517   : > { %v3321_v53 = vpop.f32.mrf.mxu3 }
 0x518   : > { %v3465_v43 = vadd.f32 %v3429_v62, %v3321_v53  ;;  %v4082_v20 = vpop.f32.mrf.mxu0  ;;  %v4214_v13 = vpop.f32.mrf.mxu2  ;;  %v10798_v53 = vld [vmem:[#allocation47_spill] sm:$0xff] }
 0x519   : > { %v4469_v42 = vadd.f32 %v4082_v20, %v9335_v38  ;;  %v4365_v12 = vadd.f32 %v6651_v40, %v4214_v13  ;;  %v3430_v38 = vadd.f32 %v6652_v3, %v10793_v56  ;;  %v6658_v40 = vld [vmem:[%s8521_s26 + $0xf8] sm:$0xff]  ;;  %v6659_v3 = vld [vmem:[%s7561_s14 + $0x20] sm:$0xff] }
 0x51a   : > { %3501 = vst.msk [vmem:[%s9692_s1] sm:$0xff] %vm1139_vm0, %v3465_v43  ;;  %v3172_v43 = vmul.f32 %v9544_v1, %v10798_v53  ;;  %v10799_v56 = vld [vmem:[#allocation14_spill] sm:$0xff] }
 0x51b   : > { %5916 = vmatmul.msk.f32.gmra.mxu0 %vm3647_vm6, %v9539_v21  ;;  %5849 = vmatmul.msk.f32.gmra.mxu3 %vm1334_vm1, %v3168_v60  ;;  %6044 = vst.msk [vmem:[%s8778_s28 + $0x278] sm:$0xff] %vm3647_vm6, %v4469_v42  ;;  %v9712_v21 = vld [vmem:[%s8521_s26 + $0x180] sm:$0xff]  ;;  %v9772_v60 = vld [vmem:[%s8521_s26 + $0x198] sm:$0xff] }
 0x51c   : > { %5992 = vst.msk [vmem:[%s8778_s28 + $0xd8] sm:$0xff] %vm3647_vm6, %v4365_v12  ;;  %v9780_v12 = vld [vmem:[%s8521_s26 + $0x300] sm:$0xff] }
 0x51d   : > { %5961 = vmatmul.msk.f32.gmra.mxu2 %vm3647_vm6, %v9568_v0 }
 0x520   : > { %v4085_v59 = vpop.f32.mrf.mxu0  ;;  %v4217_v55 = vpop.f32.mrf.mxu2 }
 0x521   : > { %v3324_v36 = vpop.f32.mrf.mxu3  ;;  %v4470_v49 = vadd.f32 %v4085_v59, %v9387_v34  ;;  %v4366_v0 = vadd.f32 %v6653_v11, %v4217_v55  ;;  %v9730_v34 = vld [vmem:[%s8521_s26 + $0x188] sm:$0xff]  ;;  %v10800_v59 = vld [vmem:[#allocation48_spill] sm:$0xff]  ;;  %v9795_v55 = vld [vmem:[%s8521_s26 + $0x1a0] sm:$0xff] }
 0x522   : > { %v3466_v25 = vadd.f32 %v3430_v38, %v3324_v36  ;;  %v3433_v38 = vadd.f32 %v6659_v3, %v10799_v56  ;;  %v6660_v11 = vld [vmem:[%s8521_s26 + $0x60] sm:$0xff]  ;;  %v9849_v56 = vld [vmem:[%s8521_s26 + $0x318] sm:$0xff] }
 0x523   : > { %5917 = vmatmul.msk.f32.gmra.mxu0 %vm3647_vm6, %v9712_v21  ;;  %5850 = vmatmul.msk.f32.gmra.mxu3 %vm1334_vm1, %v3169_v41  ;;  %6045 = vst.msk [vmem:[%s8778_s28 + $0x280] sm:$0xff] %vm3647_vm6, %v4470_v49  ;;  %v3173_v41 = vmul.f32 %v9570_v37, %v10800_v59 }
 0x524   : > { %3502 = vst.msk [vmem:[%s9692_s1 + $0x8] sm:$0xff] %vm1139_vm0, %v3466_v25 }
 0x525   : > { %5962 = vmatmul.msk.f32.gmra.mxu2 %vm3647_vm6, %v9592_v17  ;;  %5993 = vst.msk [vmem:[%s8778_s28 + $0xe0] sm:$0xff] %vm3647_vm6, %v4366_v0  ;;  %v6655_v17 = vld [vmem:[%s8521_s26 + $0xe8] sm:$0xff] }
 0x528   : > { %v4088_v57 = vpop.f32.mrf.mxu0  ;;  %v4220_v18 = vpop.f32.mrf.mxu2 }
 0x529   : > { %v4471_v32 = vadd.f32 %v4088_v57, %v9440_v45  ;;  %v3327_v26 = vpop.f32.mrf.mxu3  ;;  %v4367_v10 = vadd.f32 %v6655_v17, %v4220_v18  ;;  %v10796_v45 = vld [vmem:[#allocation46_spill] sm:$0xff] }
 0x52a   : > { %v3467_v8 = vadd.f32 %v3431_v39, %v3327_v26  ;;  %v3171_v9 = vmul.f32 %v9500_v48, %v10796_v45  ;;  %v10801_v57 = vld [vmem:[#allocation62_spill] sm:$0xff]  ;;  %v6661_v39 = vld [vmem:[%s7561_s14 + $0x28] sm:$0xff]  ;;  %v10803_v26 = vld [vmem:[#allocation49_spill] sm:$0xff] }
 0x52b   : > { %5918 = vmatmul.msk.f32.gmra.mxu0 %vm3647_vm6, %v9730_v34  ;;  %5851 = vmatmul.msk.f32.gmra.mxu3 %vm1334_vm1, %v3170_v47  ;;  %6046 = vst.msk [vmem:[%s8778_s28 + $0x288] sm:$0xff] %vm3647_vm6, %v4471_v32  ;;  %v3434_v47 = vadd.f32 %v6661_v39, %v10802_v58  ;;  %v3174_v17 = vmul.f32 %v9594_v51, %v10803_v26  ;;  %v9818_v45 = vld [vmem:[%s8521_s26 + $0x1a8] sm:$0xff] }
 0x52c   : > { %5994 = vst.msk [vmem:[%s8778_s28 + $0xe8] sm:$0xff] %vm3647_vm6, %v4367_v10  ;;  %v10810_v58 = vld [vmem:[#allocation67_spill] sm:$0xff] }
 0x52d   : > { %5963 = vmatmul.msk.f32.gmra.mxu2 %vm3647_vm6, %v9613_v23  ;;  %3503 = vst.msk [vmem:[%s9692_s1 + $0x10] sm:$0xff] %vm1139_vm0, %v3467_v8  ;;  %v6657_v23 = vld [vmem:[%s7561_s14 + $0x18] sm:$0xff] }
 0x52e   : > { %v3432_v14 = vadd.f32 %v6657_v23, %v10797_v33  ;;  %v10805_v23 = vld [vmem:[#allocation16_spill] sm:$0xff] }
 0x530   : > { %v4091_v22 = vpop.f32.mrf.mxu0  ;;  %v4223_v46 = vpop.f32.mrf.mxu2 }
 0x531   : > { %v4472_v2 = vadd.f32 %v4091_v22, %v9490_v24  ;;  %v4368_v7 = vadd.f32 %v6656_v27, %v4223_v46  ;;  %v10804_v46 = vld [vmem:[#allocation64_spill] sm:$0xff] }
 0x532   : > { %v9826_v27 = vld [vmem:[%s8521_s26 + $0x310] sm:$0xff] }
 0x533   : > { %5919 = vmatmul.msk.f32.gmra.mxu0 %vm3647_vm6, %v9752_v28  ;;  %5852 = vmatmul.msk.f32.gmra.mxu3 %vm1334_vm1, %v3171_v9  ;;  %6047 = vst.msk [vmem:[%s8778_s28 + $0x290] sm:$0xff] %vm3647_vm6, %v4472_v2  ;;  %v6662_v9 = vld [vmem:[%s8521_s26 + $0x68] sm:$0xff] }
 0x534   : > { %5995 = vst.msk [vmem:[%s8778_s28 + $0xf0] sm:$0xff] %vm3647_vm6, %v4368_v7  ;;  %v6663_v7 = vld [vmem:[%s7561_s14 + $0x30] sm:$0xff] }
 0x535   : > { %5964 = vmatmul.msk.f32.gmra.mxu2 %vm3647_vm6, %v9634_v16  ;;  %v3330_v24 = vpop.f32.mrf.mxu3  ;;  %v3435_v33 = vadd.f32 %v6663_v7, %v10805_v23  ;;  %v9890_v7 = vld [vmem:[%s8521_s26 + $0x1c0] sm:$0xff] }
 0x536   : > { %v3468_v62 = vadd.f32 %v3432_v14, %v3330_v24  ;;  %v6668_v23 = vld [vmem:[%s8521_s26 + $0x80] sm:$0xff] }
 0x538   : > { %3504 = vst.msk [vmem:[%s9692_s1 + $0x18] sm:$0xff] %vm1139_vm0, %v3468_v62  ;;  %v4094_v20 = vpop.f32.mrf.mxu0  ;;  %v4226_v13 = vpop.f32.mrf.mxu2  ;;  %v10806_v62 = vld [vmem:[#allocation50_spill] sm:$0xff] }
 0x539   : > { %v4473_v42 = vadd.f32 %v4094_v20, %v9534_v35  ;;  %v4369_v16 = vadd.f32 %v6658_v40, %v4226_v13  ;;  %v3175_v53 = vmul.f32 %v9615_v44, %v10806_v62  ;;  %v9841_v13 = vld [vmem:[%s8521_s26 + $0x1b0] sm:$0xff]  ;;  %v10813_v62 = vld [vmem:[#allocation19_spill] sm:$0xff] }
 0x53b   : > { %5920 = vmatmul.msk.f32.gmra.mxu0 %vm3647_vm6, %v9772_v60  ;;  %5853 = vmatmul.msk.f32.gmra.mxu3 %vm1334_vm1, %v3172_v43  ;;  %6048 = vst.msk [vmem:[%s8778_s28 + $0x298] sm:$0xff] %vm3647_vm6, %v4473_v42  ;;  %v6664_v42 = vld [vmem:[%s8521_s26 + $0x70] sm:$0xff] }
 0x53c   : > { %5996 = vst.msk [vmem:[%s8778_s28 + $0xf8] sm:$0xff] %vm3647_vm6, %v4369_v16  ;;  %v10807_v16 = vld [vmem:[#allocation66_spill] sm:$0xff] }
 0x53d   : > { %5965 = vmatmul.msk.f32.gmra.mxu2 %vm3647_vm6, %v9780_v12  ;;  %v3333_v35 = vpop.f32.mrf.mxu3 }
 0x53e   : > { %v3469_v36 = vadd.f32 %v3433_v38, %v3333_v35  ;;  %v6665_v38 = vld [vmem:[%s7561_s14 + $0x38] sm:$0xff] }
 0x53f   : > { %v10808_v35 = vld [vmem:[#allocation17_spill] sm:$0xff] }
 0x540   : > { %3505 = vst.msk [vmem:[%s9692_s1 + $0x20] sm:$0xff] %vm1139_vm0, %v3469_v36  ;;  %v4097_v25 = vpop.f32.mrf.mxu0  ;;  %v4229_v49 = vpop.f32.mrf.mxu2  ;;  %v3436_v36 = vadd.f32 %v6665_v38, %v10808_v35  ;;  %v9916_v35 = vld [vmem:[%s8521_s26 + $0x1c8] sm:$0xff] }
 0x541   : > { %v4337_v0 = vadd.f32 %v6660_v11, %v4097_v25  ;;  %v4370_v6 = vadd.f32 %v4229_v49, %v10801_v57  ;;  %v10809_v25 = vld [vmem:[#allocation51_spill] sm:$0xff]  ;;  %v9864_v57 = vld [vmem:[%s8521_s26 + $0x1b8] sm:$0xff] }
 0x542   : > { %v3176_v49 = vmul.f32 %v9069_v19, %v10809_v25  ;;  %v9872_v19 = vld [vmem:[%s8521_s26 + $0x320] sm:$0xff]  ;;  %v6671_v25 = vld [vmem:[%s7561_s14 + $0x50] sm:$0xff] }
 0x543   : > { %5921 = vmatmul.msk.f32.gmra.mxu0 %vm3647_vm6, %v9795_v55  ;;  %5854 = vmatmul.msk.f32.gmra.mxu3 %vm1334_vm1, %v3173_v41  ;;  %5977 = vst.msk [vmem:[%s8778_s28 + $0x60] sm:$0xff] %vm3647_vm6, %v4337_v0 }
 0x544   : > { %5997 = vst.msk [vmem:[%s8778_s28 + $0x100] sm:$0xff] %vm3647_vm6, %v4370_v6  ;;  %v6666_v6 = vld [vmem:[%s8521_s26 + $0x78] sm:$0xff] }
 0x545   : > { %5966 = vmatmul.msk.f32.gmra.mxu2 %vm3647_vm6, %v9803_v4  ;;  %v3336_v32 = vpop.f32.mrf.mxu3 }
 0x546   : > { %v3470_v18 = vadd.f32 %v3434_v47, %v3336_v32  ;;  %v6667_v32 = vld [vmem:[%s7561_s14 + $0x40] sm:$0xff] }
 0x548   : > { %3506 = vst.msk [vmem:[%s9692_s1 + $0x28] sm:$0xff] %vm1139_vm0, %v3470_v18  ;;  %v4100_v10 = vpop.f32.mrf.mxu0  ;;  %v4232_v8 = vpop.f32.mrf.mxu2  ;;  %v10811_v18 = vld [vmem:[#allocation18_spill] sm:$0xff] }
 0x549   : > { %v4338_v22 = vadd.f32 %v6662_v9, %v4100_v10  ;;  %v4371_v2 = vadd.f32 %v4232_v8, %v10804_v46  ;;  %v3437_v26 = vadd.f32 %v6667_v32, %v10811_v18  ;;  %v10812_v8 = vld [vmem:[#allocation52_spill] sm:$0xff]  ;;  %v9887_v46 = vld [vmem:[%s8521_s26 + $0x1e0] sm:$0xff] }
 0x54a   : > { %v3177_v9 = vmul.f32 %v9121_v15, %v10812_v8  ;;  %v9898_v15 = vld [vmem:[%s8521_s26 + $0x328] sm:$0xff]  ;;  %v9939_v32 = vld [vmem:[%s8521_s26 + $0x1f0] sm:$0xff] }
 0x54b   : > { %5922 = vmatmul.msk.f32.gmra.mxu0 %vm3647_vm6, %v9818_v45  ;;  %5855 = vmatmul.msk.f32.gmra.mxu3 %vm1334_vm1, %v3174_v17  ;;  %5978 = vst.msk [vmem:[%s8778_s28 + $0x68] sm:$0xff] %vm3647_vm6, %v4338_v22 }
 0x54c   : > { %5998 = vst.msk [vmem:[%s8778_s28 + $0x108] sm:$0xff] %vm3647_vm6, %v4371_v2 }
 0x54d   : > { %5967 = vmatmul.msk.f32.gmra.mxu2 %vm3647_vm6, %v9826_v27 }
 0x54e   : > { %v3339_v14 = vpop.f32.mrf.mxu3 }
 0x54f   : > { %v3471_v24 = vadd.f32 %v3435_v33, %v3339_v14 }
 0x550   : > { %v4103_v43 = vpop.f32.mrf.mxu0  ;;  %v4235_v20 = vpop.f32.mrf.mxu2 }
 0x551   : > { %3507 = vst.msk [vmem:[%s9692_s1 + $0x30] sm:$0xff] %vm1139_vm0, %v3471_v24  ;;  %v4339_v40 = vadd.f32 %v6664_v42, %v4103_v43  ;;  %v4372_v3 = vadd.f32 %v4235_v20, %v10807_v16  ;;  %v6669_v24 = vld [vmem:[%s7561_s14 + $0x48] sm:$0xff]  ;;  %v10814_v42 = vld [vmem:[#allocation53_spill] sm:$0xff] }
 0x553   : > { %5923 = vmatmul.msk.f32.gmra.mxu0 %vm3647_vm6, %v9841_v13  ;;  %5856 = vmatmul.msk.f32.gmra.mxu3 %vm1334_vm1, %v3175_v53  ;;  %5979 = vst.msk [vmem:[%s8778_s28 + $0x70] sm:$0xff] %vm3647_vm6, %v4339_v40  ;;  %v3438_v53 = vadd.f32 %v6669_v24, %v10813_v62  ;;  %v3178_v40 = vmul.f32 %v9196_v50, %v10814_v42  ;;  %v9924_v50 = vld [vmem:[%s8521_s26 + $0x330] sm:$0xff]  ;;  %v6674_v42 = vld [vmem:[%s8521_s26 + $0x98] sm:$0xff] }
 0x554   : > { %5999 = vst.msk [vmem:[%s8778_s28 + $0x110] sm:$0xff] %vm3647_vm6, %v4372_v3  ;;  %v9913_v3 = vld [vmem:[%s8521_s26 + $0x1e8] sm:$0xff] }
 0x555   : > { %5968 = vmatmul.msk.f32.gmra.mxu2 %vm3647_vm6, %v9849_v56 }
 0x556   : > { %v3342_v59 = vpop.f32.mrf.mxu3 }
 0x557   : > { %v3472_v41 = vadd.f32 %v3436_v36, %v3342_v59  ;;  %v6670_v36 = vld [vmem:[%s8521_s26 + $0x88] sm:$0xff] }
 0x558   : > { %v4106_v11 = vpop.f32.mrf.mxu0  ;;  %v4238_v0 = vpop.f32.mrf.mxu2 }
 0x559   : > { %3508 = vst.msk [vmem:[%s9692_s1 + $0x38] sm:$0xff] %vm1139_vm0, %v3472_v41  ;;  %v4340_v39 = vadd.f32 %v6666_v6, %v4106_v11  ;;  %v4373_v47 = vadd.f32 %v4238_v0, %v10810_v58 }
 0x55b   : > { %5924 = vmatmul.msk.f32.gmra.mxu0 %vm3647_vm6, %v9864_v57  ;;  %5857 = vmatmul.msk.f32.gmra.mxu3 %vm1334_vm1, %v3176_v49  ;;  %5980 = vst.msk [vmem:[%s8778_s28 + $0x78] sm:$0xff] %vm3647_vm6, %v4340_v39  ;;  %v10815_v49 = vld [vmem:[#allocation20_spill] sm:$0xff]  ;;  %v10816_v39 = vld [vmem:[#allocation54_spill] sm:$0xff] }
 0x55c   : > { %6000 = vst.msk [vmem:[%s8778_s28 + $0x118] sm:$0xff] %vm3647_vm6, %v4373_v47  ;;  %v3439_v11 = vadd.f32 %v6671_v25, %v10815_v49  ;;  %v3179_v58 = vmul.f32 %v9280_v52, %v10816_v39  ;;  %v9950_v52 = vld [vmem:[%s8521_s26 + $0x338] sm:$0xff]  ;;  %v10820_v49 = vld [vmem:[#allocation56_spill] sm:$0xff]  ;;  %v6676_v39 = vld [vmem:[%s8521_s26 + $0xa0] sm:$0xff] }
 0x55d   : > { %5969 = vmatmul.msk.f32.gmra.mxu2 %vm3647_vm6, %v9872_v19 }
 0x55e   : > { %v3345_v17 = vpop.f32.mrf.mxu3 }
 0x55f   : > { %v3473_v10 = vadd.f32 %v3437_v26, %v3345_v17  ;;  %v9942_v26 = vld [vmem:[%s8521_s26 + $0x1d0] sm:$0xff] }
 0x560   : > { %v4109_v22 = vpop.f32.mrf.mxu0  ;;  %v4241_v2 = vpop.f32.mrf.mxu2  ;;  %v6672_v17 = vld [vmem:[%s8521_s26 + $0x90] sm:$0xff] }
 0x561   : > { %3509 = vst.msk [vmem:[%s9692_s1 + $0x40] sm:$0xff] %vm1139_vm0, %v3473_v10  ;;  %v4341_v33 = vadd.f32 %v6668_v23, %v4109_v22  ;;  %v4437_v14 = vadd.f32 %v4241_v2, %v9887_v46  ;;  %v10817_v22 = vld [vmem:[#allocation21_spill] sm:$0xff] }
 0x563   : > { %5925 = vmatmul.msk.f32.gmra.mxu0 %vm3647_vm6, %v9890_v7  ;;  %5858 = vmatmul.msk.f32.gmra.mxu3 %vm1334_vm1, %v3177_v9  ;;  %5981 = vst.msk [vmem:[%s8778_s28 + $0x80] sm:$0xff] %vm3647_vm6, %v4341_v33  ;;  %v6673_v9 = vld [vmem:[%s7561_s14 + $0x58] sm:$0xff] }
 0x564   : > { %6025 = vst.msk [vmem:[%s8778_s28 + $0x1e0] sm:$0xff] %vm3647_vm6, %v4437_v14  ;;  %v3440_v2 = vadd.f32 %v6673_v9, %v10817_v22  ;;  %v10818_v14 = vld [vmem:[#allocation55_spill] sm:$0xff]  ;;  %v10822_v22 = vld [vmem:[#allocation58_spill] sm:$0xff] }
 0x565   : > { %5970 = vmatmul.msk.f32.gmra.mxu2 %vm3647_vm6, %v9898_v15  ;;  %v3180_v24 = vmul.f32 %v9318_v30, %v10818_v14  ;;  %v9976_v30 = vld [vmem:[%s8521_s26 + $0x340] sm:$0xff]  ;;  %v6679_v14 = vld [vmem:[%s8521_s26 + $0xa8] sm:$0xff] }
 0x566   : > { %v3348_v43 = vpop.f32.mrf.mxu3 }
 0x567   : > { %v3474_v20 = vadd.f32 %v3438_v53, %v3348_v43  ;;  %v9965_v53 = vld [vmem:[%s8521_s26 + $0x1f8] sm:$0xff] }
 0x568   : > { %v4112_v16 = vpop.f32.mrf.mxu0  ;;  %v4244_v38 = vpop.f32.mrf.mxu2 }
 0x569   : > { %3510 = vst.msk [vmem:[%s9692_s1 + $0x48] sm:$0xff] %vm1139_vm0, %v3474_v20  ;;  %v4342_v59 = vadd.f32 %v6670_v36, %v4112_v16  ;;  %v4438_v41 = vadd.f32 %v4244_v38, %v9913_v3  ;;  %v9968_v20 = vld [vmem:[%s8521_s26 + $0x1d8] sm:$0xff]  ;;  %v6675_v38 = vld [vmem:[%s7561_s14 + $0x60] sm:$0xff] }
 0x56a   : > { %v10819_v36 = vld [vmem:[#allocation22_spill] sm:$0xff] }
 0x56b   : > { %5926 = vmatmul.msk.f32.gmra.mxu0 %vm3647_vm6, %v9916_v35  ;;  %5859 = vmatmul.msk.f32.gmra.mxu3 %vm1334_vm1, %v3178_v40  ;;  %5982 = vst.msk [vmem:[%s8778_s28 + $0x88] sm:$0xff] %vm3647_vm6, %v4342_v59  ;;  %v3441_v59 = vadd.f32 %v6675_v38, %v10819_v36  ;;  %v10824_v36 = vld [vmem:[#allocation59_spill] sm:$0xff] }
 0x56c   : > { %6026 = vst.msk [vmem:[%s8778_s28 + $0x1e8] sm:$0xff] %vm3647_vm6, %v4438_v41 }
 0x56d   : > { %5971 = vmatmul.msk.f32.gmra.mxu2 %vm3647_vm6, %v9924_v50 }
 0x56e   : > { %v3351_v0 = vpop.f32.mrf.mxu3 }
 0x56f   : > { %v3475_v6 = vadd.f32 %v3439_v11, %v3351_v0  ;;  %v3181_v11 = vmul.f32 %v9391_v31, %v10820_v49  ;;  %v6678_v31 = vld [vmem:[%s7561_s14 + $0x68] sm:$0xff]  ;;  %v6682_v49 = vld [vmem:[%s8521_s26 + $0xb0] sm:$0xff] }
 0x570   : > { %v4115_v47 = vpop.f32.mrf.mxu0  ;;  %v4247_v18 = vpop.f32.mrf.mxu2 }
 0x571   : > { %3511 = vst.msk [vmem:[%s9692_s1 + $0x50] sm:$0xff] %vm1139_vm0, %v3475_v6  ;;  %v4343_v10 = vadd.f32 %v6672_v17, %v4115_v47  ;;  %v4439_v8 = vadd.f32 %v4247_v18, %v9939_v32  ;;  %v6677_v47 = vld [vmem:[%s8521_s26 + $0x200] sm:$0xff]  ;;  %v9996_v17 = vld [vmem:[%s8521_s26 + $0x348] sm:$0xff] }
 0x573   : > { %5927 = vmatmul.msk.f32.gmra.mxu0 %vm3647_vm6, %v9942_v26  ;;  %5860 = vmatmul.msk.f32.gmra.mxu3 %vm1334_vm1, %v3179_v58  ;;  %5983 = vst.msk [vmem:[%s8778_s28 + $0x90] sm:$0xff] %vm3647_vm6, %v4343_v10  ;;  %v10821_v10 = vld [vmem:[#allocation23_spill] sm:$0xff] }
 0x574   : > { %6027 = vst.msk [vmem:[%s8778_s28 + $0x1f0] sm:$0xff] %vm3647_vm6, %v4439_v8  ;;  %v3442_v8 = vadd.f32 %v6678_v31, %v10821_v10  ;;  %v10826_v31 = vld [vmem:[#allocation60_spill] sm:$0xff] }
 0x575   : > { %5972 = vmatmul.msk.f32.gmra.mxu2 %vm3647_vm6, %v9950_v52  ;;  %v3184_v10 = vmul.f32 %v9544_v1, %v10826_v31  ;;  %v6687_v1 = vld [vmem:[%s7561_s14 + $0x80] sm:$0xff] }
 0x576   : > { %v3354_v23 = vpop.f32.mrf.mxu3 }
 0x577   : > { %v3476_v33 = vadd.f32 %v3440_v2, %v3354_v23  ;;  %v3182_v2 = vmul.f32 %v9475_v5, %v10822_v22  ;;  %v6681_v5 = vld [vmem:[%s7561_s14 + $0x70] sm:$0xff] }
 0x578   : > { %v4118_v62 = vpop.f32.mrf.mxu0  ;;  %v4250_v43 = vpop.f32.mrf.mxu2 }
 0x579   : > { %3512 = vst.msk [vmem:[%s9692_s1 + $0x58] sm:$0xff] %vm1139_vm0, %v3476_v33  ;;  %v4344_v40 = vadd.f32 %v6674_v42, %v4118_v62  ;;  %v4440_v16 = vadd.f32 %v4250_v43, %v9965_v53  ;;  %v6680_v62 = vld [vmem:[%s8521_s26 + $0x208] sm:$0xff]  ;;  %v10016_v42 = vld [vmem:[%s8521_s26 + $0x350] sm:$0xff] }
 0x57b   : > { %5928 = vmatmul.msk.f32.gmra.mxu0 %vm3647_vm6, %v9968_v20  ;;  %5861 = vmatmul.msk.f32.gmra.mxu3 %vm1334_vm1, %v3180_v24  ;;  %5984 = vst.msk [vmem:[%s8778_s28 + $0x98] sm:$0xff] %vm3647_vm6, %v4344_v40  ;;  %v10823_v40 = vld [vmem:[#allocation24_spill] sm:$0xff] }
 0x57c   : > { %6028 = vst.msk [vmem:[%s8778_s28 + $0x1f8] sm:$0xff] %vm3647_vm6, %v4440_v16  ;;  %v3443_v16 = vadd.f32 %v6681_v5, %v10823_v40 }
 0x57d   : > { %5973 = vmatmul.msk.f32.gmra.mxu2 %vm3647_vm6, %v9976_v30 }
 0x57e   : > { %v3357_v41 = vpop.f32.mrf.mxu3 }
 0x57f   : > { %v3477_v25 = vadd.f32 %v3441_v59, %v3357_v41  ;;  %v3183_v59 = vmul.f32 %v9500_v48, %v10824_v36  ;;  %v6684_v48 = vld [vmem:[%s7561_s14 + $0x78] sm:$0xff]  ;;  %v6689_v36 = vld [vmem:[%s7561_s14 + $0x88] sm:$0xff] }
 0x580   : > { %v4121_v0 = vpop.f32.mrf.mxu0  ;;  %v4253_v6 = vpop.f32.mrf.mxu2 }
 0x581   : > { %3513 = vst.msk [vmem:[%s9692_s1 + $0x60] sm:$0xff] %vm1139_vm0, %v3477_v25  ;;  %v4345_v58 = vadd.f32 %v6676_v39, %v4121_v0  ;;  %v4441_v18 = vadd.f32 %v6677_v47, %v4253_v6  ;;  %v6683_v0 = vld [vmem:[%s8521_s26 + $0x210] sm:$0xff]  ;;  %v10036_v39 = vld [vmem:[%s8521_s26 + $0x358] sm:$0xff] }
 0x583   : > { %5929 = vmatmul.msk.f32.gmra.mxu0 %vm3647_vm6, %v9887_v46  ;;  %5862 = vmatmul.msk.f32.gmra.mxu3 %vm1334_vm1, %v3181_v11  ;;  %5985 = vst.msk [vmem:[%s8778_s28 + $0xa0] sm:$0xff] %vm3647_vm6, %v4345_v58  ;;  %v10825_v58 = vld [vmem:[#allocation25_spill] sm:$0xff] }
 0x584   : > { %6029 = vst.msk [vmem:[%s8778_s28 + $0x200] sm:$0xff] %vm3647_vm6, %v4441_v18  ;;  %v3444_v47 = vadd.f32 %v6684_v48, %v10825_v58  ;;  %v6690_v48 = vld [vmem:[%s8521_s26 + $0x228] sm:$0xff] }
 0x585   : > { %5974 = vmatmul.msk.f32.gmra.mxu2 %vm3647_vm6, %v9996_v17 }
 0x586   : > { %v3360_v9 = vpop.f32.mrf.mxu3 }
 0x587   : > { %v3478_v46 = vadd.f32 %v3442_v8, %v3360_v9 }
 0x588   : > { %v4124_v23 = vpop.f32.mrf.mxu0  ;;  %v4256_v33 = vpop.f32.mrf.mxu2 }
 0x589   : > { %3514 = vst.msk [vmem:[%s9692_s1 + $0x68] sm:$0xff] %vm1139_vm0, %v3478_v46  ;;  %v4346_v24 = vadd.f32 %v6679_v14, %v4124_v23  ;;  %v4442_v43 = vadd.f32 %v6680_v62, %v4256_v33  ;;  %v6685_v46 = vld [vmem:[%s8521_s26 + $0xb8] sm:$0xff]  ;;  %v10827_v33 = vld [vmem:[#allocation26_spill] sm:$0xff] }
 0x58a   : > { %v3445_v14 = vadd.f32 %v6687_v1, %v10827_v33  ;;  %v10833_v1 = vld [vmem:[#allocation29_spill] sm:$0xff] }
 0x58b   : > { %5930 = vmatmul.msk.f32.gmra.mxu0 %vm3647_vm6, %v9913_v3  ;;  %5863 = vmatmul.msk.f32.gmra.mxu3 %vm1334_vm1, %v3182_v2  ;;  %5986 = vst.msk [vmem:[%s8778_s28 + $0xa8] sm:$0xff] %vm3647_vm6, %v4346_v24  ;;  %v6686_v2 = vld [vmem:[%s8521_s26 + $0x218] sm:$0xff] }
 0x58c   : > { %6030 = vst.msk [vmem:[%s8778_s28 + $0x208] sm:$0xff] %vm3647_vm6, %v4442_v43  ;;  %v10828_v43 = vld [vmem:[#allocation61_spill] sm:$0xff] }
 0x58d   : > { %5975 = vmatmul.msk.f32.gmra.mxu2 %vm3647_vm6, %v10016_v42  ;;  %v3185_v5 = vmul.f32 %v9570_v37, %v10828_v43  ;;  %v6694_v43 = vld [vmem:[%s8521_s26 + $0x238] sm:$0xff] }
 0x58e   : > { %v3363_v38 = vpop.f32.mrf.mxu3 }
 0x58f   : > { %v3479_v3 = vadd.f32 %v3443_v16, %v3363_v38  ;;  %v6688_v38 = vld [vmem:[%s8521_s26 + $0x220] sm:$0xff] }
 0x590   : > { %v4127_v41 = vpop.f32.mrf.mxu0  ;;  %v4259_v25 = vpop.f32.mrf.mxu2 }
 0x591   : > { %3515 = vst.msk [vmem:[%s9692_s1 + $0x70] sm:$0xff] %vm1139_vm0, %v3479_v3  ;;  %v4347_v11 = vadd.f32 %v6682_v49, %v4127_v41  ;;  %v4443_v6 = vadd.f32 %v6683_v0, %v4259_v25  ;;  %v10830_v49 = vld [vmem:[#allocation63_spill] sm:$0xff] }
 0x593   : > { %5931 = vmatmul.msk.f32.gmra.mxu0 %vm3647_vm6, %v9939_v32  ;;  %5864 = vmatmul.msk.f32.gmra.mxu3 %vm1334_vm1, %v3183_v59  ;;  %5987 = vst.msk [vmem:[%s8778_s28 + $0xb0] sm:$0xff] %vm3647_vm6, %v4347_v11  ;;  %v10829_v59 = vld [vmem:[#allocation27_spill] sm:$0xff] }
 0x594   : > { %6031 = vst.msk [vmem:[%s8778_s28 + $0x210] sm:$0xff] %vm3647_vm6, %v4443_v6  ;;  %v3446_v41 = vadd.f32 %v6689_v36, %v10829_v59 }
 0x595   : > { %5976 = vmatmul.msk.f32.gmra.mxu2 %vm3647_vm6, %v10036_v39 }
 0x596   : > { %v3366_v18 = vpop.f32.mrf.mxu3 }
 0x597   : > { %v3480_v32 = vadd.f32 %v3444_v47, %v3366_v18  ;;  %v6691_v47 = vld [vmem:[%s7561_s14 + $0x90] sm:$0xff] }
 0x598   : > { %v4130_v8 = vpop.f32.mrf.mxu0  ;;  %v4262_v9 = vpop.f32.mrf.mxu2  ;;  %v10831_v18 = vld [vmem:[#allocation28_spill] sm:$0xff] }
 0x599   : > { %3516 = vst.msk [vmem:[%s9692_s1 + $0x78] sm:$0xff] %vm1139_vm0, %v3480_v32  ;;  %v4348_v22 = vadd.f32 %v6685_v46, %v4130_v8  ;;  %v4444_v23 = vadd.f32 %v6686_v2, %v4262_v9  ;;  %v3447_v32 = vadd.f32 %v6691_v47, %v10831_v18 }
 0x59b   : > { %5932 = vmatmul.msk.f32.gmra.mxu0 %vm3647_vm6, %v9965_v53  ;;  %5865 = vmatmul.msk.f32.gmra.mxu3 %vm1334_vm1, %v3184_v10  ;;  %5988 = vst.msk [vmem:[%s8778_s28 + $0xb8] sm:$0xff] %vm3647_vm6, %v4348_v22  ;;  %v10832_v10 = vld [vmem:[#allocation65_spill] sm:$0xff]  ;;  %v6692_v22 = vld [vmem:[%s8521_s26 + $0x230] sm:$0xff]  ;;  %s6110_s26 = smul.u32 (%p7182_p5), 96, %s7163_s21 }
 0x59c   : > { %6032 = vst.msk [vmem:[%s8778_s28 + $0x218] sm:$0xff] %vm3647_vm6, %v4444_v23  ;;  %v6693_v23 = vld [vmem:[%s7561_s14 + $0x98] sm:$0xff] }
 0x59d   : > { %v3448_v33 = vadd.f32 %v6693_v23, %v10833_v1  ;;  %v6699_v23 = vld [vmem:[%s7561_s14 + $0xc0] sm:$0xff]  ;;  %s10251_s18 = scalar_lea.vmem (%p7182_p5), %s10851_s20, %s6110_s26  }
 0x59e   : > { %v3369_v24 = vpop.f32.mrf.mxu3  ;;  %v10838_v1 = vld [vmem:[#allocation34_spill] sm:$0xff] }
 0x59f   : > { %v3481_v62 = vadd.f32 %v3445_v14, %v3369_v24 }
 0x5a0   : > { %v4133_v53 = vpop.f32.mrf.mxu0  ;;  %v4265_v40 = vpop.f32.mrf.mxu2 }
 0x5a1   : > { %3517 = vst.msk [vmem:[%s9692_s1 + $0x80] sm:$0xff] %vm1139_vm0, %v3481_v62  ;;  %v4412_v16 = vadd.f32 %v4133_v53, %v9712_v21  ;;  %v4445_v3 = vadd.f32 %v6688_v38, %v4265_v40  ;;  %v3186_v21 = vmul.f32 %v9594_v51, %v10830_v49  ;;  %v6695_v53 = vld [vmem:[%s7561_s14 + $0xa0] sm:$0xff] }
 0x5a2   : > { %v10834_v40 = vld [vmem:[#allocation30_spill] sm:$0xff] }
 0x5a3   : > { %5866 = vmatmul.msk.f32.gmra.mxu3 %vm1334_vm1, %v3185_v5  ;;  %6013 = vst.msk [vmem:[%s8778_s28 + $0x180] sm:$0xff] %vm3647_vm6, %v4412_v16  ;;  %v3449_v16 = vadd.f32 %v6695_v53, %v10834_v40 }
 0x5a4   : > { %6033 = vst.msk [vmem:[%s8778_s28 + $0x220] sm:$0xff] %vm3647_vm6, %v4445_v3 }
 0x5a6   : > { %v3372_v37 = vpop.f32.mrf.mxu3 }
 0x5a7   : > { %v3482_v25 = vadd.f32 %v3446_v41, %v3372_v37  ;;  %v6696_v37 = vld [vmem:[%s7561_s14 + $0xa8] sm:$0xff] }
 0x5a8   : > { %v4136_v11 = vpop.f32.mrf.mxu0  ;;  %v4268_v0 = vpop.f32.mrf.mxu2 }
 0x5a9   : > { %3518 = vst.msk [vmem:[%s9692_s1 + $0x88] sm:$0xff] %vm1139_vm0, %v3482_v25  ;;  %v4413_v6 = vadd.f32 %v4136_v11, %v9730_v34  ;;  %v4446_v58 = vadd.f32 %v6690_v48, %v4268_v0  ;;  %v3187_v34 = vmul.f32 %v9615_v44, %v10832_v10  ;;  %v10835_v25 = vld [vmem:[#allocation31_spill] sm:$0xff]  ;;  %v6697_v48 = vld [vmem:[%s7561_s14 + $0xb0] sm:$0xff]  ;;  %v6698_v10 = vld [vmem:[%s7561_s14 + $0xb8] sm:$0xff] }
 0x5aa   : > { %v3450_v49 = vadd.f32 %v6696_v37, %v10835_v25 }
 0x5ab   : > { %5867 = vmatmul.msk.f32.gmra.mxu3 %vm1334_vm1, %v3186_v21  ;;  %6014 = vst.msk [vmem:[%s8778_s28 + $0x188] sm:$0xff] %vm3647_vm6, %v4413_v6 }
 0x5ac   : > { %6034 = vst.msk [vmem:[%s8778_s28 + $0x228] sm:$0xff] %vm3647_vm6, %v4446_v58  ;;  %v10836_v58 = vld [vmem:[#allocation32_spill] sm:$0xff] }
 0x5ad   : > { %v3451_v47 = vadd.f32 %v6697_v48, %v10836_v58  ;;  %v6703_v48 = vld [vmem:[%s7561_s14 + $0xe0] sm:$0xff] }
 0x5ae   : > { %v3375_v51 = vpop.f32.mrf.mxu3  ;;  %v10842_v58 = vld [vmem:[#allocation38_spill] sm:$0xff] }
 0x5af   : > { %v3483_v31 = vadd.f32 %v3447_v32, %v3375_v51 }
 0x5b0   : > { %v4139_v8 = vpop.f32.mrf.mxu0  ;;  %v4271_v9 = vpop.f32.mrf.mxu2 }
 0x5b1   : > { %3519 = vst.msk [vmem:[%s9692_s1 + $0x90] sm:$0xff] %vm1139_vm0, %v3483_v31  ;;  %v4414_v46 = vadd.f32 %v4139_v8, %v9752_v28  ;;  %v4447_v2 = vadd.f32 %v6692_v22, %v4271_v9 }
 0x5b3   : > { %5868 = vmatmul.msk.f32.gmra.mxu3 %vm1334_vm1, %v3187_v34  ;;  %6015 = vst.msk [vmem:[%s8778_s28 + $0x190] sm:$0xff] %vm3647_vm6, %v4414_v46  ;;  %v10837_v34 = vld [vmem:[#allocation33_spill] sm:$0xff] }
 0x5b4   : > { %6035 = vst.msk [vmem:[%s8778_s28 + $0x230] sm:$0xff] %vm3647_vm6, %v4447_v2  ;;  %v3452_v8 = vadd.f32 %v6698_v10, %v10837_v34 }
 0x5b6   : > { %v3378_v44 = vpop.f32.mrf.mxu3 }
 0x5b7   : > { %v3484_v14 = vadd.f32 %v3448_v33, %v3378_v44  ;;  %v3453_v33 = vadd.f32 %v6699_v23, %v10838_v1 }
 0x5b8   : > { %v4142_v28 = vpop.f32.mrf.mxu0  ;;  %v4274_v24 = vpop.f32.mrf.mxu2 }
 0x5b9   : > { %3520 = vst.msk [vmem:[%s9692_s1 + $0x98] sm:$0xff] %vm1139_vm0, %v3484_v14  ;;  %v4415_v62 = vadd.f32 %v4142_v28, %v9772_v60  ;;  %v4448_v5 = vadd.f32 %v6694_v43, %v4274_v24  ;;  %v10839_v43 = vld [vmem:[#allocation35_spill] sm:$0xff] }
 0x5bb   : > { %6016 = vst.msk [vmem:[%s8778_s28 + $0x198] sm:$0xff] %vm3647_vm6, %v4415_v62  ;;  %v6700_v62 = vld [vmem:[%s7561_s14 + $0xc8] sm:$0xff] }
 0x5bc   : > { %6036 = vst.msk [vmem:[%s8778_s28 + $0x238] sm:$0xff] %vm3647_vm6, %v4448_v5  ;;  %v3454_v5 = vadd.f32 %v6700_v62, %v10839_v43  ;;  %v6707_v43 = vld [vmem:[%s7561_s14 + $0x100] sm:$0xff] }
 0x5be   : > { %v3381_v38 = vpop.f32.mrf.mxu3 }
 0x5bf   : > { %v3485_v3 = vadd.f32 %v3449_v16, %v3381_v38 }
 0x5c0   : > { %v4145_v36 = vpop.f32.mrf.mxu0  ;;  %v4277_v59 = vpop.f32.mrf.mxu2 }
 0x5c1   : > { %3521 = vst.msk [vmem:[%s9692_s1 + $0xa0] sm:$0xff] %vm1139_vm0, %v3485_v3  ;;  %v4416_v60 = vadd.f32 %v4145_v36, %v9795_v55  ;;  %v4512_v41 = vadd.f32 %v4277_v59, %v9780_v12  ;;  %v6701_v3 = vld [vmem:[%s7561_s14 + $0xd0] sm:$0xff] }
 0x5c2   : > { %v10840_v36 = vld [vmem:[#allocation36_spill] sm:$0xff] }
 0x5c3   : > { %6017 = vst.msk [vmem:[%s8778_s28 + $0x1a0] sm:$0xff] %vm3647_vm6, %v4416_v60  ;;  %v3455_v59 = vadd.f32 %v6701_v3, %v10840_v36  ;;  %v10848_v36 = vld [vmem:[#allocation44_spill] sm:$0xff] }
 0x5c4   : > { %6061 = vst.msk [vmem:[%s8778_s28 + $0x300] sm:$0xff] %vm3647_vm6, %v4512_v41 }
 0x5c6   : > { %v3384_v21 = vpop.f32.mrf.mxu3 }
 0x5c7   : > { %v3486_v11 = vadd.f32 %v3450_v49, %v3384_v21  ;;  %v6702_v49 = vld [vmem:[%s7561_s14 + $0xd8] sm:$0xff] }
 0x5c8   : > { %v4148_v0 = vpop.f32.mrf.mxu0  ;;  %v4280_v6 = vpop.f32.mrf.mxu2  ;;  %v10841_v21 = vld [vmem:[#allocation37_spill] sm:$0xff] }
 0x5c9   : > { %3522 = vst.msk [vmem:[%s9692_s1 + $0xa8] sm:$0xff] %vm1139_vm0, %v3486_v11  ;;  %v4417_v55 = vadd.f32 %v4148_v0, %v9818_v45  ;;  %v4513_v12 = vadd.f32 %v4280_v6, %v9803_v4  ;;  %v3456_v11 = vadd.f32 %v6702_v49, %v10841_v21 }
 0x5cb   : > { %6018 = vst.msk [vmem:[%s8778_s28 + $0x1a8] sm:$0xff] %vm3647_vm6, %v4417_v55 }
 0x5cc   : > { %6062 = vst.msk [vmem:[%s8778_s28 + $0x308] sm:$0xff] %vm3647_vm6, %v4513_v12 }
 0x5ce   : > { %v3387_v18 = vpop.f32.mrf.mxu3 }
 0x5cf   : > { %v3487_v32 = vadd.f32 %v3451_v47, %v3387_v18  ;;  %v3457_v47 = vadd.f32 %v6703_v48, %v10842_v58 }
 0x5d0   : > { %v4151_v51 = vpop.f32.mrf.mxu0  ;;  %v4283_v31 = vpop.f32.mrf.mxu2 }
 0x5d1   : > { %3523 = vst.msk [vmem:[%s9692_s1 + $0xb0] sm:$0xff] %vm1139_vm0, %v3487_v32  ;;  %v4418_v45 = vadd.f32 %v4151_v51, %v9841_v13  ;;  %v4514_v4 = vadd.f32 %v4283_v31, %v9826_v27 }
 0x5d3   : > { %6019 = vst.msk [vmem:[%s8778_s28 + $0x1b0] sm:$0xff] %vm3647_vm6, %v4418_v45  ;;  %v6704_v45 = vld [vmem:[%s7561_s14 + $0xe8] sm:$0xff] }
 0x5d4   : > { %6063 = vst.msk [vmem:[%s8778_s28 + $0x310] sm:$0xff] %vm3647_vm6, %v4514_v4  ;;  %v10843_v4 = vld [vmem:[#allocation39_spill] sm:$0xff] }
 0x5d5   : > { %v3458_v10 = vadd.f32 %v6704_v45, %v10843_v4 }
 0x5d6   : > { %v3390_v9 = vpop.f32.mrf.mxu3 }
 0x5d7   : > { %v3488_v46 = vadd.f32 %v3452_v8, %v3390_v9 }
 0x5d8   : > { %v4154_v22 = vpop.f32.mrf.mxu0  ;;  %v4286_v2 = vpop.f32.mrf.mxu2 }
 0x5d9   : > { %3524 = vst.msk [vmem:[%s9692_s1 + $0xb8] sm:$0xff] %vm1139_vm0, %v3488_v46  ;;  %v4419_v13 = vadd.f32 %v4154_v22, %v9864_v57  ;;  %v4515_v27 = vadd.f32 %v4286_v2, %v9849_v56  ;;  %v6705_v22 = vld [vmem:[%s7561_s14 + $0xf0] sm:$0xff] }
 0x5da   : > { %v10844_v2 = vld [vmem:[#allocation40_spill] sm:$0xff] }
 0x5db   : > { %6020 = vst.msk [vmem:[%s8778_s28 + $0x1b8] sm:$0xff] %vm3647_vm6, %v4419_v13  ;;  %v3459_v13 = vadd.f32 %v6705_v22, %v10844_v2 }
 0x5dc   : > { %6064 = vst.msk [vmem:[%s8778_s28 + $0x318] sm:$0xff] %vm3647_vm6, %v4515_v27 }
 0x5de   : > { %v3393_v44 = vpop.f32.mrf.mxu3 }
 0x5df   : > { %v3489_v14 = vadd.f32 %v3453_v33, %v3393_v44  ;;  %v6706_v44 = vld [vmem:[%s7561_s14 + $0xf8] sm:$0xff] }
 0x5e0   : > { %v4157_v28 = vpop.f32.mrf.mxu0  ;;  %v4289_v24 = vpop.f32.mrf.mxu2 }
 0x5e1   : > { %3525 = vst.msk [vmem:[%s9692_s1 + $0xc0] sm:$0xff] %vm1139_vm0, %v3489_v14  ;;  %v4420_v57 = vadd.f32 %v4157_v28, %v9890_v7  ;;  %v4516_v56 = vadd.f32 %v4289_v24, %v9872_v19  ;;  %v10845_v14 = vld [vmem:[#allocation41_spill] sm:$0xff] }
 0x5e2   : > { %v3460_v28 = vadd.f32 %v6706_v44, %v10845_v14 }
 0x5e3   : > { %6021 = vst.msk [vmem:[%s8778_s28 + $0x1c0] sm:$0xff] %vm3647_vm6, %v4420_v57 }
 0x5e4   : > { %6065 = vst.msk [vmem:[%s8778_s28 + $0x320] sm:$0xff] %vm3647_vm6, %v4516_v56 }
 0x5e6   : > { %v3396_v53 = vpop.f32.mrf.mxu3 }
 0x5e7   : > { %v3490_v40 = vadd.f32 %v3454_v5, %v3396_v53  ;;  %v10846_v5 = vld [vmem:[#allocation42_spill] sm:$0xff] }
 0x5e8   : > { %v4160_v16 = vpop.f32.mrf.mxu0  ;;  %v4292_v38 = vpop.f32.mrf.mxu2  ;;  %v3461_v53 = vadd.f32 %v6707_v43, %v10846_v5 }
 0x5e9   : > { %3526 = vst.msk [vmem:[%s9692_s1 + $0xc8] sm:$0xff] %vm1139_vm0, %v3490_v40  ;;  %v4421_v7 = vadd.f32 %v4160_v16, %v9916_v35  ;;  %v4517_v19 = vadd.f32 %v4292_v38, %v9898_v15  ;;  %v6708_v38 = vld [vmem:[%s7561_s14 + $0x108] sm:$0xff] }
 0x5eb   : > { %6022 = vst.msk [vmem:[%s8778_s28 + $0x1c8] sm:$0xff] %vm3647_vm6, %v4421_v7  ;;  %v10847_v7 = vld [vmem:[#allocation43_spill] sm:$0xff] }
 0x5ec   : > { %6066 = vst.msk [vmem:[%s8778_s28 + $0x328] sm:$0xff] %vm3647_vm6, %v4517_v19  ;;  %v3462_v19 = vadd.f32 %v6708_v38, %v10847_v7 }
 0x5ee   : > { %v3399_v60 = vpop.f32.mrf.mxu3 }
 0x5ef   : > { %v3491_v41 = vadd.f32 %v3455_v59, %v3399_v60 }
 0x5f0   : > { %v4163_v37 = vpop.f32.mrf.mxu0  ;;  %v4295_v25 = vpop.f32.mrf.mxu2 }
 0x5f1   : > { %3527 = vst.msk [vmem:[%s9692_s1 + $0xd0] sm:$0xff] %vm1139_vm0, %v3491_v41  ;;  %v4422_v35 = vadd.f32 %v4163_v37, %v9942_v26  ;;  %v4518_v15 = vadd.f32 %v4295_v25, %v9924_v50  ;;  %v6710_v37 = vld [vmem:[%s7561_s14 + $0x118] sm:$0xff] }
 0x5f2   : > { %v10849_v25 = vld [vmem:[#allocation45_spill] sm:$0xff] }
 0x5f3   : > { %6023 = vst.msk [vmem:[%s8778_s28 + $0x1d0] sm:$0xff] %vm3647_vm6, %v4422_v35  ;;  %v3464_v35 = vadd.f32 %v6710_v37, %v10849_v25 }
 0x5f4   : > { %6067 = vst.msk [vmem:[%s8778_s28 + $0x330] sm:$0xff] %vm3647_vm6, %v4518_v15 }
 0x5f6   : > { %v3402_v0 = vpop.f32.mrf.mxu3 }
 0x5f7   : > { %v3492_v6 = vadd.f32 %v3456_v11, %v3402_v0 }
 0x5f8   : > { %v4166_v55 = vpop.f32.mrf.mxu0  ;;  %v4298_v12 = vpop.f32.mrf.mxu2 }
 0x5f9   : > { %3528 = vst.msk [vmem:[%s9692_s1 + $0xd8] sm:$0xff] %vm1139_vm0, %v3492_v6  ;;  %v4423_v26 = vadd.f32 %v4166_v55, %v9968_v20  ;;  %v4519_v50 = vadd.f32 %v4298_v12, %v9950_v52 }
 0x5fb   : > { %6024 = vst.msk [vmem:[%s8778_s28 + $0x1d8] sm:$0xff] %vm3647_vm6, %v4423_v26 }
 0x5fc   : > { %6068 = vst.msk [vmem:[%s8778_s28 + $0x338] sm:$0xff] %vm3647_vm6, %v4519_v50 }
 0x5fe   : > { %v3405_v18 = vpop.f32.mrf.mxu3 }
 0x5ff   : > { %v3493_v32 = vadd.f32 %v3457_v47, %v3405_v18 }
 0x600   : > { %v4169_v51 = vpop.f32.mrf.mxu0  ;;  %v4301_v31 = vpop.f32.mrf.mxu2 }
 0x601   : > { %3529 = vst.msk [vmem:[%s9692_s1 + $0xe0] sm:$0xff] %vm1139_vm0, %v3493_v32  ;;  %v4487_v20 = vadd.f32 %v4169_v51, %v9562_v63  ;;  %v4520_v52 = vadd.f32 %v4301_v31, %v9976_v30 }
 0x603   : > { %6049 = vst.msk [vmem:[%s8778_s28 + $0x2a0] sm:$0xff] %vm3647_vm6, %v4487_v20 }
 0x604   : > { %6069 = vst.msk [vmem:[%s8778_s28 + $0x340] sm:$0xff] %vm3647_vm6, %v4520_v52 }
 0x606   : > { %v3408_v34 = vpop.f32.mrf.mxu3 }
 0x607   : > { %v3494_v8 = vadd.f32 %v3458_v10, %v3408_v34 }
 0x608   : > { %v4172_v9 = vpop.f32.mrf.mxu0  ;;  %v4304_v46 = vpop.f32.mrf.mxu2 }
 0x609   : > { %3530 = vst.msk [vmem:[%s9692_s1 + $0xe8] sm:$0xff] %vm1139_vm0, %v3494_v8  ;;  %v4488_v63 = vadd.f32 %v4172_v9, %v9587_v29  ;;  %v4521_v30 = vadd.f32 %v4304_v46, %v9996_v17 }
 0x60b   : > { %6050 = vst.msk [vmem:[%s8778_s28 + $0x2a8] sm:$0xff] %vm3647_vm6, %v4488_v63 }
 0x60c   : > { %6070 = vst.msk [vmem:[%s8778_s28 + $0x348] sm:$0xff] %vm3647_vm6, %v4521_v30 }
 0x60e   : > { %v3411_v27 = vpop.f32.mrf.mxu3 }
 0x60f   : > { %v3495_v23 = vadd.f32 %v3459_v13, %v3411_v27 }
 0x610   : > { %v4175_v1 = vpop.f32.mrf.mxu0  ;;  %v4307_v33 = vpop.f32.mrf.mxu2 }
 0x611   : > { %3531 = vst.msk [vmem:[%s9692_s1 + $0xf0] sm:$0xff] %vm1139_vm0, %v3495_v23  ;;  %v4489_v29 = vadd.f32 %v4175_v1, %v9608_v54  ;;  %v4522_v17 = vadd.f32 %v4307_v33, %v10016_v42 }
 0x613   : > { %6051 = vst.msk [vmem:[%s8778_s28 + $0x2b0] sm:$0xff] %vm3647_vm6, %v4489_v29 }
 0x614   : > { %6071 = vst.msk [vmem:[%s8778_s28 + $0x350] sm:$0xff] %vm3647_vm6, %v4522_v17 }
 0x616   : > { %v3414_v24 = vpop.f32.mrf.mxu3 }
 0x617   : > { %v3496_v57 = vadd.f32 %v3460_v28, %v3414_v24 }
 0x618   : > { %v4178_v56 = vpop.f32.mrf.mxu0  ;;  %v4310_v54 = vpop.f32.mrf.mxu2 }
 0x619   : > { %3532 = vst.msk [vmem:[%s9692_s1 + $0xf8] sm:$0xff] %vm1139_vm0, %v3496_v57  ;;  %v4490_v62 = vadd.f32 %v4178_v56, %v9629_v61  ;;  %v4523_v42 = vadd.f32 %v4310_v54, %v10036_v39  ;;  %v6709_v39 = vld [vmem:[%s7561_s14 + $0x110] sm:$0xff] }
 0x61a   : > { %v3463_v59 = vadd.f32 %v6709_v39, %v10848_v36 }
 0x61b   : > { %6052 = vst.msk [vmem:[%s8778_s28 + $0x2b8] sm:$0xff] %vm3647_vm6, %v4490_v62 }
 0x61c   : > { %6072 = vst.msk [vmem:[%s8778_s28 + $0x358] sm:$0xff] %vm3647_vm6, %v4523_v42 }
 0x61e   : > { %v3417_v40 = vpop.f32.mrf.mxu3 }
 0x61f   : > { %v3497_v16 = vadd.f32 %v3461_v53, %v3417_v40 }
 0x621   : > { %3533 = vst.msk [vmem:[%s9692_s1 + $0x100] sm:$0xff] %vm1139_vm0, %v3497_v16 }
 0x626   : > { %v3420_v61 = vpop.f32.mrf.mxu3 }
 0x627   : > { %v3498_v3 = vadd.f32 %v3462_v19, %v3420_v61 }
 0x629   : > { %3534 = vst.msk [vmem:[%s9692_s1 + $0x108] sm:$0xff] %vm1139_vm0, %v3498_v3 }
 0x62e   : > { %v3423_v60 = vpop.f32.mrf.mxu3 }
 0x62f   : > { %v3499_v41 = vadd.f32 %v3463_v59, %v3423_v60 }
 0x631   : > { %3535 = vst.msk [vmem:[%s9692_s1 + $0x110] sm:$0xff] %vm1139_vm0, %v3499_v41 }
 0x635   : > { %4551 = sbr.rel (!%p7182_p5) target bundleno = 1653 (0x675), region = 180 }
 0x636   : > { %v3426_v15 = vpop.f32.mrf.mxu3 }
 0x637   : > { %v3500_v49 = vadd.f32 %v3464_v35, %v3426_v15 }
 0x639   : > { %3536 = vst.msk [vmem:[%s9692_s1 + $0x118] sm:$0xff] %vm1139_vm0, %v3500_v49 }
 0x63a   : > { %s10893_s15 = smov (!%p4554_p0, %s4553_s15), 12 }
 0x63b   : > { %s6073_s14 = sshll.u32 %s10893_s15, 3 }
 0x63c   : > { %p6076_p1 = scmp.eq.s32.totalorder %s6073_s14, 0 }
 0x63d   : > { %6711 = sdivrem.u32 (!%p6076_p1), %s10893_s15, 12 }
 0x63e   : > { %4562 = sbr.rel (%p6076_p1) target bundleno = 1653 (0x675), region = 184 }
 0x646   : > { %s10257_s11 = spop.drf %6711 }
 0x647   : > { %s6713_s25 = spop.drf %6711  ;;  %p6077_p2 = scmp.le.s32.totalorder %s10257_s11, 0 }
 0x648   : > { %s10852_s27 = smov (!%p6077_p2), %s10251_s18  ;;  %s10853_s23 = smov (!%p6077_p2), %s8030_s30 }
 0x649   : > { %5497 = sbr.rel (%p6077_p2) target bundleno = 1627 (0x65b), region = 488  ;;  %s10266_s29 = smov (!%p6077_p2), 0  }
 0x64a   : > { %s10268_s24 = smov (!%p6077_p2), 0  }
 0x64e LB: >> { %v4649_v21 = vld [vmem:[%s6977_s23] sm:$0xff]  ;;  %v4651_v11 = vld [vmem:[%s6977_s23 + $0x8] sm:$0xff]  ;;  %v4653_v0 = vld [vmem:[%s6977_s23 + $0x10] sm:$0xff]  ;;  %s4673_s26 = sadd.s32 1, %s6981_s29  ;;  %s4643_s24 = sadd.s32 1, %s6985_s24   ;;  %s6985_s24 = sphi %s10268_s24, %s4643_s24   ;;  %s6981_s29 = sphi %s10266_s29, %s10856_s29   ;;  %s6977_s23 = sphi %s10853_s23, %s10855_s23   ;;  %s6973_s27 = sphi %s10852_s27, %s10854_s27  }
 0x64f   : >> { %4650 = vst [vmem:[%s6973_s27] sm:$0xff] %v4649_v21  ;;  %v4655_v6 = vld [vmem:[%s6977_s23 + $0x18] sm:$0xff]  ;;  %p4674_p3 = scmp.ge.s32.totalorder %s4673_s26, %s10257_s11  ;;  %v4657_v55 = vld [vmem:[%s6977_s23 + $0x20] sm:$0xff]  ;;  %v4659_v12 = vld [vmem:[%s6977_s23 + $0x28] sm:$0xff]  ;;  %p4642_p4 = scmp.ge.s32.totalorder %s4643_s24, %s10257_s11 }
 0x650   : >> { %4652 = vst [vmem:[%s6973_s27 + $0x8] sm:$0xff] %v4651_v11  ;;  %v4661_v26 = vld [vmem:[%s6977_s23 + $0x30] sm:$0xff]  ;;  %v4663_v50 = vld [vmem:[%s6977_s23 + $0x38] sm:$0xff]  ;;  %v4665_v48 = vld [vmem:[%s6977_s23 + $0x40] sm:$0xff] }
 0x651   : >> { %4654 = vst [vmem:[%s6973_s27 + $0x10] sm:$0xff] %v4653_v0  ;;  %s10895_s26 = smov (%p4674_p3, %s4673_s26), 0  ;;  %v4667_v58 = vld [vmem:[%s6977_s23 + $0x48] sm:$0xff]  ;;  %v4669_v47 = vld [vmem:[%s6977_s23 + $0x50] sm:$0xff]  ;;  %v4671_v18 = vld [vmem:[%s6977_s23 + $0x58] sm:$0xff] }
 0x652   : >> { %4656 = vst [vmem:[%s6973_s27 + $0x18] sm:$0xff] %v4655_v6  ;;  %s4676_s22 = smul.u32 96, %s10895_s26  ;;  %s10856_s29 = smov %s10895_s26 }
 0x653   : >> { %4658 = vst [vmem:[%s6973_s27 + $0x20] sm:$0xff] %v4657_v55 }
 0x654   : >> { %4660 = vst [vmem:[%s6973_s27 + $0x28] sm:$0xff] %v4659_v12  ;;  %s4678_s17 = scalar_lea.vmem %s8030_s30, %s4676_s22 [#allocation4]   ;;  %s4679_s20 = scalar_lea.vmem %s10251_s18, %s4676_s22  }
 0x655   : >> { %4662 = vst [vmem:[%s6973_s27 + $0x30] sm:$0xff] %v4661_v26  ;;  %s10855_s23 = smov %s4678_s17 }
 0x656   : >> { %4664 = vst [vmem:[%s6973_s27 + $0x38] sm:$0xff] %v4663_v50  ;;  %4645 = sbr.rel (!%p4642_p4) target bundleno = 1614 (0x64e), region = 494 }
 0x657   : >> { %4666 = vst [vmem:[%s6973_s27 + $0x40] sm:$0xff] %v4665_v48 }
 0x658   : >> { %4668 = vst [vmem:[%s6973_s27 + $0x48] sm:$0xff] %v4667_v58 }
 0x659   : >> { %4670 = vst [vmem:[%s6973_s27 + $0x50] sm:$0xff] %v4669_v47 }
 0x65a   : >> { %4672 = vst [vmem:[%s6973_s27 + $0x58] sm:$0xff] %v4671_v18  ;;  %s10854_s27 = smov %s4679_s20 }
 0x65b PF: > { %6714 = sdivrem.u32 %s10893_s15, 12 }
 0x65c   : > { %s6078_s14 = smul.u32 96, %s10257_s11 }
 0x65e   : > { %s10306_s25 = scalar_lea.vmem %s8030_s30, %s6078_s14 [#allocation4]   ;;  %s4686_s22 = scalar_lea.vmem %s10251_s18, %s6078_s14  }
 0x664   : > { %s6715_s0 = spop.drf %6714 }
 0x665   : > { %s6716_s2 = spop.drf %6714 }
 0x666   : > { %p6080_p6 = scmp.le.s32.totalorder %s6716_s2, 0 }
 0x667   : > { %s6987_s17 = smov (!%p6080_p6), %s4686_s22   ;;  %s6991_s26 = smov (!%p6080_p6), %s10306_s25  }
 0x668   : > { %5511 = sbr.rel (%p6080_p6) target bundleno = 1653 (0x675), region = 499  ;;  %s6995_s20 = smov (!%p6080_p6), 0  }
 0x669   : > { %s6999_s24 = smov (!%p6080_p6), 0  }
 0x66d LB: >> { %v4696_v32 = vld [vmem:[%s6993_s26] sm:$0xff]  ;;  %s4698_s30 = sadd.s32 1, %s6997_s20  ;;  %s4690_s24 = sadd.s32 1, %s7001_s24   ;;  %s7001_s24 = sphi %s6999_s24, %s4690_s24   ;;  %s6997_s20 = sphi %s6995_s20, %s6996_s20   ;;  %s6993_s26 = sphi %s6991_s26, %s4703_s26   ;;  %s6989_s17 = sphi %s6987_s17, %s4704_s17  }
 0x66e   : >> { %4697 = vst [vmem:[%s6989_s17] sm:$0xff] %v4696_v32  ;;  %p4699_p7 = scmp.ge.s32.totalorder %s4698_s30, %s6716_s2  ;;  %p4689_p8 = scmp.ge.s32.totalorder %s4690_s24, %s6716_s2 }
 0x670   : >> { %s10897_s30 = smov (%p4699_p7, %s4698_s30), 0  ;;  %4692 = sbr.rel (!%p4689_p8) target bundleno = 1645 (0x66d), region = 505 }
 0x671   : >> { %s6081_s0 = sshll.u32 %s10897_s30, 3  ;;  %s6996_s20 = smov %s10897_s30  }
 0x672   : >> { %s4703_s26 = scalar_lea.vmem %s10306_s25, %s6081_s0 [#allocation4]   ;;  %s4704_s17 = scalar_lea.vmem %s4686_s22, %s6081_s0  }
 0x675 PF: > { %4710 = sbr.rel (!%p7182_p5) target bundleno = 1739 (0x6cb), region = 232  ;;  %s4712_s18 = ssub.s32 (%p7182_p5), 13, %s7520_s16 }
 0x676   : > { %s6111_s11 = smul.u32 (%p7182_p5), 96, %s7163_s21  ;;  %p4713_p9 = scmp.lt.s32.totalorder (%p7182_p5), %s4712_s18, 12 }
 0x677   : > { %s10858_s29 = sld [smem:[#allocation73_spill]] (%p7182_p5) }
 0x67a   : > { %s10899_s18 = smov (!%p4713_p9, %s4712_s18), 12 }
 0x67b   : > { %s4715_s17 = smul.u32 24, %s10899_s18 }
 0x67d   : > { %s10318_s14 = scalar_lea.vmem %s10858_s29, %s6111_s11   ;;  %p6085_p10 = scmp.eq.s32.totalorder %s4715_s17, 0 }
 0x67e   : > { %6717 = sdivrem.u32 (!%p6085_p10), %s10899_s18, 11 }
 0x67f   : > { %4721 = sbr.rel (%p6085_p10) target bundleno = 1739 (0x6cb), region = 236 }
 0x687   : > { %s10324_s2 = spop.drf %6717 }
 0x688   : > { %s6719_s25 = spop.drf %6717  ;;  %p6086_p11 = scmp.le.s32.totalorder %s10324_s2, 0 }
 0x689   : > { %s10859_s22 = smov (!%p6086_p11), %s10318_s14  ;;  %s10860_s26 = smov (!%p6086_p11), %s9692_s1 }
 0x68a   : > { %5525 = sbr.rel (%p6086_p11) target bundleno = 1713 (0x6b1), region = 510  ;;  %s10333_s20 = smov (!%p6086_p11), 0  }
 0x68b   : > { %s10335_s24 = smov (!%p6086_p11), 0  }
 0x68f LB: >> { %v4854_v51 = vld [vmem:[%s7009_s26] sm:$0xff]  ;;  %v4856_v31 = vld [vmem:[%s7009_s26 + $0x8] sm:$0xff]  ;;  %v4858_v20 = vld [vmem:[%s7009_s26 + $0x10] sm:$0xff]  ;;  %s4920_s30 = sadd.s32 1, %s7013_s20  ;;  %s4848_s24 = sadd.s32 1, %s7017_s24   ;;  %s7017_s24 = sphi %s10335_s24, %s4848_s24   ;;  %s7013_s20 = sphi %s10333_s20, %s10863_s20   ;;  %s7009_s26 = sphi %s10860_s26, %s10862_s26   ;;  %s7005_s22 = sphi %s10859_s22, %s10861_s22  }
 0x690   : >> { %4855 = vst [vmem:[%s7005_s22] sm:$0xff] %v4854_v51  ;;  %v4860_v52 = vld [vmem:[%s7009_s26 + $0x18] sm:$0xff]  ;;  %p4921_p12 = scmp.ge.s32.totalorder %s4920_s30, %s10324_s2  ;;  %v4862_v45 = vld [vmem:[%s7009_s26 + $0x20] sm:$0xff]  ;;  %v4864_v4 = vld [vmem:[%s7009_s26 + $0x28] sm:$0xff]  ;;  %p4847_p13 = scmp.ge.s32.totalorder %s4848_s24, %s10324_s2 }
 0x691   : >> { %4857 = vst [vmem:[%s7005_s22 + $0x8] sm:$0xff] %v4856_v31  ;;  %v4866_v10 = vld [vmem:[%s7009_s26 + $0x30] sm:$0xff]  ;;  %v4868_v34 = vld [vmem:[%s7009_s26 + $0x38] sm:$0xff]  ;;  %v4870_v8 = vld [vmem:[%s7009_s26 + $0x40] sm:$0xff] }
 0x692   : >> { %4859 = vst [vmem:[%s7005_s22 + $0x10] sm:$0xff] %v4858_v20  ;;  %s10901_s30 = smov (%p4921_p12, %s4920_s30), 0  ;;  %v4872_v9 = vld [vmem:[%s7009_s26 + $0x48] sm:$0xff]  ;;  %v4874_v46 = vld [vmem:[%s7009_s26 + $0x50] sm:$0xff]  ;;  %v4876_v63 = vld [vmem:[%s7009_s26 + $0x60] sm:$0xff] }
 0x693   : >> { %4861 = vst [vmem:[%s7005_s22 + $0x18] sm:$0xff] %v4860_v52  ;;  %s4923_s0 = smul.u32 88, %s10901_s30  ;;  %v4878_v30 = vld [vmem:[%s7009_s26 + $0x68] sm:$0xff]  ;;  %v4880_v22 = vld [vmem:[%s7009_s26 + $0x70] sm:$0xff]  ;;  %v4882_v2 = vld [vmem:[%s7009_s26 + $0x78] sm:$0xff]  ;;  %s10863_s20 = smov %s10901_s30 }
 0x694   : >> { %4863 = vst [vmem:[%s7005_s22 + $0x20] sm:$0xff] %v4862_v45  ;;  %v4884_v13 = vld [vmem:[%s7009_s26 + $0x80] sm:$0xff]  ;;  %v4886_v27 = vld [vmem:[%s7009_s26 + $0x88] sm:$0xff]  ;;  %v4888_v23 = vld [vmem:[%s7009_s26 + $0x90] sm:$0xff] }
 0x695   : >> { %4865 = vst [vmem:[%s7005_s22 + $0x28] sm:$0xff] %v4864_v4  ;;  %s10369_s15 = scalar_lea.vmem %s9692_s1, %s4923_s0 [#allocation5]   ;;  %s10372_s11 = scalar_lea.vmem %s10318_s14, %s4923_s0   ;;  %v4890_v1 = vld [vmem:[%s7009_s26 + $0x98] sm:$0xff]  ;;  %v4892_v33 = vld [vmem:[%s7009_s26 + $0xa0] sm:$0xff]  ;;  %v4894_v29 = vld [vmem:[%s7009_s26 + $0xa8] sm:$0xff] }
 0x696   : >> { %4867 = vst [vmem:[%s7005_s22 + $0x30] sm:$0xff] %v4866_v10  ;;  %v4896_v17 = vld [vmem:[%s7009_s26 + $0xb0] sm:$0xff]  ;;  %v4898_v44 = vld [vmem:[%s7009_s26 + $0xc0] sm:$0xff]  ;;  %v4900_v14 = vld [vmem:[%s7009_s26 + $0xc8] sm:$0xff] }
 0x697   : >> { %4869 = vst [vmem:[%s7005_s22 + $0x38] sm:$0xff] %v4868_v34  ;;  %v4902_v28 = vld [vmem:[%s7009_s26 + $0xd0] sm:$0xff]  ;;  %v4904_v24 = vld [vmem:[%s7009_s26 + $0xd8] sm:$0xff]  ;;  %v4906_v57 = vld [vmem:[%s7009_s26 + $0xe0] sm:$0xff] }
 0x698   : >> { %4871 = vst [vmem:[%s7005_s22 + $0x40] sm:$0xff] %v4870_v8  ;;  %v4908_v56 = vld [vmem:[%s7009_s26 + $0xe8] sm:$0xff]  ;;  %v4910_v54 = vld [vmem:[%s7009_s26 + $0xf0] sm:$0xff]  ;;  %v4912_v62 = vld [vmem:[%s7009_s26 + $0xf8] sm:$0xff] }
 0x699   : >> { %4873 = vst [vmem:[%s7005_s22 + $0x48] sm:$0xff] %v4872_v9  ;;  %v4914_v42 = vld [vmem:[%s7009_s26 + $0x100] sm:$0xff]  ;;  %v4916_v43 = vld [vmem:[%s7009_s26 + $0x108] sm:$0xff]  ;;  %v4918_v5 = vld [vmem:[%s7009_s26 + $0x110] sm:$0xff]  ;;  %s10862_s26 = smov %s10369_s15 }
 0x69a   : >> { %4875 = vst [vmem:[%s7005_s22 + $0x50] sm:$0xff] %v4874_v46 }
 0x69b   : >> { %4877 = vst [vmem:[%s7005_s22 + $0x68] sm:$0xff] %v4876_v63 }
 0x69c   : >> { %4879 = vst [vmem:[%s7005_s22 + $0x70] sm:$0xff] %v4878_v30 }
 0x69d   : >> { %4881 = vst [vmem:[%s7005_s22 + $0x78] sm:$0xff] %v4880_v22 }
 0x69e   : >> { %4883 = vst [vmem:[%s7005_s22 + $0x80] sm:$0xff] %v4882_v2 }
 0x69f   : >> { %4885 = vst [vmem:[%s7005_s22 + $0x88] sm:$0xff] %v4884_v13 }
 0x6a0   : >> { %4887 = vst [vmem:[%s7005_s22 + $0x90] sm:$0xff] %v4886_v27 }
 0x6a1   : >> { %4889 = vst [vmem:[%s7005_s22 + $0x98] sm:$0xff] %v4888_v23 }
 0x6a2   : >> { %4891 = vst [vmem:[%s7005_s22 + $0xa0] sm:$0xff] %v4890_v1 }
 0x6a3   : >> { %4893 = vst [vmem:[%s7005_s22 + $0xa8] sm:$0xff] %v4892_v33 }
 0x6a4   : >> { %4895 = vst [vmem:[%s7005_s22 + $0xb0] sm:$0xff] %v4894_v29 }
 0x6a5   : >> { %4897 = vst [vmem:[%s7005_s22 + $0xb8] sm:$0xff] %v4896_v17 }
 0x6a6   : >> { %4899 = vst [vmem:[%s7005_s22 + $0xd0] sm:$0xff] %v4898_v44 }
 0x6a7   : >> { %4901 = vst [vmem:[%s7005_s22 + $0xd8] sm:$0xff] %v4900_v14 }
 0x6a8   : >> { %4903 = vst [vmem:[%s7005_s22 + $0xe0] sm:$0xff] %v4902_v28 }
 0x6a9   : >> { %4905 = vst [vmem:[%s7005_s22 + $0xe8] sm:$0xff] %v4904_v24 }
 0x6aa   : >> { %4907 = vst [vmem:[%s7005_s22 + $0xf0] sm:$0xff] %v4906_v57 }
 0x6ab   : >> { %4909 = vst [vmem:[%s7005_s22 + $0xf8] sm:$0xff] %v4908_v56 }
 0x6ac   : >> { %4911 = vst [vmem:[%s7005_s22 + $0x100] sm:$0xff] %v4910_v54  ;;  %4850 = sbr.rel (!%p4847_p13) target bundleno = 1679 (0x68f), region = 516 }
 0x6ad   : >> { %4913 = vst [vmem:[%s7005_s22 + $0x108] sm:$0xff] %v4912_v62 }
 0x6ae   : >> { %4915 = vst [vmem:[%s7005_s22 + $0x110] sm:$0xff] %v4914_v42 }
 0x6af   : >> { %4917 = vst [vmem:[%s7005_s22 + $0x118] sm:$0xff] %v4916_v43 }
 0x6b0   : >> { %4919 = vst [vmem:[%s7005_s22 + $0x120] sm:$0xff] %v4918_v5  ;;  %s10861_s22 = smov %s10372_s11 }
 0x6b1 PF: > { %6720 = sdivrem.u32 %s10899_s18, 11 }
 0x6b2   : > { %s6087_s27 = smul.u32 88, %s10324_s2 }
 0x6b4   : > { %s10439_s23 = scalar_lea.vmem %s9692_s1, %s6087_s27 [#allocation5]   ;;  %s10442_s29 = scalar_lea.vmem %s10318_s14, %s6087_s27  }
 0x6ba   : > { %s6721_s17 = spop.drf %6720 }
 0x6bb   : > { %s10444_s25 = spop.drf %6720 }
 0x6bc   : > { %p6089_p0 = scmp.le.s32.totalorder %s10444_s25, 0 }
 0x6bd   : > { %s10864_s22 = smov (!%p6089_p0), %s10442_s29  ;;  %s7023_s26 = smov (!%p6089_p0), %s10439_s23  }
 0x6be   : > { %5539 = sbr.rel (%p6089_p0) target bundleno = 1739 (0x6cb), region = 521  ;;  %s7027_s20 = smov (!%p6089_p0), 0  }
 0x6bf   : > { %s7031_s24 = smov (!%p6089_p0), 0  }
 0x6c3 LB: >> { %v4943_v53 = vld [vmem:[%s7025_s26] sm:$0xff]  ;;  %s4949_s1 = sadd.s32 1, %s7029_s20  ;;  %s4937_s24 = sadd.s32 1, %s7033_s24   ;;  %s7033_s24 = sphi %s7031_s24, %s4937_s24   ;;  %s7029_s20 = sphi %s7027_s20, %s7028_s20   ;;  %s7025_s26 = sphi %s7023_s26, %s4954_s26   ;;  %s7021_s22 = sphi %s10864_s22, %s4955_s22  }
 0x6c4   : >> { %v4945_v40 = vld [vmem:[%s7025_s26 + $0x60] sm:$0xff]  ;;  %4944 = vst [vmem:[%s7021_s22] sm:$0xff] %v4943_v53  ;;  %p4950_p1 = scmp.ge.s32.totalorder %s4949_s1, %s10444_s25  ;;  %p4936_p2 = scmp.ge.s32.totalorder %s4937_s24, %s10444_s25 }
 0x6c5   : >> { %v4947_v16 = vld [vmem:[%s7025_s26 + $0xc0] sm:$0xff]  ;;  %4946 = vst [vmem:[%s7021_s22 + $0x68] sm:$0xff] %v4945_v40 }
 0x6c6   : >> { %4948 = vst [vmem:[%s7021_s22 + $0xd0] sm:$0xff] %v4947_v16  ;;  %s10903_s1 = smov (%p4950_p1, %s4949_s1), 0  ;;  %4939 = sbr.rel (!%p4936_p2) target bundleno = 1731 (0x6c3), region = 527 }
 0x6c7   : >> { %s6090_s18 = sshll.u32 %s10903_s1, 3  ;;  %s7028_s20 = smov %s10903_s1  }
 0x6c8   : >> { %s4954_s26 = scalar_lea.vmem %s10439_s23, %s6090_s18 [#allocation5]   ;;  %s4955_s22 = scalar_lea.vmem %s10442_s29, %s6090_s18  }
 0x6cb PF: > { %4961 = sbr.rel (!%p7182_p5) target bundleno = 1815 (0x717), region = 284  ;;  %s4963_s2 = ssub.s32 (%p7182_p5), 13, %s7520_s16 }
 0x6cc   : > { %s6112_s30 = smul.u32 (%p7182_p5), 96, %s7163_s21  ;;  %p4964_p3 = scmp.lt.s32.totalorder (%p7182_p5), %s4963_s2, 12 }
 0x6cd   : > { %s10866_s11 = sld [smem:[#allocation74_spill]] (%p7182_p5) }
 0x6d0   : > { %s10905_s2 = smov (!%p4964_p3, %s4963_s2), 12 }
 0x6d1   : > { %s4966_s17 = smul.u32 72, %s10905_s2 }
 0x6d3   : > { %s10465_s27 = scalar_lea.vmem %s10866_s11, %s6112_s30   ;;  %p6094_p4 = scmp.eq.s32.totalorder %s4966_s17, 0 }
 0x6d4   : > { %s10471_s23 = sshrl.u32 (!%p6094_p4), %s10905_s2, 2 }
 0x6d5   : > { %4972 = sbr.rel (%p6094_p4) target bundleno = 1815 (0x717), region = 288  ;;  %p6095_p5 = scmp.le.s32.totalorder (!%p6094_p4), %s10471_s23, 0 }
 0x6da   : > { %5553 = sbr.rel (%p6095_p5) target bundleno = 1796 (0x704), region = 532  ;;  %s10867_s21 = smov (!%p6095_p5), %s10465_s27 }
 0x6db   : > { %s10868_s16 = smov (!%p6095_p5), %s8778_s28  ;;  %s10480_s29 = smov (!%p6095_p5), 0  }
 0x6dc   : > { %s10482_s25 = smov (!%p6095_p5), 0  }
 0x6df LB: >> { %v5121_v38 = vld [vmem:[%s7041_s16] sm:$0xff]  ;;  %v5123_v7 = vld [vmem:[%s7041_s16 + $0x8] sm:$0xff]  ;;  %v5125_v19 = vld [vmem:[%s7041_s16 + $0x10] sm:$0xff]  ;;  %s5193_s22 = sadd.s32 1, %s7045_s29  ;;  %s5115_s25 = sadd.s32 1, %s7049_s25   ;;  %s7049_s25 = sphi %s10482_s25, %s5115_s25   ;;  %s7045_s29 = sphi %s10480_s29, %s10871_s29   ;;  %s7041_s16 = sphi %s10868_s16, %s10870_s16   ;;  %s7037_s21 = sphi %s10867_s21, %s10869_s21  }
 0x6e0   : >> { %5122 = vst [vmem:[%s7037_s21] sm:$0xff] %v5121_v38  ;;  %v5127_v61 = vld [vmem:[%s7041_s16 + $0x18] sm:$0xff]  ;;  %p5194_p6 = scmp.ge.s32.totalorder %s5193_s22, %s10471_s23  ;;  %v5129_v3 = vld [vmem:[%s7041_s16 + $0x60] sm:$0xff]  ;;  %v5131_v39 = vld [vmem:[%s7041_s16 + $0x68] sm:$0xff]  ;;  %p5114_p7 = scmp.ge.s32.totalorder %s5115_s25, %s10471_s23 }
 0x6e1   : >> { %5124 = vst [vmem:[%s7037_s21 + $0x8] sm:$0xff] %v5123_v7  ;;  %v5133_v36 = vld [vmem:[%s7041_s16 + $0x70] sm:$0xff]  ;;  %v5135_v59 = vld [vmem:[%s7041_s16 + $0x78] sm:$0xff]  ;;  %v5137_v60 = vld [vmem:[%s7041_s16 + $0xc0] sm:$0xff] }
 0x6e2   : >> { %5126 = vst [vmem:[%s7037_s21 + $0x10] sm:$0xff] %v5125_v19  ;;  %s10907_s22 = smov (%p5194_p6, %s5193_s22), 0  ;;  %v5139_v41 = vld [vmem:[%s7041_s16 + $0xc8] sm:$0xff]  ;;  %v5141_v37 = vld [vmem:[%s7041_s16 + $0xd0] sm:$0xff]  ;;  %v5143_v25 = vld [vmem:[%s7041_s16 + $0xd8] sm:$0xff] }
 0x6e3   : >> { %5128 = vst [vmem:[%s7037_s21 + $0x18] sm:$0xff] %v5127_v61  ;;  %s6096_s26 = sshll.u32 %s10907_s22, 5  ;;  %v5145_v35 = vld [vmem:[%s7041_s16 + $0x120] sm:$0xff]  ;;  %v5147_v15 = vld [vmem:[%s7041_s16 + $0x128] sm:$0xff]  ;;  %v5149_v49 = vld [vmem:[%s7041_s16 + $0x130] sm:$0xff]  ;;  %s10871_s29 = smov %s10907_s22 }
 0x6e4   : >> { %5130 = vst [vmem:[%s7037_s21 + $0x68] sm:$0xff] %v5129_v3  ;;  %s10514_s20 = scalar_lea.vmem %s8778_s28, %s6096_s26 [#allocation6]   ;;  %s10517_s24 = scalar_lea.vmem %s10465_s27, %s6096_s26   ;;  %v5151_v21 = vld [vmem:[%s7041_s16 + $0x138] sm:$0xff]  ;;  %v5153_v11 = vld [vmem:[%s7041_s16 + $0x180] sm:$0xff]  ;;  %v5155_v0 = vld [vmem:[%s7041_s16 + $0x188] sm:$0xff] }
 0x6e5   : >> { %5132 = vst [vmem:[%s7037_s21 + $0x70] sm:$0xff] %v5131_v39  ;;  %v5157_v6 = vld [vmem:[%s7041_s16 + $0x190] sm:$0xff]  ;;  %v5159_v55 = vld [vmem:[%s7041_s16 + $0x198] sm:$0xff]  ;;  %v5161_v12 = vld [vmem:[%s7041_s16 + $0x1e0] sm:$0xff] }
 0x6e6   : >> { %5134 = vst [vmem:[%s7037_s21 + $0x78] sm:$0xff] %v5133_v36  ;;  %v5163_v26 = vld [vmem:[%s7041_s16 + $0x1e8] sm:$0xff]  ;;  %v5165_v50 = vld [vmem:[%s7041_s16 + $0x1f0] sm:$0xff]  ;;  %v5167_v48 = vld [vmem:[%s7041_s16 + $0x1f8] sm:$0xff] }
 0x6e7   : >> { %5136 = vst [vmem:[%s7037_s21 + $0x80] sm:$0xff] %v5135_v59  ;;  %v5169_v58 = vld [vmem:[%s7041_s16 + $0x240] sm:$0xff]  ;;  %v5171_v47 = vld [vmem:[%s7041_s16 + $0x248] sm:$0xff]  ;;  %v5173_v18 = vld [vmem:[%s7041_s16 + $0x250] sm:$0xff] }
 0x6e8   : >> { %5138 = vst [vmem:[%s7037_s21 + $0xd0] sm:$0xff] %v5137_v60  ;;  %v5175_v32 = vld [vmem:[%s7041_s16 + $0x258] sm:$0xff]  ;;  %v5177_v51 = vld [vmem:[%s7041_s16 + $0x2a0] sm:$0xff]  ;;  %v5179_v31 = vld [vmem:[%s7041_s16 + $0x2a8] sm:$0xff] }
 0x6e9   : >> { %5140 = vst [vmem:[%s7037_s21 + $0xd8] sm:$0xff] %v5139_v41  ;;  %v5181_v20 = vld [vmem:[%s7041_s16 + $0x2b0] sm:$0xff]  ;;  %v5183_v52 = vld [vmem:[%s7041_s16 + $0x2b8] sm:$0xff]  ;;  %v5185_v45 = vld [vmem:[%s7041_s16 + $0x300] sm:$0xff] }
 0x6ea   : >> { %5142 = vst [vmem:[%s7037_s21 + $0xe0] sm:$0xff] %v5141_v37  ;;  %v5187_v4 = vld [vmem:[%s7041_s16 + $0x308] sm:$0xff]  ;;  %v5189_v10 = vld [vmem:[%s7041_s16 + $0x310] sm:$0xff]  ;;  %v5191_v34 = vld [vmem:[%s7041_s16 + $0x318] sm:$0xff]  ;;  %s10870_s16 = smov %s10514_s20 }
 0x6eb   : >> { %5144 = vst [vmem:[%s7037_s21 + $0xe8] sm:$0xff] %v5143_v25 }
 0x6ec   : >> { %5146 = vst [vmem:[%s7037_s21 + $0x138] sm:$0xff] %v5145_v35 }
 0x6ed   : >> { %5148 = vst [vmem:[%s7037_s21 + $0x140] sm:$0xff] %v5147_v15 }
 0x6ee   : >> { %5150 = vst [vmem:[%s7037_s21 + $0x148] sm:$0xff] %v5149_v49 }
 0x6ef   : >> { %5152 = vst [vmem:[%s7037_s21 + $0x150] sm:$0xff] %v5151_v21 }
 0x6f0   : >> { %5154 = vst [vmem:[%s7037_s21 + $0x1a0] sm:$0xff] %v5153_v11 }
 0x6f1   : >> { %5156 = vst [vmem:[%s7037_s21 + $0x1a8] sm:$0xff] %v5155_v0 }
 0x6f2   : >> { %5158 = vst [vmem:[%s7037_s21 + $0x1b0] sm:$0xff] %v5157_v6 }
 0x6f3   : >> { %5160 = vst [vmem:[%s7037_s21 + $0x1b8] sm:$0xff] %v5159_v55 }
 0x6f4   : >> { %5162 = vst [vmem:[%s7037_s21 + $0x208] sm:$0xff] %v5161_v12 }
 0x6f5   : >> { %5164 = vst [vmem:[%s7037_s21 + $0x210] sm:$0xff] %v5163_v26 }
 0x6f6   : >> { %5166 = vst [vmem:[%s7037_s21 + $0x218] sm:$0xff] %v5165_v50 }
 0x6f7   : >> { %5168 = vst [vmem:[%s7037_s21 + $0x220] sm:$0xff] %v5167_v48 }
 0x6f8   : >> { %5170 = vst [vmem:[%s7037_s21 + $0x270] sm:$0xff] %v5169_v58 }
 0x6f9   : >> { %5172 = vst [vmem:[%s7037_s21 + $0x278] sm:$0xff] %v5171_v47 }
 0x6fa   : >> { %5174 = vst [vmem:[%s7037_s21 + $0x280] sm:$0xff] %v5173_v18 }
 0x6fb   : >> { %5176 = vst [vmem:[%s7037_s21 + $0x288] sm:$0xff] %v5175_v32 }
 0x6fc   : >> { %5178 = vst [vmem:[%s7037_s21 + $0x2d8] sm:$0xff] %v5177_v51 }
 0x6fd   : >> { %5180 = vst [vmem:[%s7037_s21 + $0x2e0] sm:$0xff] %v5179_v31 }
 0x6fe   : >> { %5182 = vst [vmem:[%s7037_s21 + $0x2e8] sm:$0xff] %v5181_v20 }
 0x6ff   : >> { %5184 = vst [vmem:[%s7037_s21 + $0x2f0] sm:$0xff] %v5183_v52  ;;  %5117 = sbr.rel (!%p5114_p7) target bundleno = 1759 (0x6df), region = 538 }
 0x700   : >> { %5186 = vst [vmem:[%s7037_s21 + $0x340] sm:$0xff] %v5185_v45 }
 0x701   : >> { %5188 = vst [vmem:[%s7037_s21 + $0x348] sm:$0xff] %v5187_v4 }
 0x702   : >> { %5190 = vst [vmem:[%s7037_s21 + $0x350] sm:$0xff] %v5189_v10 }
 0x703   : >> { %5192 = vst [vmem:[%s7037_s21 + $0x358] sm:$0xff] %v5191_v34  ;;  %s10869_s21 = smov %s10517_s24 }
 0x704 PF: > { %s10590_s1 = sand.u32 3, %s10905_s2   ;;  %s6113_s18 = sshll.u32 %s10471_s23, 5 }
 0x705   : > { %s10594_s14 = scalar_lea.vmem %s8778_s28, %s6113_s18 [#allocation6]   ;;  %s10597_s30 = scalar_lea.vmem %s10465_s27, %s6113_s18  }
 0x706   : > { %p6101_p8 = scmp.le.s32.totalorder %s10590_s1, 0 }
 0x707   : > { %s10872_s0 = smov (!%p6101_p8), %s10597_s30  ;;  %s10873_s15 = smov (!%p6101_p8), %s10594_s14 }
 0x708   : > { %5567 = sbr.rel (%p6101_p8) target bundleno = 1815 (0x717), region = 543  ;;  %s10606_s11 = smov (!%p6101_p8), 0  }
 0x709   : > { %s10608_s17 = smov (!%p6101_p8), 0  }
 0x70d LB: >> { %v5216_v8 = vld [vmem:[%s7057_s15] sm:$0xff]  ;;  %s5234_s28 = sadd.s32 1, %s7061_s11  ;;  %s5210_s17 = sadd.s32 1, %s7065_s17   ;;  %s7065_s17 = sphi %s10608_s17, %s5210_s17   ;;  %s7061_s11 = sphi %s10606_s11, %s10875_s11   ;;  %s7057_s15 = sphi %s10873_s15, %s5239_s15   ;;  %s7053_s0 = sphi %s10872_s0, %s10874_s0  }
 0x70e   : >> { %v5218_v9 = vld [vmem:[%s7057_s15 + $0x60] sm:$0xff]  ;;  %5217 = vst [vmem:[%s7053_s0] sm:$0xff] %v5216_v8  ;;  %p5235_p9 = scmp.ge.s32.totalorder %s5234_s28, %s10590_s1  ;;  %p5209_p10 = scmp.ge.s32.totalorder %s5210_s17, %s10590_s1 }
 0x70f   : >> { %v5220_v46 = vld [vmem:[%s7057_s15 + $0xc0] sm:$0xff]  ;;  %5219 = vst [vmem:[%s7053_s0 + $0x68] sm:$0xff] %v5218_v9 }
 0x710   : >> { %v5222_v63 = vld [vmem:[%s7057_s15 + $0x120] sm:$0xff]  ;;  %5221 = vst [vmem:[%s7053_s0 + $0xd0] sm:$0xff] %v5220_v46  ;;  %s10909_s28 = smov (%p5235_p9, %s5234_s28), 0 }
 0x711   : >> { %v5224_v30 = vld [vmem:[%s7057_s15 + $0x180] sm:$0xff]  ;;  %5223 = vst [vmem:[%s7053_s0 + $0x138] sm:$0xff] %v5222_v63  ;;  %s6102_s2 = sshll.u32 %s10909_s28, 3  ;;  %s10875_s11 = smov %s10909_s28 }
 0x712   : >> { %v5226_v22 = vld [vmem:[%s7057_s15 + $0x1e0] sm:$0xff]  ;;  %5225 = vst [vmem:[%s7053_s0 + $0x1a0] sm:$0xff] %v5224_v30  ;;  %s5240_s27 = scalar_lea.vmem %s10597_s30, %s6102_s2   ;;  %5212 = sbr.rel (!%p5209_p10) target bundleno = 1805 (0x70d), region = 549 }
 0x713   : >> { %v5228_v2 = vld [vmem:[%s7057_s15 + $0x240] sm:$0xff]  ;;  %5227 = vst [vmem:[%s7053_s0 + $0x208] sm:$0xff] %v5226_v22 }
 0x714   : >> { %v5230_v13 = vld [vmem:[%s7057_s15 + $0x2a0] sm:$0xff]  ;;  %5229 = vst [vmem:[%s7053_s0 + $0x270] sm:$0xff] %v5228_v2 }
 0x715   : >> { %v5232_v27 = vld [vmem:[%s7057_s15 + $0x300] sm:$0xff]  ;;  %s5239_s15 = scalar_lea.vmem %s10594_s14, %s6102_s2 [#allocation6]   ;;  %5231 = vst [vmem:[%s7053_s0 + $0x2d8] sm:$0xff] %v5230_v13 }
 0x716   : >> { %5233 = vst [vmem:[%s7053_s0 + $0x340] sm:$0xff] %v5232_v27  ;;  %s10874_s0 = smov %s5240_s27 }
 0x717 PF: > { %s10876_s20 = sld [smem:[#allocation7_spill]]  ;;  %s10878_s18 = smov %s6901_s19 }
 0x718   : > { %s10877_s23 = sld [smem:[#allocation8_spill]] }
 0x71d   : > { %p23_p11 = scmp.ge.s32.totalorder %s10876_s20, 4  }
 0x71e   : > { %s10879_s19 = smov %s10877_s23 }
 0x71f   :  { %25 = sbr.rel (!%p23_p11) target bundleno = 10 (0xa), region = 560 }

// kernel: tpu_custom_call.1
= control target key start
LH: loop header
LB: loop body
LE: loop exit
PB: predicated region body
PF: predicated region fallthrough
CT: control target
= control target key end

     0   :  { %s10639_s0 = inlined_call_operand.vmem [shape: f32[100,32], index: 0, kind: input, shape index: {}]   ;;  %s10640_s1 = inlined_call_operand.vmem [shape: f32[3,100,32], index: 1, kind: input, shape index: {}]   ;;  %s10641_s2 = inlined_call_operand.vmem [shape: f32[3,3,100,16], index: 2, kind: input, shape index: {}]   ;;  %s10642_s3 = inlined_call_operand.vmem [shape: f32[32,192], index: 3, kind: input, shape index: {}]   ;;  %s10643_s4 = inlined_call_operand.vmem [shape: f32[1,64], index: 4, kind: input, shape index: {}]   ;;  %s10644_s5 = inlined_call_operand.vmem [shape: f32[64,64], index: 5, kind: input, shape index: {}]   ;;  %s10645_s6 = inlined_call_operand.vmem [shape: f32[1,64], index: 6, kind: input, shape index: {}]   ;;  %s10646_s7 = inlined_call_operand.vmem [shape: f32[64,32], index: 7, kind: input, shape index: {}]   ;;  %s10647_s8 = inlined_call_operand.vmem [shape: f32[1,32], index: 8, kind: input, shape index: {}]   ;;  %s10648_s9 = inlined_call_operand.vmem [shape: f32[32,192], index: 9, kind: input, shape index: {}]   ;;  %s10649_s10 = inlined_call_operand.vmem [shape: f32[64,64], index: 10, kind: input, shape index: {}]   ;;  %s10650_s11 = inlined_call_operand.vmem [shape: f32[64,32], index: 11, kind: input, shape index: {}]   ;;  %s10651_s12 = inlined_call_operand.vmem [shape: f32[16,16], index: 12, kind: input, shape index: {}]   ;;  %s10652_s13 = inlined_call_operand.vmem [shape: f32[100,32], index: 13, kind: output, shape index: {0}]   ;;  %s10653_s14 = inlined_call_operand.vmem [shape: f32[3,100,32], index: 14, kind: output, shape index: {1}]   ;;  %s10654_s15 = inlined_call_operand.vmem [shape: f32[3,3,100,16], index: 15, kind: output, shape index: {2}]  }
   0x1   :  { %10683 = sst [smem:[#allocation68_spill]] %s10639_s0 }
   0x2   :  { %10684 = sst [smem:[#allocation69_spill]] %s10640_s1 }
   0x3   :  { %10685 = sst [smem:[#allocation70_spill]] %s10641_s2 }
   0x4   :  { %10686 = sst [smem:[#allocation71_spill]] %s10650_s11 }
   0x5   :  { %10687 = sst [smem:[#allocation72_spill]] %s10652_s13 }
   0x6   :  { %10688 = sst [smem:[#allocation73_spill]] %s10653_s14 }
   0x7   :  { %10689 = sst [smem:[#allocation74_spill]] %s10654_s15 }
   0x8   :  { %s7147_s18 = smov 0   ;;  %s7149_s19 = smov 0  }
   0x9   :  { %s7151_s20 = smov 0  }
   0xa LB: > { %s7163_s21 = sadd.s32 4294967295, %s6905_s20   ;;  %s7166_s22 = sadd.s32 1, %s6905_s20   ;;  %s6905_s20 = sphi %s7151_s20, %s10876_s20   ;;  %s6901_s19 = sphi %s7149_s19, %s10879_s19   ;;  %s6897_s18 = sphi %s7147_s18, %s10878_s18  }
   0xb   : > { %10690 = sst [smem:[#allocation7_spill]] %s7166_s22  ;;  %s56_s23 = ssub.s32 %s6905_s20, %s7166_s22 }
   0xc   : > { %s59_s24 = sadd.s32 1, %s6901_s19  ;;  %p57_p0 = scmp.eq.s32.totalorder %s56_s23, 0 }
   0xd   : > { %p66_p1 = scmp.ne.s32.totalorder %s6901_s19, %s6897_s18  ;;  %p67_p2 = scmp.eq.s32.totalorder %s6905_s20, 0 }
   0xe   : > { %p332_p3 = scmp.eq.s32.totalorder %s7163_s21, 1  ;;  %p5629_p6 = scmp.ge.s32.totalorder %s6905_s20, 2 }
   0xf   : > { %s7176_s25 = scalar_select %p57_p0, %s6901_s19, %s59_s24  }
  0x10   : > { %p7178_p4 = por %p67_p2, %p66_p1  ;;  %p7182_p5 = por %p332_p3, %p66_p1 }
  0x11   : > { %10691 = sst [smem:[#allocation8_spill]] %s7176_s25  ;;  %436 = sbr.rel (%p5629_p6) target bundleno = 187 (0xbb), region = 56 }
  0x12   : > { %s10693_s27 = scalar_select %p7182_p5, 1, 0 }
  0x14   : > { %10694 = sst [smem:[#allocation9_spill]] %s10693_s27 }
  0x16   : > { %456 = sbr.rel (!%p7178_p4) target bundleno = 109 (0x6d), region = 64  ;;  %s458_s28 = sand.u32 (%p7178_p4), 1, %s6901_s19  }
  0x17   : > { %s461_s29 = smul.u32 (%p7178_p4), 12, %s6905_s20  ;;  %s10695_s1 = sld [smem:[#allocation69_spill]] (%p7178_p4) }
  0x18   : > { %s6129_s30 = smul.u32 (%p7178_p4), 288, %s458_s28 }
  0x19   : > { %s462_s16 = ssub.s32 (%p7178_p4), 13, %s461_s29  ;;  %s6106_s17 = smul.u32 (%p7178_p4), 96, %s6905_s20 }
  0x1a   : > { %p463_p7 = scmp.lt.s32.totalorder (%p7178_p4), %s462_s16, 12  ;;  %s7200_s15 = scalar_lea.vmem (%p7178_p4), [#allocation2], %s6129_s30  }
  0x1c   : > { %s10881_s16 = smov (!%p463_p7, %s462_s16), 12 }
  0x1d   : > { %s7195_s25 = scalar_lea.vmem %s10695_s1, %s6106_s17   ;;  %s465_s22 = smul.u32 24, %s10881_s16 }
  0x1f   : > { %p5632_p8 = scmp.eq.s32.totalorder %s465_s22, 0 }
  0x20   : > { %6481 = sdivrem.u32 (!%p5632_p8), %s10881_s16, 11 }
  0x21   : > { %471 = sbr.rel (%p5632_p8) target bundleno = 109 (0x6d), region = 68 }
  0x29   : > { %s7203_s14 = spop.drf %6481 }
  0x2a   : > { %s6483_s28 = spop.drf %6481  ;;  %p5633_p9 = scmp.le.s32.totalorder %s7203_s14, 0 }
  0x2b   : > { %s10696_s29 = smov (!%p5633_p9), %s7200_s15  ;;  %s10697_s17 = smov (!%p5633_p9), %s7195_s25 }
  0x2c   : > { %5441 = sbr.rel (%p5633_p9) target bundleno = 83 (0x53), region = 444  ;;  %s7212_s23 = smov (!%p5633_p9), 0  }
  0x2d   : > { %s7214_s30 = smov (!%p5633_p9), 0  }
  0x31 LB: >> { %v604_v0 = vld [vmem:[%s6913_s17] sm:$0xff]  ;;  %v606_v1 = vld [vmem:[%s6913_s17 + $0x8] sm:$0xff]  ;;  %v608_v2 = vld [vmem:[%s6913_s17 + $0x10] sm:$0xff]  ;;  %s670_s22 = sadd.s32 1, %s6917_s23  ;;  %s598_s30 = sadd.s32 1, %s6921_s30   ;;  %s6921_s30 = sphi %s7214_s30, %s598_s30   ;;  %s6917_s23 = sphi %s7212_s23, %s10700_s23   ;;  %s6913_s17 = sphi %s10697_s17, %s10699_s17   ;;  %s6909_s29 = sphi %s10696_s29, %s10698_s29  }
  0x32   : >> { %605 = vst [vmem:[%s6909_s29] sm:$0xff] %v604_v0  ;;  %v610_v3 = vld [vmem:[%s6913_s17 + $0x18] sm:$0xff]  ;;  %p671_p10 = scmp.ge.s32.totalorder %s670_s22, %s7203_s14  ;;  %v612_v4 = vld [vmem:[%s6913_s17 + $0x20] sm:$0xff]  ;;  %v614_v5 = vld [vmem:[%s6913_s17 + $0x28] sm:$0xff]  ;;  %p597_p11 = scmp.ge.s32.totalorder %s598_s30, %s7203_s14 }
  0x33   : >> { %607 = vst [vmem:[%s6909_s29 + $0x8] sm:$0xff] %v606_v1  ;;  %v616_v6 = vld [vmem:[%s6913_s17 + $0x30] sm:$0xff]  ;;  %v618_v7 = vld [vmem:[%s6913_s17 + $0x38] sm:$0xff]  ;;  %v620_v8 = vld [vmem:[%s6913_s17 + $0x40] sm:$0xff] }
  0x34   : >> { %609 = vst [vmem:[%s6909_s29 + $0x10] sm:$0xff] %v608_v2  ;;  %s10883_s22 = smov (%p671_p10, %s670_s22), 0  ;;  %v622_v9 = vld [vmem:[%s6913_s17 + $0x48] sm:$0xff]  ;;  %v624_v10 = vld [vmem:[%s6913_s17 + $0x50] sm:$0xff]  ;;  %v630_v13 = vld [vmem:[%s6913_s17 + $0x78] sm:$0xff] }
  0x35   : >> { %611 = vst [vmem:[%s6909_s29 + $0x18] sm:$0xff] %v610_v3  ;;  %s673_s24 = smul.u32 88, %s10883_s22  ;;  %v626_v11 = vld [vmem:[%s6913_s17 + $0x68] sm:$0xff]  ;;  %v628_v12 = vld [vmem:[%s6913_s17 + $0x70] sm:$0xff]  ;;  %v632_v14 = vld [vmem:[%s6913_s17 + $0x80] sm:$0xff] }
  0x36   : >> { %613 = vst [vmem:[%s6909_s29 + $0x20] sm:$0xff] %v612_v4  ;;  %v634_v15 = vld [vmem:[%s6913_s17 + $0x88] sm:$0xff]  ;;  %v636_v16 = vld [vmem:[%s6913_s17 + $0x90] sm:$0xff]  ;;  %v638_v17 = vld [vmem:[%s6913_s17 + $0x98] sm:$0xff] }
  0x37   : >> { %615 = vst [vmem:[%s6909_s29 + $0x28] sm:$0xff] %v614_v5  ;;  %s7248_s28 = scalar_lea.vmem %s7195_s25, %s673_s24   ;;  %s7251_s23 = scalar_lea.vmem %s7200_s15, %s673_s24 [#allocation2]   ;;  %v640_v18 = vld [vmem:[%s6913_s17 + $0xa0] sm:$0xff]  ;;  %v642_v19 = vld [vmem:[%s6913_s17 + $0xa8] sm:$0xff]  ;;  %v644_v20 = vld [vmem:[%s6913_s17 + $0xb0] sm:$0xff] }
  0x38   : >> { %617 = vst [vmem:[%s6909_s29 + $0x30] sm:$0xff] %v616_v6  ;;  %v646_v21 = vld [vmem:[%s6913_s17 + $0xb8] sm:$0xff]  ;;  %v648_v22 = vld [vmem:[%s6913_s17 + $0xd0] sm:$0xff]  ;;  %v652_v24 = vld [vmem:[%s6913_s17 + $0xe0] sm:$0xff] }
  0x39   : >> { %619 = vst [vmem:[%s6909_s29 + $0x38] sm:$0xff] %v618_v7  ;;  %v650_v23 = vld [vmem:[%s6913_s17 + $0xd8] sm:$0xff]  ;;  %v654_v25 = vld [vmem:[%s6913_s17 + $0xe8] sm:$0xff]  ;;  %v656_v26 = vld [vmem:[%s6913_s17 + $0xf0] sm:$0xff] }
  0x3a   : >> { %621 = vst [vmem:[%s6909_s29 + $0x40] sm:$0xff] %v620_v8  ;;  %v658_v27 = vld [vmem:[%s6913_s17 + $0xf8] sm:$0xff]  ;;  %v660_v28 = vld [vmem:[%s6913_s17 + $0x100] sm:$0xff]  ;;  %v662_v29 = vld [vmem:[%s6913_s17 + $0x108] sm:$0xff] }
  0x3b   : >> { %623 = vst [vmem:[%s6909_s29 + $0x48] sm:$0xff] %v622_v9  ;;  %v664_v30 = vld [vmem:[%s6913_s17 + $0x110] sm:$0xff]  ;;  %v666_v31 = vld [vmem:[%s6913_s17 + $0x118] sm:$0xff]  ;;  %v668_v32 = vld [vmem:[%s6913_s17 + $0x120] sm:$0xff]  ;;  %s10699_s17 = smov %s7248_s28 }
  0x3c   : >> { %625 = vst [vmem:[%s6909_s29 + $0x50] sm:$0xff] %v624_v10 }
  0x3d   : >> { %627 = vst [vmem:[%s6909_s29 + $0x60] sm:$0xff] %v626_v11 }
  0x3e   : >> { %629 = vst [vmem:[%s6909_s29 + $0x68] sm:$0xff] %v628_v12 }
  0x3f   : >> { %631 = vst [vmem:[%s6909_s29 + $0x70] sm:$0xff] %v630_v13 }
  0x40   : >> { %633 = vst [vmem:[%s6909_s29 + $0x78] sm:$0xff] %v632_v14 }
  0x41   : >> { %635 = vst [vmem:[%s6909_s29 + $0x80] sm:$0xff] %v634_v15 }
  0x42   : >> { %637 = vst [vmem:[%s6909_s29 + $0x88] sm:$0xff] %v636_v16 }
  0x43   : >> { %639 = vst [vmem:[%s6909_s29 + $0x90] sm:$0xff] %v638_v17 }
  0x44   : >> { %641 = vst [vmem:[%s6909_s29 + $0x98] sm:$0xff] %v640_v18 }
  0x45   : >> { %643 = vst [vmem:[%s6909_s29 + $0xa0] sm:$0xff] %v642_v19 }
  0x46   : >> { %645 = vst [vmem:[%s6909_s29 + $0xa8] sm:$0xff] %v644_v20 }
  0x47   : >> { %647 = vst [vmem:[%s6909_s29 + $0xb0] sm:$0xff] %v646_v21 }
  0x48   : >> { %649 = vst [vmem:[%s6909_s29 + $0xc0] sm:$0xff] %v648_v22 }
  0x49   : >> { %651 = vst [vmem:[%s6909_s29 + $0xc8] sm:$0xff] %v650_v23 }
  0x4a   : >> { %653 = vst [vmem:[%s6909_s29 + $0xd0] sm:$0xff] %v652_v24 }
  0x4b   : >> { %655 = vst [vmem:[%s6909_s29 + $0xd8] sm:$0xff] %v654_v25 }
  0x4c   : >> { %657 = vst [vmem:[%s6909_s29 + $0xe0] sm:$0xff] %v656_v26 }
  0x4d   : >> { %659 = vst [vmem:[%s6909_s29 + $0xe8] sm:$0xff] %v658_v27 }
  0x4e   : >> { %661 = vst [vmem:[%s6909_s29 + $0xf0] sm:$0xff] %v660_v28  ;;  %600 = sbr.rel (!%p597_p11) target bundleno = 49 (0x31), region = 450 }
  0x4f   : >> { %663 = vst [vmem:[%s6909_s29 + $0xf8] sm:$0xff] %v662_v29 }
  0x50   : >> { %665 = vst [vmem:[%s6909_s29 + $0x100] sm:$0xff] %v664_v30 }
  0x51   : >> { %667 = vst [vmem:[%s6909_s29 + $0x108] sm:$0xff] %v666_v31 }
  0x52   : >> { %669 = vst [vmem:[%s6909_s29 + $0x110] sm:$0xff] %v668_v32  ;;  %s10698_s29 = smov %s7251_s23  ;;  %s10700_s23 = smov %s10883_s22 }
  0x53 PF: > { %6484 = sdivrem.u32 %s10881_s16, 11 }
  0x54   : > { %s5634_s24 = smul.u32 88, %s7203_s14 }
  0x56   : > { %s7318_s1 = scalar_lea.vmem %s7195_s25, %s5634_s24   ;;  %s7321_s13 = scalar_lea.vmem %s7200_s15, %s5634_s24 [#allocation2]  }
  0x5c   : > { %s6485_s27 = spop.drf %6484 }
  0x5d   : > { %s7323_s11 = spop.drf %6484 }
  0x5e   : > { %p5636_p12 = scmp.le.s32.totalorder %s7323_s11, 0 }
  0x5f   : > { %s10701_s29 = smov (!%p5636_p12), %s7321_s13  ;;  %s6927_s17 = smov (!%p5636_p12), %s7318_s1  }
  0x60   : > { %5455 = sbr.rel (%p5636_p12) target bundleno = 109 (0x6d), region = 455  ;;  %s6931_s30 = smov (!%p5636_p12), 0  }
  0x61   : > { %s6935_s22 = smov (!%p5636_p12), 0  }
  0x65 LB: >> { %v693_v33 = vld [vmem:[%s6929_s17] sm:$0xff]  ;;  %v695_v34 = vld [vmem:[%s6929_s17 + $0x68] sm:$0xff]  ;;  %v697_v35 = vld [vmem:[%s6929_s17 + $0xd0] sm:$0xff]  ;;  %s699_s14 = sadd.s32 1, %s6933_s30  ;;  %s687_s22 = sadd.s32 1, %s6937_s22   ;;  %s6937_s22 = sphi %s6935_s22, %s687_s22   ;;  %s6933_s30 = sphi %s6931_s30, %s6932_s30   ;;  %s6929_s17 = sphi %s6927_s17, %s704_s17   ;;  %s6925_s29 = sphi %s10701_s29, %s705_s29  }
  0x66   : >> { %694 = vst [vmem:[%s6925_s29] sm:$0xff] %v693_v33  ;;  %p700_p13 = scmp.ge.s32.totalorder %s699_s14, %s7323_s11  ;;  %p686_p0 = scmp.ge.s32.totalorder %s687_s22, %s7323_s11 }
  0x67   : >> { %696 = vst [vmem:[%s6925_s29 + $0x60] sm:$0xff] %v695_v34 }
  0x68   : >> { %698 = vst [vmem:[%s6925_s29 + $0xc0] sm:$0xff] %v697_v35  ;;  %s10885_s14 = smov (%p700_p13, %s699_s14), 0  ;;  %689 = sbr.rel (!%p686_p0) target bundleno = 101 (0x65), region = 461 }
  0x69   : >> { %s5637_s15 = sshll.u32 %s10885_s14, 3  ;;  %s6932_s30 = smov %s10885_s14  }
  0x6a   : >> { %s704_s17 = scalar_lea.vmem %s7318_s1, %s5637_s15   ;;  %s705_s29 = scalar_lea.vmem %s7321_s13, %s5637_s15 [#allocation2]  }
  0x6d PF: > { %711 = sbr.rel (!%p7178_p4) target bundleno = 187 (0xbb), region = 116  ;;  %s713_s25 = sand.u32 (%p7178_p4), 1, %s6901_s19  }
  0x6e   : > { %s716_s27 = smul.u32 (%p7178_p4), 12, %s6905_s20  ;;  %s10702_s2 = sld [smem:[#allocation70_spill]] (%p7178_p4) }
  0x6f   : > { %s6130_s16 = smul.u32 (%p7178_p4), 864, %s713_s25 }
  0x70   : > { %s717_s28 = ssub.s32 (%p7178_p4), 13, %s716_s27  ;;  %s6107_s23 = smul.u32 (%p7178_p4), 96, %s6905_s20 }
  0x71   : > { %p718_p1 = scmp.lt.s32.totalorder (%p7178_p4), %s717_s28, 12  ;;  %s7350_s11 = scalar_lea.vmem (%p7178_p4), [#allocation3], %s6130_s16  }
  0x73   : > { %s10887_s28 = smov (!%p718_p1, %s717_s28), 12 }
  0x74   : > { %s7345_s17 = scalar_lea.vmem %s10702_s2, %s6107_s23   ;;  %s720_s1 = smul.u32 72, %s10887_s28 }
  0x76   : > { %p5641_p2 = scmp.eq.s32.totalorder %s720_s1, 0 }
  0x77   : > { %s7353_s13 = sshrl.u32 (!%p5641_p2), %s10887_s28, 2 }
  0x78   : > { %726 = sbr.rel (%p5641_p2) target bundleno = 187 (0xbb), region = 120  ;;  %p5642_p3 = scmp.le.s32.totalorder (!%p5641_p2), %s7353_s13, 0 }
  0x7d   : > { %5469 = sbr.rel (%p5642_p3) target bundleno = 167 (0xa7), region = 466  ;;  %s10703_s26 = smov (!%p5642_p3), %s7350_s11 }
  0x7e   : > { %s10704_s30 = smov (!%p5642_p3), %s7345_s17  ;;  %s7362_s22 = smov (!%p5642_p3), 0  }
  0x7f   : > { %s7364_s14 = smov (!%p5642_p3), 0  }
  0x82 LB: >> { %v875_v36 = vld [vmem:[%s6945_s30] sm:$0xff]  ;;  %v877_v37 = vld [vmem:[%s6945_s30 + $0x8] sm:$0xff]  ;;  %v879_v38 = vld [vmem:[%s6945_s30 + $0x10] sm:$0xff]  ;;  %s947_s15 = sadd.s32 1, %s6949_s22  ;;  %s869_s14 = sadd.s32 1, %s6953_s14   ;;  %s6953_s14 = sphi %s7364_s14, %s869_s14   ;;  %s6949_s22 = sphi %s7362_s22, %s10707_s22   ;;  %s6945_s30 = sphi %s10704_s30, %s10706_s30   ;;  %s6941_s26 = sphi %s10703_s26, %s10705_s26  }
  0x83   : >> { %876 = vst [vmem:[%s6941_s26] sm:$0xff] %v875_v36  ;;  %v881_v39 = vld [vmem:[%s6945_s30 + $0x18] sm:$0xff]  ;;  %p948_p4 = scmp.ge.s32.totalorder %s947_s15, %s7353_s13  ;;  %v883_v40 = vld [vmem:[%s6945_s30 + $0x68] sm:$0xff]  ;;  %v885_v41 = vld [vmem:[%s6945_s30 + $0x70] sm:$0xff]  ;;  %p868_p6 = scmp.ge.s32.totalorder %s869_s14, %s7353_s13 }
  0x84   : >> { %878 = vst [vmem:[%s6941_s26 + $0x8] sm:$0xff] %v877_v37  ;;  %v887_v42 = vld [vmem:[%s6945_s30 + $0x78] sm:$0xff]  ;;  %v889_v43 = vld [vmem:[%s6945_s30 + $0x80] sm:$0xff]  ;;  %v891_v44 = vld [vmem:[%s6945_s30 + $0xd0] sm:$0xff] }
  0x85   : >> { %880 = vst [vmem:[%s6941_s26 + $0x10] sm:$0xff] %v879_v38  ;;  %s10889_s15 = smov (%p948_p4, %s947_s15), 0  ;;  %v893_v45 = vld [vmem:[%s6945_s30 + $0xd8] sm:$0xff]  ;;  %v895_v46 = vld [vmem:[%s6945_s30 + $0xe0] sm:$0xff]  ;;  %v897_v47 = vld [vmem:[%s6945_s30 + $0xe8] sm:$0xff] }
  0x86   : >> { %882 = vst [vmem:[%s6941_s26 + $0x18] sm:$0xff] %v881_v39  ;;  %s5643_s25 = sshll.u32 %s10889_s15, 5  ;;  %v899_v48 = vld [vmem:[%s6945_s30 + $0x138] sm:$0xff]  ;;  %v901_v49 = vld [vmem:[%s6945_s30 + $0x140] sm:$0xff]  ;;  %v903_v50 = vld [vmem:[%s6945_s30 + $0x148] sm:$0xff]  ;;  %s10707_s22 = smov %s10889_s15 }
  0x87   : >> { %884 = vst [vmem:[%s6941_s26 + $0x60] sm:$0xff] %v883_v40  ;;  %s7396_s27 = scalar_lea.vmem %s7345_s17, %s5643_s25   ;;  %s7399_s16 = scalar_lea.vmem %s7350_s11, %s5643_s25 [#allocation3]   ;;  %v905_v51 = vld [vmem:[%s6945_s30 + $0x150] sm:$0xff]  ;;  %v907_v52 = vld [vmem:[%s6945_s30 + $0x1a0] sm:$0xff]  ;;  %v909_v53 = vld [vmem:[%s6945_s30 + $0x1a8] sm:$0xff] }
  0x88   : >> { %886 = vst [vmem:[%s6941_s26 + $0x68] sm:$0xff] %v885_v41  ;;  %v911_v54 = vld [vmem:[%s6945_s30 + $0x1b0] sm:$0xff]  ;;  %v913_v55 = vld [vmem:[%s6945_s30 + $0x1b8] sm:$0xff]  ;;  %v915_v56 = vld [vmem:[%s6945_s30 + $0x208] sm:$0xff] }
  0x89   : >> { %888 = vst [vmem:[%s6941_s26 + $0x70] sm:$0xff] %v887_v42  ;;  %v917_v57 = vld [vmem:[%s6945_s30 + $0x210] sm:$0xff]  ;;  %v919_v58 = vld [vmem:[%s6945_s30 + $0x218] sm:$0xff]  ;;  %v921_v59 = vld [vmem:[%s6945_s30 + $0x220] sm:$0xff] }
  0x8a   : >> { %890 = vst [vmem:[%s6941_s26 + $0x78] sm:$0xff] %v889_v43  ;;  %v923_v60 = vld [vmem:[%s6945_s30 + $0x270] sm:$0xff]  ;;  %v925_v61 = vld [vmem:[%s6945_s30 + $0x278] sm:$0xff]  ;;  %v927_v62 = vld [vmem:[%s6945_s30 + $0x280] sm:$0xff] }
  0x8b   : >> { %892 = vst [vmem:[%s6941_s26 + $0xc0] sm:$0xff] %v891_v44  ;;  %v929_v63 = vld [vmem:[%s6945_s30 + $0x288] sm:$0xff]  ;;  %v931_v0 = vld [vmem:[%s6945_s30 + $0x2d8] sm:$0xff]  ;;  %v933_v1 = vld [vmem:[%s6945_s30 + $0x2e0] sm:$0xff] }
  0x8c   : >> { %894 = vst [vmem:[%s6941_s26 + $0xc8] sm:$0xff] %v893_v45  ;;  %v935_v2 = vld [vmem:[%s6945_s30 + $0x2e8] sm:$0xff]  ;;  %v937_v3 = vld [vmem:[%s6945_s30 + $0x2f0] sm:$0xff]  ;;  %v939_v4 = vld [vmem:[%s6945_s30 + $0x340] sm:$0xff] }
  0x8d   : >> { %896 = vst [vmem:[%s6941_s26 + $0xd0] sm:$0xff] %v895_v46  ;;  %v941_v5 = vld [vmem:[%s6945_s30 + $0x348] sm:$0xff]  ;;  %v943_v6 = vld [vmem:[%s6945_s30 + $0x350] sm:$0xff]  ;;  %v945_v7 = vld [vmem:[%s6945_s30 + $0x358] sm:$0xff]  ;;  %s10706_s30 = smov %s7396_s27 }
  0x8e   : >> { %898 = vst [vmem:[%s6941_s26 + $0xd8] sm:$0xff] %v897_v47 }
  0x8f   : >> { %900 = vst [vmem:[%s6941_s26 + $0x120] sm:$0xff] %v899_v48 }
  0x90   : >> { %902 = vst [vmem:[%s6941_s26 + $0x128] sm:$0xff] %v901_v49 }
  0x91   : >> { %904 = vst [vmem:[%s6941_s26 + $0x130] sm:$0xff] %v903_v50 }
  0x92   : >> { %906 = vst [vmem:[%s6941_s26 + $0x138] sm:$0xff] %v905_v51 }
  0x93   : >> { %908 = vst [vmem:[%s6941_s26 + $0x180] sm:$0xff] %v907_v52 }
  0x94   : >> { %910 = vst [vmem:[%s6941_s26 + $0x188] sm:$0xff] %v909_v53 }
  0x95   : >> { %912 = vst [vmem:[%s6941_s26 + $0x190] sm:$0xff] %v911_v54 }
  0x96   : >> { %914 = vst [vmem:[%s6941_s26 + $0x198] sm:$0xff] %v913_v55 }
  0x97   : >> { %916 = vst [vmem:[%s6941_s26 + $0x1e0] sm:$0xff] %v915_v56 }
  0x98   : >> { %918 = vst [vmem:[%s6941_s26 + $0x1e8] sm:$0xff] %v917_v57 }
  0x99   : >> { %920 = vst [vmem:[%s6941_s26 + $0x1f0] sm:$0xff] %v919_v58 }
  0x9a   : >> { %922 = vst [vmem:[%s6941_s26 + $0x1f8] sm:$0xff] %v921_v59 }
  0x9b   : >> { %924 = vst [vmem:[%s6941_s26 + $0x240] sm:$0xff] %v923_v60 }
  0x9c   : >> { %926 = vst [vmem:[%s6941_s26 + $0x248] sm:$0xff] %v925_v61 }
  0x9d   : >> { %928 = vst [vmem:[%s6941_s26 + $0x250] sm:$0xff] %v927_v62 }
  0x9e   : >> { %930 = vst [vmem:[%s6941_s26 + $0x258] sm:$0xff] %v929_v63 }
  0x9f   : >> { %932 = vst [vmem:[%s6941_s26 + $0x2a0] sm:$0xff] %v931_v0 }
  0xa0   : >> { %934 = vst [vmem:[%s6941_s26 + $0x2a8] sm:$0xff] %v933_v1 }
  0xa1   : >> { %936 = vst [vmem:[%s6941_s26 + $0x2b0] sm:$0xff] %v935_v2 }
  0xa2   : >> { %938 = vst [vmem:[%s6941_s26 + $0x2b8] sm:$0xff] %v937_v3  ;;  %871 = sbr.rel (!%p868_p6) target bundleno = 130 (0x82), region = 472 }
  0xa3   : >> { %940 = vst [vmem:[%s6941_s26 + $0x300] sm:$0xff] %v939_v4 }
  0xa4   : >> { %942 = vst [vmem:[%s6941_s26 + $0x308] sm:$0xff] %v941_v5 }
  0xa5   : >> { %944 = vst [vmem:[%s6941_s26 + $0x310] sm:$0xff] %v943_v6 }
  0xa6   : >> { %946 = vst [vmem:[%s6941_s26 + $0x318] sm:$0xff] %v945_v7  ;;  %s10705_s26 = smov %s7399_s16 }
  0xa7 PF: > { %s7472_s23 = sand.u32 3, %s10887_s28   ;;  %s6108_s24 = sshll.u32 %s7353_s13, 5 }
  0xa8   : > { %s7476_s29 = scalar_lea.vmem %s7345_s17, %s6108_s24   ;;  %s7479_s1 = scalar_lea.vmem %s7350_s11, %s6108_s24 [#allocation3]  }
  0xa9   : > { %p5648_p7 = scmp.le.s32.totalorder %s7472_s23, 0 }
  0xaa   : > { %s10708_s14 = smov (!%p5648_p7), %s7479_s1  ;;  %s10709_s26 = smov (!%p5648_p7), %s7476_s29 }
  0xab   : > { %5483 = sbr.rel (%p5648_p7) target bundleno = 187 (0xbb), region = 477  ;;  %s7488_s30 = smov (!%p5648_p7), 0  }
  0xac   : > { %s7490_s22 = smov (!%p5648_p7), 0  }
  0xb0 LB: >> { %v970_v8 = vld [vmem:[%s6961_s26] sm:$0xff]  ;;  %v972_v9 = vld [vmem:[%s6961_s26 + $0x68] sm:$0xff]  ;;  %v974_v10 = vld [vmem:[%s6961_s26 + $0xd0] sm:$0xff]  ;;  %s988_s28 = sadd.s32 1, %s6965_s30  ;;  %s964_s22 = sadd.s32 1, %s6969_s22   ;;  %s6969_s22 = sphi %s7490_s22, %s964_s22   ;;  %s6965_s30 = sphi %s7488_s30, %s10711_s30   ;;  %s6961_s26 = sphi %s10709_s26, %s993_s26   ;;  %s6957_s14 = sphi %s10708_s14, %s10710_s14  }
  0xb1   : >> { %971 = vst [vmem:[%s6957_s14] sm:$0xff] %v970_v8  ;;  %v976_v11 = vld [vmem:[%s6961_s26 + $0x138] sm:$0xff]  ;;  %p989_p8 = scmp.ge.s32.totalorder %s988_s28, %s7472_s23  ;;  %v978_v12 = vld [vmem:[%s6961_s26 + $0x1a0] sm:$0xff]  ;;  %v980_v13 = vld [vmem:[%s6961_s26 + $0x208] sm:$0xff]  ;;  %p963_p9 = scmp.ge.s32.totalorder %s964_s22, %s7472_s23 }
  0xb2   : >> { %973 = vst [vmem:[%s6957_s14 + $0x60] sm:$0xff] %v972_v9  ;;  %v982_v14 = vld [vmem:[%s6961_s26 + $0x270] sm:$0xff]  ;;  %v984_v15 = vld [vmem:[%s6961_s26 + $0x2d8] sm:$0xff]  ;;  %v986_v16 = vld [vmem:[%s6961_s26 + $0x340] sm:$0xff] }
  0xb3   : >> { %975 = vst [vmem:[%s6957_s14 + $0xc0] sm:$0xff] %v974_v10  ;;  %s10891_s28 = smov (%p989_p8, %s988_s28), 0 }
  0xb4   : >> { %977 = vst [vmem:[%s6957_s14 + $0x120] sm:$0xff] %v976_v11  ;;  %s5649_s17 = sshll.u32 %s10891_s28, 3  ;;  %s10711_s30 = smov %s10891_s28 }
  0xb5   : >> { %979 = vst [vmem:[%s6957_s14 + $0x180] sm:$0xff] %v978_v12  ;;  %s993_s26 = scalar_lea.vmem %s7476_s29, %s5649_s17   ;;  %s994_s11 = scalar_lea.vmem %s7479_s1, %s5649_s17 [#allocation3]  }
  0xb6   : >> { %981 = vst [vmem:[%s6957_s14 + $0x1e0] sm:$0xff] %v980_v13  ;;  %966 = sbr.rel (!%p963_p9) target bundleno = 176 (0xb0), region = 483 }
  0xb7   : >> { %983 = vst [vmem:[%s6957_s14 + $0x240] sm:$0xff] %v982_v14 }
  0xb8   : >> { %985 = vst [vmem:[%s6957_s14 + $0x2a0] sm:$0xff] %v984_v15 }
  0xb9   : >> { %987 = vst [vmem:[%s6957_s14 + $0x300] sm:$0xff] %v986_v16  ;;  %s10710_s14 = smov %s994_s11 }
  0xbb PF: > { %p5651_p10 = scmp.ge.s32.totalorder %s6905_s20, 1  ;;  %p999_p11 = scmp.lt.s32.totalorder %s6905_s20, 3 }
  0xbd   : > { %p1000_p12 = pnand %p5651_p10, %p999_p11 }
  0xbf   : > { %1003 = sbr.rel (%p1000_p12) target bundleno = 1815 (0x717), region = 168 }
  0xc4   : > { %v1138_v17 = vld [vmem:[%s10642_s3 + $0x38] sm:$0xff]  ;;  %v1136_v18 = vld [vmem:[%s10642_s3 + $0x28] sm:$0xff]  ;;  %s7520_s16 = smul.u32 12, %s7163_s21  ;;  %s7527_s24 = sand.u32 1, %s6897_s18   ;;  %v1627_v21 = vld [vmem:[%s10648_s9 + $0x30] sm:$0xff]  ;;  %vm1139_vm0 = vcmask 261120  }
  0xc5   : > { %1241 = vmatpush.msra.mxu1 %v1138_v17  ;;  %6115 = vmatpush.msra.mxu3 %v1138_v17  ;;  %v1134_v19 = vld [vmem:[%s10642_s3 + $0x18] sm:$0xff]  ;;  %v1132_v20 = vld [vmem:[%s10642_s3 + $0x8] sm:$0xff]  ;;  %s10712_s0 = sld [smem:[#allocation68_spill]]  ;;  %v1625_v22 = vld [vmem:[%s10648_s9 + $0x20] sm:$0xff]  ;;  %s6131_s15 = smul.u32 288, %s7527_s24  ;;  %vm1334_vm1 = vcmask 523264  }
  0xc6   : > { %p1085_p13 = scmp.lt.s32.totalorder %s7520_s16, 12  ;;  %v1623_v24 = vld [vmem:[%s10648_s9 + $0x10] sm:$0xff]  ;;  %v1621_v25 = vld [vmem:[%s10648_s9] sm:$0xff]  ;;  %v1628_v26 = vld [vmem:[%s10648_s9 + $0x38] sm:$0xff]  ;;  %s6133_s26 = smul.u32 96, %s7527_s24 }
  0xc7   : > { %1242 = vmatpush.msra.mxu1 %v1136_v18  ;;  %6116 = vmatpush.msra.mxu3 %v1136_v18  ;;  %v1626_v33 = vld [vmem:[%s10648_s9 + $0x28] sm:$0xff]  ;;  %v1329_v38 = vld [vmem:[%s10644_s5 + $0x38] sm:$0xff]  ;;  %v1328_v39 = vld [vmem:[%s10644_s5 + $0x30] sm:$0xff]  ;;  %s6132_s20 = smul.u32 864, %s7527_s24  ;;  %s10753_s13 = sld [smem:[#allocation71_spill]] }
  0xc8   : > { %s1086_s14 = scalar_select %p1085_p13, %s7520_s16, 12  ;;  %1379 = vmatpush.msra.mxu2 %v1329_v38  ;;  %v1327_v41 = vld [vmem:[%s10644_s5 + $0x28] sm:$0xff]  ;;  %v1326_v42 = vld [vmem:[%s10644_s5 + $0x20] sm:$0xff]  ;;  %v1325_v43 = vld [vmem:[%s10644_s5 + $0x18] sm:$0xff] }
  0xc9   : > { %1243 = vmatpush.msra.mxu1 %v1134_v19  ;;  %6117 = vmatpush.msra.mxu3 %v1134_v19  ;;  %v1324_v45 = vld [vmem:[%s10644_s5 + $0x10] sm:$0xff]  ;;  %v1323_v46 = vld [vmem:[%s10644_s5 + $0x8] sm:$0xff]  ;;  %v1322_v47 = vld [vmem:[%s10644_s5] sm:$0xff]  ;;  %s8030_s30 = scalar_lea.vmem [#allocation4], %s6133_s26   ;;  %s8521_s26 = scalar_lea.vmem [#allocation3], %s6132_s20 }
  0xca   : > { %s5652_s22 = sshll.u32 %s1086_s14, 3  ;;  %s7561_s14 = scalar_lea.vmem [#allocation2], %s6131_s15  ;;  %1380 = vmatpush.msra.mxu2 %v1328_v39  ;;  %v1624_v51 = vld [vmem:[%s10648_s9 + $0x18] sm:$0xff]  ;;  %v7671_v52 = vld [vmem:[%s10643_s4] ss:$0 sm:$0xff]  ;;  %v1622_v16 = vld [vmem:[%s10648_s9 + $0x8] sm:$0xff] }
  0xcb   : > { %1244 = vmatpush.msra.mxu1 %v1132_v20  ;;  %s7539_s17 = scalar_lea.vmem %s10712_s0, %s5652_s22  ;;  %6118 = vmatpush.msra.mxu3 %v1132_v20  ;;  %v7564_v27 = vld [vmem:[%s7561_s14] sm:$0xff]  ;;  %v7569_v28 = vld [vmem:[%s7561_s14 + $0x8] sm:$0xff]  ;;  %v7574_v29 = vld [vmem:[%s7561_s14 + $0x10] sm:$0xff]  ;;  %s8778_s28 = scalar_lea.vmem [#allocation6], %s6132_s20  }
  0xcc   : > { %v7546_v23 = vld [vmem:[%s7539_s17] sm:$0xff]  ;;  %v7579_v30 = vld [vmem:[%s7561_s14 + $0x18] sm:$0xff]  ;;  %v7589_v32 = vld [vmem:[%s7561_s14 + $0x28] sm:$0xff]  ;;  %1381 = vmatpush.msra.mxu2 %v1327_v41  ;;  %s9692_s1 = scalar_lea.vmem [#allocation5], %s6131_s15   ;;  %s4553_s15 = ssub.s32 (%p7182_p5), 13, %s7520_s16 }
  0xcd   : > { %1749 = vmatpush.msrb.mxu1 %v1627_v21  ;;  %v7584_v31 = vld [vmem:[%s7561_s14 + $0x20] sm:$0xff]  ;;  %v7597_v34 = vld [vmem:[%s7561_s14 + $0x30] sm:$0xff]  ;;  %v7602_v35 = vld [vmem:[%s7561_s14 + $0x38] sm:$0xff]  ;;  %p4554_p0 = scmp.lt.s32.totalorder (%p7182_p5), %s4553_s15, 12  ;;  %s10851_s20 = sld [smem:[#allocation72_spill]] (%p7182_p5) }
  0xce   : > { %5665 = vmatmul.msk.f32.vlgmr.msra.gmra.mxu1 %vm1139_vm0, %v7546_v23  ;;  %v7607_v36 = vld [vmem:[%s7561_s14 + $0x40] sm:$0xff]  ;;  %v7612_v37 = vld [vmem:[%s7561_s14 + $0x48] sm:$0xff]  ;;  %v7623_v40 = vld [vmem:[%s7561_s14 + $0x50] sm:$0xff]  ;;  %1382 = vmatpush.msra.mxu2 %v1326_v42 }
  0xcf   : > { %1750 = vmatpush.msrb.mxu1 %v1625_v22  ;;  %v7637_v44 = vld [vmem:[%s7561_s14 + $0x58] sm:$0xff]  ;;  %v7651_v48 = vld [vmem:[%s7561_s14 + $0x60] sm:$0xff]  ;;  %v7656_v49 = vld [vmem:[%s7561_s14 + $0x68] sm:$0xff] }
  0xd0   : > { %1383 = vmatpush.msra.mxu2 %v1325_v43  ;;  %v7661_v50 = vld [vmem:[%s7561_s14 + $0x70] sm:$0xff]  ;;  %v7674_v54 = vld [vmem:[%s7561_s14 + $0x78] sm:$0xff]  ;;  %v7683_v59 = vld [vmem:[%s7561_s14 + $0x80] sm:$0xff] }
  0xd1   : > { %1751 = vmatpush.msrb.mxu1 %v1623_v24  ;;  %v7690_v61 = vld [vmem:[%s7561_s14 + $0x88] sm:$0xff]  ;;  %v7697_v63 = vld [vmem:[%s7561_s14 + $0x90] sm:$0xff]  ;;  %v7709_v2 = vld [vmem:[%s7561_s14 + $0x98] sm:$0xff] }
  0xd2   : > { %1384 = vmatpush.msra.mxu2 %v1324_v45  ;;  %v7700_v0 = vld [vmem:[%s7539_s17 + $0x8] sm:$0xff]  ;;  %v7712_v3 = vld [vmem:[%s7539_s17 + $0x10] sm:$0xff]  ;;  %v7721_v5 = vld [vmem:[%s7561_s14 + $0xa0] sm:$0xff] }
  0xd3   : > { %1752 = vmatpush.msrb.mxu1 %v1621_v25  ;;  %5666 = vmatmul.msk.f32.vlgmr.msra.gmra.mxu3 %vm1139_vm0, %v7700_v0  ;;  %v7724_v6 = vld [vmem:[%s7539_s17 + $0x18] sm:$0xff]  ;;  %v7733_v8 = vld [vmem:[%s7561_s14 + $0xa8] sm:$0xff]  ;;  %v7736_v9 = vld [vmem:[%s7539_s17 + $0x20] sm:$0xff] }
  0xd4   : > { %1385 = vmatpush.msra.mxu2 %v1323_v46  ;;  %v7745_v11 = vld [vmem:[%s7561_s14 + $0xb0] sm:$0xff]  ;;  %v7748_v12 = vld [vmem:[%s7539_s17 + $0x28] sm:$0xff]  ;;  %v7757_v14 = vld [vmem:[%s7561_s14 + $0xb8] sm:$0xff] }
  0xd5   : > { %1874 = vmatpush.msra.mxu1 %v1628_v26  ;;  %v7760_v15 = vld [vmem:[%s7539_s17 + $0x30] sm:$0xff]  ;;  %v7772_v18 = vld [vmem:[%s7561_s14 + $0xc0] sm:$0xff]  ;;  %v7775_v19 = vld [vmem:[%s7539_s17 + $0x38] sm:$0xff] }
  0xd6   : > { %5701 = vmatmul.msk.f32.vlgmr.msrb.gmra.mxu1 %vm1139_vm0, %v7564_v27  ;;  %1386 = vmatpush.msra.mxu2 %v1322_v47  ;;  %v7784_v21 = vld [vmem:[%s7561_s14 + $0xc8] sm:$0xff]  ;;  %v7787_v22 = vld [vmem:[%s7539_s17 + $0x40] sm:$0xff]  ;;  %v7796_v25 = vld [vmem:[%s7561_s14 + $0xd0] sm:$0xff] }
  0xd7   : > { %1875 = vmatpush.msra.mxu1 %v1626_v33  ;;  %v7799_v26 = vld [vmem:[%s7539_s17 + $0x48] sm:$0xff]  ;;  %v7808_v38 = vld [vmem:[%s7561_s14 + $0xd8] sm:$0xff]  ;;  %v7811_v39 = vld [vmem:[%s7539_s17 + $0x50] sm:$0xff] }
  0xd8   : > { %v1455_v41 = vld [vmem:[%s10646_s7 + $0x38] sm:$0xff]  ;;  %v1454_v42 = vld [vmem:[%s10646_s7 + $0x30] sm:$0xff]  ;;  %v1453_v43 = vld [vmem:[%s10646_s7 + $0x28] sm:$0xff] }
  0xd9   : > { %1876 = vmatpush.msra.mxu1 %v1624_v51  ;;  %1504 = vmatpush.msrb.mxu3 %v1455_v41  ;;  %v1452_v45 = vld [vmem:[%s10646_s7 + $0x20] sm:$0xff]  ;;  %v7835_v51 = vld [vmem:[%s7539_s17 + $0x58] sm:$0xff] }
  0xda   : > { %v7832_v47 = vld [vmem:[%s7561_s14 + $0xe0] sm:$0xff] }
  0xdb   : > { %5667 = vmatmul.msk.f32.gmra.mxu3 %vm1139_vm0, %v7712_v3  ;;  %1877 = vmatpush.msra.mxu1 %v1622_v16  ;;  %v1448_v16 = vld [vmem:[%s10646_s7] sm:$0xff] }
  0xdc   : > { %1505 = vmatpush.msrb.mxu3 %v1454_v42  ;;  %v7859_v42 = vld [vmem:[%s7561_s14 + $0xe8] sm:$0xff] }
  0xde   : > { %5702 = vmatmul.msk.f32.gmra.mxu1 %vm1139_vm0, %v7569_v28  ;;  %1506 = vmatpush.msrb.mxu3 %v1453_v43  ;;  %v1135_v43 = vld [vmem:[%s10642_s3 + $0x20] sm:$0xff] }
  0xe0   : > { %1507 = vmatpush.msrb.mxu3 %v1452_v45  ;;  %v1133_v45 = vld [vmem:[%s10642_s3 + $0x10] sm:$0xff] }
  0xe3   : > { %5668 = vmatmul.msk.f32.gmra.mxu3 %vm1139_vm0, %v7724_v6 }
  0xe6   : > { %5703 = vmatmul.msk.f32.gmra.mxu1 %vm1139_vm0, %v7574_v29 }
  0xeb   : > { %5669 = vmatmul.msk.f32.gmra.mxu3 %vm1139_vm0, %v7736_v9 }
  0xee   : > { %5704 = vmatmul.msk.f32.gmra.mxu1 %vm1139_vm0, %v7579_v30 }
  0xf3   : > { %5670 = vmatmul.msk.f32.gmra.mxu3 %vm1139_vm0, %v7748_v12 }
  0xf6   : > { %5705 = vmatmul.msk.f32.gmra.mxu1 %vm1139_vm0, %v7584_v31 }
  0xfb   : > { %5671 = vmatmul.msk.f32.gmra.mxu3 %vm1139_vm0, %v7760_v15 }
  0xfe   : > { %5706 = vmatmul.msk.f32.gmra.mxu1 %vm1139_vm0, %v7589_v32 }
 0x103   : > { %5672 = vmatmul.msk.f32.gmra.mxu3 %vm1139_vm0, %v7775_v19 }
 0x106   : > { %5707 = vmatmul.msk.f32.gmra.mxu1 %vm1139_vm0, %v7597_v34 }
 0x10b   : > { %5673 = vmatmul.msk.f32.gmra.mxu3 %vm1139_vm0, %v7787_v22 }
 0x10e   : > { %5708 = vmatmul.msk.f32.gmra.mxu1 %vm1139_vm0, %v7602_v35 }
 0x113   : > { %5674 = vmatmul.msk.f32.gmra.mxu3 %vm1139_vm0, %v7799_v26 }
 0x116   : > { %5709 = vmatmul.msk.f32.gmra.mxu1 %vm1139_vm0, %v7607_v36 }
 0x11b   : > { %5675 = vmatmul.msk.f32.gmra.mxu3 %vm1139_vm0, %v7811_v39 }
 0x11e   : > { %5710 = vmatmul.msk.f32.gmra.mxu1 %vm1139_vm0, %v7612_v37 }
 0x123   : > { %5676 = vmatmul.msk.f32.gmra.mxu3 %vm1139_vm0, %v7835_v51 }
 0x126   : > { %5711 = vmatmul.msk.f32.gmra.mxu1 %vm1139_vm0, %v7623_v40 }
 0x12e   : > { %5712 = vmatmul.msk.f32.gmra.mxu1 %vm1139_vm0, %v7637_v44 }
 0x136   : > { %5713 = vmatmul.msk.f32.gmra.mxu1 %vm1139_vm0, %v7651_v48 }
 0x13e   : > { %5714 = vmatmul.msk.f32.gmra.mxu1 %vm1139_vm0, %v7656_v49 }
 0x146   : > { %5715 = vmatmul.msk.f32.gmra.mxu1 %vm1139_vm0, %v7661_v50 }
 0x14b   : > { %v1246_v53 = vpop.f32.mrf.mxu1 }
 0x14c   : > { %v1286_v55 = vadd.f32 %v7671_v52, %v1246_v53  ;;  %v1451_v53 = vld [vmem:[%s10646_s7 + $0x18] sm:$0xff] }
 0x14d   : > { %1508 = vmatpush.msrb.mxu3 %v1451_v53  ;;  %v1131_v53 = vld [vmem:[%s10642_s3] sm:$0xff] }
 0x14e   : > { %v1298_v56 = vmul.f32 0.1, %v1286_v55  ;;  %5716 = vmatmul.msk.f32.gmra.mxu1 %vm1139_vm0, %v7674_v54 }
 0x150   : > { %v1310_v57 = vmax.f32 %v1286_v55, %v1298_v56  ;;  %v1450_v55 = vld [vmem:[%s10646_s7 + $0x10] sm:$0xff]  ;;  %v1449_v56 = vld [vmem:[%s10646_s7 + $0x8] sm:$0xff] }
 0x151   : > { %1509 = vmatpush.msrb.mxu3 %v1450_v55 }
 0x152   : > { %5677 = vmatmul.msk.f32.vlgmr.msra.gmra.mxu2 %vm1334_vm1, %v1310_v57  ;;  %v1137_v57 = vld [vmem:[%s10642_s3 + $0x30] sm:$0xff] }
 0x153   : > { %v7680_v58 = vpop.f32.mrf.mxu1  ;;  %1510 = vmatpush.msrb.mxu3 %v1449_v56  ;;  %1188 = vmatpush.msra.mxu0 %v1137_v57  ;;  %v7877_v56 = vld [vmem:[%s7561_s14 + $0xf0] sm:$0xff] }
 0x154   : > { %10713 = vst [vmem:[#allocation10_spill] sm:$0xff] %v7680_v58 }
 0x155   : > { %1511 = vmatpush.msrb.mxu3 %v1448_v16  ;;  %1189 = vmatpush.msra.mxu0 %v1135_v43  ;;  %v7886_v16 = vld [vmem:[%s7561_s14 + $0xf8] sm:$0xff]  ;;  %v7893_v43 = vld [vmem:[%s10645_s6] ss:$0 sm:$0xff] }
 0x156   : > { %5717 = vmatmul.msk.f32.gmra.mxu1 %vm1139_vm0, %v7683_v59 }
 0x157   : > { %1190 = vmatpush.msra.mxu0 %v1133_v45 }
 0x159   : > { %1191 = vmatpush.msra.mxu0 %v1131_v53  ;;  %v7900_v53 = vld [vmem:[%s7561_s14 + $0x100] sm:$0xff] }
 0x15a   : > { %5653 = vmatmul.msk.f32.vlgmr.msra.gmra.mxu0 %vm1139_vm0, %v7546_v23 }
 0x15b   : > { %v7687_v60 = vpop.f32.mrf.mxu1 }
 0x15c   : > { %10714 = vst [vmem:[#allocation11_spill] sm:$0xff] %v7687_v60 }
 0x15e   : > { %5718 = vmatmul.msk.f32.gmra.mxu1 %vm1139_vm0, %v7690_v61 }
 0x162   : > { %5654 = vmatmul.msk.f32.gmra.mxu0 %vm1139_vm0, %v7700_v0 }
 0x163   : > { %v7694_v62 = vpop.f32.mrf.mxu1 }
 0x164   : > { %10715 = vst [vmem:[#allocation12_spill] sm:$0xff] %v7694_v62 }
 0x166   : > { %5719 = vmatmul.msk.f32.gmra.mxu1 %vm1139_vm0, %v7697_v63 }
 0x16a   : > { %5655 = vmatmul.msk.f32.gmra.mxu0 %vm1139_vm0, %v7712_v3 }
 0x16b   : > { %v7706_v1 = vpop.f32.mrf.mxu1 }
 0x16c   : > { %10716 = vst [vmem:[#allocation13_spill] sm:$0xff] %v7706_v1 }
 0x16e   : > { %5720 = vmatmul.msk.f32.gmra.mxu1 %vm1139_vm0, %v7709_v2 }
 0x172   : > { %5656 = vmatmul.msk.f32.gmra.mxu0 %vm1139_vm0, %v7724_v6  ;;  %v1249_v6 = vpop.f32.mrf.mxu3 }
 0x173   : > { %v7718_v4 = vpop.f32.mrf.mxu1 }
 0x174   : > { %10717 = vst [vmem:[#allocation14_spill] sm:$0xff] %v7718_v4 }
 0x176   : > { %5721 = vmatmul.msk.f32.gmra.mxu1 %vm1139_vm0, %v7721_v5 }
 0x17a   : > { %5657 = vmatmul.msk.f32.gmra.mxu0 %vm1139_vm0, %v7736_v9  ;;  %v1252_v9 = vpop.f32.mrf.mxu3 }
 0x17b   : > { %v7730_v7 = vpop.f32.mrf.mxu1 }
 0x17c   : > { %10718 = vst [vmem:[#allocation15_spill] sm:$0xff] %v7730_v7 }
 0x17e   : > { %5722 = vmatmul.msk.f32.gmra.mxu1 %vm1139_vm0, %v7733_v8 }
 0x182   : > { %5658 = vmatmul.msk.f32.gmra.mxu0 %vm1139_vm0, %v7748_v12 }
 0x183   : > { %v7742_v10 = vpop.f32.mrf.mxu1 }
 0x184   : > { %10719 = vst [vmem:[#allocation16_spill] sm:$0xff] %v7742_v10 }
 0x186   : > { %5723 = vmatmul.msk.f32.gmra.mxu1 %vm1139_vm0, %v7745_v11 }
 0x18a   : > { %5659 = vmatmul.msk.f32.gmra.mxu0 %vm1139_vm0, %v7760_v15 }
 0x18b   : > { %v7754_v13 = vpop.f32.mrf.mxu1 }
 0x18c   : > { %10720 = vst [vmem:[#allocation17_spill] sm:$0xff] %v7754_v13 }
 0x18e   : > { %5724 = vmatmul.msk.f32.gmra.mxu1 %vm1139_vm0, %v7757_v14 }
 0x192   : > { %5660 = vmatmul.msk.f32.gmra.mxu0 %vm1139_vm0, %v7775_v19 }
 0x193   : > { %v7769_v17 = vpop.f32.mrf.mxu1 }
 0x194   : > { %10721 = vst [vmem:[#allocation18_spill] sm:$0xff] %v7769_v17 }
 0x196   : > { %5725 = vmatmul.msk.f32.gmra.mxu1 %vm1139_vm0, %v7772_v18 }
 0x19a   : > { %5661 = vmatmul.msk.f32.gmra.mxu0 %vm1139_vm0, %v7787_v22 }
 0x19b   : > { %v7781_v20 = vpop.f32.mrf.mxu1 }
 0x19c   : > { %10722 = vst [vmem:[#allocation19_spill] sm:$0xff] %v7781_v20 }
 0x19e   : > { %5726 = vmatmul.msk.f32.gmra.mxu1 %vm1139_vm0, %v7784_v21 }
 0x1a2   : > { %5662 = vmatmul.msk.f32.gmra.mxu0 %vm1139_vm0, %v7799_v26 }
 0x1a3   : > { %v7793_v24 = vpop.f32.mrf.mxu1 }
 0x1a4   : > { %10723 = vst [vmem:[#allocation20_spill] sm:$0xff] %v7793_v24 }
 0x1a6   : > { %5727 = vmatmul.msk.f32.gmra.mxu1 %vm1139_vm0, %v7796_v25 }
 0x1aa   : > { %5663 = vmatmul.msk.f32.gmra.mxu0 %vm1139_vm0, %v7811_v39 }
 0x1ab   : > { %v7805_v33 = vpop.f32.mrf.mxu1 }
 0x1ac   : > { %10724 = vst [vmem:[#allocation21_spill] sm:$0xff] %v7805_v33  ;;  %v7910_v33 = vld [vmem:[%s7561_s14 + $0x108] sm:$0xff] }
 0x1ae   : > { %5728 = vmatmul.msk.f32.gmra.mxu1 %vm1139_vm0, %v7808_v38 }
 0x1b2   : > { %5664 = vmatmul.msk.f32.gmra.mxu0 %vm1139_vm0, %v7835_v51 }
 0x1b3   : > { %v7829_v46 = vpop.f32.mrf.mxu1 }
 0x1b4   : > { %10725 = vst [vmem:[#allocation22_spill] sm:$0xff] %v7829_v46 }
 0x1b6   : > { %5729 = vmatmul.msk.f32.gmra.mxu1 %vm1139_vm0, %v7832_v47 }
 0x1bb   : > { %v7856_v41 = vpop.f32.mrf.mxu1 }
 0x1bc   : > { %10726 = vst [vmem:[#allocation23_spill] sm:$0xff] %v7856_v41 }
 0x1be   : > { %5730 = vmatmul.msk.f32.gmra.mxu1 %vm1139_vm0, %v7859_v42 }
 0x1c3   : > { %v7874_v55 = vpop.f32.mrf.mxu1 }
 0x1c4   : > { %10727 = vst [vmem:[#allocation24_spill] sm:$0xff] %v7874_v55 }
 0x1c6   : > { %5731 = vmatmul.msk.f32.gmra.mxu1 %vm1139_vm0, %v7877_v56 }
 0x1cb   : > { %v7883_v57 = vpop.f32.mrf.mxu1 }
 0x1cc   : > { %10728 = vst [vmem:[#allocation25_spill] sm:$0xff] %v7883_v57 }
 0x1ce   : > { %5732 = vmatmul.msk.f32.gmra.mxu1 %vm1139_vm0, %v7886_v16 }
 0x1d3   : > { %v7897_v45 = vpop.f32.mrf.mxu1 }
 0x1d4   : > { %10729 = vst [vmem:[#allocation26_spill] sm:$0xff] %v7897_v45 }
 0x1d5   : > { %v1388_v0 = vpop.f32.mrf.mxu2 }
 0x1d6   : > { %v1389_v57 = vadd.f32 %v7893_v43, %v1388_v0  ;;  %5733 = vmatmul.msk.f32.gmra.mxu1 %vm1139_vm0, %v7900_v53  ;;  %v7920_v0 = vld [vmem:[%s7561_s14 + $0x110] sm:$0xff] }
 0x1d8   : > { %v1424_v55 = vmul.f32 0.1, %v1389_v57 }
 0x1da   : > { %v1436_v41 = vmax.f32 %v1389_v57, %v1424_v55  ;;  %v1287_v55 = vadd.f32 %v7671_v52, %v1249_v6 }
 0x1db   : > { %v7907_v46 = vpop.f32.mrf.mxu1 }
 0x1dc   : > { %10730 = vst [vmem:[#allocation27_spill] sm:$0xff] %v7907_v46  ;;  %5689 = vmatmul.msk.f32.vlgmr.msrb.gmra.mxu3 %vm1334_vm1, %v1436_v41  ;;  %v1299_v57 = vmul.f32 0.1, %v1287_v55  ;;  %v7930_v46 = vld [vmem:[%s7561_s14 + $0x118] sm:$0xff] }
 0x1de   : > { %5734 = vmatmul.msk.f32.gmra.mxu1 %vm1139_vm0, %v7910_v33  ;;  %v1311_v45 = vmax.f32 %v1287_v55, %v1299_v57  ;;  %v1255_v55 = vpop.f32.mrf.mxu3 }
 0x1df   : > { %v1289_v57 = vadd.f32 %v7671_v52, %v1255_v55 }
 0x1e0   : > { %5678 = vmatmul.msk.f32.gmra.mxu2 %vm1334_vm1, %v1311_v45 }
 0x1e3   : > { %v7917_v3 = vpop.f32.mrf.mxu1 }
 0x1e4   : > { %10731 = vst [vmem:[#allocation28_spill] sm:$0xff] %v7917_v3  ;;  %v1288_v3 = vadd.f32 %v7671_v52, %v1252_v9 }
 0x1e6   : > { %5735 = vmatmul.msk.f32.gmra.mxu1 %vm1139_vm0, %v7920_v0  ;;  %v1300_v24 = vmul.f32 0.1, %v1288_v3  ;;  %v1258_v15 = vpop.f32.mrf.mxu3 }
 0x1e8   : > { %v1312_v12 = vmax.f32 %v1288_v3, %v1300_v24 }
 0x1ea   : > { %5679 = vmatmul.msk.f32.gmra.mxu2 %vm1334_vm1, %v1312_v12 }
 0x1eb   : > { %v7927_v41 = vpop.f32.mrf.mxu1 }
 0x1ec   : > { %10732 = vst [vmem:[#allocation29_spill] sm:$0xff] %v7927_v41  ;;  %v1301_v41 = vmul.f32 0.1, %v1289_v57 }
 0x1ee   : > { %5736 = vmatmul.msk.f32.gmra.mxu1 %vm1139_vm0, %v7930_v46  ;;  %v1313_v9 = vmax.f32 %v1289_v57, %v1301_v41  ;;  %v1261_v19 = vpop.f32.mrf.mxu3 }
 0x1f2   : > { %5680 = vmatmul.msk.f32.gmra.mxu2 %vm1334_vm1, %v1313_v9 }
 0x1f3   : > { %v7938_v6 = vpop.f32.mrf.mxu1 }
 0x1f4   : > { %10733 = vst [vmem:[#allocation30_spill] sm:$0xff] %v7938_v6 }
 0x1f6   : > { %5737 = vmatmul.msk.f32.vlgmr.msra.gmra.mxu1 %vm1139_vm0, %v7564_v27  ;;  %v1290_v27 = vadd.f32 %v7671_v52, %v1258_v15  ;;  %v1264_v22 = vpop.f32.mrf.mxu3 }
 0x1f8   : > { %v1302_v24 = vmul.f32 0.1, %v1290_v27 }
 0x1fa   : > { %v1314_v12 = vmax.f32 %v1290_v27, %v1302_v24 }
 0x1fb   : > { %v7946_v45 = vpop.f32.mrf.mxu1 }
 0x1fc   : > { %10734 = vst [vmem:[#allocation31_spill] sm:$0xff] %v7946_v45  ;;  %5681 = vmatmul.msk.f32.gmra.mxu2 %vm1334_vm1, %v1314_v12 }
 0x1fe   : > { %5738 = vmatmul.msk.f32.gmra.mxu1 %vm1139_vm0, %v7569_v28  ;;  %v1291_v28 = vadd.f32 %v7671_v52, %v1261_v19  ;;  %v1267_v26 = vpop.f32.mrf.mxu3 }
 0x200   : > { %v1303_v41 = vmul.f32 0.1, %v1291_v28 }
 0x202   : > { %v1315_v57 = vmax.f32 %v1291_v28, %v1303_v41 }
 0x203   : > { %v7954_v3 = vpop.f32.mrf.mxu1 }
 0x204   : > { %10735 = vst [vmem:[#allocation32_spill] sm:$0xff] %v7954_v3  ;;  %5682 = vmatmul.msk.f32.gmra.mxu2 %vm1334_vm1, %v1315_v57 }
 0x206   : > { %5739 = vmatmul.msk.f32.gmra.mxu1 %vm1139_vm0, %v7574_v29  ;;  %v1292_v29 = vadd.f32 %v7671_v52, %v1264_v22  ;;  %v1270_v39 = vpop.f32.mrf.mxu3 }
 0x208   : > { %v1304_v9 = vmul.f32 0.1, %v1292_v29 }
 0x20a   : > { %v1316_v27 = vmax.f32 %v1292_v29, %v1304_v9 }
 0x20b   : > { %v7962_v55 = vpop.f32.mrf.mxu1 }
 0x20c   : > { %10736 = vst [vmem:[#allocation33_spill] sm:$0xff] %v7962_v55  ;;  %5683 = vmatmul.msk.f32.gmra.mxu2 %vm1334_vm1, %v1316_v27 }
 0x20e   : > { %5740 = vmatmul.msk.f32.gmra.mxu1 %vm1139_vm0, %v7579_v30  ;;  %v1293_v30 = vadd.f32 %v7671_v52, %v1267_v26  ;;  %v1273_v51 = vpop.f32.mrf.mxu3 }
 0x20f   : > { %v1295_v22 = vadd.f32 %v7671_v52, %v1273_v51 }
 0x210   : > { %v1305_v24 = vmul.f32 0.1, %v1293_v30 }
 0x211   : > { %v1307_v29 = vmul.f32 0.1, %v1295_v22 }
 0x212   : > { %v1317_v19 = vmax.f32 %v1293_v30, %v1305_v24 }
 0x213   : > { %v7970_v15 = vpop.f32.mrf.mxu1 }
 0x214   : > { %10737 = vst [vmem:[#allocation34_spill] sm:$0xff] %v7970_v15  ;;  %5684 = vmatmul.msk.f32.gmra.mxu2 %vm1334_vm1, %v1317_v19 }
 0x216   : > { %5741 = vmatmul.msk.f32.gmra.mxu1 %vm1139_vm0, %v7584_v31  ;;  %v1294_v31 = vadd.f32 %v7671_v52, %v1270_v39  ;;  %v1276_v27 = vpop.f32.mrf.mxu3 }
 0x217   : > { %v1296_v26 = vadd.f32 %v7671_v52, %v1276_v27 }
 0x218   : > { %v1306_v28 = vmul.f32 0.1, %v1294_v31 }
 0x219   : > { %v1308_v30 = vmul.f32 0.1, %v1296_v26 }
 0x21a   : > { %v1318_v57 = vmax.f32 %v1294_v31, %v1306_v28 }
 0x21b   : > { %v7978_v12 = vpop.f32.mrf.mxu1 }
 0x21c   : > { %10738 = vst [vmem:[#allocation35_spill] sm:$0xff] %v7978_v12  ;;  %5685 = vmatmul.msk.f32.gmra.mxu2 %vm1334_vm1, %v1318_v57 }
 0x21e   : > { %5742 = vmatmul.msk.f32.gmra.mxu1 %vm1139_vm0, %v7589_v32  ;;  %v1319_v32 = vmax.f32 %v1295_v22, %v1307_v29  ;;  %v1279_v19 = vpop.f32.mrf.mxu3  ;;  %v6489_v22 = vld [vmem:[%s10647_s8] ss:$0 sm:$0xff] }
 0x21f   : > { %v1297_v39 = vadd.f32 %v7671_v52, %v1279_v19 }
 0x221   : > { %v1309_v31 = vmul.f32 0.1, %v1297_v39 }
 0x223   : > { %v7984_v41 = vpop.f32.mrf.mxu1  ;;  %v1321_v28 = vmax.f32 %v1297_v39, %v1309_v31 }
 0x224   : > { %10739 = vst [vmem:[#allocation36_spill] sm:$0xff] %v7984_v41  ;;  %5686 = vmatmul.msk.f32.gmra.mxu2 %vm1334_vm1, %v1319_v32 }
 0x226   : > { %5743 = vmatmul.msk.f32.gmra.mxu1 %vm1139_vm0, %v7597_v34  ;;  %v1320_v34 = vmax.f32 %v1296_v26, %v1308_v30 }
 0x22b   : > { %v7990_v9 = vpop.f32.mrf.mxu1 }
 0x22c   : > { %10740 = vst [vmem:[#allocation37_spill] sm:$0xff] %v7990_v9  ;;  %5687 = vmatmul.msk.f32.gmra.mxu2 %vm1334_vm1, %v1320_v34 }
 0x22e   : > { %5744 = vmatmul.msk.f32.gmra.mxu1 %vm1139_vm0, %v7602_v35 }
 0x233   : > { %v7996_v24 = vpop.f32.mrf.mxu1 }
 0x234   : > { %10741 = vst [vmem:[#allocation38_spill] sm:$0xff] %v7996_v24  ;;  %5688 = vmatmul.msk.f32.gmra.mxu2 %vm1334_vm1, %v1321_v28  ;;  %v2469_v24 = vld [vmem:[%s10649_s10 + $0x10] sm:$0xff] }
 0x236   : > { %5745 = vmatmul.msk.f32.gmra.mxu1 %vm1139_vm0, %v7607_v36 }
 0x23b   : > { %v8002_v35 = vpop.f32.mrf.mxu1 }
 0x23c   : > { %10742 = vst [vmem:[#allocation39_spill] sm:$0xff] %v8002_v35 }
 0x23e   : > { %5746 = vmatmul.msk.f32.gmra.mxu1 %vm1139_vm0, %v7612_v37  ;;  %v1193_v37 = vpop.f32.mrf.mxu0 }
 0x243   : > { %v8007_v57 = vpop.f32.mrf.mxu1 }
 0x244   : > { %10743 = vst [vmem:[#allocation40_spill] sm:$0xff] %v8007_v57 }
 0x246   : > { %5747 = vmatmul.msk.f32.gmra.mxu1 %vm1139_vm0, %v7623_v40  ;;  %v1549_v40 = vadd.f32 %v1193_v37, %v7546_v23 }
 0x24b   : > { %v8011_v36 = vpop.f32.mrf.mxu1 }
 0x24c   : > { %10744 = vst [vmem:[#allocation41_spill] sm:$0xff] %v8011_v36 }
 0x24e   : > { %5748 = vmatmul.msk.f32.gmra.mxu1 %vm1139_vm0, %v7637_v44 }
 0x253   : > { %v8015_v52 = vpop.f32.mrf.mxu1 }
 0x254   : > { %10745 = vst [vmem:[#allocation42_spill] sm:$0xff] %v8015_v52 }
 0x256   : > { %5749 = vmatmul.msk.f32.gmra.mxu1 %vm1139_vm0, %v7651_v48 }
 0x25b   : > { %v8019_v51 = vpop.f32.mrf.mxu1 }
 0x25c   : > { %10746 = vst [vmem:[#allocation43_spill] sm:$0xff] %v8019_v51 }
 0x25e   : > { %5750 = vmatmul.msk.f32.gmra.mxu1 %vm1139_vm0, %v7656_v49 }
 0x25f   : > { %v1513_v29 = vpop.f32.mrf.mxu3 }
 0x260   : > { %v1514_v44 = vadd.f32 %v6489_v22, %v1513_v29 }
 0x262   : > { %v1561_v32 = vadd.f32 %v1549_v40, %v1514_v44 }
 0x263   : > { %v8028_v27 = vpop.f32.mrf.mxu1  ;;  %v1391_v39 = vpop.f32.mrf.mxu2 }
 0x264   : > { %10747 = vst [vmem:[#allocation44_spill] sm:$0xff] %v8028_v27  ;;  %v1392_v31 = vadd.f32 %v7893_v43, %v1391_v39 }
 0x265   : > { %1573 = vst.msk [vmem:[%s8030_s30] sm:$0xff] %vm1139_vm0, %v1561_v32 }
 0x266   : > { %5751 = vmatmul.msk.f32.gmra.mxu1 %vm1139_vm0, %v7661_v50  ;;  %v1425_v28 = vmul.f32 0.1, %v1392_v31 }
 0x268   : > { %v1437_v22 = vmax.f32 %v1392_v31, %v1425_v28 }
 0x26a   : > { %5690 = vmatmul.msk.f32.gmra.mxu3 %vm1334_vm1, %v1437_v22 }
 0x26b   : > { %v8036_v48 = vpop.f32.mrf.mxu1 }
 0x26c   : > { %10748 = vst [vmem:[#allocation45_spill] sm:$0xff] %v8036_v48 }
 0x26e   : > { %5752 = vmatmul.msk.f32.gmra.mxu1 %vm1139_vm0, %v7674_v54 }
 0x273   : > { %v8040_v49 = vpop.f32.mrf.mxu1 }
 0x274   : > { %v1987_v32 = vmul.f32 %v8040_v49, %v8040_v49 }
 0x276   : > { %5753 = vmatmul.msk.f32.gmra.mxu1 %vm1139_vm0, %v7683_v59 }
 0x27b   : > { %v8044_v23 = vpop.f32.mrf.mxu1 }
 0x27c   : > { %v1988_v22 = vmul.f32 %v8044_v23, %v8044_v23 }
 0x27e   : > { %5754 = vmatmul.msk.f32.gmra.mxu1 %vm1139_vm0, %v7690_v61 }
 0x283   : > { %v8048_v26 = vpop.f32.mrf.mxu1 }
 0x284   : > { %v1989_v52 = vmul.f32 %v8048_v26, %v8048_v26 }
 0x286   : > { %5755 = vmatmul.msk.f32.gmra.mxu1 %vm1139_vm0, %v7697_v63 }
 0x28b   : > { %v8052_v50 = vpop.f32.mrf.mxu1 }
 0x28e   : > { %5756 = vmatmul.msk.f32.gmra.mxu1 %vm1139_vm0, %v7709_v2 }
 0x293   : > { %v8056_v54 = vpop.f32.mrf.mxu1 }
 0x296   : > { %5757 = vmatmul.msk.f32.gmra.mxu1 %vm1139_vm0, %v7721_v5 }
 0x29b   : > { %v8060_v59 = vpop.f32.mrf.mxu1 }
 0x29e   : > { %5758 = vmatmul.msk.f32.gmra.mxu1 %vm1139_vm0, %v7733_v8 }
 0x2a3   : > { %v8064_v61 = vpop.f32.mrf.mxu1 }
 0x2a6   : > { %5759 = vmatmul.msk.f32.gmra.mxu1 %vm1139_vm0, %v7745_v11 }
 0x2ab   : > { %v8068_v63 = vpop.f32.mrf.mxu1 }
 0x2ae   : > { %5760 = vmatmul.msk.f32.gmra.mxu1 %vm1139_vm0, %v7757_v14 }
 0x2b3   : > { %v8072_v2 = vpop.f32.mrf.mxu1 }
 0x2b6   : > { %5761 = vmatmul.msk.f32.gmra.mxu1 %vm1139_vm0, %v7772_v18 }
 0x2bb   : > { %v8076_v5 = vpop.f32.mrf.mxu1 }
 0x2be   : > { %5762 = vmatmul.msk.f32.gmra.mxu1 %vm1139_vm0, %v7784_v21 }
 0x2c3   : > { %v8080_v8 = vpop.f32.mrf.mxu1 }
 0x2c6   : > { %5763 = vmatmul.msk.f32.gmra.mxu1 %vm1139_vm0, %v7796_v25 }
 0x2cb   : > { %v8084_v11 = vpop.f32.mrf.mxu1 }
 0x2ce   : > { %5764 = vmatmul.msk.f32.gmra.mxu1 %vm1139_vm0, %v7808_v38  ;;  %v2474_v38 = vld [vmem:[%s10649_s10 + $0x38] sm:$0xff] }
 0x2cf   : > { %2591 = vmatpush.msrb.mxu2 %v2474_v38  ;;  %6119 = vmatpush.msra.mxu3 %v2474_v38 }
 0x2d3   : > { %v8088_v14 = vpop.f32.mrf.mxu1 }
 0x2d4   : > { %v1999_v29 = vmul.f32 %v8088_v14, %v8088_v14 }
 0x2d6   : > { %5765 = vmatmul.msk.f32.gmra.mxu1 %vm1139_vm0, %v7832_v47 }
 0x2db   : > { %v8092_v18 = vpop.f32.mrf.mxu1 }
 0x2dc   : > { %v2000_v31 = vmul.f32 %v8092_v18, %v8092_v18 }
 0x2de   : > { %5766 = vmatmul.msk.f32.gmra.mxu1 %vm1139_vm0, %v7859_v42  ;;  %v2473_v42 = vld [vmem:[%s10649_s10 + $0x30] sm:$0xff]  ;;  %v2012_v48 = vadd.f32 %v2000_v31, %v1988_v22 }
 0x2df   : > { %2592 = vmatpush.msrb.mxu2 %v2473_v42  ;;  %6120 = vmatpush.msra.mxu3 %v2473_v42 }
 0x2e3   : > { %v8096_v21 = vpop.f32.mrf.mxu1 }
 0x2e6   : > { %5767 = vmatmul.msk.f32.gmra.mxu1 %vm1139_vm0, %v7877_v56 }
 0x2eb   : > { %v8100_v25 = vpop.f32.mrf.mxu1 }
 0x2ee   : > { %5768 = vmatmul.msk.f32.gmra.mxu1 %vm1139_vm0, %v7886_v16 }
 0x2f3   : > { %v8107_v47 = vpop.f32.mrf.mxu1 }
 0x2f6   : > { %5769 = vmatmul.msk.f32.gmra.mxu1 %vm1139_vm0, %v7900_v53  ;;  %v2472_v53 = vld [vmem:[%s10649_s10 + $0x28] sm:$0xff] }
 0x2f7   : > { %2593 = vmatpush.msrb.mxu2 %v2472_v53  ;;  %6121 = vmatpush.msra.mxu3 %v2472_v53  ;;  %v2011_v53 = vadd.f32 %v1999_v29, %v1987_v32 }
 0x2fb   : > { %v8114_v56 = vpop.f32.mrf.mxu1 }
 0x2fe   : > { %5770 = vmatmul.msk.f32.gmra.mxu1 %vm1139_vm0, %v7910_v33  ;;  %v2471_v33 = vld [vmem:[%s10649_s10 + $0x20] sm:$0xff] }
 0x2ff   : > { %2594 = vmatpush.msrb.mxu2 %v2471_v33  ;;  %6122 = vmatpush.msra.mxu3 %v2471_v33 }
 0x303   : > { %v8118_v16 = vpop.f32.mrf.mxu1 }
 0x304   : > { %10749 = vst [vmem:[#allocation46_spill] sm:$0xff] %v8118_v16 }
 0x306   : > { %5771 = vmatmul.msk.f32.gmra.mxu1 %vm1139_vm0, %v7920_v0 }
 0x30b   : > { %v8125_v30 = vpop.f32.mrf.mxu1 }
 0x30e   : > { %5772 = vmatmul.msk.f32.gmra.mxu1 %vm1139_vm0, %v7930_v46  ;;  %v1394_v46 = vpop.f32.mrf.mxu2 }
 0x30f   : > { %v1395_v40 = vadd.f32 %v7893_v43, %v1394_v46 }
 0x311   : > { %v1426_v44 = vmul.f32 0.1, %v1395_v40 }
 0x313   : > { %v8132_v34 = vpop.f32.mrf.mxu1  ;;  %v1438_v42 = vmax.f32 %v1395_v40, %v1426_v44 }
 0x314   : > { %v2007_v6 = vmul.f32 %v8132_v34, %v8132_v34 }
 0x315   : > { %5691 = vmatmul.msk.f32.gmra.mxu3 %vm1334_vm1, %v1438_v42 }
 0x316   : > { %v1397_v29 = vpop.f32.mrf.mxu2 }
 0x317   : > { %v1398_v44 = vadd.f32 %v7893_v43, %v1397_v29 }
 0x319   : > { %v1427_v42 = vmul.f32 0.1, %v1398_v44 }
 0x31b   : > { %v8134_v0 = vpop.f32.mrf.mxu1  ;;  %v1439_v51 = vmax.f32 %v1398_v44, %v1427_v42  ;;  %v2470_v44 = vld [vmem:[%s10649_s10 + $0x18] sm:$0xff] }
 0x31c   : > { %2595 = vmatpush.msrb.mxu2 %v2470_v44  ;;  %6123 = vmatpush.msra.mxu3 %v2470_v44  ;;  %v2008_v60 = vmul.f32 %v8134_v0, %v8134_v0 }
 0x31d   : > { %5692 = vmatmul.msk.f32.gmra.mxu3 %vm1334_vm1, %v1439_v51 }
 0x31e   : > { %v1400_v29 = vpop.f32.mrf.mxu2  ;;  %2596 = vmatpush.msrb.mxu2 %v2469_v24  ;;  %6124 = vmatpush.msra.mxu3 %v2469_v24 }
 0x323   : > { %v8136_v19 = vpop.f32.mrf.mxu1 }
 0x32b   : > { %v8139_v37 = vpop.f32.mrf.mxu1 }
 0x333   : > { %v8147_v38 = vpop.f32.mrf.mxu1 }
 0x334   : > { %v2023_v33 = vmul.f32 %v8147_v38, %v8147_v38 }
 0x336   : > { %v2035_v39 = vadd.f32 %v2023_v33, %v2011_v53  ;;  %v2001_v33 = vmul.f32 %v8096_v21, %v8096_v21 }
 0x338   : > { %v2047_v28 = vadd.f32 1e-12, %v2035_v39 }
 0x33a   : > { %6490 = vrsqrt.f32 %v2047_v28  ;;  %vm2066_vm2 = vcmp.eq.f32.partialorder %v2047_v28, inf  ;;  %v2069_v44 = vand.u32 2147483648, %v2047_v28  ;;  %vm2068_vm3 = vcmp.eq.f32.partialorder %v2047_v28, 0.0 }
 0x33b   : > { %v8156_v46 = vpop.f32.mrf.mxu1 }
 0x33c   : > { %v2024_v40 = vmul.f32 %v8156_v46, %v8156_v46 }
 0x33e   : > { %v2036_v32 = vadd.f32 %v2024_v40, %v2012_v48  ;;  %v2013_v48 = vadd.f32 %v2001_v33, %v1989_v52  ;;  %v2002_v52 = vmul.f32 %v8100_v25, %v8100_v25 }
 0x340   : > { %v6491_v53 = vpop.eup %6490  ;;  %v8163_v39 = vadd.f32 1e-12, %v2036_v32  ;;  %v1401_v32 = vadd.f32 %v7893_v43, %v1400_v29 }
 0x341   : > { %v2060_v27 = vmul.f32 %v6491_v53, %v2047_v28 }
 0x342   : > { %6492 = vrsqrt.f32 %v8163_v39  ;;  %v1428_v57 = vmul.f32 0.1, %v1401_v32  ;;  %vm2078_vm4 = vcmp.eq.f32.partialorder %v8163_v39, inf  ;;  %vm2080_vm5 = vcmp.eq.f32.partialorder %v8163_v39, 0.0 }
 0x343   : > { %v2061_v31 = vmul.f32 %v6491_v53, %v2060_v27  ;;  %v8168_v22 = vpop.f32.mrf.mxu1 }
 0x344   : > { %v2025_v40 = vmul.f32 %v8168_v22, %v8168_v22  ;;  %v1440_v9 = vmax.f32 %v1401_v32, %v1428_v57  ;;  %v1403_v57 = vpop.f32.mrf.mxu2 }
 0x345   : > { %v2062_v36 = vmul.f32 0.5, %v2061_v31  ;;  %v1404_v41 = vadd.f32 %v7893_v43, %v1403_v57 }
 0x346   : > { %v2037_v42 = vadd.f32 %v2025_v40, %v2013_v48  ;;  %v1990_v48 = vmul.f32 %v8052_v50, %v8052_v50  ;;  %5693 = vmatmul.msk.f32.gmra.mxu3 %vm1334_vm1, %v1440_v9  ;;  %v2003_v9 = vmul.f32 %v8107_v47, %v8107_v47 }
 0x347   : > { %v2063_v27 = vsub.f32 1.5, %v2062_v36  ;;  %v1429_v15 = vmul.f32 0.1, %v1404_v41 }
 0x348   : > { %v6493_v35 = vpop.eup %6492  ;;  %v8179_v51 = vadd.f32 1e-12, %v2037_v42 }
 0x349   : > { %v2064_v33 = vmul.f32 %v6491_v53, %v2063_v27  ;;  %v2072_v31 = vmul.f32 %v6493_v35, %v8163_v39  ;;  %v2014_v53 = vadd.f32 %v2002_v52, %v1990_v48 }
 0x34a   : > { %6494 = vrsqrt.f32 %v8179_v51  ;;  %vm2090_vm6 = vcmp.eq.f32.partialorder %v8179_v51, inf  ;;  %vm2092_vm7 = vcmp.eq.f32.partialorder %v8179_v51, 0.0 }
 0x34b   : > { %v2065_v36 = vmul.f32 %v2064_v33, %v2047_v28  ;;  %v2073_v40 = vmul.f32 %v6493_v35, %v2072_v31  ;;  %v8188_v29 = vpop.f32.mrf.mxu1 }
 0x34c   : > { %v2026_v42 = vmul.f32 %v8188_v29, %v8188_v29  ;;  %v1406_v57 = vpop.f32.mrf.mxu2 }
 0x34d   : > { %v2067_v32 = vsel %vm2066_vm2, %v2047_v28, %v2065_v36  ;;  %v2074_v27 = vmul.f32 0.5, %v2073_v40  ;;  %v2468_v28 = vld [vmem:[%s10649_s10 + $0x8] sm:$0xff]  ;;  %v1441_v36 = vmax.f32 %v1404_v41, %v1429_v15  ;;  %v2081_v15 = vand.u32 2147483648, %v8163_v39 }
 0x34e   : > { %v2070_v12 = vsel %vm2068_vm3, %v2069_v44, %v2067_v32  ;;  %v2038_v24 = vadd.f32 %v2026_v42, %v2014_v53  ;;  %2597 = vmatpush.msrb.mxu2 %v2468_v28  ;;  %6125 = vmatpush.msra.mxu3 %v2468_v28 }
 0x34f   : > { %v5773_v33 = vmul.f32 -1.442695, %v2070_v12  ;;  %v2075_v31 = vsub.f32 1.5, %v2074_v27  ;;  %v1991_v12 = vmul.f32 %v8056_v54, %v8056_v54  ;;  %5694 = vmatmul.msk.f32.gmra.mxu3 %vm1334_vm1, %v1441_v36  ;;  %v1407_v27 = vadd.f32 %v7893_v43, %v1406_v57 }
 0x350   : > { %v6495_v55 = vpop.eup %6494  ;;  %v8196_v52 = vadd.f32 1e-12, %v2038_v24 }
 0x351   : > { %6496 = vpow2.f32 %v5773_v33  ;;  %v2076_v48 = vmul.f32 %v6493_v35, %v2075_v31  ;;  %v2084_v3 = vmul.f32 %v6495_v55, %v8179_v51  ;;  %v2467_v35 = vld [vmem:[%s10649_s10] sm:$0xff]  ;;  %v2015_v42 = vadd.f32 %v2003_v9, %v1991_v12 }
 0x352   : > { %6498 = vrsqrt.f32 %v8196_v52  ;;  %2598 = vmatpush.msrb.mxu2 %v2467_v35  ;;  %6126 = vmatpush.msra.mxu3 %v2467_v35  ;;  %v1430_v28 = vmul.f32 0.1, %v1407_v27  ;;  %v2004_v12 = vmul.f32 %v8114_v56, %v8114_v56  ;;  %vm2102_vm8 = vcmp.eq.f32.partialorder %v8196_v52, inf }
 0x353   : > { %v2077_v40 = vmul.f32 %v2076_v48, %v8163_v39  ;;  %v2085_v53 = vmul.f32 %v6495_v55, %v2084_v3  ;;  %v8206_v44 = vpop.f32.mrf.mxu1  ;;  %vm2104_vm9 = vcmp.eq.f32.partialorder %v8196_v52, 0.0 }
 0x354   : > { %v2027_v41 = vmul.f32 %v8206_v44, %v8206_v44 }
 0x355   : > { %v2079_v3 = vsel %vm2078_vm4, %v8163_v39, %v2077_v40  ;;  %v2086_v32 = vmul.f32 0.5, %v2085_v53  ;;  %v1442_v53 = vmax.f32 %v1407_v27, %v1430_v28  ;;  %v1409_v27 = vpop.f32.mrf.mxu2  ;;  %v1995_v28 = vmul.f32 %v8072_v2, %v8072_v2 }
 0x356   : > { %v2082_v24 = vsel %vm2080_vm5, %v2081_v15, %v2079_v3  ;;  %v2039_v33 = vadd.f32 %v2027_v41, %v2015_v42  ;;  %v1992_v42 = vmul.f32 %v8060_v59, %v8060_v59  ;;  %v1993_v15 = vmul.f32 %v8064_v61, %v8064_v61 }
 0x357   : > { %v6497_v31 = vpop.eup %6496  ;;  %v5774_v9 = vmul.f32 -1.442695, %v2082_v24  ;;  %v2087_v48 = vsub.f32 1.5, %v2086_v32  ;;  %5695 = vmatmul.msk.f32.gmra.mxu3 %vm1334_vm1, %v1442_v53  ;;  %v2093_v32 = vand.u32 2147483648, %v8179_v51 }
 0x358   : > { %v6499_v36 = vpop.eup %6498  ;;  %v8221_v45 = vadd.f32 1.0, %v6497_v31  ;;  %v8223_v35 = vadd.f32 1e-12, %v2039_v33 }
 0x359   : > { %6500 = vpow2.f32 %v5774_v9  ;;  %v2088_v40 = vmul.f32 %v6495_v55, %v2087_v48  ;;  %v2096_v39 = vmul.f32 %v6499_v36, %v8196_v52  ;;  %v2016_v55 = vadd.f32 %v2004_v12, %v1992_v42 }
 0x35a   : > { %6502 = vrcp.f32 %v8221_v45  ;;  %v1410_v9 = vadd.f32 %v7893_v43, %v1409_v27  ;;  %v1994_v48 = vmul.f32 %v8068_v63, %v8068_v63  ;;  %v1996_v12 = vmul.f32 %v8076_v5, %v8076_v5 }
 0x35b   : > { %v2089_v41 = vmul.f32 %v2088_v40, %v8179_v51  ;;  %v2097_v57 = vmul.f32 %v6499_v36, %v2096_v39  ;;  %6504 = vrsqrt.f32 %v8223_v35  ;;  %v8233_v3 = vpop.f32.mrf.mxu1  ;;  %v2006_v27 = vmul.f32 %v8125_v30, %v8125_v30 }
 0x35c   : > { %v2028_v31 = vmul.f32 %v8233_v3, %v8233_v3  ;;  %v1431_v17 = vmul.f32 0.1, %v1410_v9  ;;  %v2262_v10 = vand.u32 2147483648, %v8221_v45  ;;  %vm2256_vm11 = vweird.f32 %v8221_v45 }
 0x35d   : > { %v2091_v24 = vsel %vm2090_vm6, %v8179_v51, %v2089_v41  ;;  %v2098_v33 = vmul.f32 0.5, %v2097_v57  ;;  %v2005_v51 = vmul.f32 %v8118_v16, %v8118_v16  ;;  %v2018_v62 = vadd.f32 %v2006_v27, %v1994_v48 }
 0x35e   : > { %v2094_v40 = vsel %vm2092_vm7, %v2093_v32, %v2091_v24  ;;  %v2040_v41 = vadd.f32 %v2028_v31, %v2016_v55  ;;  %v2260_v55 = vand.u32 2147483647, %v8221_v45  ;;  %v1443_v7 = vmax.f32 %v1410_v9, %v1431_v17 }
 0x35f   : > { %v6501_v39 = vpop.eup %6500  ;;  %v5775_v53 = vmul.f32 -1.442695, %v2094_v40  ;;  %v2099_v42 = vsub.f32 1.5, %v2098_v33  ;;  %v2105_v33 = vand.u32 2147483648, %v8196_v52  ;;  %v8288_v9 = vadd.f32 %v2007_v6, %v1995_v28 }
 0x360   : > { %v6503_v57 = vpop.eup %6502  ;;  %v8255_v20 = vadd.f32 1.0, %v6501_v39  ;;  %v3646_v39 = vld [vmem:[%s10651_s12 + $0x8] sm:$0xff]  ;;  %5696 = vmatmul.msk.f32.gmra.mxu3 %vm1334_vm1, %v1443_v7  ;;  %vm2261_vm13 = vcmp.eq.f32.partialorder %v2260_v55, 8.507059e+37  ;;  %v8299_v6 = vmul.f32 %v8136_v19, %v8136_v19  ;;  %vm2114_vm14 = vcmp.eq.f32.partialorder %v8223_v35, inf }
 0x361   : > { %v8257_v13 = vpop.eup %6504  ;;  %v2252_v32 = vmul.f32 %v6503_v57, %v8221_v45  ;;  %6506 = vpow2.f32 %v5775_v53  ;;  %v2100_v24 = vmul.f32 %v6499_v36, %v2099_v42  ;;  %v8271_v53 = vadd.f32 1e-12, %v2040_v41  ;;  %3986 = vmatpush.msrb.mxu0 %v3646_v39  ;;  %6127 = vmatpush.msra.mxu2 %v3646_v39 }
 0x362   : > { %6508 = vrcp.f32 %v8255_v20  ;;  %v2108_v36 = vmul.f32 %v8257_v13, %v8223_v35  ;;  %vm2257_vm10 = vweird.f32 %v6503_v57  ;;  %v2017_v41 = vadd.f32 %v2005_v51, %v1993_v15 }
 0x363   : > { %v2253_v31 = vsub.f32 1.0, %v2252_v32  ;;  %v2101_v40 = vmul.f32 %v2100_v24, %v8196_v52  ;;  %v8273_v42 = vpop.f32.mrf.mxu1  ;;  %6510 = vrsqrt.f32 %v8271_v53  ;;  %vm2258_vm12 = vmor %vm2256_vm11, %vm2257_vm10  ;;  %v2263_v15 = vor.u32 1.1754944e-38, %v2262_v10 }
 0x364   : > { %v2029_v32 = vmul.f32 %v8273_v42, %v8273_v42  ;;  %v2109_v1 = vmul.f32 %v8257_v13, %v2108_v36  ;;  %vm2116_vm2 = vcmp.eq.f32.partialorder %v8223_v35, 0.0  ;;  %vm2271_vm3 = vweird.f32 %v8255_v20 }
 0x365   : > { %v2254_v24 = vmul.f32 %v6503_v57, %v2253_v31  ;;  %v2103_v4 = vsel %vm2102_vm8, %v8196_v52, %v2101_v40  ;;  %v8295_v52 = vadd.f32 %v2008_v60, %v1996_v12  ;;  %v2275_v60 = vand.u32 2147483647, %v8255_v20 }
 0x366   : > { %v2106_v58 = vsel %vm2104_vm9, %v2105_v33, %v2103_v4  ;;  %v2110_v51 = vmul.f32 0.5, %v2109_v1  ;;  %v2041_v7 = vadd.f32 %v2029_v32, %v2017_v41  ;;  %vm2126_vm6 = vcmp.eq.f32.partialorder %v8271_v53, inf }
 0x367   : > { %v6507_v17 = vpop.eup %6506  ;;  %v2255_v31 = vadd.f32 %v6503_v57, %v2254_v24  ;;  %v5776_v40 = vmul.f32 -1.442695, %v2106_v58  ;;  %v2117_v24 = vand.u32 2147483648, %v8223_v35  ;;  %vm2276_vm4 = vcmp.eq.f32.partialorder %v2275_v60, 8.507059e+37 }
 0x368   : > { %v6509_v39 = vpop.eup %6508  ;;  %v8292_v48 = vadd.f32 1.0, %v6507_v17  ;;  %v2111_v55 = vsub.f32 1.5, %v2110_v51  ;;  %v8316_v32 = vadd.f32 1e-12, %v2041_v7  ;;  %vm2128_vm7 = vcmp.eq.f32.partialorder %v8271_v53, 0.0 }
 0x369   : > { %v2259_v27 = vsel %vm2258_vm12, %v6503_v57, %v2255_v31  ;;  %v2267_v4 = vmul.f32 %v6509_v39, %v8255_v20  ;;  %6512 = vpow2.f32 %v5776_v40  ;;  %v6511_v45 = vpop.eup %6510  ;;  %v2277_v57 = vand.u32 2147483648, %v8255_v20 }
 0x36a   : > { %v8301_v58 = vsel %vm2261_vm13, %v2263_v15, %v2259_v27  ;;  %6514 = vrcp.f32 %v8292_v48  ;;  %v2120_v33 = vmul.f32 %v6511_v45, %v8271_v53  ;;  %vm2272_vm15 = vweird.f32 %v6509_v39 }
 0x36b   : > { %v2431_v10 = vmul.f32 %v8301_v58, %v8040_v49  ;;  %v8308_v1 = vmul.f32 %v8301_v58, %v8147_v38  ;;  %v2268_v28 = vsub.f32 1.0, %v2267_v4  ;;  %v8311_v12 = vpop.f32.mrf.mxu1  ;;  %v2112_v38 = vmul.f32 %v8257_v13, %v2111_v55  ;;  %vm2273_vm5 = vmor %vm2271_vm3, %vm2272_vm15 }
 0x36c   : > { %v2030_v49 = vmul.f32 %v8311_v12, %v8311_v12  ;;  %v2121_v41 = vmul.f32 %v6511_v45, %v2120_v33  ;;  %6516 = vrsqrt.f32 %v8316_v32  ;;  %v2278_v15 = vor.u32 1.1754944e-38, %v2277_v57 }
 0x36d   : > { %v2269_v36 = vmul.f32 %v6509_v39, %v2268_v28  ;;  %5785 = vmatmul.msk.f32.vlgmr.msrb.gmra.mxu2 %vm1334_vm1, %v2431_v10  ;;  %v2113_v27 = vmul.f32 %v2112_v38, %v8223_v35  ;;  %v2129_v20 = vand.u32 2147483648, %v8271_v53  ;;  %v2292_v55 = vand.u32 2147483648, %v8292_v48  ;;  %v1412_v38 = vpop.f32.mrf.mxu2 }
 0x36e   : > { %v2122_v13 = vmul.f32 0.5, %v2121_v41  ;;  %v2042_v10 = vadd.f32 %v2030_v49, %v2018_v62  ;;  %vm2286_vm8 = vweird.f32 %v8292_v48  ;;  %vm2138_vm12 = vcmp.eq.f32.partialorder %v8316_v32, inf }
 0x36f   : > { %v6513_v17 = vpop.eup %6512  ;;  %v2270_v31 = vadd.f32 %v6509_v39, %v2269_v36  ;;  %v2115_v62 = vsel %vm2114_vm14, %v8223_v35, %v2113_v27  ;;  %vm2140_vm3 = vcmp.eq.f32.partialorder %v8316_v32, 0.0 }
 0x370   : > { %v6515_v40 = vpop.eup %6514  ;;  %v8326_v51 = vadd.f32 1.0, %v6513_v17  ;;  %v2123_v36 = vsub.f32 1.5, %v2122_v13  ;;  %v8348_v49 = vadd.f32 1e-12, %v2042_v10  ;;  %v2118_v17 = vsel %vm2116_vm2, %v2117_v24, %v2115_v62 }
 0x371   : > { %v2274_v4 = vsel %vm2273_vm5, %v6509_v39, %v2270_v31  ;;  %v2282_v7 = vmul.f32 %v6515_v40, %v8292_v48  ;;  %v2290_v39 = vand.u32 2147483647, %v8292_v48  ;;  %vm2287_vm9 = vweird.f32 %v6515_v40 }
 0x372   : > { %v8331_v28 = vsel %vm2276_vm4, %v2278_v15, %v2274_v4  ;;  %6518 = vrcp.f32 %v8326_v51  ;;  %v6517_v41 = vpop.eup %6516  ;;  %v5777_v15 = vmul.f32 -1.442695, %v2118_v17  ;;  %v2124_v4 = vmul.f32 %v6511_v45, %v2123_v36  ;;  %vm2288_vm11 = vmor %vm2286_vm8, %vm2287_vm9 }
 0x373   : > { %v8338_v60 = vmul.f32 %v8331_v28, %v8156_v46  ;;  %v2283_v57 = vsub.f32 1.0, %v2282_v7  ;;  %v8342_v33 = vpop.f32.mrf.mxu1  ;;  %v2132_v7 = vmul.f32 %v6517_v41, %v8316_v32  ;;  %6520 = vrsqrt.f32 %v8348_v49 }
 0x374   : > { %v2031_v31 = vmul.f32 %v8342_v33, %v8342_v33  ;;  %vm2291_vm10 = vcmp.eq.f32.partialorder %v2290_v39, 8.507059e+37  ;;  %v2293_v13 = vor.u32 1.1754944e-38, %v2292_v55  ;;  %v1413_v10 = vadd.f32 %v7893_v43, %v1412_v38 }
 0x375   : > { %v2284_v46 = vmul.f32 %v6515_v40, %v2283_v57  ;;  %6522 = vpow2.f32 %v5777_v15  ;;  %v2125_v35 = vmul.f32 %v2124_v4, %v8271_v53  ;;  %v2133_v24 = vmul.f32 %v6517_v41, %v2132_v7 }
 0x376   : > { %v2043_v57 = vadd.f32 %v2031_v31, %v8288_v9  ;;  %v2432_v39 = vmul.f32 %v8331_v28, %v8044_v23  ;;  %vm2301_vm13 = vweird.f32 %v8326_v51  ;;  %v2307_v31 = vand.u32 2147483648, %v8326_v51 }
 0x377   : > { %v2285_v27 = vadd.f32 %v6515_v40, %v2284_v46  ;;  %v2127_v48 = vsel %vm2126_vm6, %v8271_v53, %v2125_v35  ;;  %v2134_v36 = vmul.f32 0.5, %v2133_v24  ;;  %v1432_v35 = vmul.f32 0.1, %v1413_v10 }
 0x378   : > { %v6519_v16 = vpop.eup %6518  ;;  %v8370_v38 = vadd.f32 1e-12, %v2043_v57  ;;  %v2130_v46 = vsel %vm2128_vm7, %v2129_v20, %v2127_v48  ;;  %5786 = vmatmul.msk.f32.gmra.mxu2 %vm1334_vm1, %v2432_v39  ;;  %v2308_v39 = vor.u32 1.1754944e-38, %v2307_v31  ;;  %vm2150_vm4 = vcmp.eq.f32.partialorder %v8348_v49, inf }
 0x379   : > { %v2289_v45 = vsel %vm2288_vm11, %v6515_v40, %v2285_v27  ;;  %v2297_v62 = vmul.f32 %v6519_v16, %v8326_v51  ;;  %v6521_v17 = vpop.eup %6520  ;;  %v5778_v15 = vmul.f32 -1.442695, %v2130_v46  ;;  %v2135_v4 = vsub.f32 1.5, %v2134_v36 }
 0x37a   : > { %v8365_v55 = vsel %vm2291_vm10, %v2293_v13, %v2289_v45  ;;  %6524 = vrsqrt.f32 %v8370_v38  ;;  %vm2302_vm14 = vweird.f32 %v6519_v16  ;;  %v2144_v27 = vmul.f32 %v6521_v17, %v8348_v49 }
 0x37b   : > { %v8374_v9 = vmul.f32 %v8365_v55, %v8168_v22  ;;  %v2298_v40 = vsub.f32 1.0, %v2297_v62  ;;  %v8380_v23 = vpop.f32.mrf.mxu1  ;;  %v2305_v22 = vand.u32 2147483647, %v8326_v51  ;;  %v6523_v13 = vpop.eup %6522  ;;  %6526 = vpow2.f32 %v5778_v15  ;;  %vm2303_vm15 = vmor %vm2301_vm13, %vm2302_vm14 }
 0x37c   : > { %10750 = vst [vmem:[#allocation47_spill] sm:$0xff] %v8380_v23  ;;  %v2136_v53 = vmul.f32 %v6517_v41, %v2135_v4  ;;  %v2032_v20 = vmul.f32 %v8380_v23, %v8380_v23  ;;  %v8388_v57 = vadd.f32 1.0, %v6523_v13  ;;  %v2145_v45 = vmul.f32 %v6521_v17, %v2144_v27 }
 0x37d   : > { %v2299_v7 = vmul.f32 %v6519_v16, %v2298_v40  ;;  %v2433_v62 = vmul.f32 %v8365_v55, %v8048_v26  ;;  %v2141_v36 = vand.u32 2147483648, %v8316_v32  ;;  %v1444_v41 = vmax.f32 %v1413_v10, %v1432_v35  ;;  %v1415_v40 = vpop.f32.mrf.mxu2 }
 0x37e   : > { %v2137_v48 = vmul.f32 %v2136_v53, %v8316_v32  ;;  %vm2306_vm2 = vcmp.eq.f32.partialorder %v2305_v22, 8.507059e+37  ;;  %6528 = vrcp.f32 %v8388_v57  ;;  %v2044_v15 = vadd.f32 %v2032_v20, %v8295_v52 }
 0x37f   : > { %v2300_v24 = vadd.f32 %v6519_v16, %v2299_v7  ;;  %v2146_v51 = vmul.f32 0.5, %v2145_v45  ;;  %5697 = vmatmul.msk.f32.gmra.mxu3 %vm1334_vm1, %v1444_v41  ;;  %v1416_v31 = vadd.f32 %v7893_v43, %v1415_v40  ;;  %v8418_v20 = vmul.f32 %v8084_v11, %v8084_v11 }
 0x380   : > { %v6525_v4 = vpop.eup %6524  ;;  %v2139_v26 = vsel %vm2138_vm12, %v8316_v32, %v2137_v48  ;;  %5787 = vmatmul.msk.f32.gmra.mxu2 %vm1334_vm1, %v2433_v62  ;;  %v8427_v43 = vmul.f32 %v8139_v37, %v8139_v37  ;;  %vm2152_vm5 = vcmp.eq.f32.partialorder %v8348_v49, 0.0  ;;  %vm2162_vm6 = vcmp.eq.f32.partialorder %v8370_v38, inf }
 0x381   : > { %v2304_v46 = vsel %vm2303_vm15, %v6519_v16, %v2300_v24  ;;  %v1997_v16 = vmul.f32 %v8080_v8, %v8080_v8  ;;  %v2142_v52 = vsel %vm2140_vm3, %v2141_v36, %v2139_v26  ;;  %v6527_v22 = vpop.eup %6526  ;;  %v2147_v13 = vsub.f32 1.5, %v2146_v51 }
 0x382   : > { %v8398_v7 = vsel %vm2306_vm2, %v2308_v39, %v2304_v46  ;;  %v5779_v27 = vmul.f32 -1.442695, %v2142_v52  ;;  %v2156_v32 = vmul.f32 %v6525_v4, %v8370_v38  ;;  %v8423_v24 = vadd.f32 1e-12, %v2044_v15 }
 0x383   : > { %v8409_v10 = vmul.f32 %v8398_v7, %v8188_v29  ;;  %v8414_v53 = vpop.f32.mrf.mxu1  ;;  %v2021_v35 = vadd.f32 %v8299_v6, %v1997_v16  ;;  %v8421_v29 = vadd.f32 1.0, %v6527_v22  ;;  %v2148_v45 = vmul.f32 %v6521_v17, %v2147_v13 }
 0x384   : > { %6530 = vpow2.f32 %v5779_v27  ;;  %v2157_v62 = vmul.f32 %v6525_v4, %v2156_v32  ;;  %v6529_v39 = vpop.eup %6528  ;;  %v2033_v48 = vmul.f32 %v8414_v53, %v8414_v53  ;;  %v1433_v36 = vmul.f32 0.1, %v1416_v31 }
 0x385   : > { %6532 = vrcp.f32 %v8421_v29  ;;  %v2434_v6 = vmul.f32 %v8398_v7, %v8052_v50  ;;  %v2312_v41 = vmul.f32 %v6529_v39, %v8388_v57  ;;  %v2149_v40 = vmul.f32 %v2148_v45, %v8348_v49  ;;  %v1418_v13 = vpop.f32.mrf.mxu2 }
 0x386   : > { %v2158_v46 = vmul.f32 0.5, %v2157_v62  ;;  %v2153_v17 = vand.u32 2147483648, %v8348_v49  ;;  %6534 = vrsqrt.f32 %v8423_v24  ;;  %v2320_v26 = vand.u32 2147483647, %v8388_v57 }
 0x387   : > { %v2313_v15 = vsub.f32 1.0, %v2312_v41  ;;  %v2151_v50 = vsel %vm2150_vm4, %v8348_v49, %v2149_v40  ;;  %vm2164_vm7 = vcmp.eq.f32.partialorder %v8370_v38, 0.0  ;;  %v2322_v16 = vand.u32 2147483648, %v8388_v57 }
 0x388   : > { %v2159_v51 = vsub.f32 1.5, %v2158_v46  ;;  %v2154_v52 = vsel %vm2152_vm5, %v2153_v17, %v2151_v50  ;;  %v2045_v22 = vadd.f32 %v2033_v48, %v2021_v35  ;;  %v1445_v27 = vmax.f32 %v1416_v31, %v1433_v36  ;;  %5788 = vmatmul.msk.f32.gmra.mxu2 %vm1334_vm1, %v2434_v6 }
 0x389   : > { %v2314_v45 = vmul.f32 %v6529_v39, %v2313_v15  ;;  %vm2317_vm8 = vweird.f32 %v6529_v39  ;;  %v5780_v62 = vmul.f32 -1.442695, %v2154_v52  ;;  %vm2316_vm9 = vweird.f32 %v8388_v57 }
 0x38a   : > { %v6531_v32 = vpop.eup %6530  ;;  %v2160_v41 = vmul.f32 %v6525_v4, %v2159_v51  ;;  %v2165_v40 = vand.u32 2147483648, %v8370_v38  ;;  %v8450_v46 = vadd.f32 1e-12, %v2045_v22  ;;  %5698 = vmatmul.msk.f32.gmra.mxu3 %vm1334_vm1, %v1445_v27  ;;  %vm2321_vm10 = vcmp.eq.f32.partialorder %v2320_v26, 8.507059e+37  ;;  %vm2318_vm11 = vmor %vm2316_vm9, %vm2317_vm8 }
 0x38b   : > { %v6533_v23 = vpop.eup %6532  ;;  %v8447_v49 = vadd.f32 1.0, %v6531_v32  ;;  %v2315_v31 = vadd.f32 %v6529_v39, %v2314_v45  ;;  %6536 = vpow2.f32 %v5780_v62  ;;  %v8454_v48 = vpop.f32.mrf.mxu1  ;;  %v2323_v4 = vor.u32 1.1754944e-38, %v2322_v16  ;;  %v6634_v16 = vld [vmem:[%s10645_s6] ss:$0 sm:$0xff] }
 0x38c   : > { %v2327_v35 = vmul.f32 %v6533_v23, %v8421_v29  ;;  %v6535_v36 = vpop.eup %6534  ;;  %v2335_v57 = vand.u32 2147483647, %v8421_v29  ;;  %v2337_v6 = vand.u32 2147483648, %v8421_v29  ;;  %v2161_v50 = vmul.f32 %v2160_v41, %v8370_v38 }
 0x38d   : > { %6538 = vrcp.f32 %v8447_v49  ;;  %v2319_v17 = vsel %vm2318_vm11, %v6529_v39, %v2315_v31  ;;  %v2168_v26 = vmul.f32 %v6535_v36, %v8423_v24  ;;  %v2034_v52 = vmul.f32 %v8454_v48, %v8454_v48 }
 0x38e   : > { %v2328_v15 = vsub.f32 1.0, %v2327_v35  ;;  %v8462_v51 = vsel %vm2321_vm10, %v2323_v4, %v2319_v17  ;;  %6540 = vrsqrt.f32 %v8450_v46  ;;  %v1419_v22 = vadd.f32 %v6634_v16, %v1418_v13 }
 0x38f   : > { %v8472_v39 = vmul.f32 %v8462_v51, %v8206_v44  ;;  %vm2332_vm12 = vweird.f32 %v6533_v23  ;;  %v2163_v32 = vsel %vm2162_vm6, %v8370_v38, %v2161_v50  ;;  %v2022_v45 = vadd.f32 %v8427_v43, %v8418_v20 }
 0x390   : > { %v2329_v27 = vmul.f32 %v6533_v23, %v2328_v15  ;;  %vm2331_vm13 = vweird.f32 %v8421_v29  ;;  %v2166_v62 = vsel %vm2164_vm7, %v2165_v40, %v2163_v32  ;;  %v2169_v41 = vmul.f32 %v6535_v36, %v2168_v26  ;;  %v1421_v29 = vpop.f32.mrf.mxu2 }
 0x391   : > { %v6537_v13 = vpop.eup %6536  ;;  %vm8482_vm14 = vcmp.eq.f32.partialorder %v2335_v57, 8.507059e+37  ;;  %v2338_v35 = vor.u32 1.1754944e-38, %v2337_v6  ;;  %v5781_v4 = vmul.f32 -1.442695, %v2166_v62  ;;  %vm2333_vm15 = vmor %vm2331_vm13, %vm2332_vm12  ;;  %v2046_v43 = vadd.f32 %v2034_v52, %v2022_v45 }
 0x392   : > { %v2330_v31 = vadd.f32 %v6533_v23, %v2329_v27  ;;  %v8486_v15 = vadd.f32 1.0, %v6537_v13  ;;  %v2170_v20 = vmul.f32 0.5, %v2169_v41  ;;  %v2435_v38 = vmul.f32 %v8462_v51, %v8056_v54 }
 0x393   : > { %v6539_v17 = vpop.eup %6538  ;;  %6542 = vpow2.f32 %v5781_v4  ;;  %v1434_v57 = vmul.f32 0.1, %v1419_v22  ;;  %v1422_v27 = vadd.f32 %v6634_v16, %v1421_v29  ;;  %v8504_v62 = vadd.f32 1e-12, %v2046_v43 }
 0x394   : > { %v2334_v40 = vsel %vm2333_vm15, %v6533_v23, %v2330_v31  ;;  %v2342_v50 = vmul.f32 %v6539_v17, %v8447_v49  ;;  %v6541_v26 = vpop.eup %6540  ;;  %6544 = vrcp.f32 %v8486_v15  ;;  %5789 = vmatmul.msk.f32.gmra.mxu2 %vm1334_vm1, %v2435_v38  ;;  %v2352_v23 = vand.u32 2147483648, %v8447_v49 }
 0x395   : > { %v8494_v6 = vsel %vm8482_vm14, %v2338_v35, %v2334_v40  ;;  %v2171_v32 = vsub.f32 1.5, %v2170_v20  ;;  %v2180_v45 = vmul.f32 %v6541_v26, %v8450_v46  ;;  %vm2347_vm2 = vweird.f32 %v6539_v17 }
 0x396   : > { %v8500_v52 = vmul.f32 %v8494_v6, %v8233_v3  ;;  %v2343_v54 = vsub.f32 1.0, %v2342_v50  ;;  %v2350_v13 = vand.u32 2147483647, %v8447_v49  ;;  %v1446_v31 = vmax.f32 %v1419_v22, %v1434_v57  ;;  %v8524_v57 = vld [vmem:[%s8521_s26] sm:$0xff] }
 0x397   : > { %v2172_v44 = vmul.f32 %v6535_v36, %v2171_v32  ;;  %v2181_v35 = vmul.f32 %v6541_v26, %v2180_v45  ;;  %6546 = vrsqrt.f32 %v8504_v62  ;;  %vm2346_vm3 = vweird.f32 %v8447_v49  ;;  %v3645_v36 = vld [vmem:[%s10651_s12] sm:$0xff] }
 0x398   : > { %v2344_v41 = vmul.f32 %v6539_v17, %v2343_v54  ;;  %v2353_v16 = vor.u32 1.1754944e-38, %v2352_v23  ;;  %5699 = vmatmul.msk.f32.gmra.mxu3 %vm1334_vm1, %v1446_v31  ;;  %v1435_v20 = vmul.f32 0.1, %v1422_v27  ;;  %vm2348_vm4 = vmor %vm2346_vm3, %vm2347_vm2  ;;  %v2436_v40 = vmul.f32 %v8494_v6, %v8060_v59  ;;  %3987 = vmatpush.msrb.mxu0 %v3645_v36 }
 0x399   : > { %v6543_v3 = vpop.eup %6542  ;;  %v2173_v29 = vmul.f32 %v2172_v44, %v8423_v24  ;;  %v2182_v22 = vmul.f32 0.5, %v2181_v35  ;;  %vm2351_vm5 = vcmp.eq.f32.partialorder %v2350_v13, 8.507059e+37  ;;  %vm3647_vm6 = vcmask 130048   ;;  %6128 = vmatpush.msra.mxu2 %v3645_v36 }
 0x39a   : > { %v2345_v4 = vadd.f32 %v6539_v17, %v2344_v41  ;;  %v6545_v43 = vpop.eup %6544  ;;  %v8510_v38 = vadd.f32 1.0, %v6543_v3  ;;  %vm2174_vm7 = vcmp.eq.f32.partialorder %v8423_v24, inf  ;;  %vm2176_vm8 = vcmp.eq.f32.partialorder %v8423_v24, 0.0  ;;  %5869 = vmatmul.msk.f32.vlgmr.msrb.gmra.mxu0 %vm3647_vm6, %v8524_v57 }
 0x39b   : > { %v2357_v49 = vmul.f32 %v6545_v43, %v8486_v15  ;;  %v2177_v23 = vand.u32 2147483648, %v8423_v24  ;;  %v1447_v32 = vmax.f32 %v1422_v27, %v1435_v20  ;;  %v2365_v41 = vand.u32 2147483647, %v8486_v15 }
 0x39c   : > { %v2349_v50 = vsel %vm2348_vm4, %v6539_v17, %v2345_v4  ;;  %6548 = vrcp.f32 %v8510_v38  ;;  %5790 = vmatmul.msk.f32.gmra.mxu2 %vm1334_vm1, %v2436_v40  ;;  %v2367_v13 = vand.u32 2147483648, %v8486_v15  ;;  %v2175_v31 = vsel %vm2174_vm7, %v8423_v24, %v2173_v29 }
 0x39d   : > { %v8526_v54 = vsel %vm2351_vm5, %v2353_v16, %v2349_v50  ;;  %v2358_v17 = vsub.f32 1.0, %v2357_v49  ;;  %v6547_v45 = vpop.eup %6546  ;;  %v2183_v44 = vsub.f32 1.5, %v2182_v22  ;;  %vm2362_vm9 = vweird.f32 %v6545_v43  ;;  %v8552_v49 = vld [vmem:[%s8521_s26 + $0x8] sm:$0xff] }
 0x39e   : > { %v8536_v59 = vmul.f32 %v8526_v54, %v8273_v42  ;;  %v2178_v3 = vsel %vm2176_vm8, %v2177_v23, %v2175_v31  ;;  %v2192_v4 = vmul.f32 %v6547_v45, %v8504_v62  ;;  %v2437_v36 = vmul.f32 %v8526_v54, %v8064_v61 }
 0x39f   : > { %v2359_v35 = vmul.f32 %v6545_v43, %v2358_v17  ;;  %v5782_v16 = vmul.f32 -1.442695, %v2178_v3  ;;  %v2184_v42 = vmul.f32 %v6541_v26, %v2183_v44  ;;  %vm2361_vm10 = vweird.f32 %v8486_v15 }
 0x3a0   : > { %vm2186_vm11 = vcmp.eq.f32.partialorder %v8450_v46, inf  ;;  %v2193_v20 = vmul.f32 %v6547_v45, %v2192_v4  ;;  %5700 = vmatmul.msk.f32.gmra.mxu3 %vm1334_vm1, %v1447_v32  ;;  %vm2363_vm12 = vmor %vm2361_vm10, %vm2362_vm9  ;;  %v2368_v29 = vor.u32 1.1754944e-38, %v2367_v13  ;;  %v2189_v26 = vand.u32 2147483648, %v8450_v46 }
 0x3a1   : > { %v2360_v27 = vadd.f32 %v6545_v43, %v2359_v35  ;;  %6550 = vpow2.f32 %v5782_v16  ;;  %v2185_v22 = vmul.f32 %v2184_v42, %v8450_v46  ;;  %vm2366_vm13 = vcmp.eq.f32.partialorder %v2365_v41, 8.507059e+37 }
 0x3a2   : > { %v6549_v24 = vpop.eup %6548  ;;  %v2194_v50 = vmul.f32 0.5, %v2193_v20  ;;  %vm2188_vm14 = vcmp.eq.f32.partialorder %v8450_v46, 0.0  ;;  %5870 = vmatmul.msk.f32.gmra.mxu0 %vm3647_vm6, %v8552_v49  ;;  %v2382_v13 = vand.u32 2147483648, %v8510_v38  ;;  %vm2376_vm2 = vweird.f32 %v8510_v38 }
 0x3a3   : > { %v2364_v40 = vsel %vm2363_vm12, %v6545_v43, %v2360_v27  ;;  %v2372_v61 = vmul.f32 %v6549_v24, %v8510_v38  ;;  %v2187_v17 = vsel %vm2186_vm11, %v8450_v46, %v2185_v22  ;;  %vm2377_vm15 = vweird.f32 %v6549_v24  ;;  %v8571_v27 = vld [vmem:[%s8521_s26 + $0x10] sm:$0xff] }
 0x3a4   : > { %v2369_v15 = vsel %vm2366_vm13, %v2368_v29, %v2364_v40  ;;  %5791 = vmatmul.msk.f32.gmra.mxu2 %vm1334_vm1, %v2437_v36  ;;  %v2190_v41 = vsel %vm2188_vm14, %v2189_v26, %v2187_v17  ;;  %v2195_v44 = vsub.f32 1.5, %v2194_v50  ;;  %v2380_v46 = vand.u32 2147483647, %v8510_v38  ;;  %vm2378_vm3 = vmor %vm2376_vm2, %vm2377_vm15 }
 0x3a5   : > { %v2450_v23 = vmul.f32 %v2369_v15, %v8125_v30  ;;  %v8561_v43 = vmul.f32 %v2369_v15, %v8311_v12  ;;  %v2373_v32 = vsub.f32 1.0, %v2372_v61  ;;  %v5783_v31 = vmul.f32 -1.442695, %v2190_v41 }
 0x3a6   : > { %v2196_v4 = vmul.f32 %v6547_v45, %v2195_v44  ;;  %v2438_v16 = vmul.f32 %v2369_v15, %v8068_v63  ;;  %v2383_v42 = vor.u32 1.1754944e-38, %v2382_v13  ;;  %vm2198_vm4 = vcmp.eq.f32.partialorder %v8504_v62, inf  ;;  %v1516_v13 = vpop.f32.mrf.mxu3 }
 0x3a7   : > { %v2374_v35 = vmul.f32 %v6549_v24, %v2373_v32  ;;  %v6551_v3 = vpop.eup %6550  ;;  %6552 = vpow2.f32 %v5783_v31  ;;  %vm2381_vm5 = vcmp.eq.f32.partialorder %v2380_v46, 8.507059e+37  ;;  %v2201_v45 = vand.u32 2147483648, %v8504_v62 }
 0x3a8   : > { %v2248_v12 = vadd.f32 1.0, %v6551_v3  ;;  %5804 = vmatmul.msk.f32.vlgmr.msra.gmra.mxu3 %vm1334_vm1, %v2450_v23  ;;  %v2197_v36 = vmul.f32 %v2196_v4, %v8504_v62  ;;  %vm2200_vm7 = vcmp.eq.f32.partialorder %v8504_v62, 0.0  ;;  %v8597_v3 = vld [vmem:[%s10647_s8] ss:$0 sm:$0xff] }
 0x3a9   : > { %v2375_v30 = vadd.f32 %v6549_v24, %v2374_v35  ;;  %v6635_v35 = vld [vmem:[%s7539_s17 + $0x8] sm:$0xff]  ;;  %v1517_v4 = vadd.f32 %v8597_v3, %v1516_v13 }
 0x3aa   : > { %6554 = vrcp.f32 %v2248_v12  ;;  %v2199_v38 = vsel %vm2198_vm4, %v8504_v62, %v2197_v36  ;;  %5871 = vmatmul.msk.f32.gmra.mxu0 %vm3647_vm6, %v8571_v27  ;;  %v8586_v62 = vld [vmem:[%s8521_s26 + $0x18] sm:$0xff]  ;;  %v2395_v41 = vand.u32 2147483647, %v2248_v12  ;;  %vm2391_vm9 = vweird.f32 %v2248_v12 }
 0x3ab   : > { %v2379_v20 = vsel %vm2378_vm3, %v6549_v24, %v2375_v30  ;;  %v2202_v24 = vsel %vm2200_vm7, %v2201_v45, %v2199_v38 }
 0x3ac   : > { %v2384_v63 = vsel %vm2381_vm5, %v2383_v42, %v2379_v20  ;;  %5792 = vmatmul.msk.f32.gmra.mxu2 %vm1334_vm1, %v2438_v16  ;;  %v5784_v40 = vmul.f32 -1.442695, %v2202_v24  ;;  %vm2396_vm11 = vcmp.eq.f32.partialorder %v2395_v41, 8.507059e+37 }
 0x3ad   : > { %v2451_v29 = vmul.f32 %v2384_v63, %v8132_v34  ;;  %v8581_v22 = vmul.f32 %v2384_v63, %v8342_v33  ;;  %v6553_v26 = vpop.eup %6552  ;;  %v2439_v50 = vmul.f32 %v2384_v63, %v8072_v2  ;;  %v2397_v34 = vand.u32 2147483648, %v2248_v12  ;;  %v1196_v2 = vpop.f32.mrf.mxu0  ;;  %v8602_v63 = vld [vmem:[%s8521_s26 + $0x20] sm:$0xff] }
 0x3ae   : > { %v2249_v61 = vadd.f32 1.0, %v6553_v26  ;;  %6556 = vpow2.f32 %v5784_v40  ;;  %v1550_v46 = vadd.f32 %v6635_v35, %v1196_v2 }
 0x3af   : > { %v2398_v42 = vor.u32 1.1754944e-38, %v2397_v34  ;;  %v6637_v34 = vld [vmem:[%s7539_s17 + $0x10] sm:$0xff] }
 0x3b0   : > { %v6555_v15 = vpop.eup %6554  ;;  %6558 = vrcp.f32 %v2249_v61  ;;  %5805 = vmatmul.msk.f32.gmra.mxu3 %vm1334_vm1, %v2451_v29  ;;  %v1562_v45 = vadd.f32 %v1550_v46, %v1517_v4  ;;  %v2410_v29 = vand.u32 2147483647, %v2249_v61  ;;  %v2412_v24 = vand.u32 2147483648, %v2249_v61 }
 0x3b1   : > { %v2387_v17 = vmul.f32 %v6555_v15, %v2248_v12  ;;  %vm2392_vm8 = vweird.f32 %v6555_v15  ;;  %vm2406_vm13 = vweird.f32 %v2249_v61 }
 0x3b2   : > { %5872 = vmatmul.msk.f32.gmra.mxu0 %vm3647_vm6, %v8586_v62  ;;  %vm2393_vm10 = vmor %vm2391_vm9, %vm2392_vm8  ;;  %1574 = vst.msk [vmem:[%s8030_s30 + $0x8] sm:$0xff] %vm1139_vm0, %v1562_v45  ;;  %vm2411_vm15 = vcmp.eq.f32.partialorder %v2410_v29, 8.507059e+37 }
 0x3b3   : > { %v2388_v23 = vsub.f32 1.0, %v2387_v17  ;;  %v1519_v17 = vpop.f32.mrf.mxu3 }
 0x3b4   : > { %5793 = vmatmul.msk.f32.gmra.mxu2 %vm1334_vm1, %v2439_v50  ;;  %v6557_v33 = vpop.eup %6556 }
 0x3b5   : > { %v2389_v32 = vmul.f32 %v6555_v15, %v2388_v23  ;;  %v8591_v44 = vadd.f32 1.0, %v6557_v33  ;;  %v2413_v23 = vor.u32 1.1754944e-38, %v2412_v24  ;;  %v1520_v33 = vadd.f32 %v8597_v3, %v1519_v17 }
 0x3b6   : > { %v6559_v31 = vpop.eup %6558 }
 0x3b7   : > { %v2390_v16 = vadd.f32 %v6555_v15, %v2389_v32  ;;  %v2402_v30 = vmul.f32 %v6559_v31, %v2249_v61  ;;  %6560 = vrcp.f32 %v8591_v44  ;;  %vm2407_vm12 = vweird.f32 %v6559_v31 }
 0x3b8   : > { %vm2408_vm14 = vmor %vm2406_vm13, %vm2407_vm12  ;;  %vm2421_vm3 = vweird.f32 %v8591_v44 }
 0x3b9   : > { %v2394_v36 = vsel %vm2393_vm10, %v6555_v15, %v2390_v16  ;;  %v2403_v20 = vsub.f32 1.0, %v2402_v30  ;;  %v1199_v15 = vpop.f32.mrf.mxu0  ;;  %v8625_v16 = vld [vmem:[%s8521_s26 + $0x28] sm:$0xff]  ;;  %v2427_v30 = vand.u32 2147483648, %v8591_v44 }
 0x3ba   : > { %v8604_v38 = vsel %vm2396_vm11, %v2398_v42, %v2394_v36  ;;  %5873 = vmatmul.msk.f32.gmra.mxu0 %vm3647_vm6, %v8602_v63  ;;  %v2425_v42 = vand.u32 2147483647, %v8591_v44 }
 0x3bb   : > { %v2452_v12 = vmul.f32 %v8604_v38, %v8134_v0  ;;  %v2404_v26 = vmul.f32 %v6559_v31, %v2403_v20  ;;  %v2440_v40 = vmul.f32 %v8604_v38, %v8076_v5  ;;  %v1551_v5 = vadd.f32 %v6637_v34, %v1199_v15  ;;  %v6638_v20 = vld [vmem:[%s7539_s17 + $0x18] sm:$0xff] }
 0x3bc   : > { %v2428_v36 = vor.u32 1.1754944e-38, %v2427_v30  ;;  %vm2426_vm5 = vcmp.eq.f32.partialorder %v2425_v42, 8.507059e+37  ;;  %v8656_v34 = vld [vmem:[%s8521_s26 + $0x38] sm:$0xff] }
 0x3bd   : > { %v2405_v50 = vadd.f32 %v6559_v31, %v2404_v26  ;;  %5794 = vmatmul.msk.f32.gmra.mxu2 %vm1334_vm1, %v2440_v40  ;;  %5806 = vmatmul.msk.f32.gmra.mxu3 %vm1334_vm1, %v2452_v12  ;;  %v6561_v0 = vpop.eup %6560  ;;  %v1563_v2 = vadd.f32 %v1551_v5, %v1520_v33  ;;  %v2443_v5 = vmul.f32 %v8301_v58, %v8088_v14 }
 0x3be   : > { %v2417_v41 = vmul.f32 %v6561_v0, %v8591_v44  ;;  %vm2422_vm2 = vweird.f32 %v6561_v0  ;;  %v2444_v14 = vmul.f32 %v8331_v28, %v8092_v18  ;;  %v2445_v18 = vmul.f32 %v8365_v55, %v8096_v21  ;;  %v8701_v55 = vld [vmem:[%s8521_s26 + $0x50] sm:$0xff] }
 0x3bf   : > { %v2409_v32 = vsel %vm2408_vm14, %v6559_v31, %v2405_v50  ;;  %1575 = vst.msk [vmem:[%s8030_s30 + $0x10] sm:$0xff] %vm1139_vm0, %v1563_v2  ;;  %vm2423_vm4 = vmor %vm2421_vm3, %vm2422_vm2  ;;  %v8645_v50 = vld [vmem:[%s8521_s26 + $0x30] sm:$0xff] }
 0x3c0   : > { %v2414_v61 = vsel %vm2411_vm15, %v2413_v23, %v2409_v32  ;;  %v2418_v46 = vsub.f32 1.0, %v2417_v41  ;;  %v6640_v41 = vld [vmem:[%s7539_s17 + $0x28] sm:$0xff] }
 0x3c1   : > { %v2453_v13 = vmul.f32 %v2414_v61, %v8136_v19  ;;  %v8621_v35 = vmul.f32 %v2414_v61, %v8414_v53  ;;  %v2441_v4 = vmul.f32 %v2414_v61, %v8080_v8  ;;  %v1202_v8 = vpop.f32.mrf.mxu0  ;;  %v1522_v53 = vpop.f32.mrf.mxu3 }
 0x3c2   : > { %v2419_v31 = vmul.f32 %v6561_v0, %v2418_v46  ;;  %5874 = vmatmul.msk.f32.gmra.mxu0 %vm3647_vm6, %v8625_v16  ;;  %v1552_v45 = vadd.f32 %v6638_v20, %v1202_v8  ;;  %v1523_v29 = vadd.f32 %v8597_v3, %v1522_v53  ;;  %v8670_v46 = vld [vmem:[%s8521_s26 + $0x40] sm:$0xff]  ;;  %v3195_v8 = vld [vmem:[%s10753_s13 + $0x38] sm:$0xff] }
 0x3c3   : > { %v6642_v53 = vld [vmem:[%s7539_s17 + $0x38] sm:$0xff]  ;;  %3312 = vmatpush.msrb.mxu3 %v3195_v8 }
 0x3c4   : > { %v2420_v19 = vadd.f32 %v6561_v0, %v2419_v31  ;;  %v1564_v44 = vadd.f32 %v1552_v45, %v1523_v29  ;;  %v8715_v29 = vld [vmem:[%s8521_s26 + $0x58] sm:$0xff] }
 0x3c5   : > { %5795 = vmatmul.msk.f32.gmra.mxu2 %vm1334_vm1, %v2441_v4  ;;  %5807 = vmatmul.msk.f32.gmra.mxu3 %vm1334_vm1, %v2453_v13  ;;  %v6641_v4 = vld [vmem:[%s7539_s17 + $0x30] sm:$0xff]  ;;  %v6646_v8 = vld [vmem:[%s7539_s17 + $0x58] sm:$0xff] }
 0x3c6   : > { %v2424_v24 = vsel %vm2423_vm4, %v6561_v0, %v2420_v19  ;;  %1576 = vst.msk [vmem:[%s8030_s30 + $0x18] sm:$0xff] %vm1139_vm0, %v1564_v44  ;;  %v6639_v0 = vld [vmem:[%s7539_s17 + $0x20] sm:$0xff]  ;;  %v8684_v19 = vld [vmem:[%s8521_s26 + $0x48] sm:$0xff]  ;;  %v2447_v44 = vmul.f32 %v8462_v51, %v8107_v47  ;;  %v3194_v47 = vld [vmem:[%s10753_s13 + $0x30] sm:$0xff] }
 0x3c7   : > { %v8638_v12 = vsel %vm2426_vm5, %v2428_v36, %v2424_v24  ;;  %3313 = vmatpush.msrb.mxu3 %v3194_v47  ;;  %v6643_v51 = vld [vmem:[%s7539_s17 + $0x40] sm:$0xff]  ;;  %v3556_v47 = vld [vmem:[%s8521_s26 + $0x98] sm:$0xff] }
 0x3c8   : > { %v2454_v26 = vmul.f32 %v8638_v12, %v8139_v37  ;;  %v2442_v40 = vmul.f32 %v8638_v12, %v8084_v11 }
 0x3c9   : > { %v1205_v15 = vpop.f32.mrf.mxu0  ;;  %v1525_v17 = vpop.f32.mrf.mxu3 }
 0x3ca   : > { %5875 = vmatmul.msk.f32.gmra.mxu0 %vm3647_vm6, %v8645_v50  ;;  %v1553_v37 = vadd.f32 %v6639_v0, %v1205_v15  ;;  %v1526_v11 = vadd.f32 %v8597_v3, %v1525_v17  ;;  %v10754_v17 = vld [vmem:[#allocation46_spill] sm:$0xff] }
 0x3cb   : > { %v2449_v0 = vmul.f32 %v8526_v54, %v10754_v17 }
 0x3cc   : > { %v1565_v23 = vadd.f32 %v1553_v37, %v1526_v11  ;;  %v3551_v11 = vld [vmem:[%s8521_s26 + $0x70] sm:$0xff] }
 0x3cd   : > { %5796 = vmatmul.msk.f32.gmra.mxu2 %vm1334_vm1, %v2442_v40  ;;  %5808 = vmatmul.msk.f32.gmra.mxu3 %vm1334_vm1, %v2454_v26 }
 0x3ce   : > { %1577 = vst.msk [vmem:[%s8030_s30 + $0x20] sm:$0xff] %vm1139_vm0, %v1565_v23  ;;  %v6644_v23 = vld [vmem:[%s7539_s17 + $0x48] sm:$0xff] }
 0x3d1   : > { %v1208_v33 = vpop.f32.mrf.mxu0 }
 0x3d2   : > { %5876 = vmatmul.msk.f32.gmra.mxu0 %vm3647_vm6, %v8656_v34  ;;  %v1528_v32 = vpop.f32.mrf.mxu3  ;;  %v1554_v61 = vadd.f32 %v6640_v41, %v1208_v33 }
 0x3d3   : > { %v1529_v2 = vadd.f32 %v8597_v3, %v1528_v32 }
 0x3d5   : > { %5797 = vmatmul.msk.f32.gmra.mxu2 %vm1334_vm1, %v2443_v5  ;;  %5809 = vmatmul.msk.f32.gmra.mxu3 %vm1334_vm1, %v8308_v1  ;;  %v1566_v13 = vadd.f32 %v1554_v61, %v1529_v2  ;;  %v3552_v2 = vld [vmem:[%s8521_s26 + $0x78] sm:$0xff] }
 0x3d7   : > { %1578 = vst.msk [vmem:[%s8030_s30 + $0x28] sm:$0xff] %vm1139_vm0, %v1566_v13 }
 0x3d9   : > { %v1211_v58 = vpop.f32.mrf.mxu0 }
 0x3da   : > { %5877 = vmatmul.msk.f32.gmra.mxu0 %vm3647_vm6, %v8670_v46  ;;  %v1531_v1 = vpop.f32.mrf.mxu3  ;;  %v1555_v30 = vadd.f32 %v6641_v4, %v1211_v58  ;;  %v3553_v58 = vld [vmem:[%s8521_s26 + $0x80] sm:$0xff]  ;;  %v6645_v4 = vld [vmem:[%s7539_s17 + $0x50] sm:$0xff] }
 0x3db   : > { %v1532_v31 = vadd.f32 %v8597_v3, %v1531_v1  ;;  %v3192_v1 = vld [vmem:[%s10753_s13 + $0x20] sm:$0xff] }
 0x3dd   : > { %5798 = vmatmul.msk.f32.gmra.mxu2 %vm1334_vm1, %v2444_v14  ;;  %5810 = vmatmul.msk.f32.gmra.mxu3 %vm1334_vm1, %v8338_v60  ;;  %v1567_v42 = vadd.f32 %v1555_v30, %v1532_v31  ;;  %v10755_v31 = vld [vmem:[#allocation47_spill] sm:$0xff] }
 0x3df   : > { %1579 = vst.msk [vmem:[%s8030_s30 + $0x30] sm:$0xff] %vm1139_vm0, %v1567_v42  ;;  %v2464_v42 = vmul.f32 %v8604_v38, %v10755_v31 }
 0x3e1   : > { %v1214_v28 = vpop.f32.mrf.mxu0 }
 0x3e2   : > { %5878 = vmatmul.msk.f32.gmra.mxu0 %vm3647_vm6, %v8684_v19  ;;  %v1556_v36 = vadd.f32 %v6642_v53, %v1214_v28 }
 0x3e3   : > { %v1534_v60 = vpop.f32.mrf.mxu3 }
 0x3e4   : > { %v1535_v20 = vadd.f32 %v8597_v3, %v1534_v60 }
 0x3e5   : > { %5799 = vmatmul.msk.f32.gmra.mxu2 %vm1334_vm1, %v2445_v18  ;;  %5811 = vmatmul.msk.f32.gmra.mxu3 %vm1334_vm1, %v8374_v9  ;;  %v2446_v9 = vmul.f32 %v8398_v7, %v8100_v25  ;;  %v3549_v25 = vld [vmem:[%s8521_s26 + $0x60] sm:$0xff] }
 0x3e6   : > { %v1568_v21 = vadd.f32 %v1556_v36, %v1535_v20  ;;  %v3554_v36 = vld [vmem:[%s8521_s26 + $0x88] sm:$0xff] }
 0x3e8   : > { %1580 = vst.msk [vmem:[%s8030_s30 + $0x38] sm:$0xff] %vm1139_vm0, %v1568_v21 }
 0x3e9   : > { %v1217_v24 = vpop.f32.mrf.mxu0 }
 0x3ea   : > { %5879 = vmatmul.msk.f32.gmra.mxu0 %vm3647_vm6, %v8701_v55 }
 0x3ed   : > { %5800 = vmatmul.msk.f32.gmra.mxu2 %vm1334_vm1, %v2446_v9  ;;  %5812 = vmatmul.msk.f32.gmra.mxu3 %vm1334_vm1, %v8409_v10  ;;  %v2448_v10 = vmul.f32 %v8494_v6, %v8114_v56  ;;  %v3550_v56 = vld [vmem:[%s8521_s26 + $0x68] sm:$0xff] }
 0x3f0   : > { %v8712_v45 = vpop.f32.mrf.mxu2 }
 0x3f1   : > { %v1220_v26 = vpop.f32.mrf.mxu0 }
 0x3f2   : > { %5880 = vmatmul.msk.f32.gmra.mxu0 %vm3647_vm6, %v8715_v29  ;;  %v1558_v5 = vadd.f32 %v6644_v23, %v1220_v26 }
 0x3f5   : > { %5801 = vmatmul.msk.f32.gmra.mxu2 %vm1334_vm1, %v2447_v44  ;;  %5813 = vmatmul.msk.f32.gmra.mxu3 %vm1334_vm1, %v8472_v39  ;;  %v1557_v39 = vadd.f32 %v6643_v51, %v1217_v24 }
 0x3fa   : > { %5881 = vmatmul.msk.f32.gmra.mxu0 %vm3647_vm6, %v3549_v25  ;;  %v3555_v25 = vld [vmem:[%s8521_s26 + $0x90] sm:$0xff] }
 0x3fb   : > { %v8725_v7 = vpop.f32.mrf.mxu2 }
 0x3fd   : > { %5802 = vmatmul.msk.f32.gmra.mxu2 %vm1334_vm1, %v2448_v10  ;;  %5814 = vmatmul.msk.f32.gmra.mxu3 %vm1334_vm1, %v8500_v52  ;;  %v1223_v52 = vpop.f32.mrf.mxu0 }
 0x3fe   : > { %v1559_v30 = vadd.f32 %v6645_v4, %v1223_v52  ;;  %v2708_v4 = vmul.f32 %v8712_v45, %v8712_v45 }
 0x402   : > { %v1537_v40 = vpop.f32.mrf.mxu3  ;;  %5882 = vmatmul.msk.f32.gmra.mxu0 %vm3647_vm6, %v3550_v56  ;;  %v3557_v56 = vld [vmem:[%s8521_s26 + $0xa0] sm:$0xff] }
 0x403   : > { %v8738_v6 = vpop.f32.mrf.mxu2  ;;  %v1538_v15 = vadd.f32 %v8597_v3, %v1537_v40 }
 0x405   : > { %v1569_v37 = vadd.f32 %v1557_v39, %v1538_v15  ;;  %5803 = vmatmul.msk.f32.gmra.mxu2 %vm1334_vm1, %v2449_v0  ;;  %5815 = vmatmul.msk.f32.gmra.mxu3 %vm1334_vm1, %v8536_v59  ;;  %v3193_v59 = vld [vmem:[%s10753_s13 + $0x28] sm:$0xff]  ;;  %v1226_v61 = vpop.f32.mrf.mxu0 }
 0x406   : > { %3314 = vmatpush.msrb.mxu3 %v3193_v59  ;;  %v1560_v53 = vadd.f32 %v6646_v8, %v1226_v61  ;;  %v3602_v15 = vld [vmem:[%s8521_s26 + $0x208] sm:$0xff]  ;;  %v3559_v59 = vld [vmem:[%s8521_s26 + $0xb0] sm:$0xff] }
 0x407   : > { %1581 = vst.msk [vmem:[%s8030_s30 + $0x40] sm:$0xff] %vm1139_vm0, %v1569_v37 }
 0x408   : > { %3315 = vmatpush.msrb.mxu3 %v3192_v1 }
 0x40a   : > { %5883 = vmatmul.msk.f32.gmra.mxu0 %vm3647_vm6, %v3551_v11  ;;  %v3558_v11 = vld [vmem:[%s8521_s26 + $0xa8] sm:$0xff] }
 0x40b   : > { %v8751_v33 = vpop.f32.mrf.mxu2 }
 0x40d   : > { %v1540_v54 = vpop.f32.mrf.mxu3  ;;  %5816 = vmatmul.msk.f32.gmra.mxu3 %vm1334_vm1, %v8561_v43 }
 0x40e   : > { %v1541_v32 = vadd.f32 %v8597_v3, %v1540_v54 }
 0x410   : > { %v1570_v41 = vadd.f32 %v1558_v5, %v1541_v32 }
 0x412   : > { %1582 = vst.msk [vmem:[%s8030_s30 + $0x48] sm:$0xff] %vm1139_vm0, %v1570_v41  ;;  %5884 = vmatmul.msk.f32.gmra.mxu0 %vm3647_vm6, %v3552_v2 }
 0x415   : > { %5817 = vmatmul.msk.f32.gmra.mxu3 %vm1334_vm1, %v8581_v22 }
 0x417   : > { %v8766_v13 = vpop.f32.mrf.mxu2  ;;  %v3989_v43 = vpop.f32.mrf.mxu0 }
 0x418   : > { %v4313_v14 = vadd.f32 %v3989_v43, %v8524_v57 }
 0x41a   : > { %4325 = vst.msk [vmem:[%s8778_s28] sm:$0xff] %vm3647_vm6, %v4313_v14  ;;  %5885 = vmatmul.msk.f32.gmra.mxu0 %vm3647_vm6, %v3553_v58  ;;  %v3605_v14 = vld [vmem:[%s8521_s26 + $0x220] sm:$0xff] }
 0x41b   : > { %v1543_v22 = vpop.f32.mrf.mxu3 }
 0x41c   : > { %v1544_v57 = vadd.f32 %v8597_v3, %v1543_v22 }
 0x41d   : > { %5818 = vmatmul.msk.f32.gmra.mxu3 %vm1334_vm1, %v2464_v42 }
 0x41e   : > { %v1571_v18 = vadd.f32 %v1559_v30, %v1544_v57 }
 0x41f   : > { %v8785_v28 = vpop.f32.mrf.mxu2  ;;  %v3992_v38 = vpop.f32.mrf.mxu0 }
 0x420   : > { %1583 = vst.msk [vmem:[%s8030_s30 + $0x50] sm:$0xff] %vm1139_vm0, %v1571_v18  ;;  %v4314_v60 = vadd.f32 %v3992_v38, %v8552_v49  ;;  %v3561_v18 = vld [vmem:[%s8521_s26 + $0xc0] sm:$0xff] }
 0x422   : > { %4326 = vst.msk [vmem:[%s8778_s28 + $0x8] sm:$0xff] %vm3647_vm6, %v4314_v60  ;;  %5886 = vmatmul.msk.f32.gmra.mxu0 %vm3647_vm6, %v3554_v36  ;;  %v3606_v60 = vld [vmem:[%s8521_s26 + $0x228] sm:$0xff] }
 0x423   : > { %v1546_v20 = vpop.f32.mrf.mxu3 }
 0x424   : > { %v1547_v21 = vadd.f32 %v8597_v3, %v1546_v20  ;;  %v2466_v3 = vmul.f32 %v8638_v12, %v8454_v48  ;;  %v3191_v48 = vld [vmem:[%s10753_s13 + $0x18] sm:$0xff]  ;;  %v3601_v12 = vld [vmem:[%s8521_s26 + $0x200] sm:$0xff] }
 0x425   : > { %5819 = vmatmul.msk.f32.gmra.mxu3 %vm1334_vm1, %v8621_v35  ;;  %5933 = vmatmul.msk.f32.vlgmr.msra.gmra.mxu2 %vm3647_vm6, %v3601_v12  ;;  %v2710_v12 = vmul.f32 %v8738_v6, %v8738_v6 }
 0x426   : > { %v1572_v9 = vadd.f32 %v1560_v53, %v1547_v21  ;;  %3316 = vmatpush.msrb.mxu3 %v3191_v48  ;;  %v3562_v48 = vld [vmem:[%s8521_s26 + $0xc8] sm:$0xff] }
 0x427   : > { %v8798_v24 = vpop.f32.mrf.mxu2  ;;  %v3995_v49 = vpop.f32.mrf.mxu0 }
 0x428   : > { %1584 = vst.msk [vmem:[%s8030_s30 + $0x58] sm:$0xff] %vm1139_vm0, %v1572_v9  ;;  %v4315_v44 = vadd.f32 %v3995_v49, %v8571_v27 }
 0x42a   : > { %4327 = vst.msk [vmem:[%s8778_s28 + $0x10] sm:$0xff] %vm3647_vm6, %v4315_v44  ;;  %5887 = vmatmul.msk.f32.gmra.mxu0 %vm3647_vm6, %v3555_v25 }
 0x42b   : > { %v8808_v10 = vpop.f32.mrf.mxu3 }
 0x42c   : > { %10756 = vst [vmem:[#allocation46_spill] sm:$0xff] %v8808_v10 }
 0x42d   : > { %5820 = vmatmul.msk.f32.gmra.mxu3 %vm1334_vm1, %v2466_v3  ;;  %5934 = vmatmul.msk.f32.gmra.mxu2 %vm3647_vm6, %v3602_v15 }
 0x42f   : > { %v8812_v35 = vpop.f32.mrf.mxu2  ;;  %v3998_v26 = vpop.f32.mrf.mxu0 }
 0x430   : > { %v4316_v27 = vadd.f32 %v3998_v26, %v8586_v62 }
 0x432   : > { %4328 = vst.msk [vmem:[%s8778_s28 + $0x18] sm:$0xff] %vm3647_vm6, %v4316_v27  ;;  %5888 = vmatmul.msk.f32.gmra.mxu0 %vm3647_vm6, %v3556_v47 }
 0x433   : > { %v8826_v39 = vpop.f32.mrf.mxu3 }
 0x434   : > { %10757 = vst [vmem:[#allocation47_spill] sm:$0xff] %v8826_v39 }
 0x437   : > { %v8824_v51 = vpop.f32.mrf.mxu2  ;;  %v4001_v62 = vpop.f32.mrf.mxu0 }
 0x438   : > { %v4317_v40 = vadd.f32 %v4001_v62, %v8602_v63  ;;  %v3603_v63 = vld [vmem:[%s8521_s26 + $0x210] sm:$0xff] }
 0x439   : > { %5935 = vmatmul.msk.f32.gmra.mxu2 %vm3647_vm6, %v3603_v63 }
 0x43a   : > { %4329 = vst.msk [vmem:[%s8778_s28 + $0x20] sm:$0xff] %vm3647_vm6, %v4317_v40  ;;  %5889 = vmatmul.msk.f32.gmra.mxu0 %vm3647_vm6, %v3557_v56  ;;  %v3607_v40 = vld [vmem:[%s8521_s26 + $0x230] sm:$0xff] }
 0x43f   : > { %v4004_v37 = vpop.f32.mrf.mxu0 }
 0x440   : > { %v8835_v17 = vpop.f32.mrf.mxu2  ;;  %v8837_v0 = vpop.f32.mrf.mxu3  ;;  %v4318_v52 = vadd.f32 %v4004_v37, %v8625_v16  ;;  %v3604_v16 = vld [vmem:[%s8521_s26 + $0x218] sm:$0xff] }
 0x441   : > { %10758 = vst [vmem:[#allocation48_spill] sm:$0xff] %v8837_v0  ;;  %5936 = vmatmul.msk.f32.gmra.mxu2 %vm3647_vm6, %v3604_v16 }
 0x442   : > { %4330 = vst.msk [vmem:[%s8778_s28 + $0x28] sm:$0xff] %vm3647_vm6, %v4318_v52  ;;  %5890 = vmatmul.msk.f32.gmra.mxu0 %vm3647_vm6, %v3558_v11 }
 0x447   : > { %v4007_v54 = vpop.f32.mrf.mxu0 }
 0x448   : > { %v8846_v23 = vpop.f32.mrf.mxu2  ;;  %v8848_v5 = vpop.f32.mrf.mxu3  ;;  %v4319_v32 = vadd.f32 %v4007_v54, %v8645_v50  ;;  %v3560_v50 = vld [vmem:[%s8521_s26 + $0xb8] sm:$0xff] }
 0x449   : > { %10759 = vst [vmem:[#allocation49_spill] sm:$0xff] %v8848_v5  ;;  %5937 = vmatmul.msk.f32.gmra.mxu2 %vm3647_vm6, %v3605_v14 }
 0x44a   : > { %4331 = vst.msk [vmem:[%s8778_s28 + $0x30] sm:$0xff] %vm3647_vm6, %v4319_v32  ;;  %5891 = vmatmul.msk.f32.gmra.mxu0 %vm3647_vm6, %v3559_v59 }
 0x44f   : > { %v4010_v2 = vpop.f32.mrf.mxu0 }
 0x450   : > { %v8857_v41 = vpop.f32.mrf.mxu2  ;;  %v8859_v61 = vpop.f32.mrf.mxu3  ;;  %v4320_v43 = vadd.f32 %v4010_v2, %v8656_v34  ;;  %v3190_v2 = vld [vmem:[%s10753_s13 + $0x10] sm:$0xff] }
 0x451   : > { %10760 = vst [vmem:[#allocation50_spill] sm:$0xff] %v8859_v61  ;;  %5938 = vmatmul.msk.f32.gmra.mxu2 %vm3647_vm6, %v3606_v60  ;;  %3317 = vmatpush.msrb.mxu3 %v3190_v2  ;;  %v3563_v60 = vld [vmem:[%s8521_s26 + $0xd0] sm:$0xff] }
 0x452   : > { %4332 = vst.msk [vmem:[%s8778_s28 + $0x38] sm:$0xff] %vm3647_vm6, %v4320_v43  ;;  %5892 = vmatmul.msk.f32.gmra.mxu0 %vm3647_vm6, %v3560_v50 }
 0x457   : > { %v4013_v42 = vpop.f32.mrf.mxu0 }
 0x458   : > { %v8867_v58 = vpop.f32.mrf.mxu2  ;;  %v8869_v1 = vpop.f32.mrf.mxu3  ;;  %v4321_v22 = vadd.f32 %v4013_v42, %v8670_v46  ;;  %v2709_v46 = vmul.f32 %v8725_v7, %v8725_v7 }
 0x459   : > { %10761 = vst [vmem:[#allocation51_spill] sm:$0xff] %v8869_v1  ;;  %v2720_v34 = vmul.f32 %v8867_v58, %v8867_v58  ;;  %v2744_v31 = vmul.f32 %v8869_v1, %v8869_v1  ;;  %5939 = vmatmul.msk.f32.gmra.mxu2 %vm3647_vm6, %v3607_v40  ;;  %v3188_v40 = vld [vmem:[%s10753_s13] sm:$0xff] }
 0x45a   : > { %4333 = vst.msk [vmem:[%s8778_s28 + $0x40] sm:$0xff] %vm3647_vm6, %v4321_v22  ;;  %5893 = vmatmul.msk.f32.gmra.mxu0 %vm3647_vm6, %v3561_v18  ;;  %v3189_v18 = vld [vmem:[%s10753_s13 + $0x8] sm:$0xff] }
 0x45b   : > { %v2732_v30 = vadd.f32 %v2720_v34, %v2708_v4  ;;  %3318 = vmatpush.msrb.mxu3 %v3189_v18 }
 0x45d   : > { %v2756_v57 = vadd.f32 %v2744_v31, %v2732_v30  ;;  %3319 = vmatpush.msrb.mxu3 %v3188_v40 }
 0x45f   : > { %v2768_v38 = vadd.f32 1e-12, %v2756_v57  ;;  %v4016_v20 = vpop.f32.mrf.mxu0 }
 0x460   : > { %v8884_v8 = vpop.f32.mrf.mxu2  ;;  %v8886_v53 = vpop.f32.mrf.mxu3  ;;  %v4322_v49 = vadd.f32 %v4016_v20, %v8684_v19 }
 0x461   : > { %10762 = vst [vmem:[#allocation52_spill] sm:$0xff] %v8886_v53  ;;  %6562 = vrsqrt.f32 %v2768_v38  ;;  %v2721_v36 = vmul.f32 %v8884_v8, %v8884_v8  ;;  %v2745_v9 = vmul.f32 %v8886_v53, %v8886_v53  ;;  %vm2787_vm7 = vcmp.eq.f32.partialorder %v2768_v38, inf }
 0x462   : > { %4334 = vst.msk [vmem:[%s8778_s28 + $0x48] sm:$0xff] %vm3647_vm6, %v4322_v49  ;;  %5894 = vmatmul.msk.f32.gmra.mxu0 %vm3647_vm6, %v3562_v48  ;;  %v2790_v30 = vand.u32 2147483648, %v2768_v38  ;;  %vm2789_vm8 = vcmp.eq.f32.partialorder %v2768_v38, 0.0 }
 0x463   : > { %v2733_v21 = vadd.f32 %v2721_v36, %v2709_v46 }
 0x465   : > { %v2757_v44 = vadd.f32 %v2745_v9, %v2733_v21  ;;  %v3608_v9 = vld [vmem:[%s8521_s26 + $0x238] sm:$0xff] }
 0x466   : > { %5940 = vmatmul.msk.f32.gmra.mxu2 %vm3647_vm6, %v3608_v9 }
 0x467   : > { %v6563_v25 = vpop.eup %6562  ;;  %v8898_v26 = vadd.f32 1e-12, %v2757_v44  ;;  %v4019_v63 = vpop.f32.mrf.mxu0 }
 0x468   : > { %v2781_v3 = vmul.f32 %v6563_v25, %v2768_v38  ;;  %v8900_v27 = vpop.f32.mrf.mxu2  ;;  %v8902_v47 = vpop.f32.mrf.mxu3  ;;  %v4323_v32 = vadd.f32 %v4019_v63, %v8701_v55  ;;  %v2711_v55 = vmul.f32 %v8751_v33, %v8751_v33 }
 0x469   : > { %10763 = vst [vmem:[#allocation53_spill] sm:$0xff] %v8902_v47  ;;  %v2722_v62 = vmul.f32 %v8900_v27, %v8900_v27  ;;  %6564 = vrsqrt.f32 %v8898_v26  ;;  %v2746_v15 = vmul.f32 %v8902_v47, %v8902_v47  ;;  %vm2799_vm9 = vcmp.eq.f32.partialorder %v8898_v26, inf  ;;  %v9124_v47 = vld [vmem:[%s8521_s26 + $0x138] sm:$0xff] }
 0x46a   : > { %v2782_v19 = vmul.f32 %v6563_v25, %v2781_v3  ;;  %4335 = vst.msk [vmem:[%s8778_s28 + $0x50] sm:$0xff] %vm3647_vm6, %v4323_v32  ;;  %5895 = vmatmul.msk.f32.gmra.mxu0 %vm3647_vm6, %v3563_v60  ;;  %v2802_v32 = vand.u32 2147483648, %v8898_v26  ;;  %vm2801_vm10 = vcmp.eq.f32.partialorder %v8898_v26, 0.0 }
 0x46b   : > { %v2734_v56 = vadd.f32 %v2722_v62, %v2710_v12  ;;  %v2712_v12 = vmul.f32 %v8766_v13, %v8766_v13 }
 0x46c   : > { %v2783_v37 = vmul.f32 0.5, %v2782_v19 }
 0x46d   : > { %v2758_v52 = vadd.f32 %v2746_v15, %v2734_v56 }
 0x46e   : > { %v2784_v11 = vsub.f32 1.5, %v2783_v37 }
 0x46f   : > { %v8915_v54 = vadd.f32 1e-12, %v2758_v52  ;;  %v6565_v59 = vpop.eup %6564  ;;  %v4022_v15 = vpop.f32.mrf.mxu0 }
 0x470   : > { %v2785_v16 = vmul.f32 %v6563_v25, %v2784_v11  ;;  %v8921_v43 = vpop.f32.mrf.mxu2  ;;  %v8923_v50 = vpop.f32.mrf.mxu3  ;;  %v2793_v14 = vmul.f32 %v6565_v59, %v8898_v26  ;;  %v4324_v63 = vadd.f32 %v4022_v15, %v8715_v29  ;;  %v8970_v29 = vld [vmem:[%s8521_s26 + $0x240] sm:$0xff] }
 0x471   : > { %10764 = vst [vmem:[#allocation54_spill] sm:$0xff] %v8923_v50  ;;  %6566 = vrsqrt.f32 %v8915_v54  ;;  %v2723_v34 = vmul.f32 %v8921_v43, %v8921_v43  ;;  %v2747_v57 = vmul.f32 %v8923_v50, %v8923_v50  ;;  %5941 = vmatmul.msk.f32.gmra.mxu2 %vm3647_vm6, %v8970_v29  ;;  %vm2811_vm11 = vcmp.eq.f32.partialorder %v8915_v54, inf }
 0x472   : > { %v2786_v4 = vmul.f32 %v2785_v16, %v2768_v38  ;;  %v2794_v31 = vmul.f32 %v6565_v59, %v2793_v14  ;;  %v3564_v16 = vld [vmem:[%s8521_s26 + $0xd8] sm:$0xff]  ;;  %4336 = vst.msk [vmem:[%s8778_s28 + $0x58] sm:$0xff] %vm3647_vm6, %v4324_v63  ;;  %v2814_v9 = vand.u32 2147483648, %v8915_v54  ;;  %vm2813_vm12 = vcmp.eq.f32.partialorder %v8915_v54, 0.0 }
 0x473   : > { %v2735_v22 = vadd.f32 %v2723_v34, %v2711_v55  ;;  %5896 = vmatmul.msk.f32.gmra.mxu0 %vm3647_vm6, %v3564_v16 }
 0x474   : > { %v2788_v42 = vsel %vm2787_vm7, %v2768_v38, %v2786_v4  ;;  %v2795_v36 = vmul.f32 0.5, %v2794_v31 }
 0x475   : > { %v2791_v46 = vsel %vm2789_vm8, %v2790_v30, %v2788_v42  ;;  %v2759_v21 = vadd.f32 %v2747_v57, %v2735_v22 }
 0x476   : > { %v5821_v20 = vmul.f32 -1.442695, %v2791_v46  ;;  %v2796_v44 = vsub.f32 1.5, %v2795_v36  ;;  %v8986_v36 = vld [vmem:[%s8521_s26 + $0x120] sm:$0xff] }
 0x477   : > { %v6567_v49 = vpop.eup %6566  ;;  %v8943_v25 = vadd.f32 1e-12, %v2759_v21  ;;  %v2713_v21 = vmul.f32 %v8785_v28, %v8785_v28 }
 0x478   : > { %6568 = vpow2.f32 %v5821_v20  ;;  %v2805_v38 = vmul.f32 %v6567_v49, %v8915_v54  ;;  %v8945_v3 = vpop.f32.mrf.mxu2  ;;  %v8947_v48 = vpop.f32.mrf.mxu3  ;;  %v2797_v62 = vmul.f32 %v6565_v59, %v2796_v44 }
 0x479   : > { %10765 = vst [vmem:[#allocation55_spill] sm:$0xff] %v8947_v48  ;;  %v2724_v19 = vmul.f32 %v8945_v3, %v8945_v3  ;;  %6570 = vrsqrt.f32 %v8943_v25  ;;  %v2748_v11 = vmul.f32 %v8947_v48, %v8947_v48  ;;  %v4025_v20 = vpop.f32.mrf.mxu0  ;;  %vm2823_vm13 = vcmp.eq.f32.partialorder %v8943_v25, inf }
 0x47a   : > { %v2806_v56 = vmul.f32 %v6567_v49, %v2805_v38  ;;  %v2798_v37 = vmul.f32 %v2797_v62, %v8898_v26  ;;  %v2715_v62 = vmul.f32 %v8812_v35, %v8812_v35  ;;  %vm2825_vm2 = vcmp.eq.f32.partialorder %v8943_v25, 0.0 }
 0x47b   : > { %v2736_v52 = vadd.f32 %v2724_v19, %v2712_v12  ;;  %v3565_v12 = vld [vmem:[%s8521_s26 + $0xe0] sm:$0xff]  ;;  %v2727_v19 = vmul.f32 %v8808_v10, %v8808_v10 }
 0x47c   : > { %v2807_v59 = vmul.f32 0.5, %v2806_v56  ;;  %v2800_v2 = vsel %vm2799_vm9, %v8898_v26, %v2798_v37  ;;  %v4387_v56 = vadd.f32 %v4025_v20, %v8986_v36  ;;  %5897 = vmatmul.msk.f32.gmra.mxu0 %vm3647_vm6, %v3565_v12 }
 0x47d   : > { %v2760_v14 = vadd.f32 %v2748_v11, %v2736_v52  ;;  %v2803_v4 = vsel %vm2801_vm10, %v2802_v32, %v2800_v2 }
 0x47e   : > { %v6569_v55 = vpop.eup %6568  ;;  %v2808_v34 = vsub.f32 1.5, %v2807_v59  ;;  %v5822_v31 = vmul.f32 -1.442695, %v2803_v4  ;;  %6001 = vst.msk [vmem:[%s8778_s28 + $0x120] sm:$0xff] %vm3647_vm6, %v4387_v56  ;;  %v2714_v59 = vmul.f32 %v8798_v24, %v8798_v24  ;;  %v2826_v56 = vand.u32 2147483648, %v8943_v25 }
 0x47f   : > { %v8972_v30 = vadd.f32 1.0, %v6569_v55  ;;  %v8974_v42 = vadd.f32 1e-12, %v2760_v14  ;;  %v6571_v26 = vpop.eup %6570 }
 0x480   : > { %v2809_v22 = vmul.f32 %v6567_v49, %v2808_v34  ;;  %v8978_v57 = vpop.f32.mrf.mxu2  ;;  %v8980_v18 = vpop.f32.mrf.mxu3  ;;  %v2817_v46 = vmul.f32 %v6571_v26, %v8943_v25  ;;  %v9020_v34 = vadd.f32 %v2727_v19, %v2715_v62 }
 0x481   : > { %10766 = vst [vmem:[#allocation56_spill] sm:$0xff] %v8980_v18  ;;  %6572 = vrcp.f32 %v8972_v30  ;;  %v2725_v38 = vmul.f32 %v8978_v57, %v8978_v57  ;;  %v2749_v63 = vmul.f32 %v8980_v18, %v8980_v18  ;;  %vm2977_vm15 = vweird.f32 %v8972_v30 }
 0x482   : > { %6574 = vpow2.f32 %v5822_v31  ;;  %v2810_v60 = vmul.f32 %v2809_v22, %v8915_v54  ;;  %v2818_v44 = vmul.f32 %v6571_v26, %v2817_v46  ;;  %v2981_v46 = vand.u32 2147483647, %v8972_v30 }
 0x483   : > { %6576 = vrsqrt.f32 %v8974_v42  ;;  %v2737_v52 = vadd.f32 %v2725_v38, %v2713_v21  ;;  %vm2835_vm5 = vcmp.eq.f32.partialorder %v8974_v42, inf  ;;  %vm2837_vm9 = vcmp.eq.f32.partialorder %v8974_v42, 0.0 }
 0x484   : > { %v2812_v49 = vsel %vm2811_vm11, %v8915_v54, %v2810_v60  ;;  %v2819_v37 = vmul.f32 0.5, %v2818_v44  ;;  %v9005_v54 = vld [vmem:[%s8521_s26 + $0x248] sm:$0xff]  ;;  %v2983_v44 = vand.u32 2147483648, %v8972_v30  ;;  %vm2982_vm4 = vcmp.eq.f32.partialorder %v2981_v46, 8.507059e+37 }
 0x485   : > { %v2815_v40 = vsel %vm2813_vm12, %v2814_v9, %v2812_v49  ;;  %5942 = vmatmul.msk.f32.gmra.mxu2 %vm3647_vm6, %v9005_v54  ;;  %v2761_v22 = vadd.f32 %v2749_v63, %v2737_v52  ;;  %v9028_v9 = vld [vmem:[%s8521_s26 + $0x128] sm:$0xff]  ;;  %v4028_v49 = vpop.f32.mrf.mxu0  ;;  %v2716_v46 = vmul.f32 %v8824_v51, %v8824_v51 }
 0x486   : > { %v5823_v15 = vmul.f32 -1.442695, %v2815_v40  ;;  %v2820_v2 = vsub.f32 1.5, %v2819_v37 }
 0x487   : > { %v6573_v11 = vpop.eup %6572  ;;  %v9035_v40 = vadd.f32 1e-12, %v2761_v22 }
 0x488   : > { %v6575_v32 = vpop.eup %6574  ;;  %v2973_v16 = vmul.f32 %v6573_v11, %v8972_v30  ;;  %6578 = vpow2.f32 %v5823_v15  ;;  %v9016_v14 = vpop.f32.mrf.mxu2  ;;  %v2821_v20 = vmul.f32 %v6571_v26, %v2820_v2  ;;  %vm2978_vm14 = vweird.f32 %v6573_v11  ;;  %v3566_v26 = vld [vmem:[%s8521_s26 + $0xe8] sm:$0xff] }
 0x489   : > { %10767 = vst [vmem:[#allocation57_spill] sm:$0xff] %v9016_v14  ;;  %v9018_v55 = vpop.f32.mrf.mxu3  ;;  %v6577_v4 = vpop.eup %6576  ;;  %v9022_v31 = vadd.f32 1.0, %v6575_v32  ;;  %v2726_v38 = vmul.f32 %v9016_v14, %v9016_v14  ;;  %v4388_v15 = vadd.f32 %v4028_v49, %v9028_v9  ;;  %5898 = vmatmul.msk.f32.gmra.mxu0 %vm3647_vm6, %v3566_v26  ;;  %vm9051_vm3 = vmor %vm2977_vm15, %vm2978_vm14  ;;  %v2984_v2 = vor.u32 1.1754944e-38, %v2983_v44 }
 0x48a   : > { %10768 = vst [vmem:[#allocation58_spill] sm:$0xff] %v9018_v55  ;;  %v2974_v60 = vsub.f32 1.0, %v2973_v16  ;;  %v2829_v21 = vmul.f32 %v6577_v4, %v8974_v42  ;;  %v2822_v62 = vmul.f32 %v2821_v20, %v8943_v25  ;;  %v9048_v16 = vld [vmem:[%s8521_s26 + $0x250] sm:$0xff]  ;;  %v2728_v44 = vmul.f32 %v8826_v39, %v8826_v39 }
 0x48b   : > { %6580 = vrcp.f32 %v9022_v31  ;;  %6002 = vst.msk [vmem:[%s8778_s28 + $0x128] sm:$0xff] %vm3647_vm6, %v4388_v15  ;;  %v2738_v49 = vadd.f32 %v2726_v38, %v2714_v59  ;;  %v2717_v26 = vmul.f32 %v8835_v17, %v8835_v17  ;;  %v2750_v38 = vmul.f32 %v9018_v55, %v9018_v55 }
 0x48c   : > { %v2975_v12 = vmul.f32 %v6573_v11, %v2974_v60  ;;  %v2830_v19 = vmul.f32 %v6577_v4, %v2829_v21  ;;  %v2824_v63 = vsel %vm2823_vm13, %v8943_v25, %v2822_v62  ;;  %6582 = vrsqrt.f32 %v9035_v40 }
 0x48d   : > { %v2827_v60 = vsel %vm2825_vm2, %v2826_v56, %v2824_v63  ;;  %5943 = vmatmul.msk.f32.gmra.mxu2 %vm3647_vm6, %v9048_v16  ;;  %v9080_v56 = vld [vmem:[%s8521_s26 + $0x130] sm:$0xff]  ;;  %v4031_v15 = vpop.f32.mrf.mxu0  ;;  %v2762_v30 = vadd.f32 %v2750_v38, %v2738_v49  ;;  %v2838_v55 = vand.u32 2147483648, %v8974_v42  ;;  %v2996_v49 = vand.u32 2147483647, %v9022_v31 }
 0x48e   : > { %v6579_v37 = vpop.eup %6578  ;;  %v2976_v52 = vadd.f32 %v6573_v11, %v2975_v12  ;;  %v2831_v32 = vmul.f32 0.5, %v2830_v19  ;;  %v5824_v20 = vmul.f32 -1.442695, %v2827_v60  ;;  %v3567_v60 = vld [vmem:[%s8521_s26 + $0xf0] sm:$0xff]  ;;  %vm2992_vm8 = vweird.f32 %v9022_v31 }
 0x48f   : > { %v9055_v22 = vadd.f32 1.0, %v6579_v37  ;;  %v2729_v37 = vmul.f32 %v8837_v0, %v8837_v0  ;;  %vm2997_vm11 = vcmp.eq.f32.partialorder %v2996_v49, 8.507059e+37  ;;  %vm2847_vm13 = vcmp.eq.f32.partialorder %v9035_v40, inf }
 0x490   : > { %v2980_v25 = vsel %vm9051_vm3, %v6573_v11, %v2976_v52  ;;  %v2832_v21 = vsub.f32 1.5, %v2831_v32  ;;  %vm2849_vm2 = vcmp.eq.f32.partialorder %v9035_v40, 0.0 }
 0x491   : > { %v9063_v12 = vpop.f32.mrf.mxu3  ;;  %v6581_v62 = vpop.eup %6580  ;;  %v9069_v19 = vsel %vm2982_vm4, %v2984_v2, %v2980_v25  ;;  %6584 = vrcp.f32 %v9055_v22  ;;  %v4389_v2 = vadd.f32 %v4031_v15, %v9080_v56  ;;  %5899 = vmatmul.msk.f32.gmra.mxu0 %vm3647_vm6, %v3567_v60  ;;  %vm3007_vm14 = vweird.f32 %v9055_v22 }
 0x492   : > { %10771 = vst [vmem:[#allocation59_spill] sm:$0xff] %v9063_v12  ;;  %v3152_v11 = vmul.f32 %v9069_v19, %v8712_v45  ;;  %v2988_v59 = vmul.f32 %v6581_v62, %v9022_v31  ;;  %6586 = vpow2.f32 %v5824_v20  ;;  %v2833_v52 = vmul.f32 %v6577_v4, %v2832_v21  ;;  %v6583_v63 = vpop.eup %6582 }
 0x493   : > { %v2998_v45 = vand.u32 2147483648, %v9022_v31  ;;  %v2841_v4 = vmul.f32 %v6583_v63, %v9035_v40  ;;  %v2751_v20 = vmul.f32 %v9063_v12, %v9063_v12  ;;  %vm2993_vm7 = vweird.f32 %v6581_v62  ;;  %6003 = vst.msk [vmem:[%s8778_s28 + $0x130] sm:$0xff] %vm3647_vm6, %v4389_v2 }
 0x494   : > { %v2989_v32 = vsub.f32 1.0, %v2988_v59  ;;  %5833 = vmatmul.msk.f32.vlgmr.msrb.gmra.mxu3 %vm1334_vm1, %v3152_v11  ;;  %v2834_v25 = vmul.f32 %v2833_v52, %v8974_v42  ;;  %v9096_v59 = vadd.f32 1e-12, %v2762_v30  ;;  %v9101_v11 = vld [vmem:[%s8521_s26 + $0x258] sm:$0xff]  ;;  %vm2994_vm10 = vmor %vm2992_vm8, %vm2993_vm7 }
 0x495   : > { %v2842_v52 = vmul.f32 %v6583_v63, %v2841_v4  ;;  %5944 = vmatmul.msk.f32.gmra.mxu2 %vm3647_vm6, %v9101_v11  ;;  %v2999_v30 = vor.u32 1.1754944e-38, %v2998_v45  ;;  %v4034_v48 = vpop.f32.mrf.mxu0 }
 0x496   : > { %v2990_v21 = vmul.f32 %v6581_v62, %v2989_v32  ;;  %v2836_v15 = vsel %vm2835_vm5, %v8974_v42, %v2834_v25  ;;  %6588 = vrsqrt.f32 %v9096_v59  ;;  %v2763_v42 = vadd.f32 %v2751_v20, %v9020_v34 }
 0x497   : > { %v9103_v38 = vpop.eup %6584  ;;  %v2839_v60 = vsel %vm2837_vm9, %v2838_v55, %v2836_v15  ;;  %v2843_v25 = vmul.f32 0.5, %v2842_v52  ;;  %v2740_v55 = vadd.f32 %v2728_v44, %v2716_v46  ;;  %v9126_v52 = vadd.f32 %v2729_v37, %v2717_v26 }
 0x498   : > { %v2991_v32 = vadd.f32 %v6581_v62, %v2990_v21  ;;  %v3003_v2 = vmul.f32 %v9103_v38, %v9055_v22  ;;  %v6587_v31 = vpop.eup %6586  ;;  %v5825_v18 = vmul.f32 -1.442695, %v2839_v60  ;;  %v2718_v60 = vmul.f32 %v8846_v23, %v8846_v23 }
 0x499   : > { %v9114_v12 = vpop.f32.mrf.mxu3  ;;  %v9119_v21 = vadd.f32 1.0, %v6587_v31  ;;  %v2844_v50 = vsub.f32 1.5, %v2843_v25  ;;  %v2730_v46 = vmul.f32 %v8848_v5, %v8848_v5  ;;  %vm3008_vm12 = vweird.f32 %v9103_v38 }
 0x49a   : > { %10772 = vst [vmem:[#allocation60_spill] sm:$0xff] %v9114_v12  ;;  %v2995_v4 = vsel %vm2994_vm10, %v6581_v62, %v2991_v32  ;;  %v3004_v45 = vsub.f32 1.0, %v3003_v2  ;;  %6590 = vpow2.f32 %v5825_v18  ;;  %v3568_v62 = vld [vmem:[%s8521_s26 + $0xf8] sm:$0xff]  ;;  %v9136_v44 = vadd.f32 1e-12, %v2763_v42  ;;  %v9146_v32 = vld [vmem:[%s8521_s26 + $0x260] sm:$0xff]  ;;  %vm9167_vm15 = vmor %vm3007_vm14, %vm3008_vm12 }
 0x49b   : > { %v9121_v15 = vsel %vm2997_vm11, %v2999_v30, %v2995_v4  ;;  %6592 = vrcp.f32 %v9119_v21  ;;  %v2845_v18 = vmul.f32 %v6583_v63, %v2844_v50  ;;  %5900 = vmatmul.msk.f32.gmra.mxu0 %vm3647_vm6, %v3568_v62  ;;  %v2752_v37 = vmul.f32 %v9114_v12, %v9114_v12 }
 0x49c   : > { %v3005_v34 = vmul.f32 %v9103_v38, %v3004_v45  ;;  %v3153_v20 = vmul.f32 %v9121_v15, %v8725_v7  ;;  %v4390_v49 = vadd.f32 %v4034_v48, %v9124_v47  ;;  %v6589_v30 = vpop.eup %6588  ;;  %v3013_v50 = vand.u32 2147483648, %v9055_v22 }
 0x49d   : > { %v2846_v63 = vmul.f32 %v2845_v18, %v9035_v40  ;;  %6594 = vrsqrt.f32 %v9136_v44  ;;  %5945 = vmatmul.msk.f32.gmra.mxu2 %vm3647_vm6, %v9146_v32  ;;  %v3011_v7 = vand.u32 2147483647, %v9055_v22  ;;  %v2850_v48 = vand.u32 2147483648, %v9035_v40 }
 0x49e   : > { %v3006_v26 = vadd.f32 %v9103_v38, %v3005_v34  ;;  %v2853_v2 = vmul.f32 %v6589_v30, %v9096_v59  ;;  %5834 = vmatmul.msk.f32.gmra.mxu3 %vm1334_vm1, %v3153_v20  ;;  %6004 = vst.msk [vmem:[%s8778_s28 + $0x138] sm:$0xff] %vm3647_vm6, %v4390_v49  ;;  %v9163_v42 = vadd.f32 %v2730_v46, %v2718_v60  ;;  %v4037_v20 = vpop.f32.mrf.mxu0  ;;  %v3014_v49 = vor.u32 1.1754944e-38, %v3013_v50 }
 0x49f   : > { %v2848_v22 = vsel %vm2847_vm13, %v9035_v40, %v2846_v63  ;;  %v2764_v45 = vadd.f32 %v2752_v37, %v2740_v55  ;;  %v9186_v55 = vmul.f32 %v8857_v41, %v8857_v41  ;;  %vm3012_vm3 = vcmp.eq.f32.partialorder %v3011_v7, 8.507059e+37 }
 0x4a0   : > { %v6591_v25 = vpop.eup %6590  ;;  %v3010_v62 = vsel %vm9167_vm15, %v9103_v38, %v3006_v26  ;;  %v2851_v46 = vsel %vm2849_vm2, %v2850_v48, %v2848_v22  ;;  %v2854_v18 = vmul.f32 %v6589_v30, %v2853_v2  ;;  %v9190_v38 = vmul.f32 %v8859_v61, %v8859_v61  ;;  %v9194_v26 = vld [vmem:[%s8521_s26 + $0x100] sm:$0xff]  ;;  %v9208_v22 = vld [vmem:[%s8521_s26 + $0x268] sm:$0xff] }
 0x4a1   : > { %v9159_v31 = vpop.f32.mrf.mxu3  ;;  %v9173_v34 = vpop.eup %6592  ;;  %v9178_v60 = vadd.f32 1.0, %v6591_v25  ;;  %v5826_v12 = vmul.f32 -1.442695, %v2851_v46  ;;  %v9182_v40 = vadd.f32 1e-12, %v2764_v45  ;;  %10776 = vst [vmem:[#allocation62_spill] sm:$0xff] %v9194_v26  ;;  %v9196_v50 = vsel %vm3012_vm3, %v3014_v49, %v3010_v62 }
 0x4a2   : > { %10773 = vst [vmem:[#allocation61_spill] sm:$0xff] %v9159_v31  ;;  %v3018_v63 = vmul.f32 %v9173_v34, %v9119_v21  ;;  %v2855_v2 = vmul.f32 0.5, %v2854_v18  ;;  %v9199_v25 = vld [vmem:[%s8521_s26 + $0x140] sm:$0xff]  ;;  %v3026_v4 = vand.u32 2147483647, %v9119_v21  ;;  %vm2859_vm4 = vcmp.eq.f32.partialorder %v9096_v59, inf }
 0x4a3   : > { %6596 = vrcp.f32 %v9178_v60  ;;  %v6595_v37 = vpop.eup %6594  ;;  %5901 = vmatmul.msk.f32.gmra.mxu0 %vm3647_vm6, %v9194_v26  ;;  %vm2861_vm5 = vcmp.eq.f32.partialorder %v9096_v59, 0.0  ;;  %v2753_v18 = vmul.f32 %v9159_v31, %v9159_v31  ;;  %v3154_v49 = vmul.f32 %v9196_v50, %v8738_v6 }
 0x4a4   : > { %v3019_v48 = vsub.f32 1.0, %v3018_v63  ;;  %6598 = vpow2.f32 %v5826_v12  ;;  %v2865_v7 = vmul.f32 %v6595_v37, %v9136_v44  ;;  %v3028_v12 = vand.u32 2147483648, %v9119_v21 }
 0x4a5   : > { %6600 = vrsqrt.f32 %v9182_v40  ;;  %v2856_v62 = vsub.f32 1.5, %v2855_v2  ;;  %5946 = vmatmul.msk.f32.gmra.mxu2 %vm3647_vm6, %v9208_v22  ;;  %vm3023_vm7 = vweird.f32 %v9173_v34  ;;  %v2862_v1 = vand.u32 2147483648, %v9096_v59 }
 0x4a6   : > { %v3020_v45 = vmul.f32 %v9173_v34, %v3019_v48  ;;  %v2866_v46 = vmul.f32 %v6595_v37, %v2865_v7  ;;  %v4391_v48 = vadd.f32 %v4037_v20, %v9199_v25  ;;  %vm3022_vm8 = vweird.f32 %v9119_v21  ;;  %5835 = vmatmul.msk.f32.gmra.mxu3 %vm1334_vm1, %v3154_v49  ;;  %v9236_v20 = vpop.f32.mrf.mxu0  ;;  %v9254_v49 = vld [vmem:[%s8521_s26 + $0x108] sm:$0xff] }
 0x4a7   : > { %v2857_v2 = vmul.f32 %v6589_v30, %v2856_v62  ;;  %vm9228_vm9 = vcmp.eq.f32.partialorder %v3026_v4, 8.507059e+37  ;;  %v2765_v31 = vadd.f32 %v2753_v18, %v9126_v52  ;;  %vm2871_vm10 = vcmp.eq.f32.partialorder %v9136_v44, inf  ;;  %vm9244_vm11 = vmor %vm3022_vm8, %vm3023_vm7  ;;  %10782 = vst [vmem:[#allocation64_spill] sm:$0xff] %v9254_v49 }
 0x4a8   : > { %v3021_v53 = vadd.f32 %v9173_v34, %v3020_v45  ;;  %v2867_v6 = vmul.f32 0.5, %v2866_v46  ;;  %6005 = vst.msk [vmem:[%s8778_s28 + $0x140] sm:$0xff] %vm3647_vm6, %v4391_v48  ;;  %v3029_v45 = vor.u32 1.1754944e-38, %v3028_v12  ;;  %vm2873_vm12 = vcmp.eq.f32.partialorder %v9136_v44, 0.0 }
 0x4a9   : > { %v9219_v63 = vpop.f32.mrf.mxu3  ;;  %v9225_v61 = vpop.eup %6596  ;;  %v2858_v21 = vmul.f32 %v2857_v2, %v9096_v59  ;;  %v9251_v12 = vadd.f32 1e-12, %v2765_v31  ;;  %v3043_v31 = vand.u32 2147483648, %v9178_v60  ;;  %vm3037_vm14 = vweird.f32 %v9178_v60 }
 0x4aa   : > { %10777 = vst [vmem:[#allocation63_spill] sm:$0xff] %v9219_v63  ;;  %v6599_v30 = vpop.eup %6598  ;;  %v3033_v62 = vmul.f32 %v9225_v61, %v9178_v60  ;;  %v2868_v18 = vsub.f32 1.5, %v2867_v6  ;;  %v3025_v48 = vsel %vm9244_vm11, %v9173_v34, %v3021_v53  ;;  %vm3038_vm13 = vweird.f32 %v9225_v61  ;;  %v9271_v53 = vld [vmem:[%s8521_s26 + $0x270] sm:$0xff] }
 0x4ab   : > { %v6601_v4 = vpop.eup %6600  ;;  %v9248_v46 = vadd.f32 1.0, %v6599_v30  ;;  %v2860_v5 = vsel %vm2859_vm4, %v9096_v59, %v2858_v21  ;;  %5902 = vmatmul.msk.f32.gmra.mxu0 %vm3647_vm6, %v9254_v49  ;;  %v2754_v6 = vmul.f32 %v9219_v63, %v9219_v63  ;;  %v9280_v52 = vsel %vm9228_vm9, %v3029_v45, %v3025_v48  ;;  %vm9291_vm15 = vmor %vm3037_vm14, %vm3038_vm13 }
 0x4ac   : > { %v3034_v2 = vsub.f32 1.0, %v3033_v62  ;;  %v2877_v26 = vmul.f32 %v6601_v4, %v9182_v40  ;;  %v2863_v30 = vsel %vm2861_vm5, %v2862_v1, %v2860_v5  ;;  %v2869_v62 = vmul.f32 %v6595_v37, %v2868_v18 }
 0x4ad   : > { %6602 = vrcp.f32 %v9248_v46  ;;  %5947 = vmatmul.msk.f32.gmra.mxu2 %vm3647_vm6, %v9271_v53  ;;  %v3041_v49 = vand.u32 2147483647, %v9178_v60  ;;  %v5827_v0 = vmul.f32 -1.442695, %v2863_v30  ;;  %v3044_v37 = vor.u32 1.1754944e-38, %v3043_v31 }
 0x4ae   : > { %v3035_v34 = vmul.f32 %v9225_v61, %v3034_v2  ;;  %v2878_v21 = vmul.f32 %v6601_v4, %v2877_v26  ;;  %6604 = vrsqrt.f32 %v9251_v12  ;;  %v2870_v5 = vmul.f32 %v2869_v62, %v9136_v44  ;;  %v4043_v18 = vpop.f32.mrf.mxu0 }
 0x4af   : > { %6606 = vpow2.f32 %v5827_v0  ;;  %v2874_v7 = vand.u32 2147483648, %v9136_v44  ;;  %v2766_v45 = vadd.f32 %v2754_v6, %v9163_v42  ;;  %vm3042_vm2 = vcmp.eq.f32.partialorder %v3041_v49, 8.507059e+37 }
 0x4b0   : > { %v3036_v63 = vadd.f32 %v9225_v61, %v3035_v34  ;;  %v2879_v1 = vmul.f32 0.5, %v2878_v21  ;;  %v2872_v48 = vsel %vm2871_vm10, %v9136_v44, %v2870_v5  ;;  %v3155_v34 = vmul.f32 %v9280_v52, %v8751_v33  ;;  %v9324_v44 = vld [vmem:[%s8521_s26 + $0x148] sm:$0xff] }
 0x4b1   : > { %v9287_v59 = vpop.f32.mrf.mxu3  ;;  %v2875_v0 = vsel %vm2873_vm12, %v2874_v7, %v2872_v48  ;;  %v9309_v42 = vadd.f32 1e-12, %v2766_v45  ;;  %v2743_v6 = vadd.f32 %v9190_v38, %v9186_v55  ;;  %vm2883_vm3 = vcmp.eq.f32.partialorder %v9182_v40, inf  ;;  %v9332_v55 = vld [vmem:[%s8521_s26 + $0x150] sm:$0xff]  ;;  %v9335_v38 = vld [vmem:[%s8521_s26 + $0x278] sm:$0xff] }
 0x4b2   : > { %10783 = vst [vmem:[#allocation65_spill] sm:$0xff] %v9287_v59  ;;  %v3040_v60 = vsel %vm9291_vm15, %v9225_v61, %v3036_v63  ;;  %v2880_v2 = vsub.f32 1.5, %v2879_v1  ;;  %v2755_v61 = vmul.f32 %v9287_v59, %v9287_v59  ;;  %v9314_v63 = vld [vmem:[%s8521_s26 + $0x110] sm:$0xff]  ;;  %v5828_v49 = vmul.f32 -1.442695, %v2875_v0  ;;  %5836 = vmatmul.msk.f32.gmra.mxu3 %vm1334_vm1, %v3155_v34 }
 0x4b3   : > { %v9305_v31 = vpop.eup %6602  ;;  %10786 = vst [vmem:[#allocation66_spill] sm:$0xff] %v9314_v63  ;;  %v9318_v30 = vsel %vm3042_vm2, %v3044_v37, %v3040_v60  ;;  %5903 = vmatmul.msk.f32.gmra.mxu0 %vm3647_vm6, %v9314_v63  ;;  %vm2885_vm4 = vcmp.eq.f32.partialorder %v9182_v40, 0.0  ;;  %6608 = vrsqrt.f32 %v9309_v42  ;;  %v4392_v45 = vadd.f32 %v9236_v20, %v9324_v44 }
 0x4b4   : > { %v3048_v33 = vmul.f32 %v9305_v31, %v9248_v46  ;;  %v6605_v62 = vpop.eup %6604  ;;  %v2881_v21 = vmul.f32 %v6601_v4, %v2880_v2  ;;  %vm3053_vm5 = vweird.f32 %v9305_v31  ;;  %6610 = vpow2.f32 %v5828_v49 }
 0x4b5   : > { %v2889_v1 = vmul.f32 %v6605_v62, %v9251_v12  ;;  %5948 = vmatmul.msk.f32.gmra.mxu2 %vm3647_vm6, %v9335_v38  ;;  %v6607_v4 = vpop.eup %6606  ;;  %v2767_v37 = vadd.f32 %v2755_v61, %v2743_v6  ;;  %v3156_v7 = vmul.f32 %v9318_v30, %v8766_v13  ;;  %v4393_v34 = vadd.f32 %v4043_v18, %v9332_v55 }
 0x4b6   : > { %v3049_v5 = vsub.f32 1.0, %v3048_v33  ;;  %v2882_v26 = vmul.f32 %v2881_v21, %v9182_v40  ;;  %v9347_v48 = vadd.f32 1.0, %v6607_v4  ;;  %v3058_v0 = vand.u32 2147483648, %v9248_v46  ;;  %6006 = vst.msk [vmem:[%s8778_s28 + $0x148] sm:$0xff] %vm3647_vm6, %v4392_v45  ;;  %v4046_v20 = vpop.f32.mrf.mxu0  ;;  %v9375_v4 = vld [vmem:[%s8521_s26 + $0x118] sm:$0xff] }
 0x4b7   : > { %v2890_v2 = vmul.f32 %v6605_v62, %v2889_v1  ;;  %v2886_v13 = vand.u32 2147483648, %v9182_v40  ;;  %v9355_v6 = vadd.f32 1e-12, %v2767_v37  ;;  %vm3052_vm7 = vweird.f32 %v9248_v46  ;;  %6007 = vst.msk [vmem:[%s8778_s28 + $0x150] sm:$0xff] %vm3647_vm6, %v4393_v34  ;;  %v9387_v34 = vld [vmem:[%s8521_s26 + $0x280] sm:$0xff] }
 0x4b8   : > { %v3050_v60 = vmul.f32 %v9305_v31, %v3049_v5  ;;  %v2884_v61 = vsel %vm2883_vm3, %v9182_v40, %v2882_v26  ;;  %v3056_v18 = vand.u32 2147483647, %v9248_v46  ;;  %6612 = vrcp.f32 %v9347_v48  ;;  %vm9367_vm8 = vmor %vm3052_vm7, %vm3053_vm5  ;;  %10789 = vst [vmem:[#allocation67_spill] sm:$0xff] %v9375_v4 }
 0x4b9   : > { %v6609_v49 = vpop.eup %6608  ;;  %v2887_v5 = vsel %vm2885_vm4, %v2886_v13, %v2884_v61  ;;  %v2891_v1 = vmul.f32 0.5, %v2890_v2  ;;  %6614 = vrsqrt.f32 %v9355_v6  ;;  %v3059_v40 = vor.u32 1.1754944e-38, %v3058_v0 }
 0x4ba   : > { %v3051_v33 = vadd.f32 %v9305_v31, %v3050_v60  ;;  %v6611_v46 = vpop.eup %6610  ;;  %v5829_v37 = vmul.f32 -1.442695, %v2887_v5  ;;  %v2901_v45 = vmul.f32 %v6609_v49, %v9309_v42  ;;  %5837 = vmatmul.msk.f32.gmra.mxu3 %vm1334_vm1, %v3156_v7  ;;  %vm3057_vm9 = vcmp.eq.f32.partialorder %v3056_v18, 8.507059e+37  ;;  %v9400_v18 = vld [vmem:[%s8521_s26 + $0x158] sm:$0xff] }
 0x4bb   : > { %5904 = vmatmul.msk.f32.gmra.mxu0 %vm3647_vm6, %v9375_v4  ;;  %v9384_v60 = vadd.f32 1.0, %v6611_v46  ;;  %v2892_v2 = vsub.f32 1.5, %v2891_v1  ;;  %vm2895_vm10 = vcmp.eq.f32.partialorder %v9251_v12, inf  ;;  %vm2897_vm11 = vcmp.eq.f32.partialorder %v9251_v12, 0.0  ;;  %v9410_v46 = vld [vmem:[%s8521_s26 + $0x160] sm:$0xff] }
 0x4bc   : > { %v3055_v26 = vsel %vm9367_vm8, %v9305_v31, %v3051_v33  ;;  %6616 = vpow2.f32 %v5829_v37  ;;  %v2902_v61 = vmul.f32 %v6609_v49, %v2901_v45  ;;  %v2898_v13 = vand.u32 2147483648, %v9251_v12  ;;  %v4181_v37 = vpop.f32.mrf.mxu2 }
 0x4bd   : > { %5949 = vmatmul.msk.f32.gmra.mxu2 %vm3647_vm6, %v9387_v34  ;;  %v9391_v31 = vsel %vm3057_vm9, %v3059_v40, %v3055_v26  ;;  %6618 = vrcp.f32 %v9384_v60  ;;  %v2893_v0 = vmul.f32 %v6605_v62, %v2892_v2  ;;  %v3071_v1 = vand.u32 2147483647, %v9347_v48  ;;  %v9413_v26 = vld [vmem:[%s8521_s26 + $0x2c0] sm:$0xff] }
 0x4be   : > { %v9395_v7 = vpop.eup %6612  ;;  %v2903_v33 = vmul.f32 0.5, %v2902_v61  ;;  %vm2907_vm12 = vcmp.eq.f32.partialorder %v9309_v42, inf  ;;  %vm2909_vm13 = vcmp.eq.f32.partialorder %v9309_v42, 0.0  ;;  %v4049_v62 = vpop.f32.mrf.mxu0  ;;  %v3157_v61 = vmul.f32 %v9391_v31, %v8785_v28 }
 0x4bf   : > { %v9402_v21 = vpop.eup %6614  ;;  %v3063_v5 = vmul.f32 %v9395_v7, %v9347_v48  ;;  %v2894_v45 = vmul.f32 %v2893_v0, %v9251_v12  ;;  %v4394_v4 = vadd.f32 %v4046_v20, %v9400_v18  ;;  %v4395_v63 = vadd.f32 %v4049_v62, %v9410_v46 }
 0x4c0   : > { %v2904_v40 = vsub.f32 1.5, %v2903_v33  ;;  %v2913_v2 = vmul.f32 %v9402_v21, %v9355_v6  ;;  %v4491_v39 = vadd.f32 %v4181_v37, %v9413_v26  ;;  %vm3068_vm14 = vweird.f32 %v9395_v7 }
 0x4c1   : > { %v3064_v59 = vsub.f32 1.0, %v3063_v5  ;;  %v3073_v0 = vand.u32 2147483648, %v9347_v48  ;;  %v2896_v33 = vsel %vm2895_vm10, %v9251_v12, %v2894_v45  ;;  %6008 = vst.msk [vmem:[%s8778_s28 + $0x158] sm:$0xff] %vm3647_vm6, %v4394_v4  ;;  %v9440_v45 = vld [vmem:[%s8521_s26 + $0x288] sm:$0xff]  ;;  %vm3067_vm15 = vweird.f32 %v9347_v48 }
 0x4c2   : > { %v6617_v10 = vpop.eup %6616  ;;  %v2905_v28 = vmul.f32 %v6609_v49, %v2904_v40  ;;  %5838 = vmatmul.msk.f32.gmra.mxu3 %vm1334_vm1, %v3157_v61  ;;  %v2899_v37 = vsel %vm2897_vm11, %v2898_v13, %v2896_v33  ;;  %v2914_v14 = vmul.f32 %v9402_v21, %v2913_v2  ;;  %v2910_v61 = vand.u32 2147483648, %v9309_v42  ;;  %6009 = vst.msk [vmem:[%s8778_s28 + $0x160] sm:$0xff] %vm3647_vm6, %v4395_v63  ;;  %vm3069_vm3 = vmor %vm3067_vm15, %vm3068_vm14  ;;  %v9468_v33 = vld [vmem:[%s8521_s26 + $0x168] sm:$0xff] }
 0x4c3   : > { %5905 = vmatmul.msk.f32.gmra.mxu0 %vm3647_vm6, %v8986_v36  ;;  %v6619_v20 = vpop.eup %6618  ;;  %v3065_v5 = vmul.f32 %v9395_v7, %v3064_v59  ;;  %v9432_v62 = vadd.f32 1.0, %v6617_v10  ;;  %v5830_v40 = vmul.f32 -1.442695, %v2899_v37  ;;  %vm9451_vm2 = vcmp.eq.f32.partialorder %v3071_v1, 8.507059e+37  ;;  %6053 = vst.msk [vmem:[%s8778_s28 + $0x2c0] sm:$0xff] %vm3647_vm6, %v4491_v39 }
 0x4c4   : > { %v3078_v49 = vmul.f32 %v6619_v20, %v9384_v60  ;;  %v2906_v36 = vmul.f32 %v2905_v28, %v9309_v42  ;;  %v3074_v59 = vor.u32 1.1754944e-38, %v3073_v0  ;;  %v3088_v13 = vand.u32 2147483648, %v9384_v60  ;;  %v9471_v28 = vld [vmem:[%s8521_s26 + $0x2c8] sm:$0xff]  ;;  %v4184_v0 = vpop.f32.mrf.mxu2 }
 0x4c5   : > { %5950 = vmatmul.msk.f32.gmra.mxu2 %vm3647_vm6, %v9440_v45  ;;  %v3066_v10 = vadd.f32 %v9395_v7, %v3065_v5  ;;  %6620 = vrcp.f32 %v9432_v62  ;;  %v2915_v2 = vmul.f32 0.5, %v2914_v14  ;;  %vm3083_vm4 = vweird.f32 %v6619_v20 }
 0x4c6   : > { %v3079_v63 = vsub.f32 1.0, %v3078_v49  ;;  %6622 = vpow2.f32 %v5830_v40  ;;  %v2908_v4 = vsel %vm2907_vm12, %v9309_v42, %v2906_v36  ;;  %v4052_v39 = vpop.f32.mrf.mxu0  ;;  %v3086_v49 = vand.u32 2147483647, %v9384_v60 }
 0x4c7   : > { %v3070_v48 = vsel %vm3069_vm3, %v9395_v7, %v3066_v10  ;;  %v2911_v1 = vsel %vm2909_vm13, %v2910_v61, %v2908_v4  ;;  %v2916_v42 = vsub.f32 1.5, %v2915_v2  ;;  %v4396_v40 = vadd.f32 %v4052_v39, %v9468_v33 }
 0x4c8   : > { %v9475_v5 = vsel %vm9451_vm2, %v3074_v59, %v3070_v48  ;;  %v3080_v37 = vmul.f32 %v6619_v20, %v3079_v63  ;;  %v5831_v7 = vmul.f32 -1.442695, %v2911_v1  ;;  %vm3082_vm5 = vweird.f32 %v9384_v60 }
 0x4c9   : > { %v3158_v14 = vmul.f32 %v9475_v5, %v8798_v24  ;;  %v4492_v61 = vadd.f32 %v4184_v0, %v9471_v28  ;;  %vm3084_vm7 = vmor %vm3082_vm5, %vm3083_vm4  ;;  %v2917_v12 = vmul.f32 %v9402_v21, %v2916_v42  ;;  %6010 = vst.msk [vmem:[%s8778_s28 + $0x168] sm:$0xff] %vm3647_vm6, %v4396_v40  ;;  %v9490_v24 = vld [vmem:[%s8521_s26 + $0x290] sm:$0xff]  ;;  %v3089_v63 = vor.u32 1.1754944e-38, %v3088_v13 }
 0x4ca   : > { %v3081_v36 = vadd.f32 %v6619_v20, %v3080_v37  ;;  %6624 = vpow2.f32 %v5831_v7  ;;  %vm3087_vm8 = vcmp.eq.f32.partialorder %v3086_v49, 8.507059e+37  ;;  %vm2919_vm9 = vcmp.eq.f32.partialorder %v9355_v6, inf  ;;  %v9508_v13 = vld [vmem:[%s8521_s26 + $0x2d0] sm:$0xff] }
 0x4cb   : > { %5906 = vmatmul.msk.f32.gmra.mxu0 %vm3647_vm6, %v9028_v9  ;;  %v6621_v10 = vpop.eup %6620  ;;  %5839 = vmatmul.msk.f32.gmra.mxu3 %vm1334_vm1, %v3158_v14  ;;  %6054 = vst.msk [vmem:[%s8778_s28 + $0x2c8] sm:$0xff] %vm3647_vm6, %v4492_v61  ;;  %v2918_v21 = vmul.f32 %v2917_v12, %v9355_v6  ;;  %vm2921_vm10 = vcmp.eq.f32.partialorder %v9355_v6, 0.0  ;;  %v3103_v2 = vand.u32 2147483648, %v9432_v62  ;;  %v2922_v39 = vand.u32 2147483648, %v9355_v6 }
 0x4cc   : > { %v6623_v59 = vpop.eup %6622  ;;  %v3085_v60 = vsel %vm3084_vm7, %v6619_v20, %v3081_v36  ;;  %v3093_v4 = vmul.f32 %v6621_v10, %v9432_v62  ;;  %v9505_v20 = vld [vmem:[%s8521_s26 + $0x170] sm:$0xff]  ;;  %vm3098_vm11 = vweird.f32 %v6621_v10  ;;  %v4187_v37 = vpop.f32.mrf.mxu2  ;;  %v3101_v36 = vand.u32 2147483647, %v9432_v62 }
 0x4cd   : > { %5951 = vmatmul.msk.f32.gmra.mxu2 %vm3647_vm6, %v9490_v24  ;;  %v9497_v9 = vadd.f32 1.0, %v6623_v59  ;;  %v9500_v48 = vsel %vm3087_vm8, %v3089_v63, %v3085_v60  ;;  %v2920_v42 = vsel %vm2919_vm9, %v9355_v6, %v2918_v21  ;;  %v4493_v40 = vadd.f32 %v4187_v37, %v9508_v13  ;;  %v9539_v21 = vld [vmem:[%s8521_s26 + $0x178] sm:$0xff] }
 0x4ce   : > { %v3094_v1 = vsub.f32 1.0, %v3093_v4  ;;  %v4055_v0 = vpop.f32.mrf.mxu0  ;;  %v2923_v12 = vsel %vm2921_vm10, %v2922_v39, %v2920_v42  ;;  %v3159_v59 = vmul.f32 %v9500_v48, %v8812_v35  ;;  %vm3097_vm12 = vweird.f32 %v9432_v62  ;;  %v9534_v35 = vld [vmem:[%s8521_s26 + $0x298] sm:$0xff] }
 0x4cf   : > { %6626 = vrcp.f32 %v9497_v9  ;;  %v4397_v14 = vadd.f32 %v4055_v0, %v9505_v20  ;;  %v5832_v63 = vmul.f32 -1.442695, %v2923_v12  ;;  %vm3099_vm13 = vmor %vm3097_vm12, %vm3098_vm11  ;;  %6055 = vst.msk [vmem:[%s8778_s28 + $0x2d0] sm:$0xff] %vm3647_vm6, %v4493_v40  ;;  %v3104_v4 = vor.u32 1.1754944e-38, %v3103_v2 }
 0x4d0   : > { %v6625_v7 = vpop.eup %6624  ;;  %v3095_v49 = vmul.f32 %v6621_v10, %v3094_v1  ;;  %vm3102_vm14 = vcmp.eq.f32.partialorder %v3101_v36, 8.507059e+37  ;;  %v3118_v42 = vand.u32 2147483648, %v9497_v9  ;;  %v3116_v12 = vand.u32 2147483647, %v9497_v9 }
 0x4d1   : > { %v9517_v61 = vadd.f32 1.0, %v6625_v7  ;;  %6011 = vst.msk [vmem:[%s8778_s28 + $0x170] sm:$0xff] %vm3647_vm6, %v4397_v14  ;;  %vm3112_vm2 = vweird.f32 %v9497_v9 }
 0x4d2   : > { %v3096_v60 = vadd.f32 %v6621_v10, %v3095_v49  ;;  %vm3117_vm4 = vcmp.eq.f32.partialorder %v3116_v12, 8.507059e+37 }
 0x4d3   : > { %5907 = vmatmul.msk.f32.gmra.mxu0 %vm3647_vm6, %v9080_v56  ;;  %6628 = vrcp.f32 %v9517_v61  ;;  %5840 = vmatmul.msk.f32.gmra.mxu3 %vm1334_vm1, %v3159_v59  ;;  %v9542_v56 = vld [vmem:[%s8521_s26 + $0x2d8] sm:$0xff]  ;;  %vm3127_vm7 = vweird.f32 %v9517_v61 }
 0x4d4   : > { %v3100_v6 = vsel %vm3099_vm13, %v6621_v10, %v3096_v60  ;;  %6630 = vpow2.f32 %v5832_v63  ;;  %v4190_v37 = vpop.f32.mrf.mxu2  ;;  %v9562_v63 = vld [vmem:[%s8521_s26 + $0x2a0] sm:$0xff] }
 0x4d5   : > { %5952 = vmatmul.msk.f32.gmra.mxu2 %vm3647_vm6, %v9534_v35  ;;  %v6627_v62 = vpop.eup %6626  ;;  %v9544_v1 = vsel %vm3102_vm14, %v3104_v4, %v3100_v6  ;;  %v4494_v7 = vadd.f32 %v4190_v37, %v9542_v56  ;;  %v3119_v4 = vor.u32 1.1754944e-38, %v3118_v42 }
 0x4d6   : > { %v3108_v39 = vmul.f32 %v6627_v62, %v9497_v9  ;;  %v4058_v0 = vpop.f32.mrf.mxu0  ;;  %v3160_v14 = vmul.f32 %v9544_v1, %v8824_v51  ;;  %vm3113_vm15 = vweird.f32 %v6627_v62 }
 0x4d7   : > { %v4398_v2 = vadd.f32 %v4058_v0, %v9539_v21  ;;  %6056 = vst.msk [vmem:[%s8778_s28 + $0x2d8] sm:$0xff] %vm3647_vm6, %v4494_v7  ;;  %vm3114_vm3 = vmor %vm3112_vm2, %vm3113_vm15  ;;  %v9568_v0 = vld [vmem:[%s8521_s26 + $0x2e0] sm:$0xff]  ;;  %v3133_v7 = vand.u32 2147483648, %v9517_v61 }
 0x4d8   : > { %v3109_v10 = vsub.f32 1.0, %v3108_v39 }
 0x4d9   : > { %v6629_v49 = vpop.eup %6628  ;;  %6012 = vst.msk [vmem:[%s8778_s28 + $0x178] sm:$0xff] %vm3647_vm6, %v4398_v2 }
 0x4da   : > { %v6631_v40 = vpop.eup %6630  ;;  %v3110_v36 = vmul.f32 %v6627_v62, %v3109_v10  ;;  %v3123_v59 = vmul.f32 %v6629_v49, %v9517_v61  ;;  %vm3128_vm5 = vweird.f32 %v6629_v49 }
 0x4db   : > { %5908 = vmatmul.msk.f32.gmra.mxu0 %vm3647_vm6, %v9124_v47  ;;  %v2971_v60 = vadd.f32 1.0, %v6631_v40  ;;  %5841 = vmatmul.msk.f32.gmra.mxu3 %vm1334_vm1, %v3160_v14  ;;  %vm3129_vm8 = vmor %vm3127_vm7, %vm3128_vm5 }
 0x4dc   : > { %v3111_v51 = vadd.f32 %v6627_v62, %v3110_v36  ;;  %v3124_v6 = vsub.f32 1.0, %v3123_v59  ;;  %v4193_v9 = vpop.f32.mrf.mxu2 }
 0x4dd   : > { %5953 = vmatmul.msk.f32.gmra.mxu2 %vm3647_vm6, %v9562_v63  ;;  %6632 = vrcp.f32 %v2971_v60  ;;  %v4495_v40 = vadd.f32 %v4193_v9, %v9568_v0  ;;  %v3146_v9 = vand.u32 2147483647, %v2971_v60  ;;  %vm3142_vm11 = vweird.f32 %v2971_v60 }
 0x4de   : > { %v3115_v39 = vsel %vm3114_vm3, %v6627_v62, %v3111_v51  ;;  %v3125_v47 = vmul.f32 %v6629_v49, %v3124_v6  ;;  %v4061_v10 = vpop.f32.mrf.mxu0  ;;  %v3131_v62 = vand.u32 2147483647, %v9517_v61  ;;  %v3134_v61 = vor.u32 1.1754944e-38, %v3133_v7 }
 0x4df   : > { %v9570_v37 = vsel %vm3117_vm4, %v3119_v4, %v3115_v39  ;;  %v4462_v14 = vadd.f32 %v4061_v10, %v8970_v29  ;;  %6057 = vst.msk [vmem:[%s8778_s28 + $0x2e0] sm:$0xff] %vm3647_vm6, %v4495_v40  ;;  %v9587_v29 = vld [vmem:[%s8521_s26 + $0x2a8] sm:$0xff]  ;;  %vm3147_vm13 = vcmp.eq.f32.partialorder %v3146_v9, 8.507059e+37  ;;  %v3166_v9 = vmul.f32 %v9196_v50, %v8900_v27 }
 0x4e0   : > { %v3126_v2 = vadd.f32 %v6629_v49, %v3125_v47  ;;  %v3161_v42 = vmul.f32 %v9570_v37, %v8835_v17  ;;  %vm3132_vm9 = vcmp.eq.f32.partialorder %v3131_v62, 8.507059e+37  ;;  %v9592_v17 = vld [vmem:[%s8521_s26 + $0x2e8] sm:$0xff] }
 0x4e1   : > { %6037 = vst.msk [vmem:[%s8778_s28 + $0x240] sm:$0xff] %vm3647_vm6, %v4462_v14 }
 0x4e2   : > { %v3130_v12 = vsel %vm3129_vm8, %v6629_v49, %v3126_v2  ;;  %v3148_v49 = vand.u32 2147483648, %v2971_v60 }
 0x4e3   : > { %5909 = vmatmul.msk.f32.gmra.mxu0 %vm3647_vm6, %v9199_v25  ;;  %v6633_v36 = vpop.eup %6632  ;;  %5842 = vmatmul.msk.f32.gmra.mxu3 %vm1334_vm1, %v3161_v42  ;;  %v9594_v51 = vsel %vm3132_vm9, %v3134_v61, %v3130_v12  ;;  %v9629_v61 = vld [vmem:[%s8521_s26 + $0x2b8] sm:$0xff] }
 0x4e4   : > { %v3138_v59 = vmul.f32 %v6633_v36, %v2971_v60  ;;  %v4196_v4 = vpop.f32.mrf.mxu2  ;;  %vm3143_vm10 = vweird.f32 %v6633_v36  ;;  %v3162_v2 = vmul.f32 %v9594_v51, %v8846_v23  ;;  %v3149_v62 = vor.u32 1.1754944e-38, %v3148_v49  ;;  %v9613_v23 = vld [vmem:[%s8521_s26 + $0x2f0] sm:$0xff] }
 0x4e5   : > { %5954 = vmatmul.msk.f32.gmra.mxu2 %vm3647_vm6, %v9587_v29  ;;  %v4496_v10 = vadd.f32 %v4196_v4, %v9592_v17  ;;  %vm3144_vm12 = vmor %vm3142_vm11, %vm3143_vm10 }
 0x4e6   : > { %v3139_v25 = vsub.f32 1.0, %v3138_v59  ;;  %v4064_v6 = vpop.f32.mrf.mxu0 }
 0x4e7   : > { %v4463_v47 = vadd.f32 %v4064_v6, %v9005_v54  ;;  %6058 = vst.msk [vmem:[%s8778_s28 + $0x2e8] sm:$0xff] %vm3647_vm6, %v4496_v10  ;;  %v9608_v54 = vld [vmem:[%s8521_s26 + $0x2b0] sm:$0xff]  ;;  %v6648_v10 = vld [vmem:[%s8521_s26 + $0xc8] sm:$0xff] }
 0x4e8   : > { %v3140_v39 = vmul.f32 %v6633_v36, %v3139_v25 }
 0x4e9   : > { %6038 = vst.msk [vmem:[%s8778_s28 + $0x248] sm:$0xff] %vm3647_vm6, %v4463_v47  ;;  %v3165_v47 = vmul.f32 %v9121_v15, %v8884_v8 }
 0x4ea   : > { %v3141_v7 = vadd.f32 %v6633_v36, %v3140_v39  ;;  %v6647_v39 = vld [vmem:[%s8521_s26 + $0xc0] sm:$0xff] }
 0x4eb   : > { %5910 = vmatmul.msk.f32.gmra.mxu0 %vm3647_vm6, %v9324_v44  ;;  %5843 = vmatmul.msk.f32.gmra.mxu3 %vm1334_vm1, %v3162_v2  ;;  %v6649_v2 = vld [vmem:[%s8521_s26 + $0xd0] sm:$0xff] }
 0x4ec   : > { %v3145_v14 = vsel %vm3144_vm12, %v6633_v36, %v3141_v7  ;;  %v4199_v42 = vpop.f32.mrf.mxu2  ;;  %v3167_v7 = vmul.f32 %v9280_v52, %v8921_v43 }
 0x4ed   : > { %5955 = vmatmul.msk.f32.gmra.mxu2 %vm3647_vm6, %v9608_v54  ;;  %v9615_v44 = vsel %vm3147_vm13, %v3149_v62, %v3145_v14  ;;  %v4497_v12 = vadd.f32 %v4199_v42, %v9613_v23  ;;  %v10792_v14 = vld [vmem:[#allocation10_spill] sm:$0xff] }
 0x4ee   : > { %v4067_v60 = vpop.f32.mrf.mxu0  ;;  %v3163_v36 = vmul.f32 %v9615_v44, %v8857_v41 }
 0x4ef   : > { %v4464_v40 = vadd.f32 %v4067_v60, %v9048_v16  ;;  %6059 = vst.msk [vmem:[%s8778_s28 + $0x2f0] sm:$0xff] %vm3647_vm6, %v4497_v12  ;;  %v9634_v16 = vld [vmem:[%s8521_s26 + $0x2f8] sm:$0xff]  ;;  %v3168_v60 = vmul.f32 %v9318_v30, %v8945_v3  ;;  %v6652_v3 = vld [vmem:[%s7561_s14 + $0x8] sm:$0xff] }
 0x4f1   : > { %6039 = vst.msk [vmem:[%s8778_s28 + $0x250] sm:$0xff] %vm3647_vm6, %v4464_v40  ;;  %v6651_v40 = vld [vmem:[%s8521_s26 + $0xd8] sm:$0xff] }
 0x4f3   : > { %5911 = vmatmul.msk.f32.gmra.mxu0 %vm3647_vm6, %v9332_v55  ;;  %5844 = vmatmul.msk.f32.gmra.mxu3 %vm1334_vm1, %v3163_v36  ;;  %v3164_v55 = vmul.f32 %v9069_v19, %v8867_v58 }
 0x4f4   : > { %v4202_v41 = vpop.f32.mrf.mxu2 }
 0x4f5   : > { %5956 = vmatmul.msk.f32.gmra.mxu2 %vm3647_vm6, %v9629_v61  ;;  %v4498_v49 = vadd.f32 %v4202_v41, %v9634_v16  ;;  %v3169_v41 = vmul.f32 %v9391_v31, %v8978_v57 }
 0x4f6   : > { %v4070_v59 = vpop.f32.mrf.mxu0 }
 0x4f7   : > { %v4465_v25 = vadd.f32 %v4070_v59, %v9101_v11  ;;  %6060 = vst.msk [vmem:[%s8778_s28 + $0x2f8] sm:$0xff] %vm3647_vm6, %v4498_v49 }
 0x4f9   : > { %6040 = vst.msk [vmem:[%s8778_s28 + $0x258] sm:$0xff] %vm3647_vm6, %v4465_v25 }
 0x4fb   : > { %5912 = vmatmul.msk.f32.gmra.mxu0 %vm3647_vm6, %v9400_v18  ;;  %5845 = vmatmul.msk.f32.gmra.mxu3 %vm1334_vm1, %v3164_v55 }
 0x4fc   : > { %v4205_v6 = vpop.f32.mrf.mxu2 }
 0x4fd   : > { %5957 = vmatmul.msk.f32.gmra.mxu2 %vm3647_vm6, %v9413_v26  ;;  %v4362_v58 = vadd.f32 %v6647_v39, %v4205_v6  ;;  %v6654_v6 = vld [vmem:[%s7561_s14 + $0x10] sm:$0xff] }
 0x4fe   : > { %v4073_v11 = vpop.f32.mrf.mxu0 }
 0x4ff   : > { %v4466_v4 = vadd.f32 %v4073_v11, %v9146_v32  ;;  %5989 = vst.msk [vmem:[%s8778_s28 + $0xc0] sm:$0xff] %vm3647_vm6, %v4362_v58  ;;  %v6653_v11 = vld [vmem:[%s8521_s26 + $0xe0] sm:$0xff]  ;;  %v10795_v58 = vld [vmem:[#allocation57_spill] sm:$0xff] }
 0x501   : > { %6041 = vst.msk [vmem:[%s8778_s28 + $0x260] sm:$0xff] %vm3647_vm6, %v4466_v4  ;;  %v10794_v4 = vld [vmem:[#allocation12_spill] sm:$0xff] }
 0x502   : > { %v3431_v39 = vadd.f32 %v6654_v6, %v10794_v4  ;;  %v9803_v4 = vld [vmem:[%s8521_s26 + $0x308] sm:$0xff] }
 0x503   : > { %5913 = vmatmul.msk.f32.gmra.mxu0 %vm3647_vm6, %v9410_v46  ;;  %5846 = vmatmul.msk.f32.gmra.mxu3 %vm1334_vm1, %v3165_v47  ;;  %v3170_v47 = vmul.f32 %v9475_v5, %v10795_v58  ;;  %v10802_v58 = vld [vmem:[#allocation15_spill] sm:$0xff] }
 0x505   : > { %5958 = vmatmul.msk.f32.gmra.mxu2 %vm3647_vm6, %v9471_v28 }
 0x506   : > { %v4076_v32 = vpop.f32.mrf.mxu0 }
 0x507   : > { %v4467_v26 = vadd.f32 %v4076_v32, %v9208_v22 }
 0x508   : > { %v4208_v18 = vpop.f32.mrf.mxu2 }
 0x509   : > { %v4363_v8 = vadd.f32 %v6648_v10, %v4208_v18  ;;  %6042 = vst.msk [vmem:[%s8778_s28 + $0x268] sm:$0xff] %vm3647_vm6, %v4467_v26 }
 0x50b   : > { %5914 = vmatmul.msk.f32.gmra.mxu0 %vm3647_vm6, %v9468_v33  ;;  %5847 = vmatmul.msk.f32.gmra.mxu3 %vm1334_vm1, %v3166_v9  ;;  %5990 = vst.msk [vmem:[%s8778_s28 + $0xc8] sm:$0xff] %vm3647_vm6, %v4363_v8  ;;  %v6650_v33 = vld [vmem:[%s7561_s14] sm:$0xff] }
 0x50c   : > { %v3429_v62 = vadd.f32 %v6650_v33, %v10792_v14  ;;  %v10797_v33 = vld [vmem:[#allocation13_spill] sm:$0xff] }
 0x50d   : > { %5959 = vmatmul.msk.f32.gmra.mxu2 %vm3647_vm6, %v9508_v13 }
 0x50e   : > { %v4079_v22 = vpop.f32.mrf.mxu0 }
 0x50f   : > { %v4468_v28 = vadd.f32 %v4079_v22, %v9271_v53 }
 0x510   : > { %v4211_v46 = vpop.f32.mrf.mxu2 }
 0x511   : > { %v4364_v27 = vadd.f32 %v6649_v2, %v4211_v46  ;;  %6043 = vst.msk [vmem:[%s8778_s28 + $0x270] sm:$0xff] %vm3647_vm6, %v4468_v28  ;;  %v9752_v28 = vld [vmem:[%s8521_s26 + $0x190] sm:$0xff] }
 0x513   : > { %5915 = vmatmul.msk.f32.gmra.mxu0 %vm3647_vm6, %v9505_v20  ;;  %5848 = vmatmul.msk.f32.gmra.mxu3 %vm1334_vm1, %v3167_v7  ;;  %5991 = vst.msk [vmem:[%s8778_s28 + $0xd0] sm:$0xff] %vm3647_vm6, %v4364_v27  ;;  %v6656_v27 = vld [vmem:[%s8521_s26 + $0xf0] sm:$0xff] }
 0x515   : > { %5960 = vmatmul.msk.f32.gmra.mxu2 %vm3647_vm6, %v9542_v56  ;;  %v10793_v56 = vld [vmem:[#allocation11_spill] sm:$0xff] }
 0x517   : > { %v3321_v53 = vpop.f32.mrf.mxu3 }
 0x518   : > { %v3465_v43 = vadd.f32 %v3429_v62, %v3321_v53  ;;  %v4082_v20 = vpop.f32.mrf.mxu0  ;;  %v4214_v13 = vpop.f32.mrf.mxu2  ;;  %v10798_v53 = vld [vmem:[#allocation47_spill] sm:$0xff] }
 0x519   : > { %v4469_v42 = vadd.f32 %v4082_v20, %v9335_v38  ;;  %v4365_v12 = vadd.f32 %v6651_v40, %v4214_v13  ;;  %v3430_v38 = vadd.f32 %v6652_v3, %v10793_v56  ;;  %v6658_v40 = vld [vmem:[%s8521_s26 + $0xf8] sm:$0xff]  ;;  %v6659_v3 = vld [vmem:[%s7561_s14 + $0x20] sm:$0xff] }
 0x51a   : > { %3501 = vst.msk [vmem:[%s9692_s1] sm:$0xff] %vm1139_vm0, %v3465_v43  ;;  %v3172_v43 = vmul.f32 %v9544_v1, %v10798_v53  ;;  %v10799_v56 = vld [vmem:[#allocation14_spill] sm:$0xff] }
 0x51b   : > { %5916 = vmatmul.msk.f32.gmra.mxu0 %vm3647_vm6, %v9539_v21  ;;  %5849 = vmatmul.msk.f32.gmra.mxu3 %vm1334_vm1, %v3168_v60  ;;  %6044 = vst.msk [vmem:[%s8778_s28 + $0x278] sm:$0xff] %vm3647_vm6, %v4469_v42  ;;  %v9712_v21 = vld [vmem:[%s8521_s26 + $0x180] sm:$0xff]  ;;  %v9772_v60 = vld [vmem:[%s8521_s26 + $0x198] sm:$0xff] }
 0x51c   : > { %5992 = vst.msk [vmem:[%s8778_s28 + $0xd8] sm:$0xff] %vm3647_vm6, %v4365_v12  ;;  %v9780_v12 = vld [vmem:[%s8521_s26 + $0x300] sm:$0xff] }
 0x51d   : > { %5961 = vmatmul.msk.f32.gmra.mxu2 %vm3647_vm6, %v9568_v0 }
 0x520   : > { %v4085_v59 = vpop.f32.mrf.mxu0  ;;  %v4217_v55 = vpop.f32.mrf.mxu2 }
 0x521   : > { %v3324_v36 = vpop.f32.mrf.mxu3  ;;  %v4470_v49 = vadd.f32 %v4085_v59, %v9387_v34  ;;  %v4366_v0 = vadd.f32 %v6653_v11, %v4217_v55  ;;  %v9730_v34 = vld [vmem:[%s8521_s26 + $0x188] sm:$0xff]  ;;  %v10800_v59 = vld [vmem:[#allocation48_spill] sm:$0xff]  ;;  %v9795_v55 = vld [vmem:[%s8521_s26 + $0x1a0] sm:$0xff] }
 0x522   : > { %v3466_v25 = vadd.f32 %v3430_v38, %v3324_v36  ;;  %v3433_v38 = vadd.f32 %v6659_v3, %v10799_v56  ;;  %v6660_v11 = vld [vmem:[%s8521_s26 + $0x60] sm:$0xff]  ;;  %v9849_v56 = vld [vmem:[%s8521_s26 + $0x318] sm:$0xff] }
 0x523   : > { %5917 = vmatmul.msk.f32.gmra.mxu0 %vm3647_vm6, %v9712_v21  ;;  %5850 = vmatmul.msk.f32.gmra.mxu3 %vm1334_vm1, %v3169_v41  ;;  %6045 = vst.msk [vmem:[%s8778_s28 + $0x280] sm:$0xff] %vm3647_vm6, %v4470_v49  ;;  %v3173_v41 = vmul.f32 %v9570_v37, %v10800_v59 }
 0x524   : > { %3502 = vst.msk [vmem:[%s9692_s1 + $0x8] sm:$0xff] %vm1139_vm0, %v3466_v25 }
 0x525   : > { %5962 = vmatmul.msk.f32.gmra.mxu2 %vm3647_vm6, %v9592_v17  ;;  %5993 = vst.msk [vmem:[%s8778_s28 + $0xe0] sm:$0xff] %vm3647_vm6, %v4366_v0  ;;  %v6655_v17 = vld [vmem:[%s8521_s26 + $0xe8] sm:$0xff] }
 0x528   : > { %v4088_v57 = vpop.f32.mrf.mxu0  ;;  %v4220_v18 = vpop.f32.mrf.mxu2 }
 0x529   : > { %v4471_v32 = vadd.f32 %v4088_v57, %v9440_v45  ;;  %v3327_v26 = vpop.f32.mrf.mxu3  ;;  %v4367_v10 = vadd.f32 %v6655_v17, %v4220_v18  ;;  %v10796_v45 = vld [vmem:[#allocation46_spill] sm:$0xff] }
 0x52a   : > { %v3467_v8 = vadd.f32 %v3431_v39, %v3327_v26  ;;  %v3171_v9 = vmul.f32 %v9500_v48, %v10796_v45  ;;  %v10801_v57 = vld [vmem:[#allocation62_spill] sm:$0xff]  ;;  %v6661_v39 = vld [vmem:[%s7561_s14 + $0x28] sm:$0xff]  ;;  %v10803_v26 = vld [vmem:[#allocation49_spill] sm:$0xff] }
 0x52b   : > { %5918 = vmatmul.msk.f32.gmra.mxu0 %vm3647_vm6, %v9730_v34  ;;  %5851 = vmatmul.msk.f32.gmra.mxu3 %vm1334_vm1, %v3170_v47  ;;  %6046 = vst.msk [vmem:[%s8778_s28 + $0x288] sm:$0xff] %vm3647_vm6, %v4471_v32  ;;  %v3434_v47 = vadd.f32 %v6661_v39, %v10802_v58  ;;  %v3174_v17 = vmul.f32 %v9594_v51, %v10803_v26  ;;  %v9818_v45 = vld [vmem:[%s8521_s26 + $0x1a8] sm:$0xff] }
 0x52c   : > { %5994 = vst.msk [vmem:[%s8778_s28 + $0xe8] sm:$0xff] %vm3647_vm6, %v4367_v10  ;;  %v10810_v58 = vld [vmem:[#allocation67_spill] sm:$0xff] }
 0x52d   : > { %5963 = vmatmul.msk.f32.gmra.mxu2 %vm3647_vm6, %v9613_v23  ;;  %3503 = vst.msk [vmem:[%s9692_s1 + $0x10] sm:$0xff] %vm1139_vm0, %v3467_v8  ;;  %v6657_v23 = vld [vmem:[%s7561_s14 + $0x18] sm:$0xff] }
 0x52e   : > { %v3432_v14 = vadd.f32 %v6657_v23, %v10797_v33  ;;  %v10805_v23 = vld [vmem:[#allocation16_spill] sm:$0xff] }
 0x530   : > { %v4091_v22 = vpop.f32.mrf.mxu0  ;;  %v4223_v46 = vpop.f32.mrf.mxu2 }
 0x531   : > { %v4472_v2 = vadd.f32 %v4091_v22, %v9490_v24  ;;  %v4368_v7 = vadd.f32 %v6656_v27, %v4223_v46  ;;  %v10804_v46 = vld [vmem:[#allocation64_spill] sm:$0xff] }
 0x532   : > { %v9826_v27 = vld [vmem:[%s8521_s26 + $0x310] sm:$0xff] }
 0x533   : > { %5919 = vmatmul.msk.f32.gmra.mxu0 %vm3647_vm6, %v9752_v28  ;;  %5852 = vmatmul.msk.f32.gmra.mxu3 %vm1334_vm1, %v3171_v9  ;;  %6047 = vst.msk [vmem:[%s8778_s28 + $0x290] sm:$0xff] %vm3647_vm6, %v4472_v2  ;;  %v6662_v9 = vld [vmem:[%s8521_s26 + $0x68] sm:$0xff] }
 0x534   : > { %5995 = vst.msk [vmem:[%s8778_s28 + $0xf0] sm:$0xff] %vm3647_vm6, %v4368_v7  ;;  %v6663_v7 = vld [vmem:[%s7561_s14 + $0x30] sm:$0xff] }
 0x535   : > { %5964 = vmatmul.msk.f32.gmra.mxu2 %vm3647_vm6, %v9634_v16  ;;  %v3330_v24 = vpop.f32.mrf.mxu3  ;;  %v3435_v33 = vadd.f32 %v6663_v7, %v10805_v23  ;;  %v9890_v7 = vld [vmem:[%s8521_s26 + $0x1c0] sm:$0xff] }
 0x536   : > { %v3468_v62 = vadd.f32 %v3432_v14, %v3330_v24  ;;  %v6668_v23 = vld [vmem:[%s8521_s26 + $0x80] sm:$0xff] }
 0x538   : > { %3504 = vst.msk [vmem:[%s9692_s1 + $0x18] sm:$0xff] %vm1139_vm0, %v3468_v62  ;;  %v4094_v20 = vpop.f32.mrf.mxu0  ;;  %v4226_v13 = vpop.f32.mrf.mxu2  ;;  %v10806_v62 = vld [vmem:[#allocation50_spill] sm:$0xff] }
 0x539   : > { %v4473_v42 = vadd.f32 %v4094_v20, %v9534_v35  ;;  %v4369_v16 = vadd.f32 %v6658_v40, %v4226_v13  ;;  %v3175_v53 = vmul.f32 %v9615_v44, %v10806_v62  ;;  %v9841_v13 = vld [vmem:[%s8521_s26 + $0x1b0] sm:$0xff]  ;;  %v10813_v62 = vld [vmem:[#allocation19_spill] sm:$0xff] }
 0x53b   : > { %5920 = vmatmul.msk.f32.gmra.mxu0 %vm3647_vm6, %v9772_v60  ;;  %5853 = vmatmul.msk.f32.gmra.mxu3 %vm1334_vm1, %v3172_v43  ;;  %6048 = vst.msk [vmem:[%s8778_s28 + $0x298] sm:$0xff] %vm3647_vm6, %v4473_v42  ;;  %v6664_v42 = vld [vmem:[%s8521_s26 + $0x70] sm:$0xff] }
 0x53c   : > { %5996 = vst.msk [vmem:[%s8778_s28 + $0xf8] sm:$0xff] %vm3647_vm6, %v4369_v16  ;;  %v10807_v16 = vld [vmem:[#allocation66_spill] sm:$0xff] }
 0x53d   : > { %5965 = vmatmul.msk.f32.gmra.mxu2 %vm3647_vm6, %v9780_v12  ;;  %v3333_v35 = vpop.f32.mrf.mxu3 }
 0x53e   : > { %v3469_v36 = vadd.f32 %v3433_v38, %v3333_v35  ;;  %v6665_v38 = vld [vmem:[%s7561_s14 + $0x38] sm:$0xff] }
 0x53f   : > { %v10808_v35 = vld [vmem:[#allocation17_spill] sm:$0xff] }
 0x540   : > { %3505 = vst.msk [vmem:[%s9692_s1 + $0x20] sm:$0xff] %vm1139_vm0, %v3469_v36  ;;  %v4097_v25 = vpop.f32.mrf.mxu0  ;;  %v4229_v49 = vpop.f32.mrf.mxu2  ;;  %v3436_v36 = vadd.f32 %v6665_v38, %v10808_v35  ;;  %v9916_v35 = vld [vmem:[%s8521_s26 + $0x1c8] sm:$0xff] }
 0x541   : > { %v4337_v0 = vadd.f32 %v6660_v11, %v4097_v25  ;;  %v4370_v6 = vadd.f32 %v4229_v49, %v10801_v57  ;;  %v10809_v25 = vld [vmem:[#allocation51_spill] sm:$0xff]  ;;  %v9864_v57 = vld [vmem:[%s8521_s26 + $0x1b8] sm:$0xff] }
 0x542   : > { %v3176_v49 = vmul.f32 %v9069_v19, %v10809_v25  ;;  %v9872_v19 = vld [vmem:[%s8521_s26 + $0x320] sm:$0xff]  ;;  %v6671_v25 = vld [vmem:[%s7561_s14 + $0x50] sm:$0xff] }
 0x543   : > { %5921 = vmatmul.msk.f32.gmra.mxu0 %vm3647_vm6, %v9795_v55  ;;  %5854 = vmatmul.msk.f32.gmra.mxu3 %vm1334_vm1, %v3173_v41  ;;  %5977 = vst.msk [vmem:[%s8778_s28 + $0x60] sm:$0xff] %vm3647_vm6, %v4337_v0 }
 0x544   : > { %5997 = vst.msk [vmem:[%s8778_s28 + $0x100] sm:$0xff] %vm3647_vm6, %v4370_v6  ;;  %v6666_v6 = vld [vmem:[%s8521_s26 + $0x78] sm:$0xff] }
 0x545   : > { %5966 = vmatmul.msk.f32.gmra.mxu2 %vm3647_vm6, %v9803_v4  ;;  %v3336_v32 = vpop.f32.mrf.mxu3 }
 0x546   : > { %v3470_v18 = vadd.f32 %v3434_v47, %v3336_v32  ;;  %v6667_v32 = vld [vmem:[%s7561_s14 + $0x40] sm:$0xff] }
 0x548   : > { %3506 = vst.msk [vmem:[%s9692_s1 + $0x28] sm:$0xff] %vm1139_vm0, %v3470_v18  ;;  %v4100_v10 = vpop.f32.mrf.mxu0  ;;  %v4232_v8 = vpop.f32.mrf.mxu2  ;;  %v10811_v18 = vld [vmem:[#allocation18_spill] sm:$0xff] }
 0x549   : > { %v4338_v22 = vadd.f32 %v6662_v9, %v4100_v10  ;;  %v4371_v2 = vadd.f32 %v4232_v8, %v10804_v46  ;;  %v3437_v26 = vadd.f32 %v6667_v32, %v10811_v18  ;;  %v10812_v8 = vld [vmem:[#allocation52_spill] sm:$0xff]  ;;  %v9887_v46 = vld [vmem:[%s8521_s26 + $0x1e0] sm:$0xff] }
 0x54a   : > { %v3177_v9 = vmul.f32 %v9121_v15, %v10812_v8  ;;  %v9898_v15 = vld [vmem:[%s8521_s26 + $0x328] sm:$0xff]  ;;  %v9939_v32 = vld [vmem:[%s8521_s26 + $0x1f0] sm:$0xff] }
 0x54b   : > { %5922 = vmatmul.msk.f32.gmra.mxu0 %vm3647_vm6, %v9818_v45  ;;  %5855 = vmatmul.msk.f32.gmra.mxu3 %vm1334_vm1, %v3174_v17  ;;  %5978 = vst.msk [vmem:[%s8778_s28 + $0x68] sm:$0xff] %vm3647_vm6, %v4338_v22 }
 0x54c   : > { %5998 = vst.msk [vmem:[%s8778_s28 + $0x108] sm:$0xff] %vm3647_vm6, %v4371_v2 }
 0x54d   : > { %5967 = vmatmul.msk.f32.gmra.mxu2 %vm3647_vm6, %v9826_v27 }
 0x54e   : > { %v3339_v14 = vpop.f32.mrf.mxu3 }
 0x54f   : > { %v3471_v24 = vadd.f32 %v3435_v33, %v3339_v14 }
 0x550   : > { %v4103_v43 = vpop.f32.mrf.mxu0  ;;  %v4235_v20 = vpop.f32.mrf.mxu2 }
 0x551   : > { %3507 = vst.msk [vmem:[%s9692_s1 + $0x30] sm:$0xff] %vm1139_vm0, %v3471_v24  ;;  %v4339_v40 = vadd.f32 %v6664_v42, %v4103_v43  ;;  %v4372_v3 = vadd.f32 %v4235_v20, %v10807_v16  ;;  %v6669_v24 = vld [vmem:[%s7561_s14 + $0x48] sm:$0xff]  ;;  %v10814_v42 = vld [vmem:[#allocation53_spill] sm:$0xff] }
 0x553   : > { %5923 = vmatmul.msk.f32.gmra.mxu0 %vm3647_vm6, %v9841_v13  ;;  %5856 = vmatmul.msk.f32.gmra.mxu3 %vm1334_vm1, %v3175_v53  ;;  %5979 = vst.msk [vmem:[%s8778_s28 + $0x70] sm:$0xff] %vm3647_vm6, %v4339_v40  ;;  %v3438_v53 = vadd.f32 %v6669_v24, %v10813_v62  ;;  %v3178_v40 = vmul.f32 %v9196_v50, %v10814_v42  ;;  %v9924_v50 = vld [vmem:[%s8521_s26 + $0x330] sm:$0xff]  ;;  %v6674_v42 = vld [vmem:[%s8521_s26 + $0x98] sm:$0xff] }
 0x554   : > { %5999 = vst.msk [vmem:[%s8778_s28 + $0x110] sm:$0xff] %vm3647_vm6, %v4372_v3  ;;  %v9913_v3 = vld [vmem:[%s8521_s26 + $0x1e8] sm:$0xff] }
 0x555   : > { %5968 = vmatmul.msk.f32.gmra.mxu2 %vm3647_vm6, %v9849_v56 }
 0x556   : > { %v3342_v59 = vpop.f32.mrf.mxu3 }
 0x557   : > { %v3472_v41 = vadd.f32 %v3436_v36, %v3342_v59  ;;  %v6670_v36 = vld [vmem:[%s8521_s26 + $0x88] sm:$0xff] }
 0x558   : > { %v4106_v11 = vpop.f32.mrf.mxu0  ;;  %v4238_v0 = vpop.f32.mrf.mxu2 }
 0x559   : > { %3508 = vst.msk [vmem:[%s9692_s1 + $0x38] sm:$0xff] %vm1139_vm0, %v3472_v41  ;;  %v4340_v39 = vadd.f32 %v6666_v6, %v4106_v11  ;;  %v4373_v47 = vadd.f32 %v4238_v0, %v10810_v58 }
 0x55b   : > { %5924 = vmatmul.msk.f32.gmra.mxu0 %vm3647_vm6, %v9864_v57  ;;  %5857 = vmatmul.msk.f32.gmra.mxu3 %vm1334_vm1, %v3176_v49  ;;  %5980 = vst.msk [vmem:[%s8778_s28 + $0x78] sm:$0xff] %vm3647_vm6, %v4340_v39  ;;  %v10815_v49 = vld [vmem:[#allocation20_spill] sm:$0xff]  ;;  %v10816_v39 = vld [vmem:[#allocation54_spill] sm:$0xff] }
 0x55c   : > { %6000 = vst.msk [vmem:[%s8778_s28 + $0x118] sm:$0xff] %vm3647_vm6, %v4373_v47  ;;  %v3439_v11 = vadd.f32 %v6671_v25, %v10815_v49  ;;  %v3179_v58 = vmul.f32 %v9280_v52, %v10816_v39  ;;  %v9950_v52 = vld [vmem:[%s8521_s26 + $0x338] sm:$0xff]  ;;  %v10820_v49 = vld [vmem:[#allocation56_spill] sm:$0xff]  ;;  %v6676_v39 = vld [vmem:[%s8521_s26 + $0xa0] sm:$0xff] }
 0x55d   : > { %5969 = vmatmul.msk.f32.gmra.mxu2 %vm3647_vm6, %v9872_v19 }
 0x55e   : > { %v3345_v17 = vpop.f32.mrf.mxu3 }
 0x55f   : > { %v3473_v10 = vadd.f32 %v3437_v26, %v3345_v17  ;;  %v9942_v26 = vld [vmem:[%s8521_s26 + $0x1d0] sm:$0xff] }
 0x560   : > { %v4109_v22 = vpop.f32.mrf.mxu0  ;;  %v4241_v2 = vpop.f32.mrf.mxu2  ;;  %v6672_v17 = vld [vmem:[%s8521_s26 + $0x90] sm:$0xff] }
 0x561   : > { %3509 = vst.msk [vmem:[%s9692_s1 + $0x40] sm:$0xff] %vm1139_vm0, %v3473_v10  ;;  %v4341_v33 = vadd.f32 %v6668_v23, %v4109_v22  ;;  %v4437_v14 = vadd.f32 %v4241_v2, %v9887_v46  ;;  %v10817_v22 = vld [vmem:[#allocation21_spill] sm:$0xff] }
 0x563   : > { %5925 = vmatmul.msk.f32.gmra.mxu0 %vm3647_vm6, %v9890_v7  ;;  %5858 = vmatmul.msk.f32.gmra.mxu3 %vm1334_vm1, %v3177_v9  ;;  %5981 = vst.msk [vmem:[%s8778_s28 + $0x80] sm:$0xff] %vm3647_vm6, %v4341_v33  ;;  %v6673_v9 = vld [vmem:[%s7561_s14 + $0x58] sm:$0xff] }
 0x564   : > { %6025 = vst.msk [vmem:[%s8778_s28 + $0x1e0] sm:$0xff] %vm3647_vm6, %v4437_v14  ;;  %v3440_v2 = vadd.f32 %v6673_v9, %v10817_v22  ;;  %v10818_v14 = vld [vmem:[#allocation55_spill] sm:$0xff]  ;;  %v10822_v22 = vld [vmem:[#allocation58_spill] sm:$0xff] }
 0x565   : > { %5970 = vmatmul.msk.f32.gmra.mxu2 %vm3647_vm6, %v9898_v15  ;;  %v3180_v24 = vmul.f32 %v9318_v30, %v10818_v14  ;;  %v9976_v30 = vld [vmem:[%s8521_s26 + $0x340] sm:$0xff]  ;;  %v6679_v14 = vld [vmem:[%s8521_s26 + $0xa8] sm:$0xff] }
 0x566   : > { %v3348_v43 = vpop.f32.mrf.mxu3 }
 0x567   : > { %v3474_v20 = vadd.f32 %v3438_v53, %v3348_v43  ;;  %v9965_v53 = vld [vmem:[%s8521_s26 + $0x1f8] sm:$0xff] }
 0x568   : > { %v4112_v16 = vpop.f32.mrf.mxu0  ;;  %v4244_v38 = vpop.f32.mrf.mxu2 }
 0x569   : > { %3510 = vst.msk [vmem:[%s9692_s1 + $0x48] sm:$0xff] %vm1139_vm0, %v3474_v20  ;;  %v4342_v59 = vadd.f32 %v6670_v36, %v4112_v16  ;;  %v4438_v41 = vadd.f32 %v4244_v38, %v9913_v3  ;;  %v9968_v20 = vld [vmem:[%s8521_s26 + $0x1d8] sm:$0xff]  ;;  %v6675_v38 = vld [vmem:[%s7561_s14 + $0x60] sm:$0xff] }
 0x56a   : > { %v10819_v36 = vld [vmem:[#allocation22_spill] sm:$0xff] }
 0x56b   : > { %5926 = vmatmul.msk.f32.gmra.mxu0 %vm3647_vm6, %v9916_v35  ;;  %5859 = vmatmul.msk.f32.gmra.mxu3 %vm1334_vm1, %v3178_v40  ;;  %5982 = vst.msk [vmem:[%s8778_s28 + $0x88] sm:$0xff] %vm3647_vm6, %v4342_v59  ;;  %v3441_v59 = vadd.f32 %v6675_v38, %v10819_v36  ;;  %v10824_v36 = vld [vmem:[#allocation59_spill] sm:$0xff] }
 0x56c   : > { %6026 = vst.msk [vmem:[%s8778_s28 + $0x1e8] sm:$0xff] %vm3647_vm6, %v4438_v41 }
 0x56d   : > { %5971 = vmatmul.msk.f32.gmra.mxu2 %vm3647_vm6, %v9924_v50 }
 0x56e   : > { %v3351_v0 = vpop.f32.mrf.mxu3 }
 0x56f   : > { %v3475_v6 = vadd.f32 %v3439_v11, %v3351_v0  ;;  %v3181_v11 = vmul.f32 %v9391_v31, %v10820_v49  ;;  %v6678_v31 = vld [vmem:[%s7561_s14 + $0x68] sm:$0xff]  ;;  %v6682_v49 = vld [vmem:[%s8521_s26 + $0xb0] sm:$0xff] }
 0x570   : > { %v4115_v47 = vpop.f32.mrf.mxu0  ;;  %v4247_v18 = vpop.f32.mrf.mxu2 }
 0x571   : > { %3511 = vst.msk [vmem:[%s9692_s1 + $0x50] sm:$0xff] %vm1139_vm0, %v3475_v6  ;;  %v4343_v10 = vadd.f32 %v6672_v17, %v4115_v47  ;;  %v4439_v8 = vadd.f32 %v4247_v18, %v9939_v32  ;;  %v6677_v47 = vld [vmem:[%s8521_s26 + $0x200] sm:$0xff]  ;;  %v9996_v17 = vld [vmem:[%s8521_s26 + $0x348] sm:$0xff] }
 0x573   : > { %5927 = vmatmul.msk.f32.gmra.mxu0 %vm3647_vm6, %v9942_v26  ;;  %5860 = vmatmul.msk.f32.gmra.mxu3 %vm1334_vm1, %v3179_v58  ;;  %5983 = vst.msk [vmem:[%s8778_s28 + $0x90] sm:$0xff] %vm3647_vm6, %v4343_v10  ;;  %v10821_v10 = vld [vmem:[#allocation23_spill] sm:$0xff] }
 0x574   : > { %6027 = vst.msk [vmem:[%s8778_s28 + $0x1f0] sm:$0xff] %vm3647_vm6, %v4439_v8  ;;  %v3442_v8 = vadd.f32 %v6678_v31, %v10821_v10  ;;  %v10826_v31 = vld [vmem:[#allocation60_spill] sm:$0xff] }
 0x575   : > { %5972 = vmatmul.msk.f32.gmra.mxu2 %vm3647_vm6, %v9950_v52  ;;  %v3184_v10 = vmul.f32 %v9544_v1, %v10826_v31  ;;  %v6687_v1 = vld [vmem:[%s7561_s14 + $0x80] sm:$0xff] }
 0x576   : > { %v3354_v23 = vpop.f32.mrf.mxu3 }
 0x577   : > { %v3476_v33 = vadd.f32 %v3440_v2, %v3354_v23  ;;  %v3182_v2 = vmul.f32 %v9475_v5, %v10822_v22  ;;  %v6681_v5 = vld [vmem:[%s7561_s14 + $0x70] sm:$0xff] }
 0x578   : > { %v4118_v62 = vpop.f32.mrf.mxu0  ;;  %v4250_v43 = vpop.f32.mrf.mxu2 }
 0x579   : > { %3512 = vst.msk [vmem:[%s9692_s1 + $0x58] sm:$0xff] %vm1139_vm0, %v3476_v33  ;;  %v4344_v40 = vadd.f32 %v6674_v42, %v4118_v62  ;;  %v4440_v16 = vadd.f32 %v4250_v43, %v9965_v53  ;;  %v6680_v62 = vld [vmem:[%s8521_s26 + $0x208] sm:$0xff]  ;;  %v10016_v42 = vld [vmem:[%s8521_s26 + $0x350] sm:$0xff] }
 0x57b   : > { %5928 = vmatmul.msk.f32.gmra.mxu0 %vm3647_vm6, %v9968_v20  ;;  %5861 = vmatmul.msk.f32.gmra.mxu3 %vm1334_vm1, %v3180_v24  ;;  %5984 = vst.msk [vmem:[%s8778_s28 + $0x98] sm:$0xff] %vm3647_vm6, %v4344_v40  ;;  %v10823_v40 = vld [vmem:[#allocation24_spill] sm:$0xff] }
 0x57c   : > { %6028 = vst.msk [vmem:[%s8778_s28 + $0x1f8] sm:$0xff] %vm3647_vm6, %v4440_v16  ;;  %v3443_v16 = vadd.f32 %v6681_v5, %v10823_v40 }
 0x57d   : > { %5973 = vmatmul.msk.f32.gmra.mxu2 %vm3647_vm6, %v9976_v30 }
 0x57e   : > { %v3357_v41 = vpop.f32.mrf.mxu3 }
 0x57f   : > { %v3477_v25 = vadd.f32 %v3441_v59, %v3357_v41  ;;  %v3183_v59 = vmul.f32 %v9500_v48, %v10824_v36  ;;  %v6684_v48 = vld [vmem:[%s7561_s14 + $0x78] sm:$0xff]  ;;  %v6689_v36 = vld [vmem:[%s7561_s14 + $0x88] sm:$0xff] }
 0x580   : > { %v4121_v0 = vpop.f32.mrf.mxu0  ;;  %v4253_v6 = vpop.f32.mrf.mxu2 }
 0x581   : > { %3513 = vst.msk [vmem:[%s9692_s1 + $0x60] sm:$0xff] %vm1139_vm0, %v3477_v25  ;;  %v4345_v58 = vadd.f32 %v6676_v39, %v4121_v0  ;;  %v4441_v18 = vadd.f32 %v6677_v47, %v4253_v6  ;;  %v6683_v0 = vld [vmem:[%s8521_s26 + $0x210] sm:$0xff]  ;;  %v10036_v39 = vld [vmem:[%s8521_s26 + $0x358] sm:$0xff] }
 0x583   : > { %5929 = vmatmul.msk.f32.gmra.mxu0 %vm3647_vm6, %v9887_v46  ;;  %5862 = vmatmul.msk.f32.gmra.mxu3 %vm1334_vm1, %v3181_v11  ;;  %5985 = vst.msk [vmem:[%s8778_s28 + $0xa0] sm:$0xff] %vm3647_vm6, %v4345_v58  ;;  %v10825_v58 = vld [vmem:[#allocation25_spill] sm:$0xff] }
 0x584   : > { %6029 = vst.msk [vmem:[%s8778_s28 + $0x200] sm:$0xff] %vm3647_vm6, %v4441_v18  ;;  %v3444_v47 = vadd.f32 %v6684_v48, %v10825_v58  ;;  %v6690_v48 = vld [vmem:[%s8521_s26 + $0x228] sm:$0xff] }
 0x585   : > { %5974 = vmatmul.msk.f32.gmra.mxu2 %vm3647_vm6, %v9996_v17 }
 0x586   : > { %v3360_v9 = vpop.f32.mrf.mxu3 }
 0x587   : > { %v3478_v46 = vadd.f32 %v3442_v8, %v3360_v9 }
 0x588   : > { %v4124_v23 = vpop.f32.mrf.mxu0  ;;  %v4256_v33 = vpop.f32.mrf.mxu2 }
 0x589   : > { %3514 = vst.msk [vmem:[%s9692_s1 + $0x68] sm:$0xff] %vm1139_vm0, %v3478_v46  ;;  %v4346_v24 = vadd.f32 %v6679_v14, %v4124_v23  ;;  %v4442_v43 = vadd.f32 %v6680_v62, %v4256_v33  ;;  %v6685_v46 = vld [vmem:[%s8521_s26 + $0xb8] sm:$0xff]  ;;  %v10827_v33 = vld [vmem:[#allocation26_spill] sm:$0xff] }
 0x58a   : > { %v3445_v14 = vadd.f32 %v6687_v1, %v10827_v33  ;;  %v10833_v1 = vld [vmem:[#allocation29_spill] sm:$0xff] }
 0x58b   : > { %5930 = vmatmul.msk.f32.gmra.mxu0 %vm3647_vm6, %v9913_v3  ;;  %5863 = vmatmul.msk.f32.gmra.mxu3 %vm1334_vm1, %v3182_v2  ;;  %5986 = vst.msk [vmem:[%s8778_s28 + $0xa8] sm:$0xff] %vm3647_vm6, %v4346_v24  ;;  %v6686_v2 = vld [vmem:[%s8521_s26 + $0x218] sm:$0xff] }
 0x58c   : > { %6030 = vst.msk [vmem:[%s8778_s28 + $0x208] sm:$0xff] %vm3647_vm6, %v4442_v43  ;;  %v10828_v43 = vld [vmem:[#allocation61_spill] sm:$0xff] }
 0x58d   : > { %5975 = vmatmul.msk.f32.gmra.mxu2 %vm3647_vm6, %v10016_v42  ;;  %v3185_v5 = vmul.f32 %v9570_v37, %v10828_v43  ;;  %v6694_v43 = vld [vmem:[%s8521_s26 + $0x238] sm:$0xff] }
 0x58e   : > { %v3363_v38 = vpop.f32.mrf.mxu3 }
 0x58f   : > { %v3479_v3 = vadd.f32 %v3443_v16, %v3363_v38  ;;  %v6688_v38 = vld [vmem:[%s8521_s26 + $0x220] sm:$0xff] }
 0x590   : > { %v4127_v41 = vpop.f32.mrf.mxu0  ;;  %v4259_v25 = vpop.f32.mrf.mxu2 }
 0x591   : > { %3515 = vst.msk [vmem:[%s9692_s1 + $0x70] sm:$0xff] %vm1139_vm0, %v3479_v3  ;;  %v4347_v11 = vadd.f32 %v6682_v49, %v4127_v41  ;;  %v4443_v6 = vadd.f32 %v6683_v0, %v4259_v25  ;;  %v10830_v49 = vld [vmem:[#allocation63_spill] sm:$0xff] }
 0x593   : > { %5931 = vmatmul.msk.f32.gmra.mxu0 %vm3647_vm6, %v9939_v32  ;;  %5864 = vmatmul.msk.f32.gmra.mxu3 %vm1334_vm1, %v3183_v59  ;;  %5987 = vst.msk [vmem:[%s8778_s28 + $0xb0] sm:$0xff] %vm3647_vm6, %v4347_v11  ;;  %v10829_v59 = vld [vmem:[#allocation27_spill] sm:$0xff] }
 0x594   : > { %6031 = vst.msk [vmem:[%s8778_s28 + $0x210] sm:$0xff] %vm3647_vm6, %v4443_v6  ;;  %v3446_v41 = vadd.f32 %v6689_v36, %v10829_v59 }
 0x595   : > { %5976 = vmatmul.msk.f32.gmra.mxu2 %vm3647_vm6, %v10036_v39 }
 0x596   : > { %v3366_v18 = vpop.f32.mrf.mxu3 }
 0x597   : > { %v3480_v32 = vadd.f32 %v3444_v47, %v3366_v18  ;;  %v6691_v47 = vld [vmem:[%s7561_s14 + $0x90] sm:$0xff] }
 0x598   : > { %v4130_v8 = vpop.f32.mrf.mxu0  ;;  %v4262_v9 = vpop.f32.mrf.mxu2  ;;  %v10831_v18 = vld [vmem:[#allocation28_spill] sm:$0xff] }
 0x599   : > { %3516 = vst.msk [vmem:[%s9692_s1 + $0x78] sm:$0xff] %vm1139_vm0, %v3480_v32  ;;  %v4348_v22 = vadd.f32 %v6685_v46, %v4130_v8  ;;  %v4444_v23 = vadd.f32 %v6686_v2, %v4262_v9  ;;  %v3447_v32 = vadd.f32 %v6691_v47, %v10831_v18 }
 0x59b   : > { %5932 = vmatmul.msk.f32.gmra.mxu0 %vm3647_vm6, %v9965_v53  ;;  %5865 = vmatmul.msk.f32.gmra.mxu3 %vm1334_vm1, %v3184_v10  ;;  %5988 = vst.msk [vmem:[%s8778_s28 + $0xb8] sm:$0xff] %vm3647_vm6, %v4348_v22  ;;  %v10832_v10 = vld [vmem:[#allocation65_spill] sm:$0xff]  ;;  %v6692_v22 = vld [vmem:[%s8521_s26 + $0x230] sm:$0xff]  ;;  %s6110_s26 = smul.u32 (%p7182_p5), 96, %s7163_s21 }
 0x59c   : > { %6032 = vst.msk [vmem:[%s8778_s28 + $0x218] sm:$0xff] %vm3647_vm6, %v4444_v23  ;;  %v6693_v23 = vld [vmem:[%s7561_s14 + $0x98] sm:$0xff] }
 0x59d   : > { %v3448_v33 = vadd.f32 %v6693_v23, %v10833_v1  ;;  %v6699_v23 = vld [vmem:[%s7561_s14 + $0xc0] sm:$0xff]  ;;  %s10251_s18 = scalar_lea.vmem (%p7182_p5), %s10851_s20, %s6110_s26  }
 0x59e   : > { %v3369_v24 = vpop.f32.mrf.mxu3  ;;  %v10838_v1 = vld [vmem:[#allocation34_spill] sm:$0xff] }
 0x59f   : > { %v3481_v62 = vadd.f32 %v3445_v14, %v3369_v24 }
 0x5a0   : > { %v4133_v53 = vpop.f32.mrf.mxu0  ;;  %v4265_v40 = vpop.f32.mrf.mxu2 }
 0x5a1   : > { %3517 = vst.msk [vmem:[%s9692_s1 + $0x80] sm:$0xff] %vm1139_vm0, %v3481_v62  ;;  %v4412_v16 = vadd.f32 %v4133_v53, %v9712_v21  ;;  %v4445_v3 = vadd.f32 %v6688_v38, %v4265_v40  ;;  %v3186_v21 = vmul.f32 %v9594_v51, %v10830_v49  ;;  %v6695_v53 = vld [vmem:[%s7561_s14 + $0xa0] sm:$0xff] }
 0x5a2   : > { %v10834_v40 = vld [vmem:[#allocation30_spill] sm:$0xff] }
 0x5a3   : > { %5866 = vmatmul.msk.f32.gmra.mxu3 %vm1334_vm1, %v3185_v5  ;;  %6013 = vst.msk [vmem:[%s8778_s28 + $0x180] sm:$0xff] %vm3647_vm6, %v4412_v16  ;;  %v3449_v16 = vadd.f32 %v6695_v53, %v10834_v40 }
 0x5a4   : > { %6033 = vst.msk [vmem:[%s8778_s28 + $0x220] sm:$0xff] %vm3647_vm6, %v4445_v3 }
 0x5a6   : > { %v3372_v37 = vpop.f32.mrf.mxu3 }
 0x5a7   : > { %v3482_v25 = vadd.f32 %v3446_v41, %v3372_v37  ;;  %v6696_v37 = vld [vmem:[%s7561_s14 + $0xa8] sm:$0xff] }
 0x5a8   : > { %v4136_v11 = vpop.f32.mrf.mxu0  ;;  %v4268_v0 = vpop.f32.mrf.mxu2 }
 0x5a9   : > { %3518 = vst.msk [vmem:[%s9692_s1 + $0x88] sm:$0xff] %vm1139_vm0, %v3482_v25  ;;  %v4413_v6 = vadd.f32 %v4136_v11, %v9730_v34  ;;  %v4446_v58 = vadd.f32 %v6690_v48, %v4268_v0  ;;  %v3187_v34 = vmul.f32 %v9615_v44, %v10832_v10  ;;  %v10835_v25 = vld [vmem:[#allocation31_spill] sm:$0xff]  ;;  %v6697_v48 = vld [vmem:[%s7561_s14 + $0xb0] sm:$0xff]  ;;  %v6698_v10 = vld [vmem:[%s7561_s14 + $0xb8] sm:$0xff] }
 0x5aa   : > { %v3450_v49 = vadd.f32 %v6696_v37, %v10835_v25 }
 0x5ab   : > { %5867 = vmatmul.msk.f32.gmra.mxu3 %vm1334_vm1, %v3186_v21  ;;  %6014 = vst.msk [vmem:[%s8778_s28 + $0x188] sm:$0xff] %vm3647_vm6, %v4413_v6 }
 0x5ac   : > { %6034 = vst.msk [vmem:[%s8778_s28 + $0x228] sm:$0xff] %vm3647_vm6, %v4446_v58  ;;  %v10836_v58 = vld [vmem:[#allocation32_spill] sm:$0xff] }
 0x5ad   : > { %v3451_v47 = vadd.f32 %v6697_v48, %v10836_v58  ;;  %v6703_v48 = vld [vmem:[%s7561_s14 + $0xe0] sm:$0xff] }
 0x5ae   : > { %v3375_v51 = vpop.f32.mrf.mxu3  ;;  %v10842_v58 = vld [vmem:[#allocation38_spill] sm:$0xff] }
 0x5af   : > { %v3483_v31 = vadd.f32 %v3447_v32, %v3375_v51 }
 0x5b0   : > { %v4139_v8 = vpop.f32.mrf.mxu0  ;;  %v4271_v9 = vpop.f32.mrf.mxu2 }
 0x5b1   : > { %3519 = vst.msk [vmem:[%s9692_s1 + $0x90] sm:$0xff] %vm1139_vm0, %v3483_v31  ;;  %v4414_v46 = vadd.f32 %v4139_v8, %v9752_v28  ;;  %v4447_v2 = vadd.f32 %v6692_v22, %v4271_v9 }
 0x5b3   : > { %5868 = vmatmul.msk.f32.gmra.mxu3 %vm1334_vm1, %v3187_v34  ;;  %6015 = vst.msk [vmem:[%s8778_s28 + $0x190] sm:$0xff] %vm3647_vm6, %v4414_v46  ;;  %v10837_v34 = vld [vmem:[#allocation33_spill] sm:$0xff] }
 0x5b4   : > { %6035 = vst.msk [vmem:[%s8778_s28 + $0x230] sm:$0xff] %vm3647_vm6, %v4447_v2  ;;  %v3452_v8 = vadd.f32 %v6698_v10, %v10837_v34 }
 0x5b6   : > { %v3378_v44 = vpop.f32.mrf.mxu3 }
 0x5b7   : > { %v3484_v14 = vadd.f32 %v3448_v33, %v3378_v44  ;;  %v3453_v33 = vadd.f32 %v6699_v23, %v10838_v1 }
 0x5b8   : > { %v4142_v28 = vpop.f32.mrf.mxu0  ;;  %v4274_v24 = vpop.f32.mrf.mxu2 }
 0x5b9   : > { %3520 = vst.msk [vmem:[%s9692_s1 + $0x98] sm:$0xff] %vm1139_vm0, %v3484_v14  ;;  %v4415_v62 = vadd.f32 %v4142_v28, %v9772_v60  ;;  %v4448_v5 = vadd.f32 %v6694_v43, %v4274_v24  ;;  %v10839_v43 = vld [vmem:[#allocation35_spill] sm:$0xff] }
 0x5bb   : > { %6016 = vst.msk [vmem:[%s8778_s28 + $0x198] sm:$0xff] %vm3647_vm6, %v4415_v62  ;;  %v6700_v62 = vld [vmem:[%s7561_s14 + $0xc8] sm:$0xff] }
 0x5bc   : > { %6036 = vst.msk [vmem:[%s8778_s28 + $0x238] sm:$0xff] %vm3647_vm6, %v4448_v5  ;;  %v3454_v5 = vadd.f32 %v6700_v62, %v10839_v43  ;;  %v6707_v43 = vld [vmem:[%s7561_s14 + $0x100] sm:$0xff] }
 0x5be   : > { %v3381_v38 = vpop.f32.mrf.mxu3 }
 0x5bf   : > { %v3485_v3 = vadd.f32 %v3449_v16, %v3381_v38 }
 0x5c0   : > { %v4145_v36 = vpop.f32.mrf.mxu0  ;;  %v4277_v59 = vpop.f32.mrf.mxu2 }
 0x5c1   : > { %3521 = vst.msk [vmem:[%s9692_s1 + $0xa0] sm:$0xff] %vm1139_vm0, %v3485_v3  ;;  %v4416_v60 = vadd.f32 %v4145_v36, %v9795_v55  ;;  %v4512_v41 = vadd.f32 %v4277_v59, %v9780_v12  ;;  %v6701_v3 = vld [vmem:[%s7561_s14 + $0xd0] sm:$0xff] }
 0x5c2   : > { %v10840_v36 = vld [vmem:[#allocation36_spill] sm:$0xff] }
 0x5c3   : > { %6017 = vst.msk [vmem:[%s8778_s28 + $0x1a0] sm:$0xff] %vm3647_vm6, %v4416_v60  ;;  %v3455_v59 = vadd.f32 %v6701_v3, %v10840_v36  ;;  %v10848_v36 = vld [vmem:[#allocation44_spill] sm:$0xff] }
 0x5c4   : > { %6061 = vst.msk [vmem:[%s8778_s28 + $0x300] sm:$0xff] %vm3647_vm6, %v4512_v41 }
 0x5c6   : > { %v3384_v21 = vpop.f32.mrf.mxu3 }
 0x5c7   : > { %v3486_v11 = vadd.f32 %v3450_v49, %v3384_v21  ;;  %v6702_v49 = vld [vmem:[%s7561_s14 + $0xd8] sm:$0xff] }
 0x5c8   : > { %v4148_v0 = vpop.f32.mrf.mxu0  ;;  %v4280_v6 = vpop.f32.mrf.mxu2  ;;  %v10841_v21 = vld [vmem:[#allocation37_spill] sm:$0xff] }
 0x5c9   : > { %3522 = vst.msk [vmem:[%s9692_s1 + $0xa8] sm:$0xff] %vm1139_vm0, %v3486_v11  ;;  %v4417_v55 = vadd.f32 %v4148_v0, %v9818_v45  ;;  %v4513_v12 = vadd.f32 %v4280_v6, %v9803_v4  ;;  %v3456_v11 = vadd.f32 %v6702_v49, %v10841_v21 }
 0x5cb   : > { %6018 = vst.msk [vmem:[%s8778_s28 + $0x1a8] sm:$0xff] %vm3647_vm6, %v4417_v55 }
 0x5cc   : > { %6062 = vst.msk [vmem:[%s8778_s28 + $0x308] sm:$0xff] %vm3647_vm6, %v4513_v12 }
 0x5ce   : > { %v3387_v18 = vpop.f32.mrf.mxu3 }
 0x5cf   : > { %v3487_v32 = vadd.f32 %v3451_v47, %v3387_v18  ;;  %v3457_v47 = vadd.f32 %v6703_v48, %v10842_v58 }
 0x5d0   : > { %v4151_v51 = vpop.f32.mrf.mxu0  ;;  %v4283_v31 = vpop.f32.mrf.mxu2 }
 0x5d1   : > { %3523 = vst.msk [vmem:[%s9692_s1 + $0xb0] sm:$0xff] %vm1139_vm0, %v3487_v32  ;;  %v4418_v45 = vadd.f32 %v4151_v51, %v9841_v13  ;;  %v4514_v4 = vadd.f32 %v4283_v31, %v9826_v27 }
 0x5d3   : > { %6019 = vst.msk [vmem:[%s8778_s28 + $0x1b0] sm:$0xff] %vm3647_vm6, %v4418_v45  ;;  %v6704_v45 = vld [vmem:[%s7561_s14 + $0xe8] sm:$0xff] }
 0x5d4   : > { %6063 = vst.msk [vmem:[%s8778_s28 + $0x310] sm:$0xff] %vm3647_vm6, %v4514_v4  ;;  %v10843_v4 = vld [vmem:[#allocation39_spill] sm:$0xff] }
 0x5d5   : > { %v3458_v10 = vadd.f32 %v6704_v45, %v10843_v4 }
 0x5d6   : > { %v3390_v9 = vpop.f32.mrf.mxu3 }
 0x5d7   : > { %v3488_v46 = vadd.f32 %v3452_v8, %v3390_v9 }
 0x5d8   : > { %v4154_v22 = vpop.f32.mrf.mxu0  ;;  %v4286_v2 = vpop.f32.mrf.mxu2 }
 0x5d9   : > { %3524 = vst.msk [vmem:[%s9692_s1 + $0xb8] sm:$0xff] %vm1139_vm0, %v3488_v46  ;;  %v4419_v13 = vadd.f32 %v4154_v22, %v9864_v57  ;;  %v4515_v27 = vadd.f32 %v4286_v2, %v9849_v56  ;;  %v6705_v22 = vld [vmem:[%s7561_s14 + $0xf0] sm:$0xff] }
 0x5da   : > { %v10844_v2 = vld [vmem:[#allocation40_spill] sm:$0xff] }
 0x5db   : > { %6020 = vst.msk [vmem:[%s8778_s28 + $0x1b8] sm:$0xff] %vm3647_vm6, %v4419_v13  ;;  %v3459_v13 = vadd.f32 %v6705_v22, %v10844_v2 }
 0x5dc   : > { %6064 = vst.msk [vmem:[%s8778_s28 + $0x318] sm:$0xff] %vm3647_vm6, %v4515_v27 }
 0x5de   : > { %v3393_v44 = vpop.f32.mrf.mxu3 }
 0x5df   : > { %v3489_v14 = vadd.f32 %v3453_v33, %v3393_v44  ;;  %v6706_v44 = vld [vmem:[%s7561_s14 + $0xf8] sm:$0xff] }
 0x5e0   : > { %v4157_v28 = vpop.f32.mrf.mxu0  ;;  %v4289_v24 = vpop.f32.mrf.mxu2 }
 0x5e1   : > { %3525 = vst.msk [vmem:[%s9692_s1 + $0xc0] sm:$0xff] %vm1139_vm0, %v3489_v14  ;;  %v4420_v57 = vadd.f32 %v4157_v28, %v9890_v7  ;;  %v4516_v56 = vadd.f32 %v4289_v24, %v9872_v19  ;;  %v10845_v14 = vld [vmem:[#allocation41_spill] sm:$0xff] }
 0x5e2   : > { %v3460_v28 = vadd.f32 %v6706_v44, %v10845_v14 }
 0x5e3   : > { %6021 = vst.msk [vmem:[%s8778_s28 + $0x1c0] sm:$0xff] %vm3647_vm6, %v4420_v57 }
 0x5e4   : > { %6065 = vst.msk [vmem:[%s8778_s28 + $0x320] sm:$0xff] %vm3647_vm6, %v4516_v56 }
 0x5e6   : > { %v3396_v53 = vpop.f32.mrf.mxu3 }
 0x5e7   : > { %v3490_v40 = vadd.f32 %v3454_v5, %v3396_v53  ;;  %v10846_v5 = vld [vmem:[#allocation42_spill] sm:$0xff] }
 0x5e8   : > { %v4160_v16 = vpop.f32.mrf.mxu0  ;;  %v4292_v38 = vpop.f32.mrf.mxu2  ;;  %v3461_v53 = vadd.f32 %v6707_v43, %v10846_v5 }
 0x5e9   : > { %3526 = vst.msk [vmem:[%s9692_s1 + $0xc8] sm:$0xff] %vm1139_vm0, %v3490_v40  ;;  %v4421_v7 = vadd.f32 %v4160_v16, %v9916_v35  ;;  %v4517_v19 = vadd.f32 %v4292_v38, %v9898_v15  ;;  %v6708_v38 = vld [vmem:[%s7561_s14 + $0x108] sm:$0xff] }
 0x5eb   : > { %6022 = vst.msk [vmem:[%s8778_s28 + $0x1c8] sm:$0xff] %vm3647_vm6, %v4421_v7  ;;  %v10847_v7 = vld [vmem:[#allocation43_spill] sm:$0xff] }
 0x5ec   : > { %6066 = vst.msk [vmem:[%s8778_s28 + $0x328] sm:$0xff] %vm3647_vm6, %v4517_v19  ;;  %v3462_v19 = vadd.f32 %v6708_v38, %v10847_v7 }
 0x5ee   : > { %v3399_v60 = vpop.f32.mrf.mxu3 }
 0x5ef   : > { %v3491_v41 = vadd.f32 %v3455_v59, %v3399_v60 }
 0x5f0   : > { %v4163_v37 = vpop.f32.mrf.mxu0  ;;  %v4295_v25 = vpop.f32.mrf.mxu2 }
 0x5f1   : > { %3527 = vst.msk [vmem:[%s9692_s1 + $0xd0] sm:$0xff] %vm1139_vm0, %v3491_v41  ;;  %v4422_v35 = vadd.f32 %v4163_v37, %v9942_v26  ;;  %v4518_v15 = vadd.f32 %v4295_v25, %v9924_v50  ;;  %v6710_v37 = vld [vmem:[%s7561_s14 + $0x118] sm:$0xff] }
 0x5f2   : > { %v10849_v25 = vld [vmem:[#allocation45_spill] sm:$0xff] }
 0x5f3   : > { %6023 = vst.msk [vmem:[%s8778_s28 + $0x1d0] sm:$0xff] %vm3647_vm6, %v4422_v35  ;;  %v3464_v35 = vadd.f32 %v6710_v37, %v10849_v25 }
 0x5f4   : > { %6067 = vst.msk [vmem:[%s8778_s28 + $0x330] sm:$0xff] %vm3647_vm6, %v4518_v15 }
 0x5f6   : > { %v3402_v0 = vpop.f32.mrf.mxu3 }
 0x5f7   : > { %v3492_v6 = vadd.f32 %v3456_v11, %v3402_v0 }
 0x5f8   : > { %v4166_v55 = vpop.f32.mrf.mxu0  ;;  %v4298_v12 = vpop.f32.mrf.mxu2 }
 0x5f9   : > { %3528 = vst.msk [vmem:[%s9692_s1 + $0xd8] sm:$0xff] %vm1139_vm0, %v3492_v6  ;;  %v4423_v26 = vadd.f32 %v4166_v55, %v9968_v20  ;;  %v4519_v50 = vadd.f32 %v4298_v12, %v9950_v52 }
 0x5fb   : > { %6024 = vst.msk [vmem:[%s8778_s28 + $0x1d8] sm:$0xff] %vm3647_vm6, %v4423_v26 }
 0x5fc   : > { %6068 = vst.msk [vmem:[%s8778_s28 + $0x338] sm:$0xff] %vm3647_vm6, %v4519_v50 }
 0x5fe   : > { %v3405_v18 = vpop.f32.mrf.mxu3 }
 0x5ff   : > { %v3493_v32 = vadd.f32 %v3457_v47, %v3405_v18 }
 0x600   : > { %v4169_v51 = vpop.f32.mrf.mxu0  ;;  %v4301_v31 = vpop.f32.mrf.mxu2 }
 0x601   : > { %3529 = vst.msk [vmem:[%s9692_s1 + $0xe0] sm:$0xff] %vm1139_vm0, %v3493_v32  ;;  %v4487_v20 = vadd.f32 %v4169_v51, %v9562_v63  ;;  %v4520_v52 = vadd.f32 %v4301_v31, %v9976_v30 }
 0x603   : > { %6049 = vst.msk [vmem:[%s8778_s28 + $0x2a0] sm:$0xff] %vm3647_vm6, %v4487_v20 }
 0x604   : > { %6069 = vst.msk [vmem:[%s8778_s28 + $0x340] sm:$0xff] %vm3647_vm6, %v4520_v52 }
 0x606   : > { %v3408_v34 = vpop.f32.mrf.mxu3 }
 0x607   : > { %v3494_v8 = vadd.f32 %v3458_v10, %v3408_v34 }
 0x608   : > { %v4172_v9 = vpop.f32.mrf.mxu0  ;;  %v4304_v46 = vpop.f32.mrf.mxu2 }
 0x609   : > { %3530 = vst.msk [vmem:[%s9692_s1 + $0xe8] sm:$0xff] %vm1139_vm0, %v3494_v8  ;;  %v4488_v63 = vadd.f32 %v4172_v9, %v9587_v29  ;;  %v4521_v30 = vadd.f32 %v4304_v46, %v9996_v17 }
 0x60b   : > { %6050 = vst.msk [vmem:[%s8778_s28 + $0x2a8] sm:$0xff] %vm3647_vm6, %v4488_v63 }
 0x60c   : > { %6070 = vst.msk [vmem:[%s8778_s28 + $0x348] sm:$0xff] %vm3647_vm6, %v4521_v30 }
 0x60e   : > { %v3411_v27 = vpop.f32.mrf.mxu3 }
 0x60f   : > { %v3495_v23 = vadd.f32 %v3459_v13, %v3411_v27 }
 0x610   : > { %v4175_v1 = vpop.f32.mrf.mxu0  ;;  %v4307_v33 = vpop.f32.mrf.mxu2 }
 0x611   : > { %3531 = vst.msk [vmem:[%s9692_s1 + $0xf0] sm:$0xff] %vm1139_vm0, %v3495_v23  ;;  %v4489_v29 = vadd.f32 %v4175_v1, %v9608_v54  ;;  %v4522_v17 = vadd.f32 %v4307_v33, %v10016_v42 }
 0x613   : > { %6051 = vst.msk [vmem:[%s8778_s28 + $0x2b0] sm:$0xff] %vm3647_vm6, %v4489_v29 }
 0x614   : > { %6071 = vst.msk [vmem:[%s8778_s28 + $0x350] sm:$0xff] %vm3647_vm6, %v4522_v17 }
 0x616   : > { %v3414_v24 = vpop.f32.mrf.mxu3 }
 0x617   : > { %v3496_v57 = vadd.f32 %v3460_v28, %v3414_v24 }
 0x618   : > { %v4178_v56 = vpop.f32.mrf.mxu0  ;;  %v4310_v54 = vpop.f32.mrf.mxu2 }
 0x619   : > { %3532 = vst.msk [vmem:[%s9692_s1 + $0xf8] sm:$0xff] %vm1139_vm0, %v3496_v57  ;;  %v4490_v62 = vadd.f32 %v4178_v56, %v9629_v61  ;;  %v4523_v42 = vadd.f32 %v4310_v54, %v10036_v39  ;;  %v6709_v39 = vld [vmem:[%s7561_s14 + $0x110] sm:$0xff] }
 0x61a   : > { %v3463_v59 = vadd.f32 %v6709_v39, %v10848_v36 }
 0x61b   : > { %6052 = vst.msk [vmem:[%s8778_s28 + $0x2b8] sm:$0xff] %vm3647_vm6, %v4490_v62 }
 0x61c   : > { %6072 = vst.msk [vmem:[%s8778_s28 + $0x358] sm:$0xff] %vm3647_vm6, %v4523_v42 }
 0x61e   : > { %v3417_v40 = vpop.f32.mrf.mxu3 }
 0x61f   : > { %v3497_v16 = vadd.f32 %v3461_v53, %v3417_v40 }
 0x621   : > { %3533 = vst.msk [vmem:[%s9692_s1 + $0x100] sm:$0xff] %vm1139_vm0, %v3497_v16 }
 0x626   : > { %v3420_v61 = vpop.f32.mrf.mxu3 }
 0x627   : > { %v3498_v3 = vadd.f32 %v3462_v19, %v3420_v61 }
 0x629   : > { %3534 = vst.msk [vmem:[%s9692_s1 + $0x108] sm:$0xff] %vm1139_vm0, %v3498_v3 }
 0x62e   : > { %v3423_v60 = vpop.f32.mrf.mxu3 }
 0x62f   : > { %v3499_v41 = vadd.f32 %v3463_v59, %v3423_v60 }
 0x631   : > { %3535 = vst.msk [vmem:[%s9692_s1 + $0x110] sm:$0xff] %vm1139_vm0, %v3499_v41 }
 0x635   : > { %4551 = sbr.rel (!%p7182_p5) target bundleno = 1653 (0x675), region = 180 }
 0x636   : > { %v3426_v15 = vpop.f32.mrf.mxu3 }
 0x637   : > { %v3500_v49 = vadd.f32 %v3464_v35, %v3426_v15 }
 0x639   : > { %3536 = vst.msk [vmem:[%s9692_s1 + $0x118] sm:$0xff] %vm1139_vm0, %v3500_v49 }
 0x63a   : > { %s10893_s15 = smov (!%p4554_p0, %s4553_s15), 12 }
 0x63b   : > { %s6073_s14 = sshll.u32 %s10893_s15, 3 }
 0x63c   : > { %p6076_p1 = scmp.eq.s32.totalorder %s6073_s14, 0 }
 0x63d   : > { %6711 = sdivrem.u32 (!%p6076_p1), %s10893_s15, 12 }
 0x63e   : > { %4562 = sbr.rel (%p6076_p1) target bundleno = 1653 (0x675), region = 184 }
 0x646   : > { %s10257_s11 = spop.drf %6711 }
 0x647   : > { %s6713_s25 = spop.drf %6711  ;;  %p6077_p2 = scmp.le.s32.totalorder %s10257_s11, 0 }
 0x648   : > { %s10852_s27 = smov (!%p6077_p2), %s10251_s18  ;;  %s10853_s23 = smov (!%p6077_p2), %s8030_s30 }
 0x649   : > { %5497 = sbr.rel (%p6077_p2) target bundleno = 1627 (0x65b), region = 488  ;;  %s10266_s29 = smov (!%p6077_p2), 0  }
 0x64a   : > { %s10268_s24 = smov (!%p6077_p2), 0  }
 0x64e LB: >> { %v4649_v21 = vld [vmem:[%s6977_s23] sm:$0xff]  ;;  %v4651_v11 = vld [vmem:[%s6977_s23 + $0x8] sm:$0xff]  ;;  %v4653_v0 = vld [vmem:[%s6977_s23 + $0x10] sm:$0xff]  ;;  %s4673_s26 = sadd.s32 1, %s6981_s29  ;;  %s4643_s24 = sadd.s32 1, %s6985_s24   ;;  %s6985_s24 = sphi %s10268_s24, %s4643_s24   ;;  %s6981_s29 = sphi %s10266_s29, %s10856_s29   ;;  %s6977_s23 = sphi %s10853_s23, %s10855_s23   ;;  %s6973_s27 = sphi %s10852_s27, %s10854_s27  }
 0x64f   : >> { %4650 = vst [vmem:[%s6973_s27] sm:$0xff] %v4649_v21  ;;  %v4655_v6 = vld [vmem:[%s6977_s23 + $0x18] sm:$0xff]  ;;  %p4674_p3 = scmp.ge.s32.totalorder %s4673_s26, %s10257_s11  ;;  %v4657_v55 = vld [vmem:[%s6977_s23 + $0x20] sm:$0xff]  ;;  %v4659_v12 = vld [vmem:[%s6977_s23 + $0x28] sm:$0xff]  ;;  %p4642_p4 = scmp.ge.s32.totalorder %s4643_s24, %s10257_s11 }
 0x650   : >> { %4652 = vst [vmem:[%s6973_s27 + $0x8] sm:$0xff] %v4651_v11  ;;  %v4661_v26 = vld [vmem:[%s6977_s23 + $0x30] sm:$0xff]  ;;  %v4663_v50 = vld [vmem:[%s6977_s23 + $0x38] sm:$0xff]  ;;  %v4665_v48 = vld [vmem:[%s6977_s23 + $0x40] sm:$0xff] }
 0x651   : >> { %4654 = vst [vmem:[%s6973_s27 + $0x10] sm:$0xff] %v4653_v0  ;;  %s10895_s26 = smov (%p4674_p3, %s4673_s26), 0  ;;  %v4667_v58 = vld [vmem:[%s6977_s23 + $0x48] sm:$0xff]  ;;  %v4669_v47 = vld [vmem:[%s6977_s23 + $0x50] sm:$0xff]  ;;  %v4671_v18 = vld [vmem:[%s6977_s23 + $0x58] sm:$0xff] }
 0x652   : >> { %4656 = vst [vmem:[%s6973_s27 + $0x18] sm:$0xff] %v4655_v6  ;;  %s4676_s22 = smul.u32 96, %s10895_s26  ;;  %s10856_s29 = smov %s10895_s26 }
 0x653   : >> { %4658 = vst [vmem:[%s6973_s27 + $0x20] sm:$0xff] %v4657_v55 }
 0x654   : >> { %4660 = vst [vmem:[%s6973_s27 + $0x28] sm:$0xff] %v4659_v12  ;;  %s4678_s17 = scalar_lea.vmem %s8030_s30, %s4676_s22 [#allocation4]   ;;  %s4679_s20 = scalar_lea.vmem %s10251_s18, %s4676_s22  }
 0x655   : >> { %4662 = vst [vmem:[%s6973_s27 + $0x30] sm:$0xff] %v4661_v26  ;;  %s10855_s23 = smov %s4678_s17 }
 0x656   : >> { %4664 = vst [vmem:[%s6973_s27 + $0x38] sm:$0xff] %v4663_v50  ;;  %4645 = sbr.rel (!%p4642_p4) target bundleno = 1614 (0x64e), region = 494 }
 0x657   : >> { %4666 = vst [vmem:[%s6973_s27 + $0x40] sm:$0xff] %v4665_v48 }
 0x658   : >> { %4668 = vst [vmem:[%s6973_s27 + $0x48] sm:$0xff] %v4667_v58 }
 0x659   : >> { %4670 = vst [vmem:[%s6973_s27 + $0x50] sm:$0xff] %v4669_v47 }
 0x65a   : >> { %4672 = vst [vmem:[%s6973_s27 + $0x58] sm:$0xff] %v4671_v18  ;;  %s10854_s27 = smov %s4679_s20 }
 0x65b PF: > { %6714 = sdivrem.u32 %s10893_s15, 12 }
 0x65c   : > { %s6078_s14 = smul.u32 96, %s10257_s11 }
 0x65e   : > { %s10306_s25 = scalar_lea.vmem %s8030_s30, %s6078_s14 [#allocation4]   ;;  %s4686_s22 = scalar_lea.vmem %s10251_s18, %s6078_s14  }
 0x664   : > { %s6715_s0 = spop.drf %6714 }
 0x665   : > { %s6716_s2 = spop.drf %6714 }
 0x666   : > { %p6080_p6 = scmp.le.s32.totalorder %s6716_s2, 0 }
 0x667   : > { %s6987_s17 = smov (!%p6080_p6), %s4686_s22   ;;  %s6991_s26 = smov (!%p6080_p6), %s10306_s25  }
 0x668   : > { %5511 = sbr.rel (%p6080_p6) target bundleno = 1653 (0x675), region = 499  ;;  %s6995_s20 = smov (!%p6080_p6), 0  }
 0x669   : > { %s6999_s24 = smov (!%p6080_p6), 0  }
 0x66d LB: >> { %v4696_v32 = vld [vmem:[%s6993_s26] sm:$0xff]  ;;  %s4698_s30 = sadd.s32 1, %s6997_s20  ;;  %s4690_s24 = sadd.s32 1, %s7001_s24   ;;  %s7001_s24 = sphi %s6999_s24, %s4690_s24   ;;  %s6997_s20 = sphi %s6995_s20, %s6996_s20   ;;  %s6993_s26 = sphi %s6991_s26, %s4703_s26   ;;  %s6989_s17 = sphi %s6987_s17, %s4704_s17  }
 0x66e   : >> { %4697 = vst [vmem:[%s6989_s17] sm:$0xff] %v4696_v32  ;;  %p4699_p7 = scmp.ge.s32.totalorder %s4698_s30, %s6716_s2  ;;  %p4689_p8 = scmp.ge.s32.totalorder %s4690_s24, %s6716_s2 }
 0x670   : >> { %s10897_s30 = smov (%p4699_p7, %s4698_s30), 0  ;;  %4692 = sbr.rel (!%p4689_p8) target bundleno = 1645 (0x66d), region = 505 }
 0x671   : >> { %s6081_s0 = sshll.u32 %s10897_s30, 3  ;;  %s6996_s20 = smov %s10897_s30  }
 0x672   : >> { %s4703_s26 = scalar_lea.vmem %s10306_s25, %s6081_s0 [#allocation4]   ;;  %s4704_s17 = scalar_lea.vmem %s4686_s22, %s6081_s0  }
 0x675 PF: > { %4710 = sbr.rel (!%p7182_p5) target bundleno = 1739 (0x6cb), region = 232  ;;  %s4712_s18 = ssub.s32 (%p7182_p5), 13, %s7520_s16 }
 0x676   : > { %s6111_s11 = smul.u32 (%p7182_p5), 96, %s7163_s21  ;;  %p4713_p9 = scmp.lt.s32.totalorder (%p7182_p5), %s4712_s18, 12 }
 0x677   : > { %s10858_s29 = sld [smem:[#allocation73_spill]] (%p7182_p5) }
 0x67a   : > { %s10899_s18 = smov (!%p4713_p9, %s4712_s18), 12 }
 0x67b   : > { %s4715_s17 = smul.u32 24, %s10899_s18 }
 0x67d   : > { %s10318_s14 = scalar_lea.vmem %s10858_s29, %s6111_s11   ;;  %p6085_p10 = scmp.eq.s32.totalorder %s4715_s17, 0 }
 0x67e   : > { %6717 = sdivrem.u32 (!%p6085_p10), %s10899_s18, 11 }
 0x67f   : > { %4721 = sbr.rel (%p6085_p10) target bundleno = 1739 (0x6cb), region = 236 }
 0x687   : > { %s10324_s2 = spop.drf %6717 }
 0x688   : > { %s6719_s25 = spop.drf %6717  ;;  %p6086_p11 = scmp.le.s32.totalorder %s10324_s2, 0 }
 0x689   : > { %s10859_s22 = smov (!%p6086_p11), %s10318_s14  ;;  %s10860_s26 = smov (!%p6086_p11), %s9692_s1 }
 0x68a   : > { %5525 = sbr.rel (%p6086_p11) target bundleno = 1713 (0x6b1), region = 510  ;;  %s10333_s20 = smov (!%p6086_p11), 0  }
 0x68b   : > { %s10335_s24 = smov (!%p6086_p11), 0  }
 0x68f LB: >> { %v4854_v51 = vld [vmem:[%s7009_s26] sm:$0xff]  ;;  %v4856_v31 = vld [vmem:[%s7009_s26 + $0x8] sm:$0xff]  ;;  %v4858_v20 = vld [vmem:[%s7009_s26 + $0x10] sm:$0xff]  ;;  %s4920_s30 = sadd.s32 1, %s7013_s20  ;;  %s4848_s24 = sadd.s32 1, %s7017_s24   ;;  %s7017_s24 = sphi %s10335_s24, %s4848_s24   ;;  %s7013_s20 = sphi %s10333_s20, %s10863_s20   ;;  %s7009_s26 = sphi %s10860_s26, %s10862_s26   ;;  %s7005_s22 = sphi %s10859_s22, %s10861_s22  }
 0x690   : >> { %4855 = vst [vmem:[%s7005_s22] sm:$0xff] %v4854_v51  ;;  %v4860_v52 = vld [vmem:[%s7009_s26 + $0x18] sm:$0xff]  ;;  %p4921_p12 = scmp.ge.s32.totalorder %s4920_s30, %s10324_s2  ;;  %v4862_v45 = vld [vmem:[%s7009_s26 + $0x20] sm:$0xff]  ;;  %v4864_v4 = vld [vmem:[%s7009_s26 + $0x28] sm:$0xff]  ;;  %p4847_p13 = scmp.ge.s32.totalorder %s4848_s24, %s10324_s2 }
 0x691   : >> { %4857 = vst [vmem:[%s7005_s22 + $0x8] sm:$0xff] %v4856_v31  ;;  %v4866_v10 = vld [vmem:[%s7009_s26 + $0x30] sm:$0xff]  ;;  %v4868_v34 = vld [vmem:[%s7009_s26 + $0x38] sm:$0xff]  ;;  %v4870_v8 = vld [vmem:[%s7009_s26 + $0x40] sm:$0xff] }
 0x692   : >> { %4859 = vst [vmem:[%s7005_s22 + $0x10] sm:$0xff] %v4858_v20  ;;  %s10901_s30 = smov (%p4921_p12, %s4920_s30), 0  ;;  %v4872_v9 = vld [vmem:[%s7009_s26 + $0x48] sm:$0xff]  ;;  %v4874_v46 = vld [vmem:[%s7009_s26 + $0x50] sm:$0xff]  ;;  %v4876_v63 = vld [vmem:[%s7009_s26 + $0x60] sm:$0xff] }
 0x693   : >> { %4861 = vst [vmem:[%s7005_s22 + $0x18] sm:$0xff] %v4860_v52  ;;  %s4923_s0 = smul.u32 88, %s10901_s30  ;;  %v4878_v30 = vld [vmem:[%s7009_s26 + $0x68] sm:$0xff]  ;;  %v4880_v22 = vld [vmem:[%s7009_s26 + $0x70] sm:$0xff]  ;;  %v4882_v2 = vld [vmem:[%s7009_s26 + $0x78] sm:$0xff]  ;;  %s10863_s20 = smov %s10901_s30 }
 0x694   : >> { %4863 = vst [vmem:[%s7005_s22 + $0x20] sm:$0xff] %v4862_v45  ;;  %v4884_v13 = vld [vmem:[%s7009_s26 + $0x80] sm:$0xff]  ;;  %v4886_v27 = vld [vmem:[%s7009_s26 + $0x88] sm:$0xff]  ;;  %v4888_v23 = vld [vmem:[%s7009_s26 + $0x90] sm:$0xff] }
 0x695   : >> { %4865 = vst [vmem:[%s7005_s22 + $0x28] sm:$0xff] %v4864_v4  ;;  %s10369_s15 = scalar_lea.vmem %s9692_s1, %s4923_s0 [#allocation5]   ;;  %s10372_s11 = scalar_lea.vmem %s10318_s14, %s4923_s0   ;;  %v4890_v1 = vld [vmem:[%s7009_s26 + $0x98] sm:$0xff]  ;;  %v4892_v33 = vld [vmem:[%s7009_s26 + $0xa0] sm:$0xff]  ;;  %v4894_v29 = vld [vmem:[%s7009_s26 + $0xa8] sm:$0xff] }
 0x696   : >> { %4867 = vst [vmem:[%s7005_s22 + $0x30] sm:$0xff] %v4866_v10  ;;  %v4896_v17 = vld [vmem:[%s7009_s26 + $0xb0] sm:$0xff]  ;;  %v4898_v44 = vld [vmem:[%s7009_s26 + $0xc0] sm:$0xff]  ;;  %v4900_v14 = vld [vmem:[%s7009_s26 + $0xc8] sm:$0xff] }
 0x697   : >> { %4869 = vst [vmem:[%s7005_s22 + $0x38] sm:$0xff] %v4868_v34  ;;  %v4902_v28 = vld [vmem:[%s7009_s26 + $0xd0] sm:$0xff]  ;;  %v4904_v24 = vld [vmem:[%s7009_s26 + $0xd8] sm:$0xff]  ;;  %v4906_v57 = vld [vmem:[%s7009_s26 + $0xe0] sm:$0xff] }
 0x698   : >> { %4871 = vst [vmem:[%s7005_s22 + $0x40] sm:$0xff] %v4870_v8  ;;  %v4908_v56 = vld [vmem:[%s7009_s26 + $0xe8] sm:$0xff]  ;;  %v4910_v54 = vld [vmem:[%s7009_s26 + $0xf0] sm:$0xff]  ;;  %v4912_v62 = vld [vmem:[%s7009_s26 + $0xf8] sm:$0xff] }
 0x699   : >> { %4873 = vst [vmem:[%s7005_s22 + $0x48] sm:$0xff] %v4872_v9  ;;  %v4914_v42 = vld [vmem:[%s7009_s26 + $0x100] sm:$0xff]  ;;  %v4916_v43 = vld [vmem:[%s7009_s26 + $0x108] sm:$0xff]  ;;  %v4918_v5 = vld [vmem:[%s7009_s26 + $0x110] sm:$0xff]  ;;  %s10862_s26 = smov %s10369_s15 }
 0x69a   : >> { %4875 = vst [vmem:[%s7005_s22 + $0x50] sm:$0xff] %v4874_v46 }
 0x69b   : >> { %4877 = vst [vmem:[%s7005_s22 + $0x68] sm:$0xff] %v4876_v63 }
 0x69c   : >> { %4879 = vst [vmem:[%s7005_s22 + $0x70] sm:$0xff] %v4878_v30 }
 0x69d   : >> { %4881 = vst [vmem:[%s7005_s22 + $0x78] sm:$0xff] %v4880_v22 }
 0x69e   : >> { %4883 = vst [vmem:[%s7005_s22 + $0x80] sm:$0xff] %v4882_v2 }
 0x69f   : >> { %4885 = vst [vmem:[%s7005_s22 + $0x88] sm:$0xff] %v4884_v13 }
 0x6a0   : >> { %4887 = vst [vmem:[%s7005_s22 + $0x90] sm:$0xff] %v4886_v27 }
 0x6a1   : >> { %4889 = vst [vmem:[%s7005_s22 + $0x98] sm:$0xff] %v4888_v23 }
 0x6a2   : >> { %4891 = vst [vmem:[%s7005_s22 + $0xa0] sm:$0xff] %v4890_v1 }
 0x6a3   : >> { %4893 = vst [vmem:[%s7005_s22 + $0xa8] sm:$0xff] %v4892_v33 }
 0x6a4   : >> { %4895 = vst [vmem:[%s7005_s22 + $0xb0] sm:$0xff] %v4894_v29 }
 0x6a5   : >> { %4897 = vst [vmem:[%s7005_s22 + $0xb8] sm:$0xff] %v4896_v17 }
 0x6a6   : >> { %4899 = vst [vmem:[%s7005_s22 + $0xd0] sm:$0xff] %v4898_v44 }
 0x6a7   : >> { %4901 = vst [vmem:[%s7005_s22 + $0xd8] sm:$0xff] %v4900_v14 }
 0x6a8   : >> { %4903 = vst [vmem:[%s7005_s22 + $0xe0] sm:$0xff] %v4902_v28 }
 0x6a9   : >> { %4905 = vst [vmem:[%s7005_s22 + $0xe8] sm:$0xff] %v4904_v24 }
 0x6aa   : >> { %4907 = vst [vmem:[%s7005_s22 + $0xf0] sm:$0xff] %v4906_v57 }
 0x6ab   : >> { %4909 = vst [vmem:[%s7005_s22 + $0xf8] sm:$0xff] %v4908_v56 }
 0x6ac   : >> { %4911 = vst [vmem:[%s7005_s22 + $0x100] sm:$0xff] %v4910_v54  ;;  %4850 = sbr.rel (!%p4847_p13) target bundleno = 1679 (0x68f), region = 516 }
 0x6ad   : >> { %4913 = vst [vmem:[%s7005_s22 + $0x108] sm:$0xff] %v4912_v62 }
 0x6ae   : >> { %4915 = vst [vmem:[%s7005_s22 + $0x110] sm:$0xff] %v4914_v42 }
 0x6af   : >> { %4917 = vst [vmem:[%s7005_s22 + $0x118] sm:$0xff] %v4916_v43 }
 0x6b0   : >> { %4919 = vst [vmem:[%s7005_s22 + $0x120] sm:$0xff] %v4918_v5  ;;  %s10861_s22 = smov %s10372_s11 }
 0x6b1 PF: > { %6720 = sdivrem.u32 %s10899_s18, 11 }
 0x6b2   : > { %s6087_s27 = smul.u32 88, %s10324_s2 }
 0x6b4   : > { %s10439_s23 = scalar_lea.vmem %s9692_s1, %s6087_s27 [#allocation5]   ;;  %s10442_s29 = scalar_lea.vmem %s10318_s14, %s6087_s27  }
 0x6ba   : > { %s6721_s17 = spop.drf %6720 }
 0x6bb   : > { %s10444_s25 = spop.drf %6720 }
 0x6bc   : > { %p6089_p0 = scmp.le.s32.totalorder %s10444_s25, 0 }
 0x6bd   : > { %s10864_s22 = smov (!%p6089_p0), %s10442_s29  ;;  %s7023_s26 = smov (!%p6089_p0), %s10439_s23  }
 0x6be   : > { %5539 = sbr.rel (%p6089_p0) target bundleno = 1739 (0x6cb), region = 521  ;;  %s7027_s20 = smov (!%p6089_p0), 0  }
 0x6bf   : > { %s7031_s24 = smov (!%p6089_p0), 0  }
 0x6c3 LB: >> { %v4943_v53 = vld [vmem:[%s7025_s26] sm:$0xff]  ;;  %s4949_s1 = sadd.s32 1, %s7029_s20  ;;  %s4937_s24 = sadd.s32 1, %s7033_s24   ;;  %s7033_s24 = sphi %s7031_s24, %s4937_s24   ;;  %s7029_s20 = sphi %s7027_s20, %s7028_s20   ;;  %s7025_s26 = sphi %s7023_s26, %s4954_s26   ;;  %s7021_s22 = sphi %s10864_s22, %s4955_s22  }
 0x6c4   : >> { %v4945_v40 = vld [vmem:[%s7025_s26 + $0x60] sm:$0xff]  ;;  %4944 = vst [vmem:[%s7021_s22] sm:$0xff] %v4943_v53  ;;  %p4950_p1 = scmp.ge.s32.totalorder %s4949_s1, %s10444_s25  ;;  %p4936_p2 = scmp.ge.s32.totalorder %s4937_s24, %s10444_s25 }
 0x6c5   : >> { %v4947_v16 = vld [vmem:[%s7025_s26 + $0xc0] sm:$0xff]  ;;  %4946 = vst [vmem:[%s7021_s22 + $0x68] sm:$0xff] %v4945_v40 }
 0x6c6   : >> { %4948 = vst [vmem:[%s7021_s22 + $0xd0] sm:$0xff] %v4947_v16  ;;  %s10903_s1 = smov (%p4950_p1, %s4949_s1), 0  ;;  %4939 = sbr.rel (!%p4936_p2) target bundleno = 1731 (0x6c3), region = 527 }
 0x6c7   : >> { %s6090_s18 = sshll.u32 %s10903_s1, 3  ;;  %s7028_s20 = smov %s10903_s1  }
 0x6c8   : >> { %s4954_s26 = scalar_lea.vmem %s10439_s23, %s6090_s18 [#allocation5]   ;;  %s4955_s22 = scalar_lea.vmem %s10442_s29, %s6090_s18  }
 0x6cb PF: > { %4961 = sbr.rel (!%p7182_p5) target bundleno = 1815 (0x717), region = 284  ;;  %s4963_s2 = ssub.s32 (%p7182_p5), 13, %s7520_s16 }
 0x6cc   : > { %s6112_s30 = smul.u32 (%p7182_p5), 96, %s7163_s21  ;;  %p4964_p3 = scmp.lt.s32.totalorder (%p7182_p5), %s4963_s2, 12 }
 0x6cd   : > { %s10866_s11 = sld [smem:[#allocation74_spill]] (%p7182_p5) }
 0x6d0   : > { %s10905_s2 = smov (!%p4964_p3, %s4963_s2), 12 }
 0x6d1   : > { %s4966_s17 = smul.u32 72, %s10905_s2 }
 0x6d3   : > { %s10465_s27 = scalar_lea.vmem %s10866_s11, %s6112_s30   ;;  %p6094_p4 = scmp.eq.s32.totalorder %s4966_s17, 0 }
 0x6d4   : > { %s10471_s23 = sshrl.u32 (!%p6094_p4), %s10905_s2, 2 }
 0x6d5   : > { %4972 = sbr.rel (%p6094_p4) target bundleno = 1815 (0x717), region = 288  ;;  %p6095_p5 = scmp.le.s32.totalorder (!%p6094_p4), %s10471_s23, 0 }
 0x6da   : > { %5553 = sbr.rel (%p6095_p5) target bundleno = 1796 (0x704), region = 532  ;;  %s10867_s21 = smov (!%p6095_p5), %s10465_s27 }
 0x6db   : > { %s10868_s16 = smov (!%p6095_p5), %s8778_s28  ;;  %s10480_s29 = smov (!%p6095_p5), 0  }
 0x6dc   : > { %s10482_s25 = smov (!%p6095_p5), 0  }
 0x6df LB: >> { %v5121_v38 = vld [vmem:[%s7041_s16] sm:$0xff]  ;;  %v5123_v7 = vld [vmem:[%s7041_s16 + $0x8] sm:$0xff]  ;;  %v5125_v19 = vld [vmem:[%s7041_s16 + $0x10] sm:$0xff]  ;;  %s5193_s22 = sadd.s32 1, %s7045_s29  ;;  %s5115_s25 = sadd.s32 1, %s7049_s25   ;;  %s7049_s25 = sphi %s10482_s25, %s5115_s25   ;;  %s7045_s29 = sphi %s10480_s29, %s10871_s29   ;;  %s7041_s16 = sphi %s10868_s16, %s10870_s16   ;;  %s7037_s21 = sphi %s10867_s21, %s10869_s21  }
 0x6e0   : >> { %5122 = vst [vmem:[%s7037_s21] sm:$0xff] %v5121_v38  ;;  %v5127_v61 = vld [vmem:[%s7041_s16 + $0x18] sm:$0xff]  ;;  %p5194_p6 = scmp.ge.s32.totalorder %s5193_s22, %s10471_s23  ;;  %v5129_v3 = vld [vmem:[%s7041_s16 + $0x60] sm:$0xff]  ;;  %v5131_v39 = vld [vmem:[%s7041_s16 + $0x68] sm:$0xff]  ;;  %p5114_p7 = scmp.ge.s32.totalorder %s5115_s25, %s10471_s23 }
 0x6e1   : >> { %5124 = vst [vmem:[%s7037_s21 + $0x8] sm:$0xff] %v5123_v7  ;;  %v5133_v36 = vld [vmem:[%s7041_s16 + $0x70] sm:$0xff]  ;;  %v5135_v59 = vld [vmem:[%s7041_s16 + $0x78] sm:$0xff]  ;;  %v5137_v60 = vld [vmem:[%s7041_s16 + $0xc0] sm:$0xff] }
 0x6e2   : >> { %5126 = vst [vmem:[%s7037_s21 + $0x10] sm:$0xff] %v5125_v19  ;;  %s10907_s22 = smov (%p5194_p6, %s5193_s22), 0  ;;  %v5139_v41 = vld [vmem:[%s7041_s16 + $0xc8] sm:$0xff]  ;;  %v5141_v37 = vld [vmem:[%s7041_s16 + $0xd0] sm:$0xff]  ;;  %v5143_v25 = vld [vmem:[%s7041_s16 + $0xd8] sm:$0xff] }
 0x6e3   : >> { %5128 = vst [vmem:[%s7037_s21 + $0x18] sm:$0xff] %v5127_v61  ;;  %s6096_s26 = sshll.u32 %s10907_s22, 5  ;;  %v5145_v35 = vld [vmem:[%s7041_s16 + $0x120] sm:$0xff]  ;;  %v5147_v15 = vld [vmem:[%s7041_s16 + $0x128] sm:$0xff]  ;;  %v5149_v49 = vld [vmem:[%s7041_s16 + $0x130] sm:$0xff]  ;;  %s10871_s29 = smov %s10907_s22 }
 0x6e4   : >> { %5130 = vst [vmem:[%s7037_s21 + $0x68] sm:$0xff] %v5129_v3  ;;  %s10514_s20 = scalar_lea.vmem %s8778_s28, %s6096_s26 [#allocation6]   ;;  %s10517_s24 = scalar_lea.vmem %s10465_s27, %s6096_s26   ;;  %v5151_v21 = vld [vmem:[%s7041_s16 + $0x138] sm:$0xff]  ;;  %v5153_v11 = vld [vmem:[%s7041_s16 + $0x180] sm:$0xff]  ;;  %v5155_v0 = vld [vmem:[%s7041_s16 + $0x188] sm:$0xff] }
 0x6e5   : >> { %5132 = vst [vmem:[%s7037_s21 + $0x70] sm:$0xff] %v5131_v39  ;;  %v5157_v6 = vld [vmem:[%s7041_s16 + $0x190] sm:$0xff]  ;;  %v5159_v55 = vld [vmem:[%s7041_s16 + $0x198] sm:$0xff]  ;;  %v5161_v12 = vld [vmem:[%s7041_s16 + $0x1e0] sm:$0xff] }
 0x6e6   : >> { %5134 = vst [vmem:[%s7037_s21 + $0x78] sm:$0xff] %v5133_v36  ;;  %v5163_v26 = vld [vmem:[%s7041_s16 + $0x1e8] sm:$0xff]  ;;  %v5165_v50 = vld [vmem:[%s7041_s16 + $0x1f0] sm:$0xff]  ;;  %v5167_v48 = vld [vmem:[%s7041_s16 + $0x1f8] sm:$0xff] }
 0x6e7   : >> { %5136 = vst [vmem:[%s7037_s21 + $0x80] sm:$0xff] %v5135_v59  ;;  %v5169_v58 = vld [vmem:[%s7041_s16 + $0x240] sm:$0xff]  ;;  %v5171_v47 = vld [vmem:[%s7041_s16 + $0x248] sm:$0xff]  ;;  %v5173_v18 = vld [vmem:[%s7041_s16 + $0x250] sm:$0xff] }
 0x6e8   : >> { %5138 = vst [vmem:[%s7037_s21 + $0xd0] sm:$0xff] %v5137_v60  ;;  %v5175_v32 = vld [vmem:[%s7041_s16 + $0x258] sm:$0xff]  ;;  %v5177_v51 = vld [vmem:[%s7041_s16 + $0x2a0] sm:$0xff]  ;;  %v5179_v31 = vld [vmem:[%s7041_s16 + $0x2a8] sm:$0xff] }
 0x6e9   : >> { %5140 = vst [vmem:[%s7037_s21 + $0xd8] sm:$0xff] %v5139_v41  ;;  %v5181_v20 = vld [vmem:[%s7041_s16 + $0x2b0] sm:$0xff]  ;;  %v5183_v52 = vld [vmem:[%s7041_s16 + $0x2b8] sm:$0xff]  ;;  %v5185_v45 = vld [vmem:[%s7041_s16 + $0x300] sm:$0xff] }
 0x6ea   : >> { %5142 = vst [vmem:[%s7037_s21 + $0xe0] sm:$0xff] %v5141_v37  ;;  %v5187_v4 = vld [vmem:[%s7041_s16 + $0x308] sm:$0xff]  ;;  %v5189_v10 = vld [vmem:[%s7041_s16 + $0x310] sm:$0xff]  ;;  %v5191_v34 = vld [vmem:[%s7041_s16 + $0x318] sm:$0xff]  ;;  %s10870_s16 = smov %s10514_s20 }
 0x6eb   : >> { %5144 = vst [vmem:[%s7037_s21 + $0xe8] sm:$0xff] %v5143_v25 }
 0x6ec   : >> { %5146 = vst [vmem:[%s7037_s21 + $0x138] sm:$0xff] %v5145_v35 }
 0x6ed   : >> { %5148 = vst [vmem:[%s7037_s21 + $0x140] sm:$0xff] %v5147_v15 }
 0x6ee   : >> { %5150 = vst [vmem:[%s7037_s21 + $0x148] sm:$0xff] %v5149_v49 }
 0x6ef   : >> { %5152 = vst [vmem:[%s7037_s21 + $0x150] sm:$0xff] %v5151_v21 }
 0x6f0   : >> { %5154 = vst [vmem:[%s7037_s21 + $0x1a0] sm:$0xff] %v5153_v11 }
 0x6f1   : >> { %5156 = vst [vmem:[%s7037_s21 + $0x1a8] sm:$0xff] %v5155_v0 }
 0x6f2   : >> { %5158 = vst [vmem:[%s7037_s21 + $0x1b0] sm:$0xff] %v5157_v6 }
 0x6f3   : >> { %5160 = vst [vmem:[%s7037_s21 + $0x1b8] sm:$0xff] %v5159_v55 }
 0x6f4   : >> { %5162 = vst [vmem:[%s7037_s21 + $0x208] sm:$0xff] %v5161_v12 }
 0x6f5   : >> { %5164 = vst [vmem:[%s7037_s21 + $0x210] sm:$0xff] %v5163_v26 }
 0x6f6   : >> { %5166 = vst [vmem:[%s7037_s21 + $0x218] sm:$0xff] %v5165_v50 }
 0x6f7   : >> { %5168 = vst [vmem:[%s7037_s21 + $0x220] sm:$0xff] %v5167_v48 }
 0x6f8   : >> { %5170 = vst [vmem:[%s7037_s21 + $0x270] sm:$0xff] %v5169_v58 }
 0x6f9   : >> { %5172 = vst [vmem:[%s7037_s21 + $0x278] sm:$0xff] %v5171_v47 }
 0x6fa   : >> { %5174 = vst [vmem:[%s7037_s21 + $0x280] sm:$0xff] %v5173_v18 }
 0x6fb   : >> { %5176 = vst [vmem:[%s7037_s21 + $0x288] sm:$0xff] %v5175_v32 }
 0x6fc   : >> { %5178 = vst [vmem:[%s7037_s21 + $0x2d8] sm:$0xff] %v5177_v51 }
 0x6fd   : >> { %5180 = vst [vmem:[%s7037_s21 + $0x2e0] sm:$0xff] %v5179_v31 }
 0x6fe   : >> { %5182 = vst [vmem:[%s7037_s21 + $0x2e8] sm:$0xff] %v5181_v20 }
 0x6ff   : >> { %5184 = vst [vmem:[%s7037_s21 + $0x2f0] sm:$0xff] %v5183_v52  ;;  %5117 = sbr.rel (!%p5114_p7) target bundleno = 1759 (0x6df), region = 538 }
 0x700   : >> { %5186 = vst [vmem:[%s7037_s21 + $0x340] sm:$0xff] %v5185_v45 }
 0x701   : >> { %5188 = vst [vmem:[%s7037_s21 + $0x348] sm:$0xff] %v5187_v4 }
 0x702   : >> { %5190 = vst [vmem:[%s7037_s21 + $0x350] sm:$0xff] %v5189_v10 }
 0x703   : >> { %5192 = vst [vmem:[%s7037_s21 + $0x358] sm:$0xff] %v5191_v34  ;;  %s10869_s21 = smov %s10517_s24 }
 0x704 PF: > { %s10590_s1 = sand.u32 3, %s10905_s2   ;;  %s6113_s18 = sshll.u32 %s10471_s23, 5 }
 0x705   : > { %s10594_s14 = scalar_lea.vmem %s8778_s28, %s6113_s18 [#allocation6]   ;;  %s10597_s30 = scalar_lea.vmem %s10465_s27, %s6113_s18  }
 0x706   : > { %p6101_p8 = scmp.le.s32.totalorder %s10590_s1, 0 }
 0x707   : > { %s10872_s0 = smov (!%p6101_p8), %s10597_s30  ;;  %s10873_s15 = smov (!%p6101_p8), %s10594_s14 }
 0x708   : > { %5567 = sbr.rel (%p6101_p8) target bundleno = 1815 (0x717), region = 543  ;;  %s10606_s11 = smov (!%p6101_p8), 0  }
 0x709   : > { %s10608_s17 = smov (!%p6101_p8), 0  }
 0x70d LB: >> { %v5216_v8 = vld [vmem:[%s7057_s15] sm:$0xff]  ;;  %s5234_s28 = sadd.s32 1, %s7061_s11  ;;  %s5210_s17 = sadd.s32 1, %s7065_s17   ;;  %s7065_s17 = sphi %s10608_s17, %s5210_s17   ;;  %s7061_s11 = sphi %s10606_s11, %s10875_s11   ;;  %s7057_s15 = sphi %s10873_s15, %s5239_s15   ;;  %s7053_s0 = sphi %s10872_s0, %s10874_s0  }
 0x70e   : >> { %v5218_v9 = vld [vmem:[%s7057_s15 + $0x60] sm:$0xff]  ;;  %5217 = vst [vmem:[%s7053_s0] sm:$0xff] %v5216_v8  ;;  %p5235_p9 = scmp.ge.s32.totalorder %s5234_s28, %s10590_s1  ;;  %p5209_p10 = scmp.ge.s32.totalorder %s5210_s17, %s10590_s1 }
 0x70f   : >> { %v5220_v46 = vld [vmem:[%s7057_s15 + $0xc0] sm:$0xff]  ;;  %5219 = vst [vmem:[%s7053_s0 + $0x68] sm:$0xff] %v5218_v9 }
 0x710   : >> { %v5222_v63 = vld [vmem:[%s7057_s15 + $0x120] sm:$0xff]  ;;  %5221 = vst [vmem:[%s7053_s0 + $0xd0] sm:$0xff] %v5220_v46  ;;  %s10909_s28 = smov (%p5235_p9, %s5234_s28), 0 }
 0x711   : >> { %v5224_v30 = vld [vmem:[%s7057_s15 + $0x180] sm:$0xff]  ;;  %5223 = vst [vmem:[%s7053_s0 + $0x138] sm:$0xff] %v5222_v63  ;;  %s6102_s2 = sshll.u32 %s10909_s28, 3  ;;  %s10875_s11 = smov %s10909_s28 }
 0x712   : >> { %v5226_v22 = vld [vmem:[%s7057_s15 + $0x1e0] sm:$0xff]  ;;  %5225 = vst [vmem:[%s7053_s0 + $0x1a0] sm:$0xff] %v5224_v30  ;;  %s5240_s27 = scalar_lea.vmem %s10597_s30, %s6102_s2   ;;  %5212 = sbr.rel (!%p5209_p10) target bundleno = 1805 (0x70d), region = 549 }
 0x713   : >> { %v5228_v2 = vld [vmem:[%s7057_s15 + $0x240] sm:$0xff]  ;;  %5227 = vst [vmem:[%s7053_s0 + $0x208] sm:$0xff] %v5226_v22 }
 0x714   : >> { %v5230_v13 = vld [vmem:[%s7057_s15 + $0x2a0] sm:$0xff]  ;;  %5229 = vst [vmem:[%s7053_s0 + $0x270] sm:$0xff] %v5228_v2 }
 0x715   : >> { %v5232_v27 = vld [vmem:[%s7057_s15 + $0x300] sm:$0xff]  ;;  %s5239_s15 = scalar_lea.vmem %s10594_s14, %s6102_s2 [#allocation6]   ;;  %5231 = vst [vmem:[%s7053_s0 + $0x2d8] sm:$0xff] %v5230_v13 }
 0x716   : >> { %5233 = vst [vmem:[%s7053_s0 + $0x340] sm:$0xff] %v5232_v27  ;;  %s10874_s0 = smov %s5240_s27 }
 0x717 PF: > { %s10876_s20 = sld [smem:[#allocation7_spill]]  ;;  %s10878_s18 = smov %s6901_s19 }
 0x718   : > { %s10877_s23 = sld [smem:[#allocation8_spill]] }
 0x71d   : > { %p23_p11 = scmp.ge.s32.totalorder %s10876_s20, 4  }
 0x71e   : > { %s10879_s19 = smov %s10877_s23 }
 0x71f   :  { %25 = sbr.rel (!%p23_p11) target bundleno = 10 (0xa), region = 560 }

</bundles_post_ra>
